<compile_context>
chip_gen: v7x
topology: tpu7x:2x2x1
jax: 0.10.0
libtpu: 0.0.40
codegen_flags: <defaults>
</compile_context>

<pallas_src>
import functools

import numpy as np
import jax
import jax.numpy as jnp
from jax.experimental import pallas as pl
from jax.experimental.pallas import tpu as pltpu

HID_H, HID_W = 4, 4          # self.hidden_size = (4, 4) in the torch module
HW = HID_H * HID_W           # 16 spatial positions of the recurrent state


# ----------------------------------------------------------------------------- kernels

def _matmul_bias_act_kernel(x_ref, w_ref, b_ref, o_ref, *, apply_relu):
    y = jnp.dot(x_ref[...], w_ref[...], preferred_element_type=jnp.float32)
    y = y + b_ref[...]
    if apply_relu:
        y = jnp.maximum(y, 0.0)
    o_ref[...] = y.astype(o_ref.dtype)


def matmul_bias_act(x, w, b, *, relu, out_dtype=jnp.float32):
    """y = act(x @ w + b); whole (tiny) problem is one VMEM block."""
    P = x.shape[0]
    N = w.shape[1]
    kern = functools.partial(_matmul_bias_act_kernel, apply_relu=relu)
    return pl.pallas_call(
        kern,
        out_shape=jax.ShapeDtypeStruct((P, N), out_dtype),
    )(x, w, b)


def _convlstm_decoder_kernel(*refs, hidden_channels, seq_len, batch):
    """Fused: layer-0 x-gates for all T, ConvLSTM recurrence over T, decoder ConvT+ReLU.

    refs layout:
      [feat, mx0, b0, mh0, (mxh, b)(layers 1..L-1)..., rev_w, rev_b, out]
    """
    L = len(hidden_channels)
    idx = 0
    feat_ref = refs[idx]; idx += 1
    mx0_ref = refs[idx]; b0_ref = refs[idx + 1]; mh0_ref = refs[idx + 2]; idx += 3
    mxh_refs, b_refs = [None] * L, [None] * L
    for li in range(1, L):
        mxh_refs[li] = refs[idx]
        b_refs[li] = refs[idx + 1]
        idx += 2
    rev_w_ref = refs[idx]; rev_b_ref = refs[idx + 1]; out_ref = refs[idx + 2]

    T, B = seq_len, batch
    f32, bf16 = jnp.float32, jnp.bfloat16

    # Layer-0 x-gate contribution (+bias) for ALL timesteps in one dot (M = T*B rows),
    # so the 256x1024 weight is pushed into the MXU only once.
    gx_all = jnp.dot(feat_ref[...], mx0_ref[...], preferred_element_type=f32) + b0_ref[...]

    mh0 = mh0_ref[...]
    mxhs, bs = [None] * L, [None] * L
    for li in range(1, L):
        mxhs[li] = mxh_refs[li][...]
        bs[li] = b_refs[li][...]
    rev_w = rev_w_ref[...]
    rev_b = rev_b_ref[...]

    # get_controller_init_hidden: zeros; state stays VMEM/vreg-resident across timesteps
    hs = [jnp.zeros((B, hc * HW), f32) for hc in hidden_channels]
    cs = [jnp.zeros((B, hc * HW), f32) for hc in hidden_channels]

    # TODO(synk): for large T, hold the RHS weights stationary across timesteps via
    # pltpu.matmul_push_rhs / matmul_acc_lhs / matmul_pop instead of re-issuing jnp.dot.
    for t in range(T):                       # static unroll (small T), LLO-visible
        x_prev = None
        for li in range(L):
            n = hidden_channels[li] * HW
            if li == 0:
                gates = gx_all[t * B:(t + 1) * B] + jnp.dot(
                    hs[0].astype(bf16), mh0, preferred_element_type=f32)
            else:
                xh = jnp.concatenate([x_prev, hs[li]], axis=-1).astype(bf16)  # K = 512
                gates = jnp.dot(xh, mxhs[li], preferred_element_type=f32) + bs[li]
            # torch.layer_norm over (4*hid, H, W) per sample, eps=1e-5, no affine.
            # single-pass mean / E[x^2] reduction.
            mean = jnp.mean(gates, axis=-1, keepdims=True)
            msq = jnp.mean(gates * gates, axis=-1, keepdims=True)
            var = jnp.maximum(msq - mean * mean, 0.0)
            g = (gates - mean) * jax.lax.rsqrt(var + 1e-5)
            # gate slabs are 256-wide, 128-lane aligned (channel-major, position-minor);
            # torch split order is i, f, o, g
            gi = jax.nn.sigmoid(g[:, 0 * n:1 * n])
            gf = jax.nn.sigmoid(g[:, 1 * n:2 * n])
            go = jax.nn.sigmoid(g[:, 2 * n:3 * n])
            gg = jnp.tanh(g[:, 3 * n:4 * n])
            c_next = gf * cs[li] + gi * gg
            h_next = go * jnp.tanh(c_next)
            cs[li] = c_next
            hs[li] = h_next
            x_prev = h_next
        # fused decoder: ConvTranspose2d(16->1, k, s=2) + ReLU as one lane-dense
        # (hc_last*HW -> 128-padded) dot; padded columns are zero and sliced off host-side
        y = jnp.dot(x_prev.astype(bf16), rev_w, preferred_element_type=f32) + rev_b
        out_ref[t] = jnp.maximum(y, 0.0)


def fused_convlstm_decoder(feat, params, hidden_channels, T, B):
    """feat: (T*B, cin0*HW) bf16, rows t-major / b-minor, NHWC (position-major) layout."""
    L = len(hidden_channels)
    r0 = params["rnn"][0]
    inputs = [feat, r0["mx"], r0["b"], r0["mh"]]
    for li in range(1, L):
        r = params["rnn"][li]
        inputs += [r["mxh"], r["b"]]
    inputs += [params["rev_w"], params["rev_b"]]
    n_out = params["rev_w"].shape[1]                       # 128 (lane-padded)

    kern = functools.partial(
        _convlstm_decoder_kernel,
        hidden_channels=tuple(hidden_channels),
        seq_len=T,
        batch=B,
    )
    return pl.pallas_call(
        kern,
        out_shape=jax.ShapeDtypeStruct((T, B, n_out), jnp.float32),
        compiler_params=pltpu.CompilerParams(vmem_limit_bytes=32 * 1024 * 1024),
    )(*inputs)


# ----------------------------------------------------------------------------- glue

def im2col(x, k, stride):
    """x: (N, H, W, C) -> (N, oh*ow, k*k*C); flattening is (ky,kx)-major, C-minor."""
    N, H, W, C = x.shape
    oh = (H - k) // stride + 1
    ow = (W - k) // stride + 1
    cols = []
    for i in range(k):
        for j in range(k):
            cols.append(x[:, i:i + stride * oh:stride, j:j + stride * ow:stride, :])
    patches = jnp.stack(cols, axis=3)          # (N, oh, ow, k*k, C)
    return patches.reshape(N, oh * ow, k * k * C), oh, ow


def conv_as_matmul_weight(w_spat):
    """(Cout, Cin, k, k) torch conv weight -> (k*k*Cin, Cout) matching im2col flattening."""
    w = np.asarray(w_spat)
    Cout, Cin, k, _ = w.shape
    return np.ascontiguousarray(w.transpose(2, 3, 1, 0).reshape(k * k * Cin, Cout))


def conv_to_dense_matrix(w_spat, k, H=HID_H, W=HID_W):
    """Same-padded kxk conv on an HxW grid as a dense (Cin*H*W, Cout*H*W) matrix.
       Both input and output use channel-major / position-minor flattening."""
    w = np.asarray(w_spat)                     # (Cout, Cin, k, k)
    Cout, Cin = w.shape[0], w.shape[1]
    pad = k // 2
    M = np.zeros((Cin * H * W, Cout * H * W), np.float32)
    ci = np.arange(Cin)[:, None]
    co = np.arange(Cout)[None, :]
    for py in range(H):
        for px in range(W):
            p = py * W + px
            for dy in range(k):
                for dx in range(k):
                    qy, qx = py + dy - pad, px + dx - pad
                    if 0 <= qy < H and 0 <= qx < W:
                        q = qy * W + qx
                        M[ci * (H * W) + q, co * (H * W) + p] += w[:, :, dy, dx].T
    return M


def deconv_to_dense_matrix(w_spat, k, stride=2, H=HID_H, W=HID_W):
    """ConvTranspose2d (pad=0) on an HxW grid as a dense (Cin*H*W, Cout*OH*OW) matrix."""
    w = np.asarray(w_spat)                     # (Cin, Cout, k, k) torch ConvT layout
    Cin, Cout = w.shape[0], w.shape[1]
    OH = stride * (H - 1) + k
    OW = stride * (W - 1) + k
    M = np.zeros((Cin * H * W, Cout * OH * OW), np.float32)
    ci = np.arange(Cin)[:, None]
    co = np.arange(Cout)[None, :]
    for qy in range(H):
        for qx in range(W):
            q = qy * W + qx
            for ky in range(k):
                for kx in range(k):
                    y, x = stride * qy + ky, stride * qx + kx
                    M[ci * (H * W) + q, co * (OH * OW) + (y * OW + x)] += w[:, :, ky, kx]
    return M


def make_params(key, cnn_k, rnn_k, hidden_channels):
    """Synthetic init matching the module (orthogonal weights, zero biases)."""
    def ortho(k_, out_c, in_flat):
        return jax.nn.initializers.orthogonal()(k_, (out_c, in_flat), jnp.float32)

    L = len(hidden_channels)
    keys = jax.random.split(key, 3 + L)
    p = {}

    # encoder: Conv(1->16, k, s=2)+ReLU, Conv(16->16, k, s=2)+ReLU  (bf16 weights)
    w1 = ortho(keys[0], 16, 1 * cnn_k * cnn_k).reshape(16, 1, cnn_k, cnn_k)
    w2 = ortho(keys[1], 16, 16 * cnn_k * cnn_k).reshape(16, 16, cnn_k, cnn_k)
    p["cnn1_w"] = jnp.asarray(conv_as_matmul_weight(w1), jnp.bfloat16)
    p["cnn1_b"] = jnp.zeros((1, 16), jnp.float32)
    p["cnn2_w"] = jnp.asarray(conv_as_matmul_weight(w2), jnp.bfloat16)
    p["cnn2_b"] = jnp.zeros((1, 16), jnp.float32)

    # ConvLSTM cells: conv((in+hid)->4*hid, k, same pad); torch.cat([x, h], dim=1)
    in_chs = [16] + list(hidden_channels)
    p["rnn"] = []
    for li, hc in enumerate(hidden_channels):
        cin = in_chs[li]
        wg = ortho(keys[2 + li], 4 * hc, (cin + hc) * rnn_k * rnn_k)
        wg = wg.reshape(4 * hc, cin + hc, rnn_k, rnn_k)
        wx, wh = wg[:, :cin], wg[:, cin:]
        mx = conv_to_dense_matrix(wx, rnn_k)               # (cin*HW, 4*hc*HW) ch-major rows
        mh = conv_to_dense_matrix(wh, rnn_k)               # (hc*HW,  4*hc*HW) ch-major rows
        b = jnp.zeros((1, 4 * hc * HW), jnp.float32)       # zero bias (tiled layout)
        if li == 0:
            # fold the encoder NHWC (position-major, channel-minor) layout into the row
            # ordering of the x-operator so feat feeds it with no host-side transpose
            n_g = mx.shape[1]
            mx_pm = mx.reshape(cin, HW, n_g).transpose(1, 0, 2).reshape(cin * HW, n_g)
            p["rnn"].append({"mx": jnp.asarray(mx_pm, jnp.bfloat16),
                             "mh": jnp.asarray(mh, jnp.bfloat16),
                             "b": b})
        else:
            # merged [x;h] operator: one K=(cin+hc)*HW dot per layer-step
            mxh = np.concatenate([mx, mh], axis=0)
            p["rnn"].append({"mxh": jnp.asarray(mxh, jnp.bfloat16), "b": b})

    # decoder: ConvTranspose2d(16->1, k, s=2)+ReLU as one dense operator, lane-padded to 128
    wr = ortho(keys[2 + L], 16, 1 * cnn_k * cnn_k).reshape(16, 1, cnn_k, cnn_k)
    out_hw = 2 * (HID_H - 1) + cnn_k
    rev = deconv_to_dense_matrix(wr, cnn_k, stride=2)      # (hc_last*HW, out_hw*out_hw)
    n_pad = ((out_hw * out_hw + 127) // 128) * 128         # 81 -> 128 lanes
    rev_pad = np.zeros((rev.shape[0], n_pad), np.float32)
    rev_pad[:, :out_hw * out_hw] = rev
    p["rev_w"] = jnp.asarray(rev_pad, jnp.bfloat16)
    p["rev_b"] = jnp.zeros((1, n_pad), jnp.float32)
    return p


def predictive_model_forward(params, input_seq, *, hidden_channels, cnn_k, rnn_k):
    """input_seq: (B, T, 1, H, W) NCHW -> (B, T, 1, 9, 9), matching the torch module."""
    B, T, C, H, W = input_seq.shape

    # t-major / b-minor row ordering for everything downstream of the encoder
    x = input_seq.transpose(1, 0, 2, 3, 4).reshape(T * B, C, H, W)
    x = x.transpose(0, 2, 3, 1).astype(jnp.bfloat16)       # NHWC

    # ---- encoder (no recurrence): batched over T*B, one pallas matmul per conv layer
    p1, oh1, ow1 = im2col(x, cnn_k, 2)
    y1 = matmul_bias_act(p1.reshape(T * B * oh1 * ow1, -1),
                         params["cnn1_w"], params["cnn1_b"], relu=True,
                         out_dtype=jnp.bfloat16)
    y1 = y1.reshape(T * B, oh1, ow1, 16)
    p2, oh2, ow2 = im2col(y1, cnn_k, 2)
    feat = matmul_bias_act(p2.reshape(T * B * oh2 * ow2, -1),
                           params["cnn2_w"], params["cnn2_b"], relu=True,
                           out_dtype=jnp.bfloat16)
    # NHWC position-major flattening; layer-0 x-operator rows are permuted to match,
    # so no transpose is needed here.
    feat = feat.reshape(T * B, oh2 * ow2 * 16)             # (T*B, 256) bf16

    # ---- ONE fused kernel: layer-0 x-gates (all T), ConvLSTM recurrence, decoder+ReLU
    out128 = fused_convlstm_decoder(feat, params, hidden_channels, T, B)  # (T, B, 128)

    out_hw = 2 * (HID_H - 1) + cnn_k                       # 9
    y = out128[..., :out_hw * out_hw].reshape(T, B, out_hw, out_hw)
    return y.transpose(1, 0, 2, 3)[:, :, None]             # (B, T, 1, 9, 9)


# ----------------------------------------------------------------------------- main

if __name__ == "__main__":
    # Hyper-parameters implied by the torch code: 1 input channel, two stride-2 convs
    # must land on hidden_size=(4,4) => 20x20 frames, k=3; last hidden channel is 16
    # so reverse_layer (ConvTranspose 16->1) applies.
    B, T, CNN_K, RNN_K = 2, 3, 3, 3
    HIDDEN_CHANNELS = [16, 16]

    key = jax.random.PRNGKey(0)
    k_param, k_data = jax.random.split(key)
    params = make_params(k_param, CNN_K, RNN_K, HIDDEN_CHANNELS)
    input_seq = jax.random.normal(k_data, (B, T, 1, 20, 20), dtype=jnp.float32)

    fwd = jax.jit(
        functools.partial(
            predictive_model_forward,
            hidden_channels=tuple(HIDDEN_CHANNELS),
            cnn_k=CNN_K,
            rnn_k=RNN_K,
        )
    )
    out = jax.block_until_ready(fwd(params, input_seq))

    assert out.shape == (B, T, 1, 9, 9), out.shape
    assert bool(jnp.all(jnp.isfinite(out)))
    print("KERNEL_OK")
</pallas_src>

<mosaic_0001>
module attributes {stable_mosaic.version = 11 : i64} {
  func.func @_matmul_bias_act_kernel(%arg0: memref<486x9xbf16, #tpu.memory_space<vmem>>, %arg1: memref<9x16xbf16, #tpu.memory_space<vmem>>, %arg2: memref<1x16xf32, #tpu.memory_space<vmem>>, %arg3: memref<486x16xbf16, #tpu.memory_space<vmem>>) attributes {dimension_semantics = [], scalar_prefetch = 0 : i64, scratch_operands = 0 : i64, tpu.core_type = #tpu.core_type<tc>} {
    %c0 = arith.constant 0 : index
    %c0_0 = arith.constant 0 : index
    %0 = vector.load %arg0[%c0, %c0_0] : memref<486x9xbf16, #tpu.memory_space<vmem>>, vector<486x9xbf16>
    %c0_1 = arith.constant 0 : index
    %c0_2 = arith.constant 0 : index
    %1 = vector.load %arg1[%c0_1, %c0_2] : memref<9x16xbf16, #tpu.memory_space<vmem>>, vector<9x16xbf16>
    %cst = arith.constant dense<0.000000e+00> : vector<486x16xf32>
    %2 = tpu.matmul %0, %1, %cst {dimension_numbers = #tpu.dot_dimension_numbers<[1], [0], [0], [1], [0, 0, 1, 1], [], []>} : vector<486x9xbf16>, vector<9x16xbf16>, vector<486x16xf32> -> vector<486x16xf32>
    %c0_3 = arith.constant 0 : index
    %c0_4 = arith.constant 0 : index
    %3 = vector.load %arg2[%c0_3, %c0_4] : memref<1x16xf32, #tpu.memory_space<vmem>>, vector<1x16xf32>
    %4 = vector.broadcast %3 : vector<1x16xf32> to vector<486x16xf32>
    %5 = arith.addf %2, %4 : vector<486x16xf32>
    %cst_5 = arith.constant 0.000000e+00 : f32
    %6 = vector.broadcast %cst_5 : f32 to vector<486x16xf32>
    %7 = arith.maximumf %5, %6 : vector<486x16xf32>
    %8 = arith.truncf %7 : vector<486x16xf32> to vector<486x16xbf16>
    %c0_6 = arith.constant 0 : index
    %c0_7 = arith.constant 0 : index
    %9 = vector.load %arg3[%c0_6, %c0_7] : memref<486x16xbf16, #tpu.memory_space<vmem>>, vector<486x16xbf16>
    tpu.vector_store %arg3[%c0_6, %c0_7], %8 {strides = array<i32>} : memref<486x16xbf16, #tpu.memory_space<vmem>>, vector<486x16xbf16>,
    return
  }
}

module attributes {stable_mosaic.version = 11 : i64} {
  func.func @_matmul_bias_act_kernel(%arg0: memref<96x144xbf16, #tpu.memory_space<vmem>>, %arg1: memref<144x16xbf16, #tpu.memory_space<vmem>>, %arg2: memref<1x16xf32, #tpu.memory_space<vmem>>, %arg3: memref<96x16xbf16, #tpu.memory_space<vmem>>) attributes {dimension_semantics = [], scalar_prefetch = 0 : i64, scratch_operands = 0 : i64, tpu.core_type = #tpu.core_type<tc>} {
    %c0 = arith.constant 0 : index
    %c0_0 = arith.constant 0 : index
    %0 = vector.load %arg0[%c0, %c0_0] : memref<96x144xbf16, #tpu.memory_space<vmem>>, vector<96x144xbf16>
    %c0_1 = arith.constant 0 : index
    %c0_2 = arith.constant 0 : index
    %1 = vector.load %arg1[%c0_1, %c0_2] : memref<144x16xbf16, #tpu.memory_space<vmem>>, vector<144x16xbf16>
    %cst = arith.constant dense<0.000000e+00> : vector<96x16xf32>
    %2 = tpu.matmul %0, %1, %cst {dimension_numbers = #tpu.dot_dimension_numbers<[1], [0], [0], [1], [0, 0, 1, 1], [], []>} : vector<96x144xbf16>, vector<144x16xbf16>, vector<96x16xf32> -> vector<96x16xf32>
    %c0_3 = arith.constant 0 : index
    %c0_4 = arith.constant 0 : index
    %3 = vector.load %arg2[%c0_3, %c0_4] : memref<1x16xf32, #tpu.memory_space<vmem>>, vector<1x16xf32>
    %4 = vector.broadcast %3 : vector<1x16xf32> to vector<96x16xf32>
    %5 = arith.addf %2, %4 : vector<96x16xf32>
    %cst_5 = arith.constant 0.000000e+00 : f32
    %6 = vector.broadcast %cst_5 : f32 to vector<96x16xf32>
    %7 = arith.maximumf %5, %6 : vector<96x16xf32>
    %8 = arith.truncf %7 : vector<96x16xf32> to vector<96x16xbf16>
    %c0_6 = arith.constant 0 : index
    %c0_7 = arith.constant 0 : index
    %9 = vector.load %arg3[%c0_6, %c0_7] : memref<96x16xbf16, #tpu.memory_space<vmem>>, vector<96x16xbf16>
    tpu.vector_store %arg3[%c0_6, %c0_7], %8 {strides = array<i32>} : memref<96x16xbf16, #tpu.memory_space<vmem>>, vector<96x16xbf16>,
    return
  }
}

module attributes {stable_mosaic.version = 11 : i64} {
  func.func @_convlstm_decoder_kernel(%arg0: memref<6x256xbf16, #tpu.memory_space<vmem>>, %arg1: memref<256x1024xbf16, #tpu.memory_space<vmem>>, %arg2: memref<1x1024xf32, #tpu.memory_space<vmem>>, %arg3: memref<256x1024xbf16, #tpu.memory_space<vmem>>, %arg4: memref<512x1024xbf16, #tpu.memory_space<vmem>>, %arg5: memref<1x1024xf32, #tpu.memory_space<vmem>>, %arg6: memref<256x128xbf16, #tpu.memory_space<vmem>>, %arg7: memref<1x128xf32, #tpu.memory_space<vmem>>, %arg8: memref<3x2x128xf32, #tpu.memory_space<vmem>>) attributes {dimension_semantics = [], scalar_prefetch = 0 : i64, scratch_operands = 0 : i64, tpu.core_type = #tpu.core_type<tc>} {
    %c0 = arith.constant 0 : index
    %c0_0 = arith.constant 0 : index
    %0 = vector.load %arg0[%c0, %c0_0] : memref<6x256xbf16, #tpu.memory_space<vmem>>, vector<6x256xbf16>
    %c0_1 = arith.constant 0 : index
    %c0_2 = arith.constant 0 : index
    %1 = vector.load %arg1[%c0_1, %c0_2] : memref<256x1024xbf16, #tpu.memory_space<vmem>>, vector<256x1024xbf16>
    %cst = arith.constant dense<0.000000e+00> : vector<6x1024xf32>
    %2 = tpu.matmul %0, %1, %cst {dimension_numbers = #tpu.dot_dimension_numbers<[1], [0], [0], [1], [0, 0, 1, 1], [], []>} : vector<6x256xbf16>, vector<256x1024xbf16>, vector<6x1024xf32> -> vector<6x1024xf32>
    %c0_3 = arith.constant 0 : index
    %c0_4 = arith.constant 0 : index
    %3 = vector.load %arg2[%c0_3, %c0_4] : memref<1x1024xf32, #tpu.memory_space<vmem>>, vector<1x1024xf32>
    %4 = vector.broadcast %3 : vector<1x1024xf32> to vector<6x1024xf32>
    %5 = arith.addf %2, %4 : vector<6x1024xf32>
    %c0_5 = arith.constant 0 : index
    %c0_6 = arith.constant 0 : index
    %6 = vector.load %arg3[%c0_5, %c0_6] : memref<256x1024xbf16, #tpu.memory_space<vmem>>, vector<256x1024xbf16>
    %c0_7 = arith.constant 0 : index
    %c0_8 = arith.constant 0 : index
    %7 = vector.load %arg4[%c0_7, %c0_8] : memref<512x1024xbf16, #tpu.memory_space<vmem>>, vector<512x1024xbf16>
    %c0_9 = arith.constant 0 : index
    %c0_10 = arith.constant 0 : index
    %8 = vector.load %arg5[%c0_9, %c0_10] : memref<1x1024xf32, #tpu.memory_space<vmem>>, vector<1x1024xf32>
    %c0_11 = arith.constant 0 : index
    %c0_12 = arith.constant 0 : index
    %9 = vector.load %arg6[%c0_11, %c0_12] : memref<256x128xbf16, #tpu.memory_space<vmem>>, vector<256x128xbf16>
    %c0_13 = arith.constant 0 : index
    %c0_14 = arith.constant 0 : index
    %10 = vector.load %arg7[%c0_13, %c0_14] : memref<1x128xf32, #tpu.memory_space<vmem>>, vector<1x128xf32>
    %cst_15 = arith.constant 0.000000e+00 : f32
    %11 = vector.broadcast %cst_15 : f32 to vector<2x256xf32>
    %cst_16 = arith.constant 0.000000e+00 : f32
    %12 = vector.broadcast %cst_16 : f32 to vector<2x256xf32>
    %cst_17 = arith.constant 0.000000e+00 : f32
    %13 = vector.broadcast %cst_17 : f32 to vector<2x256xf32>
    %cst_18 = arith.constant 0.000000e+00 : f32
    %14 = vector.broadcast %cst_18 : f32 to vector<2x256xf32>
    %15 = vector.extract_strided_slice %5 {offsets = [0, 0], sizes = [2, 1024], strides = [1, 1]} : vector<6x1024xf32> to vector<2x1024xf32>
    %16 = arith.truncf %11 : vector<2x256xf32> to vector<2x256xbf16>
    %cst_19 = arith.constant dense<0.000000e+00> : vector<2x1024xf32>
    %17 = tpu.matmul %16, %6, %cst_19 {dimension_numbers = #tpu.dot_dimension_numbers<[1], [0], [0], [1], [0, 0, 1, 1], [], []>} : vector<2x256xbf16>, vector<256x1024xbf16>, vector<2x1024xf32> -> vector<2x1024xf32>
    %18 = arith.addf %15, %17 : vector<2x1024xf32>
    %cst_20 = arith.constant dense<0.000000e+00> : vector<2xf32>
    %19 = vector.multi_reduction <add>, %18, %cst_20 [1] : vector<2x1024xf32> to vector<2xf32>
    %20 = vector.shape_cast %19 : vector<2xf32> to vector<2x1xf32>
    %cst_21 = arith.constant 1.024000e+03 : f32
    %21 = vector.broadcast %cst_21 : f32 to vector<2x1xf32>
    %22 = arith.divf %20, %21 : vector<2x1xf32>
    %23 = arith.mulf %18, %18 : vector<2x1024xf32>
    %cst_22 = arith.constant dense<0.000000e+00> : vector<2xf32>
    %24 = vector.multi_reduction <add>, %23, %cst_22 [1] : vector<2x1024xf32> to vector<2xf32>
    %25 = vector.shape_cast %24 : vector<2xf32> to vector<2x1xf32>
    %cst_23 = arith.constant 1.024000e+03 : f32
    %26 = vector.broadcast %cst_23 : f32 to vector<2x1xf32>
    %27 = arith.divf %25, %26 : vector<2x1xf32>
    %28 = arith.mulf %22, %22 : vector<2x1xf32>
    %29 = arith.subf %27, %28 : vector<2x1xf32>
    %cst_24 = arith.constant 0.000000e+00 : f32
    %30 = vector.broadcast %cst_24 : f32 to vector<2x1xf32>
    %31 = arith.maximumf %29, %30 : vector<2x1xf32>
    %32 = vector.broadcast %22 : vector<2x1xf32> to vector<2x1024xf32>
    %33 = arith.subf %18, %32 : vector<2x1024xf32>
    %cst_25 = arith.constant 9.99999974E-6 : f32
    %34 = vector.broadcast %cst_25 : f32 to vector<2x1xf32>
    %35 = arith.addf %31, %34 : vector<2x1xf32>
    %36 = math.rsqrt %35 : vector<2x1xf32>
    %37 = vector.broadcast %36 : vector<2x1xf32> to vector<2x1024xf32>
    %38 = arith.mulf %33, %37 : vector<2x1024xf32>
    %39 = vector.extract_strided_slice %38 {offsets = [0, 0], sizes = [2, 256], strides = [1, 1]} : vector<2x1024xf32> to vector<2x256xf32>
    %40 = arith.negf %39 : vector<2x256xf32>
    %41 = math.exp %40 : vector<2x256xf32>
    %cst_26 = arith.constant 1.000000e+00 : f32
    %42 = vector.broadcast %cst_26 : f32 to vector<2x256xf32>
    %43 = arith.addf %42, %41 : vector<2x256xf32>
    %44 = arith.divf %42, %43 : vector<2x256xf32>
    %45 = vector.extract_strided_slice %38 {offsets = [0, 256], sizes = [2, 256], strides = [1, 1]} : vector<2x1024xf32> to vector<2x256xf32>
    %46 = arith.negf %45 : vector<2x256xf32>
    %47 = math.exp %46 : vector<2x256xf32>
    %cst_27 = arith.constant 1.000000e+00 : f32
    %48 = vector.broadcast %cst_27 : f32 to vector<2x256xf32>
    %49 = arith.addf %48, %47 : vector<2x256xf32>
    %50 = arith.divf %48, %49 : vector<2x256xf32>
    %51 = vector.extract_strided_slice %38 {offsets = [0, 512], sizes = [2, 256], strides = [1, 1]} : vector<2x1024xf32> to vector<2x256xf32>
    %52 = arith.negf %51 : vector<2x256xf32>
    %53 = math.exp %52 : vector<2x256xf32>
    %cst_28 = arith.constant 1.000000e+00 : f32
    %54 = vector.broadcast %cst_28 : f32 to vector<2x256xf32>
    %55 = arith.addf %54, %53 : vector<2x256xf32>
    %56 = arith.divf %54, %55 : vector<2x256xf32>
    %57 = vector.extract_strided_slice %38 {offsets = [0, 768], sizes = [2, 256], strides = [1, 1]} : vector<2x1024xf32> to vector<2x256xf32>
    %58 = math.tanh %57 : vector<2x256xf32>
    %59 = arith.mulf %50, %13 : vector<2x256xf32>
    %60 = arith.mulf %44, %58 : vector<2x256xf32>
    %61 = arith.addf %59, %60 : vector<2x256xf32>
    %62 = math.tanh %61 : vector<2x256xf32>
    %63 = arith.mulf %56, %62 : vector<2x256xf32>
    %64 = tpu.concatenate %63, %12 in 1 : vector<2x256xf32>, vector<2x256xf32> -> vector<2x512xf32>
    %65 = arith.truncf %64 : vector<2x512xf32> to vector<2x512xbf16>
    %cst_29 = arith.constant dense<0.000000e+00> : vector<2x1024xf32>
    %66 = tpu.matmul %65, %7, %cst_29 {dimension_numbers = #tpu.dot_dimension_numbers<[1], [0], [0], [1], [0, 0, 1, 1], [], []>} : vector<2x512xbf16>, vector<512x1024xbf16>, vector<2x1024xf32> -> vector<2x1024xf32>
    %67 = vector.broadcast %8 : vector<1x1024xf32> to vector<2x1024xf32>
    %68 = arith.addf %66, %67 : vector<2x1024xf32>
    %cst_30 = arith.constant dense<0.000000e+00> : vector<2xf32>
    %69 = vector.multi_reduction <add>, %68, %cst_30 [1] : vector<2x1024xf32> to vector<2xf32>
    %70 = vector.shape_cast %69 : vector<2xf32> to vector<2x1xf32>
    %cst_31 = arith.constant 1.024000e+03 : f32
    %71 = vector.broadcast %cst_31 : f32 to vector<2x1xf32>
    %72 = arith.divf %70, %71 : vector<2x1xf32>
    %73 = arith.mulf %68, %68 : vector<2x1024xf32>
    %cst_32 = arith.constant dense<0.000000e+00> : vector<2xf32>
    %74 = vector.multi_reduction <add>, %73, %cst_32 [1] : vector<2x1024xf32> to vector<2xf32>
    %75 = vector.shape_cast %74 : vector<2xf32> to vector<2x1xf32>
    %cst_33 = arith.constant 1.024000e+03 : f32
    %76 = vector.broadcast %cst_33 : f32 to vector<2x1xf32>
    %77 = arith.divf %75, %76 : vector<2x1xf32>
    %78 = arith.mulf %72, %72 : vector<2x1xf32>
    %79 = arith.subf %77, %78 : vector<2x1xf32>
    %cst_34 = arith.constant 0.000000e+00 : f32
    %80 = vector.broadcast %cst_34 : f32 to vector<2x1xf32>
    %81 = arith.maximumf %79, %80 : vector<2x1xf32>
    %82 = vector.broadcast %72 : vector<2x1xf32> to vector<2x1024xf32>
    %83 = arith.subf %68, %82 : vector<2x1024xf32>
    %cst_35 = arith.constant 9.99999974E-6 : f32
    %84 = vector.broadcast %cst_35 : f32 to vector<2x1xf32>
    %85 = arith.addf %81, %84 : vector<2x1xf32>
    %86 = math.rsqrt %85 : vector<2x1xf32>
    %87 = vector.broadcast %86 : vector<2x1xf32> to vector<2x1024xf32>
    %88 = arith.mulf %83, %87 : vector<2x1024xf32>
    %89 = vector.extract_strided_slice %88 {offsets = [0, 0], sizes = [2, 256], strides = [1, 1]} : vector<2x1024xf32> to vector<2x256xf32>
    %90 = arith.negf %89 : vector<2x256xf32>
    %91 = math.exp %90 : vector<2x256xf32>
    %cst_36 = arith.constant 1.000000e+00 : f32
    %92 = vector.broadcast %cst_36 : f32 to vector<2x256xf32>
    %93 = arith.addf %92, %91 : vector<2x256xf32>
    %94 = arith.divf %92, %93 : vector<2x256xf32>
    %95 = vector.extract_strided_slice %88 {offsets = [0, 256], sizes = [2, 256], strides = [1, 1]} : vector<2x1024xf32> to vector<2x256xf32>
    %96 = arith.negf %95 : vector<2x256xf32>
    %97 = math.exp %96 : vector<2x256xf32>
    %cst_37 = arith.constant 1.000000e+00 : f32
    %98 = vector.broadcast %cst_37 : f32 to vector<2x256xf32>
    %99 = arith.addf %98, %97 : vector<2x256xf32>
    %100 = arith.divf %98, %99 : vector<2x256xf32>
    %101 = vector.extract_strided_slice %88 {offsets = [0, 512], sizes = [2, 256], strides = [1, 1]} : vector<2x1024xf32> to vector<2x256xf32>
    %102 = arith.negf %101 : vector<2x256xf32>
    %103 = math.exp %102 : vector<2x256xf32>
    %cst_38 = arith.constant 1.000000e+00 : f32
    %104 = vector.broadcast %cst_38 : f32 to vector<2x256xf32>
    %105 = arith.addf %104, %103 : vector<2x256xf32>
    %106 = arith.divf %104, %105 : vector<2x256xf32>
    %107 = vector.extract_strided_slice %88 {offsets = [0, 768], sizes = [2, 256], strides = [1, 1]} : vector<2x1024xf32> to vector<2x256xf32>
    %108 = math.tanh %107 : vector<2x256xf32>
    %109 = arith.mulf %100, %14 : vector<2x256xf32>
    %110 = arith.mulf %94, %108 : vector<2x256xf32>
    %111 = arith.addf %109, %110 : vector<2x256xf32>
    %112 = math.tanh %111 : vector<2x256xf32>
    %113 = arith.mulf %106, %112 : vector<2x256xf32>
    %114 = arith.truncf %113 : vector<2x256xf32> to vector<2x256xbf16>
    %cst_39 = arith.constant dense<0.000000e+00> : vector<2x128xf32>
    %115 = tpu.matmul %114, %9, %cst_39 {dimension_numbers = #tpu.dot_dimension_numbers<[1], [0], [0], [1], [0, 0, 1, 1], [], []>} : vector<2x256xbf16>, vector<256x128xbf16>, vector<2x128xf32> -> vector<2x128xf32>
    %116 = vector.broadcast %10 : vector<1x128xf32> to vector<2x128xf32>
    %117 = arith.addf %115, %116 : vector<2x128xf32>
    %cst_40 = arith.constant 0.000000e+00 : f32
    %118 = vector.broadcast %cst_40 : f32 to vector<2x128xf32>
    %119 = arith.maximumf %117, %118 : vector<2x128xf32>
    %c0_41 = arith.constant 0 : index
    %c0_42 = arith.constant 0 : index
    %c0_43 = arith.constant 0 : index
    %120 = vector.load %arg8[%c0_41, %c0_42, %c0_43] : memref<3x2x128xf32, #tpu.memory_space<vmem>>, vector<1x2x128xf32>
    %121 = vector.shape_cast %120 : vector<1x2x128xf32> to vector<2x128xf32>
    %122 = vector.shape_cast %119 : vector<2x128xf32> to vector<1x2x128xf32>
    tpu.vector_store %arg8[%c0_41, %c0_42, %c0_43], %122 {strides = array<i32>} : memref<3x2x128xf32, #tpu.memory_space<vmem>>, vector<1x2x128xf32>,
    %123 = vector.extract_strided_slice %5 {offsets = [2, 0], sizes = [2, 1024], strides = [1, 1]} : vector<6x1024xf32> to vector<2x1024xf32>
    %124 = arith.truncf %63 : vector<2x256xf32> to vector<2x256xbf16>
    %cst_44 = arith.constant dense<0.000000e+00> : vector<2x1024xf32>
    %125 = tpu.matmul %124, %6, %cst_44 {dimension_numbers = #tpu.dot_dimension_numbers<[1], [0], [0], [1], [0, 0, 1, 1], [], []>} : vector<2x256xbf16>, vector<256x1024xbf16>, vector<2x1024xf32> -> vector<2x1024xf32>
    %126 = arith.addf %123, %125 : vector<2x1024xf32>
    %cst_45 = arith.constant dense<0.000000e+00> : vector<2xf32>
    %127 = vector.multi_reduction <add>, %126, %cst_45 [1] : vector<2x1024xf32> to vector<2xf32>
    %128 = vector.shape_cast %127 : vector<2xf32> to vector<2x1xf32>
    %cst_46 = arith.constant 1.024000e+03 : f32
    %129 = vector.broadcast %cst_46 : f32 to vector<2x1xf32>
    %130 = arith.divf %128, %129 : vector<2x1xf32>
    %131 = arith.mulf %126, %126 : vector<2x1024xf32>
    %cst_47 = arith.constant dense<0.000000e+00> : vector<2xf32>
    %132 = vector.multi_reduction <add>, %131, %cst_47 [1] : vector<2x1024xf32> to vector<2xf32>
    %133 = vector.shape_cast %132 : vector<2xf32> to vector<2x1xf32>
    %cst_48 = arith.constant 1.024000e+03 : f32
    %134 = vector.broadcast %cst_48 : f32 to vector<2x1xf32>
    %135 = arith.divf %133, %134 : vector<2x1xf32>
    %136 = arith.mulf %130, %130 : vector<2x1xf32>
    %137 = arith.subf %135, %136 : vector<2x1xf32>
    %cst_49 = arith.constant 0.000000e+00 : f32
    %138 = vector.broadcast %cst_49 : f32 to vector<2x1xf32>
    %139 = arith.maximumf %137, %138 : vector<2x1xf32>
    %140 = vector.broadcast %130 : vector<2x1xf32> to vector<2x1024xf32>
    %141 = arith.subf %126, %140 : vector<2x1024xf32>
    %cst_50 = arith.constant 9.99999974E-6 : f32
    %142 = vector.broadcast %cst_50 : f32 to vector<2x1xf32>
    %143 = arith.addf %139, %142 : vector<2x1xf32>
    %144 = math.rsqrt %143 : vector<2x1xf32>
    %145 = vector.broadcast %144 : vector<2x1xf32> to vector<2x1024xf32>
    %146 = arith.mulf %141, %145 : vector<2x1024xf32>
    %147 = vector.extract_strided_slice %146 {offsets = [0, 0], sizes = [2, 256], strides = [1, 1]} : vector<2x1024xf32> to vector<2x256xf32>
    %148 = arith.negf %147 : vector<2x256xf32>
    %149 = math.exp %148 : vector<2x256xf32>
    %cst_51 = arith.constant 1.000000e+00 : f32
    %150 = vector.broadcast %cst_51 : f32 to vector<2x256xf32>
    %151 = arith.addf %150, %149 : vector<2x256xf32>
    %152 = arith.divf %150, %151 : vector<2x256xf32>
    %153 = vector.extract_strided_slice %146 {offsets = [0, 256], sizes = [2, 256], strides = [1, 1]} : vector<2x1024xf32> to vector<2x256xf32>
    %154 = arith.negf %153 : vector<2x256xf32>
    %155 = math.exp %154 : vector<2x256xf32>
    %cst_52 = arith.constant 1.000000e+00 : f32
    %156 = vector.broadcast %cst_52 : f32 to vector<2x256xf32>
    %157 = arith.addf %156, %155 : vector<2x256xf32>
    %158 = arith.divf %156, %157 : vector<2x256xf32>
    %159 = vector.extract_strided_slice %146 {offsets = [0, 512], sizes = [2, 256], strides = [1, 1]} : vector<2x1024xf32> to vector<2x256xf32>
    %160 = arith.negf %159 : vector<2x256xf32>
    %161 = math.exp %160 : vector<2x256xf32>
    %cst_53 = arith.constant 1.000000e+00 : f32
    %162 = vector.broadcast %cst_53 : f32 to vector<2x256xf32>
    %163 = arith.addf %162, %161 : vector<2x256xf32>
    %164 = arith.divf %162, %163 : vector<2x256xf32>
    %165 = vector.extract_strided_slice %146 {offsets = [0, 768], sizes = [2, 256], strides = [1, 1]} : vector<2x1024xf32> to vector<2x256xf32>
    %166 = math.tanh %165 : vector<2x256xf32>
    %167 = arith.mulf %158, %61 : vector<2x256xf32>
    %168 = arith.mulf %152, %166 : vector<2x256xf32>
    %169 = arith.addf %167, %168 : vector<2x256xf32>
    %170 = math.tanh %169 : vector<2x256xf32>
    %171 = arith.mulf %164, %170 : vector<2x256xf32>
    %172 = tpu.concatenate %171, %113 in 1 : vector<2x256xf32>, vector<2x256xf32> -> vector<2x512xf32>
    %173 = arith.truncf %172 : vector<2x512xf32> to vector<2x512xbf16>
    %cst_54 = arith.constant dense<0.000000e+00> : vector<2x1024xf32>
    %174 = tpu.matmul %173, %7, %cst_54 {dimension_numbers = #tpu.dot_dimension_numbers<[1], [0], [0], [1], [0, 0, 1, 1], [], []>} : vector<2x512xbf16>, vector<512x1024xbf16>, vector<2x1024xf32> -> vector<2x1024xf32>
    %175 = vector.broadcast %8 : vector<1x1024xf32> to vector<2x1024xf32>
    %176 = arith.addf %174, %175 : vector<2x1024xf32>
    %cst_55 = arith.constant dense<0.000000e+00> : vector<2xf32>
    %177 = vector.multi_reduction <add>, %176, %cst_55 [1] : vector<2x1024xf32> to vector<2xf32>
    %178 = vector.shape_cast %177 : vector<2xf32> to vector<2x1xf32>
    %cst_56 = arith.constant 1.024000e+03 : f32
    %179 = vector.broadcast %cst_56 : f32 to vector<2x1xf32>
    %180 = arith.divf %178, %179 : vector<2x1xf32>
    %181 = arith.mulf %176, %176 : vector<2x1024xf32>
    %cst_57 = arith.constant dense<0.000000e+00> : vector<2xf32>
    %182 = vector.multi_reduction <add>, %181, %cst_57 [1] : vector<2x1024xf32> to vector<2xf32>
    %183 = vector.shape_cast %182 : vector<2xf32> to vector<2x1xf32>
    %cst_58 = arith.constant 1.024000e+03 : f32
    %184 = vector.broadcast %cst_58 : f32 to vector<2x1xf32>
    %185 = arith.divf %183, %184 : vector<2x1xf32>
    %186 = arith.mulf %180, %180 : vector<2x1xf32>
    %187 = arith.subf %185, %186 : vector<2x1xf32>
    %cst_59 = arith.constant 0.000000e+00 : f32
    %188 = vector.broadcast %cst_59 : f32 to vector<2x1xf32>
    %189 = arith.maximumf %187, %188 : vector<2x1xf32>
    %190 = vector.broadcast %180 : vector<2x1xf32> to vector<2x1024xf32>
    %191 = arith.subf %176, %190 : vector<2x1024xf32>
    %cst_60 = arith.constant 9.99999974E-6 : f32
    %192 = vector.broadcast %cst_60 : f32 to vector<2x1xf32>
    %193 = arith.addf %189, %192 : vector<2x1xf32>
    %194 = math.rsqrt %193 : vector<2x1xf32>
    %195 = vector.broadcast %194 : vector<2x1xf32> to vector<2x1024xf32>
    %196 = arith.mulf %191, %195 : vector<2x1024xf32>
    %197 = vector.extract_strided_slice %196 {offsets = [0, 0], sizes = [2, 256], strides = [1, 1]} : vector<2x1024xf32> to vector<2x256xf32>
    %198 = arith.negf %197 : vector<2x256xf32>
    %199 = math.exp %198 : vector<2x256xf32>
    %cst_61 = arith.constant 1.000000e+00 : f32
    %200 = vector.broadcast %cst_61 : f32 to vector<2x256xf32>
    %201 = arith.addf %200, %199 : vector<2x256xf32>
    %202 = arith.divf %200, %201 : vector<2x256xf32>
    %203 = vector.extract_strided_slice %196 {offsets = [0, 256], sizes = [2, 256], strides = [1, 1]} : vector<2x1024xf32> to vector<2x256xf32>
    %204 = arith.negf %203 : vector<2x256xf32>
    %205 = math.exp %204 : vector<2x256xf32>
    %cst_62 = arith.constant 1.000000e+00 : f32
    %206 = vector.broadcast %cst_62 : f32 to vector<2x256xf32>
    %207 = arith.addf %206, %205 : vector<2x256xf32>
    %208 = arith.divf %206, %207 : vector<2x256xf32>
    %209 = vector.extract_strided_slice %196 {offsets = [0, 512], sizes = [2, 256], strides = [1, 1]} : vector<2x1024xf32> to vector<2x256xf32>
    %210 = arith.negf %209 : vector<2x256xf32>
    %211 = math.exp %210 : vector<2x256xf32>
    %cst_63 = arith.constant 1.000000e+00 : f32
    %212 = vector.broadcast %cst_63 : f32 to vector<2x256xf32>
    %213 = arith.addf %212, %211 : vector<2x256xf32>
    %214 = arith.divf %212, %213 : vector<2x256xf32>
    %215 = vector.extract_strided_slice %196 {offsets = [0, 768], sizes = [2, 256], strides = [1, 1]} : vector<2x1024xf32> to vector<2x256xf32>
    %216 = math.tanh %215 : vector<2x256xf32>
    %217 = arith.mulf %208, %111 : vector<2x256xf32>
    %218 = arith.mulf %202, %216 : vector<2x256xf32>
    %219 = arith.addf %217, %218 : vector<2x256xf32>
    %220 = math.tanh %219 : vector<2x256xf32>
    %221 = arith.mulf %214, %220 : vector<2x256xf32>
    %222 = arith.truncf %221 : vector<2x256xf32> to vector<2x256xbf16>
    %cst_64 = arith.constant dense<0.000000e+00> : vector<2x128xf32>
    %223 = tpu.matmul %222, %9, %cst_64 {dimension_numbers = #tpu.dot_dimension_numbers<[1], [0], [0], [1], [0, 0, 1, 1], [], []>} : vector<2x256xbf16>, vector<256x128xbf16>, vector<2x128xf32> -> vector<2x128xf32>
    %224 = vector.broadcast %10 : vector<1x128xf32> to vector<2x128xf32>
    %225 = arith.addf %223, %224 : vector<2x128xf32>
    %cst_65 = arith.constant 0.000000e+00 : f32
    %226 = vector.broadcast %cst_65 : f32 to vector<2x128xf32>
    %227 = arith.maximumf %225, %226 : vector<2x128xf32>
    %c1 = arith.constant 1 : index
    %c0_66 = arith.constant 0 : index
    %c0_67 = arith.constant 0 : index
    %228 = vector.load %arg8[%c1, %c0_66, %c0_67] : memref<3x2x128xf32, #tpu.memory_space<vmem>>, vector<1x2x128xf32>
    %229 = vector.shape_cast %228 : vector<1x2x128xf32> to vector<2x128xf32>
    %230 = vector.shape_cast %227 : vector<2x128xf32> to vector<1x2x128xf32>
    tpu.vector_store %arg8[%c1, %c0_66, %c0_67], %230 {strides = array<i32>} : memref<3x2x128xf32, #tpu.memory_space<vmem>>, vector<1x2x128xf32>,
    %231 = vector.extract_strided_slice %5 {offsets = [4, 0], sizes = [2, 1024], strides = [1, 1]} : vector<6x1024xf32> to vector<2x1024xf32>
    %232 = arith.truncf %171 : vector<2x256xf32> to vector<2x256xbf16>
    %cst_68 = arith.constant dense<0.000000e+00> : vector<2x1024xf32>
    %233 = tpu.matmul %232, %6, %cst_68 {dimension_numbers = #tpu.dot_dimension_numbers<[1], [0], [0], [1], [0, 0, 1, 1], [], []>} : vector<2x256xbf16>, vector<256x1024xbf16>, vector<2x1024xf32> -> vector<2x1024xf32>
    %234 = arith.addf %231, %233 : vector<2x1024xf32>
    %cst_69 = arith.constant dense<0.000000e+00> : vector<2xf32>
    %235 = vector.multi_reduction <add>, %234, %cst_69 [1] : vector<2x1024xf32> to vector<2xf32>
    %236 = vector.shape_cast %235 : vector<2xf32> to vector<2x1xf32>
    %cst_70 = arith.constant 1.024000e+03 : f32
    %237 = vector.broadcast %cst_70 : f32 to vector<2x1xf32>
    %238 = arith.divf %236, %237 : vector<2x1xf32>
    %239 = arith.mulf %234, %234 : vector<2x1024xf32>
    %cst_71 = arith.constant dense<0.000000e+00> : vector<2xf32>
    %240 = vector.multi_reduction <add>, %239, %cst_71 [1] : vector<2x1024xf32> to vector<2xf32>
    %241 = vector.shape_cast %240 : vector<2xf32> to vector<2x1xf32>
    %cst_72 = arith.constant 1.024000e+03 : f32
    %242 = vector.broadcast %cst_72 : f32 to vector<2x1xf32>
    %243 = arith.divf %241, %242 : vector<2x1xf32>
    %244 = arith.mulf %238, %238 : vector<2x1xf32>
    %245 = arith.subf %243, %244 : vector<2x1xf32>
    %cst_73 = arith.constant 0.000000e+00 : f32
    %246 = vector.broadcast %cst_73 : f32 to vector<2x1xf32>
    %247 = arith.maximumf %245, %246 : vector<2x1xf32>
    %248 = vector.broadcast %238 : vector<2x1xf32> to vector<2x1024xf32>
    %249 = arith.subf %234, %248 : vector<2x1024xf32>
    %cst_74 = arith.constant 9.99999974E-6 : f32
    %250 = vector.broadcast %cst_74 : f32 to vector<2x1xf32>
    %251 = arith.addf %247, %250 : vector<2x1xf32>
    %252 = math.rsqrt %251 : vector<2x1xf32>
    %253 = vector.broadcast %252 : vector<2x1xf32> to vector<2x1024xf32>
    %254 = arith.mulf %249, %253 : vector<2x1024xf32>
    %255 = vector.extract_strided_slice %254 {offsets = [0, 0], sizes = [2, 256], strides = [1, 1]} : vector<2x1024xf32> to vector<2x256xf32>
    %256 = arith.negf %255 : vector<2x256xf32>
    %257 = math.exp %256 : vector<2x256xf32>
    %cst_75 = arith.constant 1.000000e+00 : f32
    %258 = vector.broadcast %cst_75 : f32 to vector<2x256xf32>
    %259 = arith.addf %258, %257 : vector<2x256xf32>
    %260 = arith.divf %258, %259 : vector<2x256xf32>
    %261 = vector.extract_strided_slice %254 {offsets = [0, 256], sizes = [2, 256], strides = [1, 1]} : vector<2x1024xf32> to vector<2x256xf32>
    %262 = arith.negf %261 : vector<2x256xf32>
    %263 = math.exp %262 : vector<2x256xf32>
    %cst_76 = arith.constant 1.000000e+00 : f32
    %264 = vector.broadcast %cst_76 : f32 to vector<2x256xf32>
    %265 = arith.addf %264, %263 : vector<2x256xf32>
    %266 = arith.divf %264, %265 : vector<2x256xf32>
    %267 = vector.extract_strided_slice %254 {offsets = [0, 512], sizes = [2, 256], strides = [1, 1]} : vector<2x1024xf32> to vector<2x256xf32>
    %268 = arith.negf %267 : vector<2x256xf32>
    %269 = math.exp %268 : vector<2x256xf32>
    %cst_77 = arith.constant 1.000000e+00 : f32
    %270 = vector.broadcast %cst_77 : f32 to vector<2x256xf32>
    %271 = arith.addf %270, %269 : vector<2x256xf32>
    %272 = arith.divf %270, %271 : vector<2x256xf32>
    %273 = vector.extract_strided_slice %254 {offsets = [0, 768], sizes = [2, 256], strides = [1, 1]} : vector<2x1024xf32> to vector<2x256xf32>
    %274 = math.tanh %273 : vector<2x256xf32>
    %275 = arith.mulf %266, %169 : vector<2x256xf32>
    %276 = arith.mulf %260, %274 : vector<2x256xf32>
    %277 = arith.addf %275, %276 : vector<2x256xf32>
    %278 = math.tanh %277 : vector<2x256xf32>
    %279 = arith.mulf %272, %278 : vector<2x256xf32>
    %280 = tpu.concatenate %279, %221 in 1 : vector<2x256xf32>, vector<2x256xf32> -> vector<2x512xf32>
    %281 = arith.truncf %280 : vector<2x512xf32> to vector<2x512xbf16>
    %cst_78 = arith.constant dense<0.000000e+00> : vector<2x1024xf32>
    %282 = tpu.matmul %281, %7, %cst_78 {dimension_numbers = #tpu.dot_dimension_numbers<[1], [0], [0], [1], [0, 0, 1, 1], [], []>} : vector<2x512xbf16>, vector<512x1024xbf16>, vector<2x1024xf32> -> vector<2x1024xf32>
    %283 = vector.broadcast %8 : vector<1x1024xf32> to vector<2x1024xf32>
    %284 = arith.addf %282, %283 : vector<2x1024xf32>
    %cst_79 = arith.constant dense<0.000000e+00> : vector<2xf32>
    %285 = vector.multi_reduction <add>, %284, %cst_79 [1] : vector<2x1024xf32> to vector<2xf32>
    %286 = vector.shape_cast %285 : vector<2xf32> to vector<2x1xf32>
    %cst_80 = arith.constant 1.024000e+03 : f32
    %287 = vector.broadcast %cst_80 : f32 to vector<2x1xf32>
    %288 = arith.divf %286, %287 : vector<2x1xf32>
    %289 = arith.mulf %284, %284 : vector<2x1024xf32>
    %cst_81 = arith.constant dense<0.000000e+00> : vector<2xf32>
    %290 = vector.multi_reduction <add>, %289, %cst_81 [1] : vector<2x1024xf32> to vector<2xf32>
    %291 = vector.shape_cast %290 : vector<2xf32> to vector<2x1xf32>
    %cst_82 = arith.constant 1.024000e+03 : f32
    %292 = vector.broadcast %cst_82 : f32 to vector<2x1xf32>
    %293 = arith.divf %291, %292 : vector<2x1xf32>
    %294 = arith.mulf %288, %288 : vector<2x1xf32>
    %295 = arith.subf %293, %294 : vector<2x1xf32>
    %cst_83 = arith.constant 0.000000e+00 : f32
    %296 = vector.broadcast %cst_83 : f32 to vector<2x1xf32>
    %297 = arith.maximumf %295, %296 : vector<2x1xf32>
    %298 = vector.broadcast %288 : vector<2x1xf32> to vector<2x1024xf32>
    %299 = arith.subf %284, %298 : vector<2x1024xf32>
    %cst_84 = arith.constant 9.99999974E-6 : f32
    %300 = vector.broadcast %cst_84 : f32 to vector<2x1xf32>
    %301 = arith.addf %297, %300 : vector<2x1xf32>
    %302 = math.rsqrt %301 : vector<2x1xf32>
    %303 = vector.broadcast %302 : vector<2x1xf32> to vector<2x1024xf32>
    %304 = arith.mulf %299, %303 : vector<2x1024xf32>
    %305 = vector.extract_strided_slice %304 {offsets = [0, 0], sizes = [2, 256], strides = [1, 1]} : vector<2x1024xf32> to vector<2x256xf32>
    %306 = arith.negf %305 : vector<2x256xf32>
    %307 = math.exp %306 : vector<2x256xf32>
    %cst_85 = arith.constant 1.000000e+00 : f32
    %308 = vector.broadcast %cst_85 : f32 to vector<2x256xf32>
    %309 = arith.addf %308, %307 : vector<2x256xf32>
    %310 = arith.divf %308, %309 : vector<2x256xf32>
    %311 = vector.extract_strided_slice %304 {offsets = [0, 256], sizes = [2, 256], strides = [1, 1]} : vector<2x1024xf32> to vector<2x256xf32>
    %312 = arith.negf %311 : vector<2x256xf32>
    %313 = math.exp %312 : vector<2x256xf32>
    %cst_86 = arith.constant 1.000000e+00 : f32
    %314 = vector.broadcast %cst_86 : f32 to vector<2x256xf32>
    %315 = arith.addf %314, %313 : vector<2x256xf32>
    %316 = arith.divf %314, %315 : vector<2x256xf32>
    %317 = vector.extract_strided_slice %304 {offsets = [0, 512], sizes = [2, 256], strides = [1, 1]} : vector<2x1024xf32> to vector<2x256xf32>
    %318 = arith.negf %317 : vector<2x256xf32>
    %319 = math.exp %318 : vector<2x256xf32>
    %cst_87 = arith.constant 1.000000e+00 : f32
    %320 = vector.broadcast %cst_87 : f32 to vector<2x256xf32>
    %321 = arith.addf %320, %319 : vector<2x256xf32>
    %322 = arith.divf %320, %321 : vector<2x256xf32>
    %323 = vector.extract_strided_slice %304 {offsets = [0, 768], sizes = [2, 256], strides = [1, 1]} : vector<2x1024xf32> to vector<2x256xf32>
    %324 = math.tanh %323 : vector<2x256xf32>
    %325 = arith.mulf %316, %219 : vector<2x256xf32>
    %326 = arith.mulf %310, %324 : vector<2x256xf32>
    %327 = arith.addf %325, %326 : vector<2x256xf32>
    %328 = math.tanh %327 : vector<2x256xf32>
    %329 = arith.mulf %322, %328 : vector<2x256xf32>
    %330 = arith.truncf %329 : vector<2x256xf32> to vector<2x256xbf16>
    %cst_88 = arith.constant dense<0.000000e+00> : vector<2x128xf32>
    %331 = tpu.matmul %330, %9, %cst_88 {dimension_numbers = #tpu.dot_dimension_numbers<[1], [0], [0], [1], [0, 0, 1, 1], [], []>} : vector<2x256xbf16>, vector<256x128xbf16>, vector<2x128xf32> -> vector<2x128xf32>
    %332 = vector.broadcast %10 : vector<1x128xf32> to vector<2x128xf32>
    %333 = arith.addf %331, %332 : vector<2x128xf32>
    %cst_89 = arith.constant 0.000000e+00 : f32
    %334 = vector.broadcast %cst_89 : f32 to vector<2x128xf32>
    %335 = arith.maximumf %333, %334 : vector<2x128xf32>
    %c2 = arith.constant 2 : index
    %c0_90 = arith.constant 0 : index
    %c0_91 = arith.constant 0 : index
    %336 = vector.load %arg8[%c2, %c0_90, %c0_91] : memref<3x2x128xf32, #tpu.memory_space<vmem>>, vector<1x2x128xf32>
    %337 = vector.shape_cast %336 : vector<1x2x128xf32> to vector<2x128xf32>
    %338 = vector.shape_cast %335 : vector<2x128xf32> to vector<1x2x128xf32>
    tpu.vector_store %arg8[%c2, %c0_90, %c0_91], %338 {strides = array<i32>} : memref<3x2x128xf32, #tpu.memory_space<vmem>>, vector<1x2x128xf32>,
    return
  }
}

</mosaic_0001>

<bundles_post_ra>
// kernel: predictive_model_forward.3
= control target key start
LH: loop header
LB: loop body
LE: loop exit
PB: predicated region body
PF: predicated region fallthrough
CT: control target
= control target key end

     0   :  { %vm337_vm0 = vcmask 1043456   ;;  %vm338_vm1 = vcmask 1044480   ;;  %v1378_v0 = vmov 0.0   ;;  %v1379_v2 = vmov 65535   ;;  %s1901_s1 = inlined_call_operand.vmem [shape: bf16[9,16], index: 1, kind: input, shape index: {}]   ;;  %s1902_s0 = inlined_call_operand.vmem [shape: bf16[486,9], index: 0, kind: input, shape index: {}]   ;;  %s1903_s2 = inlined_call_operand.vmem [shape: f32[1,16], index: 2, kind: input, shape index: {}]   ;;  %s1904_s3 = inlined_call_operand.vmem [shape: bf16[486,16], index: 3, kind: output, shape index: {}]  }
   0x1   :  { %1215 = vmatprep.subr.bf16.mxu0 %v1378_v0  ;;  %v1346_v1 = vld [vmem:[%s1901_s1] sm:$0x1f]   ;;  %1341 = vmatprep.subr.bf16.mxu1 %v1378_v0  ;;  %v339_v3 = vsel %vm337_vm0, 4294967295, %v1379_v2  ;;  %vm1380_vm2 = vmmov 0   ;;  %vm243_vm3 = vcmask 72704   ;;  %v1349_v8 = vld [vmem:[%s1902_s0 + $0x8] sm:$0xff]  }
   0x2   :  { %v340_v4 = vsel %vm338_vm1, %v339_v3, 0  ;;  %1217 = vmatprep.mubr.msk.bf16.mxu0 %vm1380_vm2, %v1378_v0  ;;  %v1347_v5 = vld [vmem:[%s1902_s0] sm:$0xff]   ;;  %1281 = vmatprep.mubr.msk.bf16.mxu1 %vm1380_vm2, %v1378_v0  ;;  %v1350_v9 = vld [vmem:[%s1902_s0 + $0x88] sm:$0xff]   ;;  %v1351_v10 = vld [vmem:[%s1902_s0 + $0x10] sm:$0xff]   ;;  %vm930_vm4 = vcmask 125952   ;;  %vm991_vm5 = vcmask 124928  }
   0x3   :  { %v342_v6 = vand.u32 %v1346_v1, %v340_v4  ;;  %v1348_v7 = vld [vmem:[%s1902_s0 + $0x80] sm:$0xff]   ;;  %v1352_v11 = vld [vmem:[%s1902_s0 + $0x90] sm:$0xff]   ;;  %v1353_v12 = vld [vmem:[%s1902_s0 + $0x18] sm:$0xff]  }
   0x4   :  { %v1354_v13 = vld [vmem:[%s1902_s0 + $0x98] sm:$0xff]   ;;  %v1355_v14 = vld [vmem:[%s1902_s0 + $0x20] sm:$0xff]   ;;  %v1357_v16 = vld [vmem:[%s1902_s0 + $0x28] sm:$0xff]  }
   0x5   :  { %1216 = vmatpush3.bf16.msra.mxu0 %v342_v6  ;;  %1342 = vmatpush3.bf16.msra.mxu1 %v342_v6  ;;  %v1356_v15 = vld [vmem:[%s1902_s0 + $0xa0] sm:$0xff]   ;;  %v1358_v17 = vld [vmem:[%s1902_s0 + $0xa8] sm:$0xff]   ;;  %v1359_v18 = vld [vmem:[%s1902_s0 + $0x30] sm:$0xff]  }
   0x6   :  { %v1360_v19 = vld [vmem:[%s1902_s0 + $0xb0] sm:$0xff]   ;;  %v1361_v20 = vld [vmem:[%s1902_s0 + $0x38] sm:$0xff]   ;;  %v1363_v22 = vld [vmem:[%s1902_s0 + $0x40] sm:$0xff]  }
   0x7   :  { %v1362_v21 = vld [vmem:[%s1902_s0 + $0xb8] sm:$0xff]   ;;  %v1364_v23 = vld [vmem:[%s1902_s0 + $0xc0] sm:$0xff]   ;;  %v1365_v24 = vld [vmem:[%s1902_s0 + $0x48] sm:$0xff]  }
   0x8   :  { %1218 = vmatmul.mubr.msk.bf16.vlgmr.msra.gmra.mrb[0].mxu0 %vm243_vm3, %v1347_v5  ;;  %1282 = vmatmul.mubr.msk.bf16.vlgmr.msra.gmra.mrb[0].mxu1 %vm243_vm3, %v1348_v7  ;;  %v1366_v25 = vld [vmem:[%s1902_s0 + $0xc8] sm:$0xff]   ;;  %v1367_v26 = vld [vmem:[%s1902_s0 + $0x50] sm:$0xff]   ;;  %v1369_v28 = vld [vmem:[%s1902_s0 + $0x58] sm:$0xff]  }
   0x9   :  { %1221 = vmatprep.mubr.msk.bf16.mxu0 %vm1380_vm2, %v1378_v0  ;;  %1285 = vmatprep.mubr.msk.bf16.mxu1 %vm1380_vm2, %v1378_v0  ;;  %v1368_v27 = vld [vmem:[%s1902_s0 + $0xd0] sm:$0xff]   ;;  %v1370_v29 = vld [vmem:[%s1902_s0 + $0xd8] sm:$0xff]   ;;  %v1371_v30 = vld [vmem:[%s1902_s0 + $0x60] sm:$0xff]  }
   0xa   :  { %v1372_v31 = vld [vmem:[%s1902_s0 + $0xe0] sm:$0xff]   ;;  %v1373_v32 = vld [vmem:[%s1902_s0 + $0x68] sm:$0xff]   ;;  %v1375_v34 = vld [vmem:[%s1902_s0 + $0x70] sm:$0xff]  }
   0xb   :  { %v1374_v33 = vld [vmem:[%s1902_s0 + $0xe8] sm:$0xff]   ;;  %v1376_v35 = vld [vmem:[%s1902_s0 + $0xf0] ss:$0 sps:$4 sm:$0x77]   ;;  %v1377_v36 = vld [vmem:[%s1902_s0 + $0x78] sm:$0xff]  }
   0xc   :  { %v1595_v37 = vld [vmem:[%s1903_s2] ss:$0 sm:$0xff] }
  0x10   :  { %1222 = vmatmul.mubr.msk.bf16.gmra.mrb[4].mxu0 %vm243_vm3, %v1349_v8  ;;  %1286 = vmatmul.mubr.msk.bf16.gmra.mrb[4].mxu1 %vm243_vm3, %v1350_v9 }
  0x11   :  { %1225 = vmatprep.mubr.msk.bf16.mxu0 %vm1380_vm2, %v1378_v0  ;;  %1289 = vmatprep.mubr.msk.bf16.mxu1 %vm1380_vm2, %v1378_v0 }
  0x18   :  { %1226 = vmatmul.mubr.msk.bf16.gmra.mrb[8].mxu0 %vm243_vm3, %v1351_v10  ;;  %1290 = vmatmul.mubr.msk.bf16.gmra.mrb[8].mxu1 %vm243_vm3, %v1352_v11 }
  0x19   :  { %1229 = vmatprep.mubr.msk.bf16.mxu0 %vm1380_vm2, %v1378_v0  ;;  %1293 = vmatprep.mubr.msk.bf16.mxu1 %vm1380_vm2, %v1378_v0 }
  0x20   :  { %1230 = vmatmul.mubr.msk.bf16.gmra.mrb[12].mxu0 %vm243_vm3, %v1353_v12  ;;  %1294 = vmatmul.mubr.msk.bf16.gmra.mrb[12].mxu1 %vm243_vm3, %v1354_v13 }
  0x21   :  { %1233 = vmatprep.mubr.msk.bf16.mxu0 %vm1380_vm2, %v1378_v0  ;;  %1297 = vmatprep.mubr.msk.bf16.mxu1 %vm1380_vm2, %v1378_v0 }
  0x28   :  { %1234 = vmatmul.mubr.msk.bf16.gmra.mrb[16].mxu0 %vm243_vm3, %v1355_v14  ;;  %1298 = vmatmul.mubr.msk.bf16.gmra.mrb[16].mxu1 %vm243_vm3, %v1356_v15 }
  0x29   :  { %1237 = vmatprep.mubr.msk.bf16.mxu0 %vm1380_vm2, %v1378_v0  ;;  %1301 = vmatprep.mubr.msk.bf16.mxu1 %vm1380_vm2, %v1378_v0 }
  0x30   :  { %1238 = vmatmul.mubr.msk.bf16.gmra.mrb[20].mxu0 %vm243_vm3, %v1357_v16  ;;  %1302 = vmatmul.mubr.msk.bf16.gmra.mrb[20].mxu1 %vm243_vm3, %v1358_v17 }
  0x31   :  { %1241 = vmatprep.mubr.msk.bf16.mxu0 %vm1380_vm2, %v1378_v0  ;;  %1305 = vmatprep.mubr.msk.bf16.mxu1 %vm1380_vm2, %v1378_v0 }
  0x38   :  { %1242 = vmatmul.mubr.msk.bf16.gmra.mrb[24].mxu0 %vm243_vm3, %v1359_v18  ;;  %1306 = vmatmul.mubr.msk.bf16.gmra.mrb[24].mxu1 %vm243_vm3, %v1360_v19 }
  0x39   :  { %1245 = vmatprep.mubr.msk.bf16.mxu0 %vm1380_vm2, %v1378_v0  ;;  %1309 = vmatprep.mubr.msk.bf16.mxu1 %vm1380_vm2, %v1378_v0 }
  0x40   :  { %1246 = vmatmul.mubr.msk.bf16.gmra.mrb[28].mxu0 %vm243_vm3, %v1361_v20  ;;  %1310 = vmatmul.mubr.msk.bf16.gmra.mrb[28].mxu1 %vm243_vm3, %v1362_v21 }
  0x41   :  { %1249 = vmatprep.mubr.msk.bf16.mxu0 %vm1380_vm2, %v1378_v0  ;;  %1313 = vmatprep.mubr.msk.bf16.mxu1 %vm1380_vm2, %v1378_v0 }
  0x48   :  { %1250 = vmatmul.mubr.msk.bf16.gmra.mrb[32].mxu0 %vm243_vm3, %v1363_v22  ;;  %1314 = vmatmul.mubr.msk.bf16.gmra.mrb[32].mxu1 %vm243_vm3, %v1364_v23 }
  0x49   :  { %1253 = vmatprep.mubr.msk.bf16.mxu0 %vm1380_vm2, %v1378_v0  ;;  %1317 = vmatprep.mubr.msk.bf16.mxu1 %vm1380_vm2, %v1378_v0 }
  0x50   :  { %1254 = vmatmul.mubr.msk.bf16.gmra.mrb[36].mxu0 %vm243_vm3, %v1365_v24  ;;  %1318 = vmatmul.mubr.msk.bf16.gmra.mrb[36].mxu1 %vm243_vm3, %v1366_v25 }
  0x51   :  { %1257 = vmatprep.mubr.msk.bf16.mxu0 %vm1380_vm2, %v1378_v0  ;;  %1321 = vmatprep.mubr.msk.bf16.mxu1 %vm1380_vm2, %v1378_v0 }
  0x58   :  { %1258 = vmatmul.mubr.msk.bf16.gmra.mrb[40].mxu0 %vm243_vm3, %v1367_v26  ;;  %1322 = vmatmul.mubr.msk.bf16.gmra.mrb[40].mxu1 %vm243_vm3, %v1368_v27 }
  0x59   :  { %1261 = vmatprep.mubr.msk.bf16.mxu0 %vm1380_vm2, %v1378_v0  ;;  %1325 = vmatprep.mubr.msk.bf16.mxu1 %vm1380_vm2, %v1378_v0 }
  0x60   :  { %1262 = vmatmul.mubr.msk.bf16.gmra.mrb[44].mxu0 %vm243_vm3, %v1369_v28  ;;  %1326 = vmatmul.mubr.msk.bf16.gmra.mrb[44].mxu1 %vm243_vm3, %v1370_v29 }
  0x61   :  { %1265 = vmatprep.mubr.msk.bf16.mxu0 %vm1380_vm2, %v1378_v0  ;;  %1329 = vmatprep.mubr.msk.bf16.mxu1 %vm1380_vm2, %v1378_v0 }
  0x68   :  { %1266 = vmatmul.mubr.msk.bf16.gmra.mrb[48].mxu0 %vm243_vm3, %v1371_v30  ;;  %1330 = vmatmul.mubr.msk.bf16.gmra.mrb[48].mxu1 %vm243_vm3, %v1372_v31 }
  0x69   :  { %1269 = vmatprep.mubr.msk.bf16.mxu0 %vm1380_vm2, %v1378_v0  ;;  %1333 = vmatprep.mubr.msk.bf16.mxu1 %vm1380_vm2, %v1378_v0 }
  0x70   :  { %1270 = vmatmul.mubr.msk.bf16.gmra.mrb[52].mxu0 %vm243_vm3, %v1373_v32  ;;  %1334 = vmatmul.mubr.msk.bf16.gmra.mrb[52].mxu1 %vm243_vm3, %v1374_v33 }
  0x71   :  { %1273 = vmatprep.mubr.msk.bf16.mxu0 %vm1380_vm2, %v1378_v0  ;;  %1337 = vmatprep.mubr.msk.bf16.mxu1 %vm1380_vm2, %v1378_v0 }
  0x78   :  { %1274 = vmatmul.mubr.msk.bf16.gmra.mrb[56].mxu0 %vm243_vm3, %v1375_v34  ;;  %1338 = vmatmul.mubr.msk.bf16.gmra.mrb[56].mxu1 %vm243_vm3, %v1376_v35 }
  0x79   :  { %1277 = vmatprep.mubr.msk.bf16.mxu0 %vm1380_vm2, %v1378_v0 }
  0x80   :  { %1278 = vmatmul.mubr.msk.bf16.gmra.mrb[60].mxu0 %vm243_vm3, %v1377_v36 }
  0xdb   :  { %v378_v38 = vpop.f32.mrb[0].mxu0  ;;  %v506_v39 = vpop.f32.mrb[0].mxu1 }
  0xdc   :  { %v379_v40 = vadd.f32 %v1595_v37, %v378_v38  ;;  %v1219_v41 = vpop.f32.mrb[1].mxu0  ;;  %v507_v42 = vadd.f32 %v1595_v37, %v506_v39  ;;  %v1283_v43 = vpop.f32.mrb[1].mxu1 }
  0xdd   :  { %v381_v44 = vpop.f32.mrb[2].mxu0  ;;  %v509_v45 = vpop.f32.mrb[2].mxu1 }
  0xde   :  { %v624_v46 = vmax.f32 %v379_v40, 0.0  ;;  %v382_v47 = vadd.f32 %v1595_v37, %v381_v44  ;;  %v1220_v48 = vpop.f32.mrb[3].mxu0  ;;  %v656_v49 = vmax.f32 %v507_v42, 0.0  ;;  %v510_v50 = vadd.f32 %v1595_v37, %v509_v45  ;;  %v1284_v51 = vpop.f32.mrb[3].mxu1 }
  0xe0   :  { %v1122_v52 = vpack.c.bf16 %v624_v46, %v624_v46  ;;  %v625_v53 = vmax.f32 %v382_v47, 0.0  ;;  %v1154_v54 = vpack.c.bf16 %v656_v49, %v656_v49  ;;  %v657_v55 = vmax.f32 %v510_v50, 0.0 }
  0xe2   :  { %931 = vst.msk [vmem:[%s1904_s3] sm:$0xf] %vm930_vm4, %v1122_v52  ;;  %v1123_v56 = vpack.c.bf16 %v625_v53, %v625_v53  ;;  %963 = vst.msk [vmem:[%s1904_s3 + $0x80] sm:$0xf] %vm930_vm4, %v1154_v54  ;;  %v1155_v57 = vpack.c.bf16 %v657_v55, %v657_v55 }
  0xe3   :  { %v386_v58 = vpop.f32.mrb[4].mxu0  ;;  %v514_v59 = vpop.f32.mrb[4].mxu1 }
  0xe4   :  { %932 = vst.msk [vmem:[%s1904_s3 + $0x4] sm:$0xf] %vm930_vm4, %v1123_v56  ;;  %v387_v60 = vadd.f32 %v1595_v37, %v386_v58  ;;  %v1223_v61 = vpop.f32.mrb[5].mxu0  ;;  %964 = vst.msk [vmem:[%s1904_s3 + $0x84] sm:$0xf] %vm930_vm4, %v1155_v57  ;;  %v515_v62 = vadd.f32 %v1595_v37, %v514_v59  ;;  %v1287_v63 = vpop.f32.mrb[5].mxu1 }
  0xe5   :  { %v389_v0 = vpop.f32.mrb[6].mxu0  ;;  %v517_v1 = vpop.f32.mrb[6].mxu1 }
  0xe6   :  { %v626_v2 = vmax.f32 %v387_v60, 0.0  ;;  %v390_v3 = vadd.f32 %v1595_v37, %v389_v0  ;;  %v1224_v4 = vpop.f32.mrb[7].mxu0  ;;  %v658_v5 = vmax.f32 %v515_v62, 0.0  ;;  %v518_v6 = vadd.f32 %v1595_v37, %v517_v1  ;;  %v1288_v7 = vpop.f32.mrb[7].mxu1 }
  0xe8   :  { %v1124_v8 = vpack.c.bf16 %v626_v2, %v626_v2  ;;  %v627_v9 = vmax.f32 %v390_v3, 0.0  ;;  %v1156_v10 = vpack.c.bf16 %v658_v5, %v658_v5  ;;  %v659_v11 = vmax.f32 %v518_v6, 0.0 }
  0xea   :  { %933 = vst.msk [vmem:[%s1904_s3 + $0x8] sm:$0xf] %vm930_vm4, %v1124_v8  ;;  %v1125_v12 = vpack.c.bf16 %v627_v9, %v627_v9  ;;  %965 = vst.msk [vmem:[%s1904_s3 + $0x88] sm:$0xf] %vm930_vm4, %v1156_v10  ;;  %v1157_v13 = vpack.c.bf16 %v659_v11, %v659_v11 }
  0xeb   :  { %v394_v14 = vpop.f32.mrb[8].mxu0  ;;  %v522_v15 = vpop.f32.mrb[8].mxu1 }
  0xec   :  { %934 = vst.msk [vmem:[%s1904_s3 + $0xc] sm:$0xf] %vm930_vm4, %v1125_v12  ;;  %v395_v16 = vadd.f32 %v1595_v37, %v394_v14  ;;  %v1227_v17 = vpop.f32.mrb[9].mxu0  ;;  %966 = vst.msk [vmem:[%s1904_s3 + $0x8c] sm:$0xf] %vm930_vm4, %v1157_v13  ;;  %v523_v18 = vadd.f32 %v1595_v37, %v522_v15  ;;  %v1291_v19 = vpop.f32.mrb[9].mxu1 }
  0xed   :  { %v397_v20 = vpop.f32.mrb[10].mxu0  ;;  %v525_v21 = vpop.f32.mrb[10].mxu1 }
  0xee   :  { %v628_v22 = vmax.f32 %v395_v16, 0.0  ;;  %v398_v23 = vadd.f32 %v1595_v37, %v397_v20  ;;  %v1228_v24 = vpop.f32.mrb[11].mxu0  ;;  %v660_v25 = vmax.f32 %v523_v18, 0.0  ;;  %v526_v26 = vadd.f32 %v1595_v37, %v525_v21  ;;  %v1292_v27 = vpop.f32.mrb[11].mxu1 }
  0xf0   :  { %v1126_v28 = vpack.c.bf16 %v628_v22, %v628_v22  ;;  %v629_v29 = vmax.f32 %v398_v23, 0.0  ;;  %v1158_v30 = vpack.c.bf16 %v660_v25, %v660_v25  ;;  %v661_v31 = vmax.f32 %v526_v26, 0.0 }
  0xf2   :  { %935 = vst.msk [vmem:[%s1904_s3 + $0x10] sm:$0xf] %vm930_vm4, %v1126_v28  ;;  %v1127_v32 = vpack.c.bf16 %v629_v29, %v629_v29  ;;  %967 = vst.msk [vmem:[%s1904_s3 + $0x90] sm:$0xf] %vm930_vm4, %v1158_v30  ;;  %v1159_v33 = vpack.c.bf16 %v661_v31, %v661_v31 }
  0xf3   :  { %v402_v34 = vpop.f32.mrb[12].mxu0  ;;  %v530_v35 = vpop.f32.mrb[12].mxu1 }
  0xf4   :  { %936 = vst.msk [vmem:[%s1904_s3 + $0x14] sm:$0xf] %vm930_vm4, %v1127_v32  ;;  %v403_v36 = vadd.f32 %v1595_v37, %v402_v34  ;;  %v1231_v38 = vpop.f32.mrb[13].mxu0  ;;  %968 = vst.msk [vmem:[%s1904_s3 + $0x94] sm:$0xf] %vm930_vm4, %v1159_v33  ;;  %v531_v39 = vadd.f32 %v1595_v37, %v530_v35  ;;  %v1295_v40 = vpop.f32.mrb[13].mxu1 }
  0xf5   :  { %v405_v41 = vpop.f32.mrb[14].mxu0  ;;  %v533_v42 = vpop.f32.mrb[14].mxu1 }
  0xf6   :  { %v630_v43 = vmax.f32 %v403_v36, 0.0  ;;  %v406_v44 = vadd.f32 %v1595_v37, %v405_v41  ;;  %v1232_v45 = vpop.f32.mrb[15].mxu0  ;;  %v662_v46 = vmax.f32 %v531_v39, 0.0  ;;  %v534_v47 = vadd.f32 %v1595_v37, %v533_v42  ;;  %v1296_v48 = vpop.f32.mrb[15].mxu1 }
  0xf8   :  { %v1128_v49 = vpack.c.bf16 %v630_v43, %v630_v43  ;;  %v631_v50 = vmax.f32 %v406_v44, 0.0  ;;  %v1160_v51 = vpack.c.bf16 %v662_v46, %v662_v46  ;;  %v663_v52 = vmax.f32 %v534_v47, 0.0 }
  0xfa   :  { %937 = vst.msk [vmem:[%s1904_s3 + $0x18] sm:$0xf] %vm930_vm4, %v1128_v49  ;;  %v1129_v53 = vpack.c.bf16 %v631_v50, %v631_v50  ;;  %969 = vst.msk [vmem:[%s1904_s3 + $0x98] sm:$0xf] %vm930_vm4, %v1160_v51  ;;  %v1161_v54 = vpack.c.bf16 %v663_v52, %v663_v52 }
  0xfb   :  { %v410_v55 = vpop.f32.mrb[16].mxu0  ;;  %v538_v56 = vpop.f32.mrb[16].mxu1 }
  0xfc   :  { %938 = vst.msk [vmem:[%s1904_s3 + $0x1c] sm:$0xf] %vm930_vm4, %v1129_v53  ;;  %v411_v57 = vadd.f32 %v1595_v37, %v410_v55  ;;  %v1235_v58 = vpop.f32.mrb[17].mxu0  ;;  %970 = vst.msk [vmem:[%s1904_s3 + $0x9c] sm:$0xf] %vm930_vm4, %v1161_v54  ;;  %v539_v59 = vadd.f32 %v1595_v37, %v538_v56  ;;  %v1299_v60 = vpop.f32.mrb[17].mxu1 }
  0xfd   :  { %v413_v61 = vpop.f32.mrb[18].mxu0  ;;  %v541_v62 = vpop.f32.mrb[18].mxu1 }
  0xfe   :  { %v632_v63 = vmax.f32 %v411_v57, 0.0  ;;  %v414_v0 = vadd.f32 %v1595_v37, %v413_v61  ;;  %v1236_v1 = vpop.f32.mrb[19].mxu0  ;;  %v664_v2 = vmax.f32 %v539_v59, 0.0  ;;  %v542_v3 = vadd.f32 %v1595_v37, %v541_v62  ;;  %v1300_v4 = vpop.f32.mrb[19].mxu1 }
 0x100   :  { %v1130_v5 = vpack.c.bf16 %v632_v63, %v632_v63  ;;  %v633_v6 = vmax.f32 %v414_v0, 0.0  ;;  %v1162_v7 = vpack.c.bf16 %v664_v2, %v664_v2  ;;  %v665_v8 = vmax.f32 %v542_v3, 0.0 }
 0x102   :  { %939 = vst.msk [vmem:[%s1904_s3 + $0x20] sm:$0xf] %vm930_vm4, %v1130_v5  ;;  %v1131_v9 = vpack.c.bf16 %v633_v6, %v633_v6  ;;  %971 = vst.msk [vmem:[%s1904_s3 + $0xa0] sm:$0xf] %vm930_vm4, %v1162_v7  ;;  %v1163_v10 = vpack.c.bf16 %v665_v8, %v665_v8 }
 0x103   :  { %v418_v11 = vpop.f32.mrb[20].mxu0  ;;  %v546_v12 = vpop.f32.mrb[20].mxu1 }
 0x104   :  { %940 = vst.msk [vmem:[%s1904_s3 + $0x24] sm:$0xf] %vm930_vm4, %v1131_v9  ;;  %v419_v13 = vadd.f32 %v1595_v37, %v418_v11  ;;  %v1239_v14 = vpop.f32.mrb[21].mxu0  ;;  %972 = vst.msk [vmem:[%s1904_s3 + $0xa4] sm:$0xf] %vm930_vm4, %v1163_v10  ;;  %v547_v15 = vadd.f32 %v1595_v37, %v546_v12  ;;  %v1303_v16 = vpop.f32.mrb[21].mxu1 }
 0x105   :  { %v421_v17 = vpop.f32.mrb[22].mxu0  ;;  %v549_v18 = vpop.f32.mrb[22].mxu1 }
 0x106   :  { %v634_v19 = vmax.f32 %v419_v13, 0.0  ;;  %v422_v20 = vadd.f32 %v1595_v37, %v421_v17  ;;  %v1240_v21 = vpop.f32.mrb[23].mxu0  ;;  %v666_v22 = vmax.f32 %v547_v15, 0.0  ;;  %v550_v23 = vadd.f32 %v1595_v37, %v549_v18  ;;  %v1304_v24 = vpop.f32.mrb[23].mxu1 }
 0x108   :  { %v1132_v25 = vpack.c.bf16 %v634_v19, %v634_v19  ;;  %v635_v26 = vmax.f32 %v422_v20, 0.0  ;;  %v1164_v27 = vpack.c.bf16 %v666_v22, %v666_v22  ;;  %v667_v28 = vmax.f32 %v550_v23, 0.0 }
 0x10a   :  { %941 = vst.msk [vmem:[%s1904_s3 + $0x28] sm:$0xf] %vm930_vm4, %v1132_v25  ;;  %v1133_v29 = vpack.c.bf16 %v635_v26, %v635_v26  ;;  %973 = vst.msk [vmem:[%s1904_s3 + $0xa8] sm:$0xf] %vm930_vm4, %v1164_v27  ;;  %v1165_v30 = vpack.c.bf16 %v667_v28, %v667_v28 }
 0x10b   :  { %v426_v31 = vpop.f32.mrb[24].mxu0  ;;  %v554_v32 = vpop.f32.mrb[24].mxu1 }
 0x10c   :  { %942 = vst.msk [vmem:[%s1904_s3 + $0x2c] sm:$0xf] %vm930_vm4, %v1133_v29  ;;  %v427_v33 = vadd.f32 %v1595_v37, %v426_v31  ;;  %v1243_v34 = vpop.f32.mrb[25].mxu0  ;;  %974 = vst.msk [vmem:[%s1904_s3 + $0xac] sm:$0xf] %vm930_vm4, %v1165_v30  ;;  %v555_v35 = vadd.f32 %v1595_v37, %v554_v32  ;;  %v1307_v36 = vpop.f32.mrb[25].mxu1 }
 0x10d   :  { %v429_v38 = vpop.f32.mrb[26].mxu0  ;;  %v557_v39 = vpop.f32.mrb[26].mxu1 }
 0x10e   :  { %v636_v40 = vmax.f32 %v427_v33, 0.0  ;;  %v430_v41 = vadd.f32 %v1595_v37, %v429_v38  ;;  %v1244_v42 = vpop.f32.mrb[27].mxu0  ;;  %v668_v43 = vmax.f32 %v555_v35, 0.0  ;;  %v558_v44 = vadd.f32 %v1595_v37, %v557_v39  ;;  %v1308_v45 = vpop.f32.mrb[27].mxu1 }
 0x110   :  { %v1134_v46 = vpack.c.bf16 %v636_v40, %v636_v40  ;;  %v637_v47 = vmax.f32 %v430_v41, 0.0  ;;  %v1166_v48 = vpack.c.bf16 %v668_v43, %v668_v43  ;;  %v669_v49 = vmax.f32 %v558_v44, 0.0 }
 0x112   :  { %943 = vst.msk [vmem:[%s1904_s3 + $0x30] sm:$0xf] %vm930_vm4, %v1134_v46  ;;  %v1135_v50 = vpack.c.bf16 %v637_v47, %v637_v47  ;;  %975 = vst.msk [vmem:[%s1904_s3 + $0xb0] sm:$0xf] %vm930_vm4, %v1166_v48  ;;  %v1167_v51 = vpack.c.bf16 %v669_v49, %v669_v49 }
 0x113   :  { %v434_v52 = vpop.f32.mrb[28].mxu0  ;;  %v562_v53 = vpop.f32.mrb[28].mxu1 }
 0x114   :  { %944 = vst.msk [vmem:[%s1904_s3 + $0x34] sm:$0xf] %vm930_vm4, %v1135_v50  ;;  %v435_v54 = vadd.f32 %v1595_v37, %v434_v52  ;;  %v1247_v55 = vpop.f32.mrb[29].mxu0  ;;  %976 = vst.msk [vmem:[%s1904_s3 + $0xb4] sm:$0xf] %vm930_vm4, %v1167_v51  ;;  %v563_v56 = vadd.f32 %v1595_v37, %v562_v53  ;;  %v1311_v57 = vpop.f32.mrb[29].mxu1 }
 0x115   :  { %v437_v58 = vpop.f32.mrb[30].mxu0  ;;  %v565_v59 = vpop.f32.mrb[30].mxu1 }
 0x116   :  { %v638_v60 = vmax.f32 %v435_v54, 0.0  ;;  %v438_v61 = vadd.f32 %v1595_v37, %v437_v58  ;;  %v1248_v62 = vpop.f32.mrb[31].mxu0  ;;  %v670_v63 = vmax.f32 %v563_v56, 0.0  ;;  %v566_v0 = vadd.f32 %v1595_v37, %v565_v59  ;;  %v1312_v1 = vpop.f32.mrb[31].mxu1 }
 0x118   :  { %v1136_v2 = vpack.c.bf16 %v638_v60, %v638_v60  ;;  %v639_v3 = vmax.f32 %v438_v61, 0.0  ;;  %v1168_v4 = vpack.c.bf16 %v670_v63, %v670_v63  ;;  %v671_v5 = vmax.f32 %v566_v0, 0.0 }
 0x11a   :  { %945 = vst.msk [vmem:[%s1904_s3 + $0x38] sm:$0xf] %vm930_vm4, %v1136_v2  ;;  %v1137_v6 = vpack.c.bf16 %v639_v3, %v639_v3  ;;  %977 = vst.msk [vmem:[%s1904_s3 + $0xb8] sm:$0xf] %vm930_vm4, %v1168_v4  ;;  %v1169_v7 = vpack.c.bf16 %v671_v5, %v671_v5 }
 0x11b   :  { %v442_v8 = vpop.f32.mrb[32].mxu0  ;;  %v570_v9 = vpop.f32.mrb[32].mxu1 }
 0x11c   :  { %946 = vst.msk [vmem:[%s1904_s3 + $0x3c] sm:$0xf] %vm930_vm4, %v1137_v6  ;;  %v443_v10 = vadd.f32 %v1595_v37, %v442_v8  ;;  %v1251_v11 = vpop.f32.mrb[33].mxu0  ;;  %978 = vst.msk [vmem:[%s1904_s3 + $0xbc] sm:$0xf] %vm930_vm4, %v1169_v7  ;;  %v571_v12 = vadd.f32 %v1595_v37, %v570_v9  ;;  %v1315_v13 = vpop.f32.mrb[33].mxu1 }
 0x11d   :  { %v445_v14 = vpop.f32.mrb[34].mxu0  ;;  %v573_v15 = vpop.f32.mrb[34].mxu1 }
 0x11e   :  { %v640_v16 = vmax.f32 %v443_v10, 0.0  ;;  %v446_v17 = vadd.f32 %v1595_v37, %v445_v14  ;;  %v1252_v18 = vpop.f32.mrb[35].mxu0  ;;  %v672_v19 = vmax.f32 %v571_v12, 0.0  ;;  %v574_v20 = vadd.f32 %v1595_v37, %v573_v15  ;;  %v1316_v21 = vpop.f32.mrb[35].mxu1 }
 0x120   :  { %v1138_v22 = vpack.c.bf16 %v640_v16, %v640_v16  ;;  %v641_v23 = vmax.f32 %v446_v17, 0.0  ;;  %v1170_v24 = vpack.c.bf16 %v672_v19, %v672_v19  ;;  %v673_v25 = vmax.f32 %v574_v20, 0.0 }
 0x122   :  { %947 = vst.msk [vmem:[%s1904_s3 + $0x40] sm:$0xf] %vm930_vm4, %v1138_v22  ;;  %v1139_v26 = vpack.c.bf16 %v641_v23, %v641_v23  ;;  %979 = vst.msk [vmem:[%s1904_s3 + $0xc0] sm:$0xf] %vm930_vm4, %v1170_v24  ;;  %v1171_v27 = vpack.c.bf16 %v673_v25, %v673_v25 }
 0x123   :  { %v450_v28 = vpop.f32.mrb[36].mxu0  ;;  %v578_v29 = vpop.f32.mrb[36].mxu1 }
 0x124   :  { %948 = vst.msk [vmem:[%s1904_s3 + $0x44] sm:$0xf] %vm930_vm4, %v1139_v26  ;;  %v451_v30 = vadd.f32 %v1595_v37, %v450_v28  ;;  %v1255_v31 = vpop.f32.mrb[37].mxu0  ;;  %980 = vst.msk [vmem:[%s1904_s3 + $0xc4] sm:$0xf] %vm930_vm4, %v1171_v27  ;;  %v579_v32 = vadd.f32 %v1595_v37, %v578_v29  ;;  %v1319_v33 = vpop.f32.mrb[37].mxu1 }
 0x125   :  { %v453_v34 = vpop.f32.mrb[38].mxu0  ;;  %v581_v35 = vpop.f32.mrb[38].mxu1 }
 0x126   :  { %v642_v36 = vmax.f32 %v451_v30, 0.0  ;;  %v454_v38 = vadd.f32 %v1595_v37, %v453_v34  ;;  %v1256_v39 = vpop.f32.mrb[39].mxu0  ;;  %v674_v40 = vmax.f32 %v579_v32, 0.0  ;;  %v582_v41 = vadd.f32 %v1595_v37, %v581_v35  ;;  %v1320_v42 = vpop.f32.mrb[39].mxu1 }
 0x128   :  { %v1140_v43 = vpack.c.bf16 %v642_v36, %v642_v36  ;;  %v643_v44 = vmax.f32 %v454_v38, 0.0  ;;  %v1172_v45 = vpack.c.bf16 %v674_v40, %v674_v40  ;;  %v675_v46 = vmax.f32 %v582_v41, 0.0 }
 0x12a   :  { %949 = vst.msk [vmem:[%s1904_s3 + $0x48] sm:$0xf] %vm930_vm4, %v1140_v43  ;;  %v1141_v47 = vpack.c.bf16 %v643_v44, %v643_v44  ;;  %981 = vst.msk [vmem:[%s1904_s3 + $0xc8] sm:$0xf] %vm930_vm4, %v1172_v45  ;;  %v1173_v48 = vpack.c.bf16 %v675_v46, %v675_v46 }
 0x12b   :  { %v458_v49 = vpop.f32.mrb[40].mxu0  ;;  %v586_v50 = vpop.f32.mrb[40].mxu1 }
 0x12c   :  { %950 = vst.msk [vmem:[%s1904_s3 + $0x4c] sm:$0xf] %vm930_vm4, %v1141_v47  ;;  %v459_v51 = vadd.f32 %v1595_v37, %v458_v49  ;;  %v1259_v52 = vpop.f32.mrb[41].mxu0  ;;  %982 = vst.msk [vmem:[%s1904_s3 + $0xcc] sm:$0xf] %vm930_vm4, %v1173_v48  ;;  %v587_v53 = vadd.f32 %v1595_v37, %v586_v50  ;;  %v1323_v54 = vpop.f32.mrb[41].mxu1 }
 0x12d   :  { %v461_v55 = vpop.f32.mrb[42].mxu0  ;;  %v589_v56 = vpop.f32.mrb[42].mxu1 }
 0x12e   :  { %v644_v57 = vmax.f32 %v459_v51, 0.0  ;;  %v462_v58 = vadd.f32 %v1595_v37, %v461_v55  ;;  %v1260_v59 = vpop.f32.mrb[43].mxu0  ;;  %v676_v60 = vmax.f32 %v587_v53, 0.0  ;;  %v590_v61 = vadd.f32 %v1595_v37, %v589_v56  ;;  %v1324_v62 = vpop.f32.mrb[43].mxu1 }
 0x130   :  { %v1142_v63 = vpack.c.bf16 %v644_v57, %v644_v57  ;;  %v645_v0 = vmax.f32 %v462_v58, 0.0  ;;  %v1174_v1 = vpack.c.bf16 %v676_v60, %v676_v60  ;;  %v677_v2 = vmax.f32 %v590_v61, 0.0 }
 0x132   :  { %951 = vst.msk [vmem:[%s1904_s3 + $0x50] sm:$0xf] %vm930_vm4, %v1142_v63  ;;  %v1143_v3 = vpack.c.bf16 %v645_v0, %v645_v0  ;;  %983 = vst.msk [vmem:[%s1904_s3 + $0xd0] sm:$0xf] %vm930_vm4, %v1174_v1  ;;  %v1175_v4 = vpack.c.bf16 %v677_v2, %v677_v2 }
 0x133   :  { %v466_v5 = vpop.f32.mrb[44].mxu0  ;;  %v594_v6 = vpop.f32.mrb[44].mxu1 }
 0x134   :  { %952 = vst.msk [vmem:[%s1904_s3 + $0x54] sm:$0xf] %vm930_vm4, %v1143_v3  ;;  %v467_v7 = vadd.f32 %v1595_v37, %v466_v5  ;;  %v1263_v8 = vpop.f32.mrb[45].mxu0  ;;  %984 = vst.msk [vmem:[%s1904_s3 + $0xd4] sm:$0xf] %vm930_vm4, %v1175_v4  ;;  %v595_v9 = vadd.f32 %v1595_v37, %v594_v6  ;;  %v1327_v10 = vpop.f32.mrb[45].mxu1 }
 0x135   :  { %v469_v11 = vpop.f32.mrb[46].mxu0  ;;  %v597_v12 = vpop.f32.mrb[46].mxu1 }
 0x136   :  { %v646_v13 = vmax.f32 %v467_v7, 0.0  ;;  %v470_v14 = vadd.f32 %v1595_v37, %v469_v11  ;;  %v1264_v15 = vpop.f32.mrb[47].mxu0  ;;  %v678_v16 = vmax.f32 %v595_v9, 0.0  ;;  %v598_v17 = vadd.f32 %v1595_v37, %v597_v12  ;;  %v1328_v18 = vpop.f32.mrb[47].mxu1 }
 0x138   :  { %v1144_v19 = vpack.c.bf16 %v646_v13, %v646_v13  ;;  %v647_v20 = vmax.f32 %v470_v14, 0.0  ;;  %v1176_v21 = vpack.c.bf16 %v678_v16, %v678_v16  ;;  %v679_v22 = vmax.f32 %v598_v17, 0.0 }
 0x13a   :  { %953 = vst.msk [vmem:[%s1904_s3 + $0x58] sm:$0xf] %vm930_vm4, %v1144_v19  ;;  %v1145_v23 = vpack.c.bf16 %v647_v20, %v647_v20  ;;  %985 = vst.msk [vmem:[%s1904_s3 + $0xd8] sm:$0xf] %vm930_vm4, %v1176_v21  ;;  %v1177_v24 = vpack.c.bf16 %v679_v22, %v679_v22 }
 0x13b   :  { %v474_v25 = vpop.f32.mrb[48].mxu0  ;;  %v602_v26 = vpop.f32.mrb[48].mxu1 }
 0x13c   :  { %954 = vst.msk [vmem:[%s1904_s3 + $0x5c] sm:$0xf] %vm930_vm4, %v1145_v23  ;;  %v475_v27 = vadd.f32 %v1595_v37, %v474_v25  ;;  %v1267_v28 = vpop.f32.mrb[49].mxu0  ;;  %986 = vst.msk [vmem:[%s1904_s3 + $0xdc] sm:$0xf] %vm930_vm4, %v1177_v24  ;;  %v603_v29 = vadd.f32 %v1595_v37, %v602_v26  ;;  %v1331_v30 = vpop.f32.mrb[49].mxu1 }
 0x13d   :  { %v477_v31 = vpop.f32.mrb[50].mxu0  ;;  %v605_v32 = vpop.f32.mrb[50].mxu1 }
 0x13e   :  { %v648_v33 = vmax.f32 %v475_v27, 0.0  ;;  %v478_v34 = vadd.f32 %v1595_v37, %v477_v31  ;;  %v1268_v35 = vpop.f32.mrb[51].mxu0  ;;  %v680_v36 = vmax.f32 %v603_v29, 0.0  ;;  %v606_v38 = vadd.f32 %v1595_v37, %v605_v32  ;;  %v1332_v39 = vpop.f32.mrb[51].mxu1 }
 0x140   :  { %v1146_v40 = vpack.c.bf16 %v648_v33, %v648_v33  ;;  %v649_v41 = vmax.f32 %v478_v34, 0.0  ;;  %v1178_v42 = vpack.c.bf16 %v680_v36, %v680_v36  ;;  %v681_v43 = vmax.f32 %v606_v38, 0.0 }
 0x142   :  { %955 = vst.msk [vmem:[%s1904_s3 + $0x60] sm:$0xf] %vm930_vm4, %v1146_v40  ;;  %v1147_v44 = vpack.c.bf16 %v649_v41, %v649_v41  ;;  %987 = vst.msk [vmem:[%s1904_s3 + $0xe0] sm:$0xf] %vm930_vm4, %v1178_v42  ;;  %v1179_v45 = vpack.c.bf16 %v681_v43, %v681_v43 }
 0x143   :  { %v482_v46 = vpop.f32.mrb[52].mxu0  ;;  %v610_v47 = vpop.f32.mrb[52].mxu1 }
 0x144   :  { %956 = vst.msk [vmem:[%s1904_s3 + $0x64] sm:$0xf] %vm930_vm4, %v1147_v44  ;;  %v483_v48 = vadd.f32 %v1595_v37, %v482_v46  ;;  %v1271_v49 = vpop.f32.mrb[53].mxu0  ;;  %988 = vst.msk [vmem:[%s1904_s3 + $0xe4] sm:$0xf] %vm930_vm4, %v1179_v45  ;;  %v611_v50 = vadd.f32 %v1595_v37, %v610_v47  ;;  %v1335_v51 = vpop.f32.mrb[53].mxu1 }
 0x145   :  { %v485_v52 = vpop.f32.mrb[54].mxu0  ;;  %v613_v53 = vpop.f32.mrb[54].mxu1 }
 0x146   :  { %v650_v54 = vmax.f32 %v483_v48, 0.0  ;;  %v486_v55 = vadd.f32 %v1595_v37, %v485_v52  ;;  %v1272_v56 = vpop.f32.mrb[55].mxu0  ;;  %v682_v57 = vmax.f32 %v611_v50, 0.0  ;;  %v614_v58 = vadd.f32 %v1595_v37, %v613_v53  ;;  %v1336_v59 = vpop.f32.mrb[55].mxu1 }
 0x148   :  { %v1148_v60 = vpack.c.bf16 %v650_v54, %v650_v54  ;;  %v651_v61 = vmax.f32 %v486_v55, 0.0  ;;  %v1180_v62 = vpack.c.bf16 %v682_v57, %v682_v57  ;;  %v683_v63 = vmax.f32 %v614_v58, 0.0 }
 0x14a   :  { %957 = vst.msk [vmem:[%s1904_s3 + $0x68] sm:$0xf] %vm930_vm4, %v1148_v60  ;;  %v1149_v0 = vpack.c.bf16 %v651_v61, %v651_v61  ;;  %989 = vst.msk [vmem:[%s1904_s3 + $0xe8] sm:$0xf] %vm930_vm4, %v1180_v62  ;;  %v1181_v1 = vpack.c.bf16 %v683_v63, %v683_v63 }
 0x14b   :  { %v490_v2 = vpop.f32.mrb[56].mxu0  ;;  %v618_v3 = vpop.f32.mrb[56].mxu1 }
 0x14c   :  { %958 = vst.msk [vmem:[%s1904_s3 + $0x6c] sm:$0xf] %vm930_vm4, %v1149_v0  ;;  %v491_v4 = vadd.f32 %v1595_v37, %v490_v2  ;;  %v1275_v5 = vpop.f32.mrb[57].mxu0  ;;  %990 = vst.msk [vmem:[%s1904_s3 + $0xec] sm:$0xf] %vm930_vm4, %v1181_v1  ;;  %v619_v6 = vadd.f32 %v1595_v37, %v618_v3  ;;  %v1339_v7 = vpop.f32.mrb[57].mxu1 }
 0x14d   :  { %v493_v8 = vpop.f32.mrb[58].mxu0  ;;  %v621_v9 = vpop.f32.mrb[58].mxu1 }
 0x14e   :  { %v652_v10 = vmax.f32 %v491_v4, 0.0  ;;  %v494_v11 = vadd.f32 %v1595_v37, %v493_v8  ;;  %v1276_v12 = vpop.f32.mrb[59].mxu0  ;;  %v684_v13 = vmax.f32 %v619_v6, 0.0  ;;  %v1340_v14 = vpop.f32.mrb[59].mxu1 }
 0x150   :  { %v1150_v15 = vpack.c.bf16 %v652_v10, %v652_v10  ;;  %v653_v16 = vmax.f32 %v494_v11, 0.0  ;;  %v1182_v17 = vpack.c.bf16 %v684_v13, %v684_v13 }
 0x152   :  { %959 = vst.msk [vmem:[%s1904_s3 + $0x70] sm:$0xf] %vm930_vm4, %v1150_v15  ;;  %v1151_v18 = vpack.c.bf16 %v653_v16, %v653_v16 }
 0x153   :  { %992 = vst.msk [vmem:[%s1904_s3 + $0xf0] sm:$0x7] %vm991_vm5, %v1182_v17  ;;  %v498_v19 = vpop.f32.mrb[60].mxu0 }
 0x154   :  { %960 = vst.msk [vmem:[%s1904_s3 + $0x74] sm:$0xf] %vm930_vm4, %v1151_v18  ;;  %v499_v20 = vadd.f32 %v1595_v37, %v498_v19  ;;  %v1279_v21 = vpop.f32.mrb[61].mxu0 }
 0x155   :  { %v501_v22 = vpop.f32.mrb[62].mxu0 }
 0x156   :  { %v654_v23 = vmax.f32 %v499_v20, 0.0  ;;  %v502_v24 = vadd.f32 %v1595_v37, %v501_v22  ;;  %v1280_v25 = vpop.f32.mrb[63].mxu0 }
 0x158   :  { %v1152_v26 = vpack.c.bf16 %v654_v23, %v654_v23  ;;  %v655_v27 = vmax.f32 %v502_v24, 0.0 }
 0x15a   :  { %961 = vst.msk [vmem:[%s1904_s3 + $0x78] sm:$0xf] %vm930_vm4, %v1152_v26  ;;  %v1153_v28 = vpack.c.bf16 %v655_v27, %v655_v27 }
 0x15c   :  { %962 = vst.msk [vmem:[%s1904_s3 + $0x7c] sm:$0xf] %vm930_vm4, %v1153_v28 }

// kernel: predictive_model_forward.4
= control target key start
LH: loop header
LB: loop body
LE: loop exit
PB: predicated region body
PF: predicated region fallthrough
CT: control target
= control target key end

     0   :  { %v435_v0 = vmov 0   ;;  %vm160_vm0 = vcmask 130048   ;;  %vm320_vm1 = vcmask 125952   ;;  %s576_s1 = inlined_call_operand.vmem [shape: bf16[144,16], index: 1, kind: input, shape index: {}]   ;;  %s577_s0 = inlined_call_operand.vmem [shape: bf16[96,144], index: 0, kind: input, shape index: {}]   ;;  %s578_s2 = inlined_call_operand.vmem [shape: f32[1,16], index: 2, kind: input, shape index: {}]   ;;  %s579_s3 = inlined_call_operand.vmem [shape: bf16[96,16], index: 3, kind: output, shape index: {}]  }
   0x1   :  { %179 = vmatprep.subr.bf16.mxu0 %v435_v0  ;;  %389 = vmatprep.subr.bf16.mxu1 %v435_v0  ;;  %v408_v1 = vld [vmem:[%s576_s1] sm:$0xff]   ;;  %v409_v2 = vld [vmem:[%s576_s1 + $0x8] sm:$0xff]   ;;  %v410_v3 = vld [vmem:[%s576_s1 + $0x10] sm:$0xff]  }
   0x2   :  { %180 = vmatpush1.bf16.msra.mxu0 %v408_v1  ;;  %398 = vmatpush1.bf16.msra.mxu1 %v408_v1  ;;  %v411_v4 = vld [vmem:[%s576_s1 + $0x18] sm:$0xff]   ;;  %v419_v5 = vld [vmem:[%s577_s0 + $0x4] ss:$8 sps:$4 sm:$0xff]   ;;  %v414_v9 = vld [vmem:[%s576_s1 + $0x30] sm:$0xff]  }
   0x3   :  { %181 = vmatprep.subr.bf16.mxu0 %v435_v0  ;;  %390 = vmatprep.subr.bf16.mxu1 %v435_v0  ;;  %v422_v6 = vld [vmem:[%s577_s0 + $0x34] ss:$8 sps:$4 sm:$0xff]   ;;  %v412_v7 = vld [vmem:[%s576_s1 + $0x20] sm:$0xff]   ;;  %v413_v8 = vld [vmem:[%s576_s1 + $0x28] sm:$0xff]  }
   0x4   :  { %359 = vmatprep.mubr.msk.bf16.mxu0 %vm160_vm0, %v419_v5  ;;  %362 = vmatprep.mubr.msk.bf16.mxu1 %vm160_vm0, %v422_v6  ;;  %v415_v10 = vld [vmem:[%s576_s1 + $0x38] sm:$0xff]   ;;  %v416_v11 = vld [vmem:[%s576_s1 + $0x40] sm:$0xff]  }
   0x5   :  { %v417_v12 = vld [vmem:[%s577_s0] ss:$8 sps:$4 sm:$0xff]   ;;  %v420_v13 = vld [vmem:[%s577_s0 + $0x30] ss:$8 sps:$4 sm:$0xff]   ;;  %v423_v14 = vld [vmem:[%s577_s0 + $0x14] ss:$8 sps:$4 sm:$0xff]  }
   0x6   :  { %182 = vmatpush1.bf16.msra.mxu0 %v409_v2  ;;  %399 = vmatpush1.bf16.msra.mxu1 %v409_v2  ;;  %v425_v15 = vld [vmem:[%s577_s0 + $0x44] ss:$8 sps:$4 sm:$0xff]   ;;  %v427_v16 = vld [vmem:[%s577_s0 + $0x10] ss:$8 sps:$4 sm:$0xff]   ;;  %v428_v17 = vld [vmem:[%s577_s0 + $0x40] ss:$8 sps:$4 sm:$0xff]  }
   0x7   :  { %183 = vmatprep.subr.bf16.mxu0 %v435_v0  ;;  %391 = vmatprep.subr.bf16.mxu1 %v435_v0  ;;  %v429_v18 = vld [vmem:[%s577_s0 + $0x24] ss:$8 sps:$4 sm:$0xff]   ;;  %v431_v19 = vld [vmem:[%s577_s0 + $0x54] ss:$8 sps:$4 sm:$0xff]   ;;  %v433_v20 = vld [vmem:[%s577_s0 + $0x20] ss:$8 sps:$4 sm:$0xff]  }
   0x8   :  { %v434_v21 = vld [vmem:[%s577_s0 + $0x50] ss:$8 sps:$4 sm:$0xff]   ;;  %v337_v22 = vld [vmem:[%s578_s2] ss:$0 sm:$0xff] }
   0xa   :  { %184 = vmatpush1.bf16.msra.mxu0 %v410_v3  ;;  %400 = vmatpush1.bf16.msra.mxu1 %v410_v3 }
   0xb   :  { %185 = vmatprep.subr.bf16.mxu0 %v435_v0  ;;  %392 = vmatprep.subr.bf16.mxu1 %v435_v0 }
   0xe   :  { %186 = vmatpush1.bf16.msra.mxu0 %v411_v4  ;;  %401 = vmatpush1.bf16.msra.mxu1 %v411_v4 }
   0xf   :  { %187 = vmatprep.subr.bf16.mxu0 %v435_v0  ;;  %393 = vmatprep.subr.bf16.mxu1 %v435_v0 }
  0x12   :  { %188 = vmatpush1.bf16.msra.mxu0 %v412_v7  ;;  %402 = vmatpush1.bf16.msra.mxu1 %v412_v7 }
  0x13   :  { %189 = vmatprep.subr.bf16.mxu0 %v435_v0  ;;  %394 = vmatprep.subr.bf16.mxu1 %v435_v0 }
  0x16   :  { %190 = vmatpush1.bf16.msra.mxu0 %v413_v8  ;;  %403 = vmatpush1.bf16.msra.mxu1 %v413_v8 }
  0x17   :  { %191 = vmatprep.subr.bf16.mxu0 %v435_v0  ;;  %395 = vmatprep.subr.bf16.mxu1 %v435_v0 }
  0x1a   :  { %192 = vmatpush1.bf16.msra.mxu0 %v414_v9  ;;  %404 = vmatpush1.bf16.msra.mxu1 %v414_v9 }
  0x1b   :  { %193 = vmatprep.subr.bf16.mxu0 %v435_v0  ;;  %396 = vmatprep.subr.bf16.mxu1 %v435_v0 }
  0x1e   :  { %194 = vmatpush1.bf16.msra.mxu0 %v415_v10  ;;  %405 = vmatpush1.bf16.msra.mxu1 %v415_v10 }
  0x1f   :  { %195 = vmatprep.subr.bf16.mxu0 %v435_v0  ;;  %397 = vmatprep.subr.bf16.mxu1 %v435_v0 }
  0x22   :  { %196 = vmatpush1.bf16.msra.mxu0 %v416_v11  ;;  %406 = vmatpush1.bf16.msra.mxu1 %v416_v11 }
  0x25   :  { %212 = vmatmul.mubr.bf16.vlgmr.msra.gmra.mrb[0].mxu0 %v417_v12  ;;  %236 = vmatmul.mubr.bf16.vlgmr.msra.gmra.mrb[0].mxu1 %v420_v13 }
  0x26   :  { %360 = vmatprep.mubr.msk.bf16.mxu0 %vm160_vm0, %v423_v14  ;;  %363 = vmatprep.mubr.msk.bf16.mxu1 %vm160_vm0, %v425_v15 }
  0x2d   :  { %220 = vmatmul.mubr.bf16.gmra.mrb[4].mxu0 %v427_v16  ;;  %244 = vmatmul.mubr.bf16.gmra.mrb[4].mxu1 %v428_v17 }
  0x2e   :  { %361 = vmatprep.mubr.msk.bf16.mxu0 %vm160_vm0, %v429_v18  ;;  %364 = vmatprep.mubr.msk.bf16.mxu1 %vm160_vm0, %v431_v19 }
  0x35   :  { %228 = vmatmul.mubr.bf16.gmra.mrb[8].mxu0 %v433_v20  ;;  %252 = vmatmul.mubr.bf16.gmra.mrb[8].mxu1 %v434_v21 }
  0xf8   :  { %v213_v23 = vpop.f32.mrb[0].mxu0  ;;  %v237_v24 = vpop.f32.mrb[0].mxu1 }
  0xf9   :  { %v214_v25 = vadd.f32 %v337_v22, %v213_v23  ;;  %v238_v26 = vadd.f32 %v337_v22, %v237_v24  ;;  %v215_v27 = vpop.f32.mrb[1].mxu0  ;;  %v239_v28 = vpop.f32.mrb[1].mxu1 }
  0xfa   :  { %v216_v29 = vpop.f32.mrb[2].mxu0  ;;  %v240_v30 = vpop.f32.mrb[2].mxu1 }
  0xfb   :  { %v260_v31 = vmax.f32 %v214_v25, 0.0  ;;  %v266_v32 = vmax.f32 %v238_v26, 0.0  ;;  %v217_v33 = vadd.f32 %v337_v22, %v216_v29  ;;  %v241_v34 = vadd.f32 %v337_v22, %v240_v30  ;;  %v218_v35 = vpop.f32.mrb[3].mxu0  ;;  %v242_v36 = vpop.f32.mrb[3].mxu1 }
  0xfd   :  { %v377_v37 = vpack.c.bf16 %v260_v31, %v260_v31  ;;  %v383_v38 = vpack.c.bf16 %v266_v32, %v266_v32  ;;  %v261_v39 = vmax.f32 %v217_v33, 0.0  ;;  %v267_v40 = vmax.f32 %v241_v34, 0.0 }
  0xff   :  { %321 = vst.msk [vmem:[%s579_s3] sm:$0xf] %vm320_vm1, %v377_v37  ;;  %327 = vst.msk [vmem:[%s579_s3 + $0x18] sm:$0xf] %vm320_vm1, %v383_v38  ;;  %v378_v41 = vpack.c.bf16 %v261_v39, %v261_v39  ;;  %v384_v42 = vpack.c.bf16 %v267_v40, %v267_v40 }
 0x100   :  { %v221_v43 = vpop.f32.mrb[4].mxu0  ;;  %v245_v44 = vpop.f32.mrb[4].mxu1 }
 0x101   :  { %322 = vst.msk [vmem:[%s579_s3 + $0x4] sm:$0xf] %vm320_vm1, %v378_v41  ;;  %328 = vst.msk [vmem:[%s579_s3 + $0x1c] sm:$0xf] %vm320_vm1, %v384_v42  ;;  %v222_v45 = vadd.f32 %v337_v22, %v221_v43  ;;  %v246_v46 = vadd.f32 %v337_v22, %v245_v44  ;;  %v223_v47 = vpop.f32.mrb[5].mxu0  ;;  %v247_v48 = vpop.f32.mrb[5].mxu1 }
 0x102   :  { %v224_v49 = vpop.f32.mrb[6].mxu0  ;;  %v248_v50 = vpop.f32.mrb[6].mxu1 }
 0x103   :  { %v262_v51 = vmax.f32 %v222_v45, 0.0  ;;  %v268_v52 = vmax.f32 %v246_v46, 0.0  ;;  %v225_v53 = vadd.f32 %v337_v22, %v224_v49  ;;  %v249_v54 = vadd.f32 %v337_v22, %v248_v50  ;;  %v226_v55 = vpop.f32.mrb[7].mxu0  ;;  %v250_v56 = vpop.f32.mrb[7].mxu1 }
 0x105   :  { %v379_v57 = vpack.c.bf16 %v262_v51, %v262_v51  ;;  %v385_v58 = vpack.c.bf16 %v268_v52, %v268_v52  ;;  %v263_v59 = vmax.f32 %v225_v53, 0.0  ;;  %v269_v60 = vmax.f32 %v249_v54, 0.0 }
 0x107   :  { %323 = vst.msk [vmem:[%s579_s3 + $0x8] sm:$0xf] %vm320_vm1, %v379_v57  ;;  %329 = vst.msk [vmem:[%s579_s3 + $0x20] sm:$0xf] %vm320_vm1, %v385_v58  ;;  %v380_v61 = vpack.c.bf16 %v263_v59, %v263_v59  ;;  %v386_v62 = vpack.c.bf16 %v269_v60, %v269_v60 }
 0x108   :  { %v229_v63 = vpop.f32.mrb[8].mxu0  ;;  %v253_v0 = vpop.f32.mrb[8].mxu1 }
 0x109   :  { %324 = vst.msk [vmem:[%s579_s3 + $0xc] sm:$0xf] %vm320_vm1, %v380_v61  ;;  %330 = vst.msk [vmem:[%s579_s3 + $0x24] sm:$0xf] %vm320_vm1, %v386_v62  ;;  %v230_v1 = vadd.f32 %v337_v22, %v229_v63  ;;  %v254_v2 = vadd.f32 %v337_v22, %v253_v0  ;;  %v231_v3 = vpop.f32.mrb[9].mxu0  ;;  %v255_v4 = vpop.f32.mrb[9].mxu1 }
 0x10a   :  { %v232_v5 = vpop.f32.mrb[10].mxu0  ;;  %v256_v6 = vpop.f32.mrb[10].mxu1 }
 0x10b   :  { %v264_v7 = vmax.f32 %v230_v1, 0.0  ;;  %v270_v8 = vmax.f32 %v254_v2, 0.0  ;;  %v233_v9 = vadd.f32 %v337_v22, %v232_v5  ;;  %v257_v10 = vadd.f32 %v337_v22, %v256_v6  ;;  %v234_v11 = vpop.f32.mrb[11].mxu0  ;;  %v258_v12 = vpop.f32.mrb[11].mxu1 }
 0x10d   :  { %v381_v13 = vpack.c.bf16 %v264_v7, %v264_v7  ;;  %v387_v14 = vpack.c.bf16 %v270_v8, %v270_v8  ;;  %v265_v15 = vmax.f32 %v233_v9, 0.0  ;;  %v271_v16 = vmax.f32 %v257_v10, 0.0 }
 0x10f   :  { %325 = vst.msk [vmem:[%s579_s3 + $0x10] sm:$0xf] %vm320_vm1, %v381_v13  ;;  %331 = vst.msk [vmem:[%s579_s3 + $0x28] sm:$0xf] %vm320_vm1, %v387_v14  ;;  %v382_v17 = vpack.c.bf16 %v265_v15, %v265_v15  ;;  %v388_v18 = vpack.c.bf16 %v271_v16, %v271_v16 }
 0x111   :  { %326 = vst.msk [vmem:[%s579_s3 + $0x14] sm:$0xf] %vm320_vm1, %v382_v17  ;;  %332 = vst.msk [vmem:[%s579_s3 + $0x2c] sm:$0xf] %vm320_vm1, %v388_v18 }

// kernel: predictive_model_forward.5
= control target key start
LH: loop header
LB: loop body
LE: loop exit
PB: predicated region body
PF: predicated region fallthrough
CT: control target
= control target key end

     0   :  { %vm2242_vm0 = vcmask 1041408   ;;  %vm4464_vm1 = vcmask 1043458   ;;  %vm5288_vm2 = vcmask 1045508   ;;  %s11221_s1 = inlined_call_operand.vmem [shape: bf16[256,1024], index: 1, kind: input, shape index: {}]   ;;  %s11222_s0 = inlined_call_operand.vmem [shape: bf16[6,256], index: 0, kind: input, shape index: {}]   ;;  %s11223_s3 = inlined_call_operand.vmem [shape: bf16[256,1024], index: 3, kind: input, shape index: {}]   ;;  %s11224_s2 = inlined_call_operand.vmem [shape: f32[1,1024], index: 2, kind: input, shape index: {}]   ;;  %s11225_s4 = inlined_call_operand.vmem [shape: bf16[512,1024], index: 4, kind: input, shape index: {}]   ;;  %s11226_s5 = inlined_call_operand.vmem [shape: f32[1,1024], index: 5, kind: input, shape index: {}]   ;;  %s11227_s6 = inlined_call_operand.vmem [shape: bf16[256,128], index: 6, kind: input, shape index: {}]   ;;  %s11228_s7 = inlined_call_operand.vmem [shape: f32[1,128], index: 7, kind: input, shape index: {}]   ;;  %s11229_s8 = inlined_call_operand.vmem [shape: f32[3,2,128], index: 8, kind: output, shape index: {}]  }
   0x1   :  { %v31_v0 = vld [vmem:[%s11221_s1] sm:$0xff]  ;;  %v32_v2 = vld [vmem:[%s11221_s1 + $0x8] sm:$0xff] }
   0x2   :  { %v35_v1 = vld [vmem:[%s11221_s1 + $0x20] sm:$0xff]  ;;  %v36_v4 = vld [vmem:[%s11221_s1 + $0x28] sm:$0xff] }
   0x3   :  { %v5923_v3 = vcombine.high %v31_v0, %v35_v1  ;;  %v5922_v5 = vcombine.low %v31_v0, %v35_v1  ;;  %v39_v6 = vld [vmem:[%s11221_s1 + $0x40] sm:$0xff]  ;;  %v5925_v8 = vcombine.high %v32_v2, %v36_v4  ;;  %v5924_v9 = vcombine.low %v32_v2, %v36_v4  ;;  %v40_v11 = vld [vmem:[%s11221_s1 + $0x48] sm:$0xff] }
   0x4   :  { %v43_v7 = vld [vmem:[%s11221_s1 + $0x60] sm:$0xff]  ;;  %v44_v12 = vld [vmem:[%s11221_s1 + $0x68] sm:$0xff] }
   0x5   :  { %v5931_v10 = vcombine.high %v39_v6, %v43_v7  ;;  %v47_v13 = vld [vmem:[%s11221_s1 + $0x80] sm:$0xff]  ;;  %848 = vmatprep.subr.bf16.mxu0 %v5923_v3  ;;  %v5933_v14 = vcombine.high %v40_v11, %v44_v12  ;;  %v48_v16 = vld [vmem:[%s11221_s1 + $0x88] sm:$0xff]  ;;  %889 = vmatprep.subr.bf16.mxu1 %v5925_v8  ;;  %v5930_v18 = vcombine.low %v39_v6, %v43_v7 }
   0x6   :  { %v51_v15 = vld [vmem:[%s11221_s1 + $0xa0] sm:$0xff]  ;;  %v52_v17 = vld [vmem:[%s11221_s1 + $0xa8] sm:$0xff]  ;;  %849 = vmatpush1.bf16.msra.mxu0 %v5922_v5  ;;  %890 = vmatpush1.bf16.msra.mxu1 %v5924_v9  ;;  %v5932_v19 = vcombine.low %v40_v11, %v44_v12 }
   0x7   :  { %850 = vmatprep.subr.bf16.mxu0 %v5931_v10  ;;  %v5939_v20 = vcombine.high %v47_v13, %v51_v15  ;;  %891 = vmatprep.subr.bf16.mxu1 %v5933_v14  ;;  %v5941_v21 = vcombine.high %v48_v16, %v52_v17  ;;  %v55_v22 = vld [vmem:[%s11221_s1 + $0xc0] sm:$0xff]  ;;  %v56_v24 = vld [vmem:[%s11221_s1 + $0xc8] sm:$0xff]  ;;  %v5938_v26 = vcombine.low %v47_v13, %v51_v15 }
   0x8   :  { %v59_v23 = vld [vmem:[%s11221_s1 + $0xe0] sm:$0xff]  ;;  %v60_v25 = vld [vmem:[%s11221_s1 + $0xe8] sm:$0xff]  ;;  %v5940_v27 = vcombine.low %v48_v16, %v52_v17 }
   0x9   :  { %v5947_v28 = vcombine.high %v55_v22, %v59_v23  ;;  %v5949_v29 = vcombine.high %v56_v24, %v60_v25  ;;  %v63_v30 = vld [vmem:[%s11221_s1 + $0x100] sm:$0xff]  ;;  %v64_v32 = vld [vmem:[%s11221_s1 + $0x108] sm:$0xff]  ;;  %v5946_v34 = vcombine.low %v55_v22, %v59_v23  ;;  %v5948_v35 = vcombine.low %v56_v24, %v60_v25 }
   0xa   :  { %851 = vmatpush1.bf16.msra.mxu0 %v5930_v18  ;;  %892 = vmatpush1.bf16.msra.mxu1 %v5932_v19  ;;  %v67_v31 = vld [vmem:[%s11221_s1 + $0x120] sm:$0xff]  ;;  %v68_v33 = vld [vmem:[%s11221_s1 + $0x128] sm:$0xff] }
   0xb   :  { %852 = vmatprep.subr.bf16.mxu0 %v5939_v20  ;;  %893 = vmatprep.subr.bf16.mxu1 %v5941_v21  ;;  %v5955_v36 = vcombine.high %v63_v30, %v67_v31  ;;  %v5957_v37 = vcombine.high %v64_v32, %v68_v33  ;;  %v71_v38 = vld [vmem:[%s11221_s1 + $0x140] sm:$0xff]  ;;  %v72_v40 = vld [vmem:[%s11221_s1 + $0x148] sm:$0xff]  ;;  %v5954_v42 = vcombine.low %v63_v30, %v67_v31 }
   0xc   :  { %v75_v39 = vld [vmem:[%s11221_s1 + $0x160] sm:$0xff]  ;;  %v76_v41 = vld [vmem:[%s11221_s1 + $0x168] sm:$0xff]  ;;  %v5956_v43 = vcombine.low %v64_v32, %v68_v33 }
   0xd   :  { %v5963_v44 = vcombine.high %v71_v38, %v75_v39  ;;  %v5965_v45 = vcombine.high %v72_v40, %v76_v41  ;;  %v79_v46 = vld [vmem:[%s11221_s1 + $0x180] sm:$0xff]  ;;  %v80_v48 = vld [vmem:[%s11221_s1 + $0x188] sm:$0xff]  ;;  %v5962_v50 = vcombine.low %v71_v38, %v75_v39  ;;  %v5964_v51 = vcombine.low %v72_v40, %v76_v41 }
   0xe   :  { %853 = vmatpush1.bf16.msra.mxu0 %v5938_v26  ;;  %894 = vmatpush1.bf16.msra.mxu1 %v5940_v27  ;;  %v83_v47 = vld [vmem:[%s11221_s1 + $0x1a0] sm:$0xff]  ;;  %v84_v49 = vld [vmem:[%s11221_s1 + $0x1a8] sm:$0xff] }
   0xf   :  { %854 = vmatprep.subr.bf16.mxu0 %v5947_v28  ;;  %895 = vmatprep.subr.bf16.mxu1 %v5949_v29  ;;  %v5971_v52 = vcombine.high %v79_v46, %v83_v47  ;;  %v7019_v53 = vld [vmem:[%s11222_s0] sm:$0x77]  ;;  %v5973_v54 = vcombine.high %v80_v48, %v84_v49  ;;  %v88_v58 = vld [vmem:[%s11221_s1 + $0x1c8] sm:$0xff]  ;;  %v5970_v60 = vcombine.low %v79_v46, %v83_v47 }
  0x10   :  { %v87_v55 = vld [vmem:[%s11221_s1 + $0x1c0] sm:$0xff]  ;;  %v7029_v57 = vcombine.high %v7019_v53, %v7019_v53  ;;  %v92_v59 = vld [vmem:[%s11221_s1 + $0x1e8] sm:$0xff]  ;;  %v5972_v61 = vcombine.low %v80_v48, %v84_v49 }
  0x11   :  { %v91_v56 = vld [vmem:[%s11221_s1 + $0x1e0] sm:$0xff]  ;;  %v5981_v63 = vcombine.high %v88_v58, %v92_v59  ;;  %v96_v2 = vld [vmem:[%s11221_s1 + $0x208] sm:$0xff]  ;;  %v5980_v5 = vcombine.low %v88_v58, %v92_v59 }
  0x12   :  { %855 = vmatpush1.bf16.msra.mxu0 %v5946_v34  ;;  %896 = vmatpush1.bf16.msra.mxu1 %v5948_v35  ;;  %v5979_v62 = vcombine.high %v87_v55, %v91_v56  ;;  %v95_v0 = vld [vmem:[%s11221_s1 + $0x200] sm:$0xff]  ;;  %v100_v3 = vld [vmem:[%s11221_s1 + $0x228] sm:$0xff]  ;;  %v5978_v4 = vcombine.low %v87_v55, %v91_v56 }
  0x13   :  { %856 = vmatprep.subr.bf16.mxu0 %v5955_v36  ;;  %897 = vmatprep.subr.bf16.mxu1 %v5957_v37  ;;  %v99_v1 = vld [vmem:[%s11221_s1 + $0x220] sm:$0xff]  ;;  %v5989_v7 = vcombine.high %v96_v2, %v100_v3  ;;  %v104_v10 = vld [vmem:[%s11221_s1 + $0x248] sm:$0xff]  ;;  %v5988_v13 = vcombine.low %v96_v2, %v100_v3  ;;  %v33_v2 = vld [vmem:[%s11221_s1 + $0x10] sm:$0xff] }
  0x14   :  { %880 = vmatprep.mubr.bf16.mxu0 %v7029_v57  ;;  %921 = vmatprep.mubr.bf16.mxu1 %v7029_v57  ;;  %v5987_v6 = vcombine.high %v95_v0, %v99_v1  ;;  %v103_v8 = vld [vmem:[%s11221_s1 + $0x240] sm:$0xff]  ;;  %v108_v11 = vld [vmem:[%s11221_s1 + $0x268] sm:$0xff]  ;;  %v5986_v12 = vcombine.low %v95_v0, %v99_v1  ;;  %v37_v3 = vld [vmem:[%s11221_s1 + $0x30] sm:$0xff] }
  0x15   :  { %v107_v9 = vld [vmem:[%s11221_s1 + $0x260] sm:$0xff]  ;;  %v5997_v15 = vcombine.high %v104_v10, %v108_v11  ;;  %v112_v18 = vld [vmem:[%s11221_s1 + $0x288] sm:$0xff]  ;;  %v5996_v21 = vcombine.low %v104_v10, %v108_v11  ;;  %v41_v10 = vld [vmem:[%s11221_s1 + $0x50] sm:$0xff] }
  0x16   :  { %857 = vmatpush1.bf16.msra.mxu0 %v5954_v42  ;;  %898 = vmatpush1.bf16.msra.mxu1 %v5956_v43  ;;  %v5995_v14 = vcombine.high %v103_v8, %v107_v9  ;;  %v111_v16 = vld [vmem:[%s11221_s1 + $0x280] sm:$0xff]  ;;  %v116_v19 = vld [vmem:[%s11221_s1 + $0x2a8] sm:$0xff]  ;;  %v5994_v20 = vcombine.low %v103_v8, %v107_v9  ;;  %v5927_v8 = vcombine.high %v33_v2, %v37_v3  ;;  %v45_v11 = vld [vmem:[%s11221_s1 + $0x70] sm:$0xff] }
  0x17   :  { %858 = vmatprep.subr.bf16.mxu0 %v5963_v44  ;;  %899 = vmatprep.subr.bf16.mxu1 %v5965_v45  ;;  %v115_v17 = vld [vmem:[%s11221_s1 + $0x2a0] sm:$0xff]  ;;  %v6005_v23 = vcombine.high %v112_v18, %v116_v19  ;;  %v120_v26 = vld [vmem:[%s11221_s1 + $0x2c8] sm:$0xff]  ;;  %v6004_v29 = vcombine.low %v112_v18, %v116_v19  ;;  %v53_v19 = vld [vmem:[%s11221_s1 + $0xb0] sm:$0xff] }
  0x18   :  { %v6003_v22 = vcombine.high %v111_v16, %v115_v17  ;;  %v119_v24 = vld [vmem:[%s11221_s1 + $0x2c0] sm:$0xff]  ;;  %v124_v27 = vld [vmem:[%s11221_s1 + $0x2e8] sm:$0xff]  ;;  %v6002_v28 = vcombine.low %v111_v16, %v115_v17  ;;  %v5935_v17 = vcombine.high %v41_v10, %v45_v11 }
  0x19   :  { %v123_v25 = vld [vmem:[%s11221_s1 + $0x2e0] sm:$0xff]  ;;  %v6013_v31 = vcombine.high %v120_v26, %v124_v27  ;;  %v128_v34 = vld [vmem:[%s11221_s1 + $0x308] sm:$0xff]  ;;  %v6012_v37 = vcombine.low %v120_v26, %v124_v27  ;;  %v57_v26 = vld [vmem:[%s11221_s1 + $0xd0] sm:$0xff] }
  0x1a   :  { %859 = vmatpush1.bf16.msra.mxu0 %v5962_v50  ;;  %900 = vmatpush1.bf16.msra.mxu1 %v5964_v51  ;;  %v6011_v30 = vcombine.high %v119_v24, %v123_v25  ;;  %v127_v32 = vld [vmem:[%s11221_s1 + $0x300] sm:$0xff]  ;;  %v132_v35 = vld [vmem:[%s11221_s1 + $0x328] sm:$0xff]  ;;  %v6010_v36 = vcombine.low %v119_v24, %v123_v25  ;;  %v61_v27 = vld [vmem:[%s11221_s1 + $0xf0] sm:$0xff] }
  0x1b   :  { %860 = vmatprep.subr.bf16.mxu0 %v5971_v52  ;;  %901 = vmatprep.subr.bf16.mxu1 %v5973_v54  ;;  %v131_v33 = vld [vmem:[%s11221_s1 + $0x320] sm:$0xff]  ;;  %v6021_v39 = vcombine.high %v128_v34, %v132_v35  ;;  %v136_v42 = vld [vmem:[%s11221_s1 + $0x348] sm:$0xff]  ;;  %v6020_v45 = vcombine.low %v128_v34, %v132_v35  ;;  %v65_v34 = vld [vmem:[%s11221_s1 + $0x110] sm:$0xff] }
  0x1c   :  { %v6019_v38 = vcombine.high %v127_v32, %v131_v33  ;;  %v135_v40 = vld [vmem:[%s11221_s1 + $0x340] sm:$0xff]  ;;  %v140_v43 = vld [vmem:[%s11221_s1 + $0x368] sm:$0xff]  ;;  %v6018_v44 = vcombine.low %v127_v32, %v131_v33  ;;  %v5951_v32 = vcombine.high %v57_v26, %v61_v27  ;;  %v69_v35 = vld [vmem:[%s11221_s1 + $0x130] sm:$0xff] }
  0x1d   :  { %v139_v41 = vld [vmem:[%s11221_s1 + $0x360] sm:$0xff]  ;;  %v6029_v47 = vcombine.high %v136_v42, %v140_v43  ;;  %v144_v50 = vld [vmem:[%s11221_s1 + $0x388] sm:$0xff]  ;;  %v6028_v54 = vcombine.low %v136_v42, %v140_v43  ;;  %v77_v42 = vld [vmem:[%s11221_s1 + $0x170] sm:$0xff] }
  0x1e   :  { %861 = vmatpush1.bf16.msra.mxu0 %v5970_v60  ;;  %902 = vmatpush1.bf16.msra.mxu1 %v5972_v61  ;;  %v6027_v46 = vcombine.high %v135_v40, %v139_v41  ;;  %v143_v48 = vld [vmem:[%s11221_s1 + $0x380] sm:$0xff]  ;;  %v148_v51 = vld [vmem:[%s11221_s1 + $0x3a8] sm:$0xff]  ;;  %v6026_v52 = vcombine.low %v135_v40, %v139_v41  ;;  %v73_v41 = vld [vmem:[%s11221_s1 + $0x150] sm:$0xff] }
  0x1f   :  { %862 = vmatprep.subr.bf16.mxu0 %v5979_v62  ;;  %903 = vmatprep.subr.bf16.mxu1 %v5981_v63  ;;  %v147_v49 = vld [vmem:[%s11221_s1 + $0x3a0] sm:$0xff]  ;;  %v6037_v56 = vcombine.high %v144_v50, %v148_v51  ;;  %v152_v60 = vld [vmem:[%s11221_s1 + $0x3c8] sm:$0xff]  ;;  %v6036_v63 = vcombine.low %v144_v50, %v148_v51  ;;  %v74_v43 = vld [vmem:[%s11221_s1 + $0x158] sm:$0xff] }
  0x20   :  { %v6035_v55 = vcombine.high %v143_v48, %v147_v49  ;;  %v151_v58 = vld [vmem:[%s11221_s1 + $0x3c0] sm:$0xff]  ;;  %v156_v61 = vld [vmem:[%s11221_s1 + $0x3e8] sm:$0xff]  ;;  %v6034_v62 = vcombine.low %v143_v48, %v147_v49  ;;  %v81_v49 = vld [vmem:[%s11221_s1 + $0x190] sm:$0xff] }
  0x21   :  { %v155_v59 = vld [vmem:[%s11221_s1 + $0x3e0] sm:$0xff]  ;;  %v6045_v1 = vcombine.high %v152_v60, %v156_v61  ;;  %v85_v50 = vld [vmem:[%s11221_s1 + $0x1b0] sm:$0xff]  ;;  %v82_v51 = vld [vmem:[%s11221_s1 + $0x198] sm:$0xff] }
  0x22   :  { %863 = vmatpush1.bf16.msra.mxu0 %v5978_v4  ;;  %904 = vmatpush1.bf16.msra.mxu1 %v5980_v5  ;;  %v6043_v0 = vcombine.high %v151_v58, %v155_v59  ;;  %v34_v4 = vld [vmem:[%s11221_s1 + $0x18] sm:$0xff] }
  0x23   :  { %864 = vmatprep.subr.bf16.mxu0 %v5987_v6  ;;  %905 = vmatprep.subr.bf16.mxu1 %v5989_v7  ;;  %v38_v5 = vld [vmem:[%s11221_s1 + $0x38] sm:$0xff]  ;;  %v6042_v6 = vcombine.low %v151_v58, %v155_v59  ;;  %v6044_v7 = vcombine.low %v152_v60, %v156_v61  ;;  %v89_v59 = vld [vmem:[%s11221_s1 + $0x1d0] sm:$0xff] }
  0x24   :  { %v5929_v9 = vcombine.high %v34_v4, %v38_v5  ;;  %v5928_v16 = vcombine.low %v34_v4, %v38_v5  ;;  %v93_v60 = vld [vmem:[%s11221_s1 + $0x1f0] sm:$0xff]  ;;  %v90_v61 = vld [vmem:[%s11221_s1 + $0x1d8] sm:$0xff] }
  0x25   :  { %v101_v4 = vld [vmem:[%s11221_s1 + $0x230] sm:$0xff]  ;;  %v98_v5 = vld [vmem:[%s11221_s1 + $0x218] sm:$0xff] }
  0x26   :  { %865 = vmatpush1.bf16.msra.mxu0 %v5986_v12  ;;  %906 = vmatpush1.bf16.msra.mxu1 %v5988_v13  ;;  %v7155_v12 = vcombine.low %v7019_v53, %v7019_v53  ;;  %v42_v13 = vld [vmem:[%s11221_s1 + $0x58] sm:$0xff]  ;;  %v49_v53 = vld [vmem:[%s11221_s1 + $0x90] sm:$0xff] }
  0x27   :  { %866 = vmatprep.subr.bf16.mxu0 %v5995_v14  ;;  %907 = vmatprep.subr.bf16.mxu1 %v5997_v15  ;;  %v46_v14 = vld [vmem:[%s11221_s1 + $0x78] sm:$0xff]  ;;  %v5926_v15 = vcombine.low %v33_v2, %v37_v3  ;;  %v5943_v24 = vcombine.high %v49_v53, %v53_v19  ;;  %v97_v3 = vld [vmem:[%s11221_s1 + $0x210] sm:$0xff] }
  0x28   :  { %v5937_v18 = vcombine.high %v42_v13, %v46_v14 }
  0x2a   :  { %867 = vmatpush1.bf16.msra.mxu0 %v5994_v20  ;;  %908 = vmatpush1.bf16.msra.mxu1 %v5996_v21  ;;  %v50_v20 = vld [vmem:[%s11221_s1 + $0x98] sm:$0xff] }
  0x2b   :  { %868 = vmatprep.subr.bf16.mxu0 %v6003_v22  ;;  %909 = vmatprep.subr.bf16.mxu1 %v6005_v23  ;;  %v54_v21 = vld [vmem:[%s11221_s1 + $0xb8] sm:$0xff]  ;;  %v5934_v22 = vcombine.low %v41_v10, %v45_v11  ;;  %v5936_v23 = vcombine.low %v42_v13, %v46_v14  ;;  %v105_v11 = vld [vmem:[%s11221_s1 + $0x250] sm:$0xff] }
  0x2c   :  { %v5945_v25 = vcombine.high %v50_v20, %v54_v21  ;;  %v109_v13 = vld [vmem:[%s11221_s1 + $0x270] sm:$0xff]  ;;  %v106_v14 = vld [vmem:[%s11221_s1 + $0x258] sm:$0xff] }
  0x2e   :  { %869 = vmatpush1.bf16.msra.mxu0 %v6002_v28  ;;  %910 = vmatpush1.bf16.msra.mxu1 %v6004_v29  ;;  %v58_v28 = vld [vmem:[%s11221_s1 + $0xd8] sm:$0xff] }
  0x2f   :  { %870 = vmatprep.subr.bf16.mxu0 %v6011_v30  ;;  %911 = vmatprep.subr.bf16.mxu1 %v6013_v31  ;;  %v62_v29 = vld [vmem:[%s11221_s1 + $0xf8] sm:$0xff]  ;;  %v5942_v30 = vcombine.low %v49_v53, %v53_v19  ;;  %v5944_v31 = vcombine.low %v50_v20, %v54_v21  ;;  %v113_v19 = vld [vmem:[%s11221_s1 + $0x290] sm:$0xff] }
  0x30   :  { %v5953_v33 = vcombine.high %v58_v28, %v62_v29  ;;  %v117_v20 = vld [vmem:[%s11221_s1 + $0x2b0] sm:$0xff]  ;;  %v114_v21 = vld [vmem:[%s11221_s1 + $0x298] sm:$0xff] }
  0x32   :  { %871 = vmatpush1.bf16.msra.mxu0 %v6010_v36  ;;  %912 = vmatpush1.bf16.msra.mxu1 %v6012_v37  ;;  %v70_v36 = vld [vmem:[%s11221_s1 + $0x138] sm:$0xff]  ;;  %v5950_v37 = vcombine.low %v57_v26, %v61_v27  ;;  %v121_v27 = vld [vmem:[%s11221_s1 + $0x2d0] sm:$0xff] }
  0x33   :  { %872 = vmatprep.subr.bf16.mxu0 %v6019_v38  ;;  %913 = vmatprep.subr.bf16.mxu1 %v6021_v39  ;;  %v5952_v38 = vcombine.low %v58_v28, %v62_v29  ;;  %v5959_v39 = vcombine.high %v65_v34, %v69_v35  ;;  %v125_v28 = vld [vmem:[%s11221_s1 + $0x2f0] sm:$0xff]  ;;  %v122_v29 = vld [vmem:[%s11221_s1 + $0x2d8] sm:$0xff] }
  0x36   :  { %873 = vmatpush1.bf16.msra.mxu0 %v6018_v44  ;;  %914 = vmatpush1.bf16.msra.mxu1 %v6020_v45  ;;  %v78_v44 = vld [vmem:[%s11221_s1 + $0x178] sm:$0xff]  ;;  %v5958_v45 = vcombine.low %v65_v34, %v69_v35  ;;  %v129_v35 = vld [vmem:[%s11221_s1 + $0x310] sm:$0xff] }
  0x37   :  { %874 = vmatprep.subr.bf16.mxu0 %v6027_v46  ;;  %915 = vmatprep.subr.bf16.mxu1 %v6029_v47  ;;  %v5967_v47 = vcombine.high %v73_v41, %v77_v42  ;;  %v5969_v48 = vcombine.high %v74_v43, %v78_v44 }
  0x3a   :  { %875 = vmatpush1.bf16.msra.mxu0 %v6026_v52  ;;  %916 = vmatpush1.bf16.msra.mxu1 %v6028_v54  ;;  %v86_v52 = vld [vmem:[%s11221_s1 + $0x1b8] sm:$0xff]  ;;  %v5966_v54 = vcombine.low %v73_v41, %v77_v42  ;;  %v137_v42 = vld [vmem:[%s11221_s1 + $0x350] sm:$0xff] }
  0x3b   :  { %876 = vmatprep.subr.bf16.mxu0 %v6035_v55  ;;  %917 = vmatprep.subr.bf16.mxu1 %v6037_v56  ;;  %v5968_v55 = vcombine.low %v74_v43, %v78_v44  ;;  %v5975_v56 = vcombine.high %v81_v49, %v85_v50  ;;  %v5977_v58 = vcombine.high %v82_v51, %v86_v52  ;;  %v141_v43 = vld [vmem:[%s11221_s1 + $0x370] sm:$0xff]  ;;  %v138_v44 = vld [vmem:[%s11221_s1 + $0x358] sm:$0xff] }
  0x3e   :  { %877 = vmatpush1.bf16.msra.mxu0 %v6034_v62  ;;  %918 = vmatpush1.bf16.msra.mxu1 %v6036_v63  ;;  %v94_v62 = vld [vmem:[%s11221_s1 + $0x1f8] sm:$0xff]  ;;  %v5974_v63 = vcombine.low %v81_v49, %v85_v50  ;;  %v145_v50 = vld [vmem:[%s11221_s1 + $0x390] sm:$0xff] }
  0x3f   :  { %878 = vmatprep.subr.bf16.mxu0 %v6043_v0  ;;  %919 = vmatprep.subr.bf16.mxu1 %v6045_v1  ;;  %v5976_v0 = vcombine.low %v82_v51, %v86_v52  ;;  %v5983_v1 = vcombine.high %v89_v59, %v93_v60  ;;  %v5985_v2 = vcombine.high %v90_v61, %v94_v62  ;;  %v149_v51 = vld [vmem:[%s11221_s1 + $0x3b0] sm:$0xff]  ;;  %v146_v52 = vld [vmem:[%s11221_s1 + $0x398] sm:$0xff] }
  0x42   :  { %879 = vmatpush1.bf16.msra.mxu0 %v6042_v6  ;;  %920 = vmatpush1.bf16.msra.mxu1 %v6044_v7  ;;  %v102_v6 = vld [vmem:[%s11221_s1 + $0x238] sm:$0xff]  ;;  %v5982_v7 = vcombine.low %v89_v59, %v93_v60  ;;  %v153_v60 = vld [vmem:[%s11221_s1 + $0x3d0] sm:$0xff] }
  0x43   :  { %930 = vmatprep.subr.bf16.mxu0 %v5927_v8  ;;  %971 = vmatprep.subr.bf16.mxu1 %v5929_v9  ;;  %v5984_v8 = vcombine.low %v90_v61, %v94_v62  ;;  %v5991_v9 = vcombine.high %v97_v3, %v101_v4  ;;  %v5993_v10 = vcombine.high %v98_v5, %v102_v6  ;;  %v157_v61 = vld [vmem:[%s11221_s1 + $0x3f0] sm:$0xff]  ;;  %v154_v62 = vld [vmem:[%s11221_s1 + $0x3d8] sm:$0xff] }
  0x45   :  { %881 = vmatmul.mubr.bf16.vlgmr.msra.gmra.mrb[0].mxu0 %v7155_v12  ;;  %922 = vmatmul.mubr.bf16.vlgmr.msra.gmra.mrb[0].mxu1 %v7155_v12 }
  0x46   :  { %931 = vmatpush1.bf16.msra.mxu0 %v5926_v15  ;;  %972 = vmatpush1.bf16.msra.mxu1 %v5928_v16  ;;  %v110_v15 = vld [vmem:[%s11221_s1 + $0x278] sm:$0xff]  ;;  %v5990_v16 = vcombine.low %v97_v3, %v101_v4  ;;  %v1012_v4 = vld [vmem:[%s11223_s3] sm:$0xff] }
  0x47   :  { %932 = vmatprep.subr.bf16.mxu0 %v5935_v17  ;;  %973 = vmatprep.subr.bf16.mxu1 %v5937_v18  ;;  %v5992_v17 = vcombine.low %v98_v5, %v102_v6  ;;  %v5999_v18 = vcombine.high %v105_v11, %v109_v13  ;;  %v6001_v53 = vcombine.high %v106_v14, %v110_v15  ;;  %v1016_v5 = vld [vmem:[%s11223_s3 + $0x20] sm:$0xff]  ;;  %v1013_v6 = vld [vmem:[%s11223_s3 + $0x8] sm:$0xff] }
  0x48   :  { %962 = vmatprep.mubr.bf16.mxu0 %v7029_v57  ;;  %1003 = vmatprep.mubr.bf16.mxu1 %v7029_v57  ;;  %v66_v57 = vld [vmem:[%s11221_s1 + $0x118] sm:$0xff] }
  0x49   :  { %v5961_v40 = vcombine.high %v66_v57, %v70_v36  ;;  %v5960_v46 = vcombine.low %v66_v57, %v70_v36  ;;  %v133_v57 = vld [vmem:[%s11221_s1 + $0x330] sm:$0xff]  ;;  %v130_v36 = vld [vmem:[%s11221_s1 + $0x318] sm:$0xff] }
  0x4a   :  { %933 = vmatpush1.bf16.msra.mxu0 %v5934_v22  ;;  %974 = vmatpush1.bf16.msra.mxu1 %v5936_v23  ;;  %v118_v22 = vld [vmem:[%s11221_s1 + $0x2b8] sm:$0xff]  ;;  %v5998_v23 = vcombine.low %v105_v11, %v109_v13  ;;  %v1020_v13 = vld [vmem:[%s11223_s3 + $0x40] sm:$0xff] }
  0x4b   :  { %934 = vmatprep.subr.bf16.mxu0 %v5943_v24  ;;  %975 = vmatprep.subr.bf16.mxu1 %v5945_v25  ;;  %v6000_v24 = vcombine.low %v106_v14, %v110_v15  ;;  %v6007_v25 = vcombine.high %v113_v19, %v117_v20  ;;  %v6009_v26 = vcombine.high %v114_v21, %v118_v22  ;;  %v1024_v14 = vld [vmem:[%s11223_s3 + $0x60] sm:$0xff]  ;;  %v1021_v15 = vld [vmem:[%s11223_s3 + $0x48] sm:$0xff] }
  0x4e   :  { %935 = vmatpush1.bf16.msra.mxu0 %v5942_v30  ;;  %976 = vmatpush1.bf16.msra.mxu1 %v5944_v31  ;;  %v126_v30 = vld [vmem:[%s11221_s1 + $0x2f8] sm:$0xff]  ;;  %v6006_v31 = vcombine.low %v113_v19, %v117_v20  ;;  %v1028_v20 = vld [vmem:[%s11223_s3 + $0x80] sm:$0xff] }
  0x4f   :  { %936 = vmatprep.subr.bf16.mxu0 %v5951_v32  ;;  %977 = vmatprep.subr.bf16.mxu1 %v5953_v33  ;;  %v6008_v32 = vcombine.low %v114_v21, %v118_v22  ;;  %v6015_v33 = vcombine.high %v121_v27, %v125_v28  ;;  %v6017_v34 = vcombine.high %v122_v29, %v126_v30  ;;  %v1032_v21 = vld [vmem:[%s11223_s3 + $0xa0] sm:$0xff]  ;;  %v1029_v22 = vld [vmem:[%s11223_s3 + $0x88] sm:$0xff] }
  0x52   :  { %937 = vmatpush1.bf16.msra.mxu0 %v5950_v37  ;;  %978 = vmatpush1.bf16.msra.mxu1 %v5952_v38  ;;  %v134_v37 = vld [vmem:[%s11221_s1 + $0x338] sm:$0xff]  ;;  %v6014_v38 = vcombine.low %v121_v27, %v125_v28  ;;  %v1040_v28 = vld [vmem:[%s11223_s3 + $0xe0] sm:$0xff] }
  0x53   :  { %938 = vmatprep.subr.bf16.mxu0 %v5959_v39  ;;  %979 = vmatprep.subr.bf16.mxu1 %v5961_v40  ;;  %v6016_v39 = vcombine.low %v122_v29, %v126_v30  ;;  %v6023_v40 = vcombine.high %v129_v35, %v133_v57  ;;  %v6025_v41 = vcombine.high %v130_v36, %v134_v37  ;;  %v11230_v29 = vmov 0   ;;  %v1037_v30 = vld [vmem:[%s11223_s3 + $0xc8] sm:$0xff] }
  0x56   :  { %939 = vmatpush1.bf16.msra.mxu0 %v5958_v45  ;;  %980 = vmatpush1.bf16.msra.mxu1 %v5960_v46  ;;  %v142_v45 = vld [vmem:[%s11221_s1 + $0x378] sm:$0xff]  ;;  %v6022_v46 = vcombine.low %v129_v35, %v133_v57  ;;  %v1044_v57 = vld [vmem:[%s11223_s3 + $0x100] sm:$0xff] }
  0x57   :  { %940 = vmatprep.subr.bf16.mxu0 %v5967_v47  ;;  %981 = vmatprep.subr.bf16.mxu1 %v5969_v48  ;;  %v6024_v47 = vcombine.low %v130_v36, %v134_v37  ;;  %v6031_v48 = vcombine.high %v137_v42, %v141_v43  ;;  %v6033_v49 = vcombine.high %v138_v44, %v142_v45  ;;  %v1048_v36 = vld [vmem:[%s11223_s3 + $0x120] sm:$0xff]  ;;  %v1045_v37 = vld [vmem:[%s11223_s3 + $0x108] sm:$0xff] }
  0x5a   :  { %941 = vmatpush1.bf16.msra.mxu0 %v5966_v54  ;;  %982 = vmatpush1.bf16.msra.mxu1 %v5968_v55  ;;  %v150_v54 = vld [vmem:[%s11221_s1 + $0x3b8] sm:$0xff]  ;;  %v6030_v55 = vcombine.low %v137_v42, %v141_v43  ;;  %v1052_v43 = vld [vmem:[%s11223_s3 + $0x140] sm:$0xff] }
  0x5b   :  { %942 = vmatprep.subr.bf16.mxu0 %v5975_v56  ;;  %983 = vmatprep.subr.bf16.mxu1 %v5977_v58  ;;  %v6032_v56 = vcombine.low %v138_v44, %v142_v45  ;;  %v6039_v58 = vcombine.high %v145_v50, %v149_v51  ;;  %v6041_v59 = vcombine.high %v146_v52, %v150_v54  ;;  %v1056_v44 = vld [vmem:[%s11223_s3 + $0x160] sm:$0xff]  ;;  %v1053_v45 = vld [vmem:[%s11223_s3 + $0x148] sm:$0xff] }
  0x5e   :  { %943 = vmatpush1.bf16.msra.mxu0 %v5974_v63  ;;  %984 = vmatpush1.bf16.msra.mxu1 %v5976_v0  ;;  %v158_v63 = vld [vmem:[%s11221_s1 + $0x3f8] sm:$0xff]  ;;  %v6038_v0 = vcombine.low %v145_v50, %v149_v51  ;;  %v1060_v51 = vld [vmem:[%s11223_s3 + $0x180] sm:$0xff] }
  0x5f   :  { %944 = vmatprep.subr.bf16.mxu0 %v5983_v1  ;;  %985 = vmatprep.subr.bf16.mxu1 %v5985_v2  ;;  %v6040_v1 = vcombine.low %v146_v52, %v150_v54  ;;  %v6047_v2 = vcombine.high %v153_v60, %v157_v61  ;;  %v6049_v3 = vcombine.high %v154_v62, %v158_v63  ;;  %v1064_v52 = vld [vmem:[%s11223_s3 + $0x1a0] sm:$0xff]  ;;  %v1061_v54 = vld [vmem:[%s11223_s3 + $0x188] sm:$0xff] }
  0x62   :  { %945 = vmatpush1.bf16.msra.mxu0 %v5982_v7  ;;  %986 = vmatpush1.bf16.msra.mxu1 %v5984_v8  ;;  %v1017_v7 = vld [vmem:[%s11223_s3 + $0x28] sm:$0xff]  ;;  %v6046_v8 = vcombine.low %v153_v60, %v157_v61  ;;  %v1068_v61 = vld [vmem:[%s11223_s3 + $0x1c0] sm:$0xff] }
  0x63   :  { %946 = vmatprep.subr.bf16.mxu0 %v5991_v9  ;;  %987 = vmatprep.subr.bf16.mxu1 %v5993_v10  ;;  %v6048_v9 = vcombine.low %v154_v62, %v158_v63  ;;  %v7347_v10 = vcombine.high %v1012_v4, %v1016_v5  ;;  %v7349_v11 = vcombine.high %v1013_v6, %v1017_v7  ;;  %v1072_v62 = vld [vmem:[%s11223_s3 + $0x1e0] sm:$0xff]  ;;  %v1069_v63 = vld [vmem:[%s11223_s3 + $0x1c8] sm:$0xff] }
  0x65   :  { %11971 = vst [vmem:[#allocation2_spill] sm:$0xff] %v7349_v11 }
  0x66   :  { %947 = vmatpush1.bf16.msra.mxu0 %v5990_v16  ;;  %988 = vmatpush1.bf16.msra.mxu1 %v5992_v17  ;;  %v1025_v16 = vld [vmem:[%s11223_s3 + $0x68] sm:$0xff]  ;;  %v7363_v17 = vcombine.low %v1012_v4, %v1016_v5  ;;  %v1076_v5 = vld [vmem:[%s11223_s3 + $0x200] sm:$0xff] }
  0x67   :  { %948 = vmatprep.subr.bf16.mxu0 %v5999_v18  ;;  %989 = vmatprep.subr.bf16.mxu1 %v6001_v53  ;;  %v7366_v18 = vcombine.low %v1013_v6, %v1017_v7  ;;  %v7368_v53 = vcombine.high %v1020_v13, %v1024_v14  ;;  %v7371_v19 = vcombine.high %v1021_v15, %v1025_v16  ;;  %v1080_v6 = vld [vmem:[%s11223_s3 + $0x220] sm:$0xff]  ;;  %v1077_v7 = vld [vmem:[%s11223_s3 + $0x208] sm:$0xff] }
  0x69   :  { %11972 = vst [vmem:[#allocation3_spill] sm:$0xff] %v7366_v18  ;;  %11973 = vst [vmem:[#allocation4_spill] sm:$0xff] %v7371_v19 }
  0x6a   :  { %949 = vmatpush1.bf16.msra.mxu0 %v5998_v23  ;;  %990 = vmatpush1.bf16.msra.mxu1 %v6000_v24  ;;  %v1033_v23 = vld [vmem:[%s11223_s3 + $0xa8] sm:$0xff]  ;;  %v7388_v24 = vcombine.low %v1020_v13, %v1024_v14  ;;  %v7540_v14 = vcombine.high %v1076_v5, %v1080_v6 }
  0x6b   :  { %950 = vmatprep.subr.bf16.mxu0 %v6007_v25  ;;  %991 = vmatprep.subr.bf16.mxu1 %v6009_v26  ;;  %v7392_v25 = vcombine.low %v1021_v15, %v1025_v16  ;;  %v7394_v26 = vcombine.high %v1028_v20, %v1032_v21  ;;  %v7397_v27 = vcombine.high %v1029_v22, %v1033_v23  ;;  %v1084_v16 = vld [vmem:[%s11223_s3 + $0x240] sm:$0xff] }
  0x6c   :  { %11989 = vst [vmem:[#allocation20_spill] sm:$0xff] %v7540_v14 }
  0x6d   :  { %11974 = vst [vmem:[#allocation5_spill] sm:$0xff] %v7392_v25  ;;  %11975 = vst [vmem:[#allocation6_spill] sm:$0xff] %v7397_v27 }
  0x6e   :  { %951 = vmatpush1.bf16.msra.mxu0 %v6006_v31  ;;  %992 = vmatpush1.bf16.msra.mxu1 %v6008_v32  ;;  %v1041_v31 = vld [vmem:[%s11223_s3 + $0xe8] sm:$0xff]  ;;  %v7414_v32 = vcombine.low %v1028_v20, %v1032_v21  ;;  %v1088_v20 = vld [vmem:[%s11223_s3 + $0x260] sm:$0xff] }
  0x6f   :  { %952 = vmatprep.subr.bf16.mxu0 %v6015_v33  ;;  %993 = vmatprep.subr.bf16.mxu1 %v6017_v34  ;;  %v7418_v33 = vcombine.low %v1029_v22, %v1033_v23  ;;  %v7423_v35 = vcombine.high %v1037_v30, %v1041_v31  ;;  %v1085_v21 = vld [vmem:[%s11223_s3 + $0x248] sm:$0xff]  ;;  %v7558_v23 = vcombine.low %v1076_v5, %v1080_v6  ;;  %v1112_v5 = vld [vmem:[%s11223_s3 + $0x320] sm:$0xff] }
  0x70   :  { %v1089_v22 = vld [vmem:[%s11223_s3 + $0x268] sm:$0xff] }
  0x71   :  { %11976 = vst [vmem:[#allocation7_spill] sm:$0xff] %v7418_v33  ;;  %11977 = vst [vmem:[#allocation8_spill] sm:$0xff] %v7423_v35  ;;  %v1109_v6 = vld [vmem:[%s11223_s3 + $0x308] sm:$0xff] }
  0x72   :  { %953 = vmatpush1.bf16.msra.mxu0 %v6014_v38  ;;  %994 = vmatpush1.bf16.msra.mxu1 %v6016_v39  ;;  %v1049_v38 = vld [vmem:[%s11223_s3 + $0x128] sm:$0xff]  ;;  %11991 = vst [vmem:[#allocation22_spill] sm:$0xff] %v7558_v23 }
  0x73   :  { %954 = vmatprep.subr.bf16.mxu0 %v6023_v40  ;;  %995 = vmatprep.subr.bf16.mxu1 %v6025_v41  ;;  %v7442_v40 = vcombine.low %v1037_v30, %v1041_v31  ;;  %v7444_v41 = vcombine.high %v1044_v57, %v1048_v36  ;;  %v7447_v42 = vcombine.high %v1045_v37, %v1049_v38  ;;  %v1092_v31 = vld [vmem:[%s11223_s3 + $0x280] sm:$0xff] }
  0x74   :  { %v7567_v30 = vcombine.high %v1085_v21, %v1089_v22 }
  0x75   :  { %11978 = vst [vmem:[#allocation9_spill] sm:$0xff] %v7442_v40  ;;  %11979 = vst [vmem:[#allocation10_spill] sm:$0xff] %v7447_v42 }
  0x76   :  { %955 = vmatpush1.bf16.msra.mxu0 %v6022_v46  ;;  %996 = vmatpush1.bf16.msra.mxu1 %v6024_v47  ;;  %v1057_v46 = vld [vmem:[%s11223_s3 + $0x168] sm:$0xff]  ;;  %v7462_v47 = vcombine.low %v1044_v57, %v1048_v36  ;;  %11994 = vst [vmem:[#allocation25_spill] sm:$0xff] %v7567_v30  ;;  %v1096_v57 = vld [vmem:[%s11223_s3 + $0x2a0] sm:$0xff] }
  0x77   :  { %956 = vmatprep.subr.bf16.mxu0 %v6031_v48  ;;  %997 = vmatprep.subr.bf16.mxu1 %v6033_v49  ;;  %v7466_v48 = vcombine.low %v1045_v37, %v1049_v38  ;;  %v7468_v49 = vcombine.high %v1052_v43, %v1056_v44  ;;  %v7471_v50 = vcombine.high %v1053_v45, %v1057_v46  ;;  %v1093_v36 = vld [vmem:[%s11223_s3 + $0x288] sm:$0xff] }
  0x78   :  { %v1097_v37 = vld [vmem:[%s11223_s3 + $0x2a8] sm:$0xff]  ;;  %v7582_v38 = vcombine.low %v1084_v16, %v1088_v20 }
  0x79   :  { %11980 = vst [vmem:[#allocation11_spill] sm:$0xff] %v7466_v48  ;;  %11981 = vst [vmem:[#allocation12_spill] sm:$0xff] %v7471_v50 }
  0x7a   :  { %957 = vmatpush1.bf16.msra.mxu0 %v6030_v55  ;;  %998 = vmatpush1.bf16.msra.mxu1 %v6032_v56  ;;  %v1065_v55 = vld [vmem:[%s11223_s3 + $0x1a8] sm:$0xff]  ;;  %v7486_v56 = vcombine.low %v1052_v43, %v1056_v44  ;;  %11995 = vst [vmem:[#allocation26_spill] sm:$0xff] %v7582_v38  ;;  %v7586_v43 = vcombine.low %v1085_v21, %v1089_v22  ;;  %v1116_v22 = vld [vmem:[%s11223_s3 + $0x340] sm:$0xff] }
  0x7b   :  { %958 = vmatprep.subr.bf16.mxu0 %v6039_v58  ;;  %999 = vmatprep.subr.bf16.mxu1 %v6041_v59  ;;  %v7490_v58 = vcombine.low %v1053_v45, %v1057_v46  ;;  %v7492_v59 = vcombine.high %v1060_v51, %v1064_v52  ;;  %v7495_v60 = vcombine.high %v1061_v54, %v1065_v55  ;;  %v1100_v46 = vld [vmem:[%s11223_s3 + $0x2c0] sm:$0xff] }
  0x7c   :  { %11996 = vst [vmem:[#allocation27_spill] sm:$0xff] %v7586_v43  ;;  %v7588_v44 = vcombine.high %v1092_v31, %v1096_v57  ;;  %v7591_v45 = vcombine.high %v1093_v36, %v1097_v37 }
  0x7d   :  { %11982 = vst [vmem:[#allocation13_spill] sm:$0xff] %v7490_v58  ;;  %11983 = vst [vmem:[#allocation14_spill] sm:$0xff] %v7495_v60 }
  0x7e   :  { %959 = vmatpush1.bf16.msra.mxu0 %v6038_v0  ;;  %1000 = vmatpush1.bf16.msra.mxu1 %v6040_v1  ;;  %v1073_v0 = vld [vmem:[%s11223_s3 + $0x1e8] sm:$0xff]  ;;  %v7510_v1 = vcombine.low %v1060_v51, %v1064_v52  ;;  %11997 = vst [vmem:[#allocation28_spill] sm:$0xff] %v7588_v44  ;;  %11998 = vst [vmem:[#allocation29_spill] sm:$0xff] %v7591_v45  ;;  %v1104_v51 = vld [vmem:[%s11223_s3 + $0x2e0] sm:$0xff] }
  0x7f   :  { %960 = vmatprep.subr.bf16.mxu0 %v6047_v2  ;;  %1001 = vmatprep.subr.bf16.mxu1 %v6049_v3  ;;  %v7514_v2 = vcombine.low %v1061_v54, %v1065_v55  ;;  %v7516_v3 = vcombine.high %v1068_v61, %v1072_v62  ;;  %v7519_v4 = vcombine.high %v1069_v63, %v1073_v0  ;;  %v1101_v52 = vld [vmem:[%s11223_s3 + $0x2c8] sm:$0xff] }
  0x80   :  { %v7538_v13 = vcombine.low %v1069_v63, %v1073_v0  ;;  %v1105_v54 = vld [vmem:[%s11223_s3 + $0x2e8] sm:$0xff]  ;;  %v7606_v55 = vcombine.low %v1092_v31, %v1096_v57  ;;  %v1108_v0 = vld [vmem:[%s11223_s3 + $0x300] sm:$0xff] }
  0x81   :  { %11984 = vst [vmem:[#allocation15_spill] sm:$0xff] %v7514_v2  ;;  %11985 = vst [vmem:[#allocation16_spill] sm:$0xff] %v7516_v3  ;;  %v7615_v63 = vcombine.high %v1101_v52, %v1105_v54  ;;  %v1120_v31 = vld [vmem:[%s11223_s3 + $0x360] sm:$0xff]  ;;  %v1117_v57 = vld [vmem:[%s11223_s3 + $0x348] sm:$0xff] }
  0x82   :  { %961 = vmatpush1.bf16.msra.mxu0 %v6046_v8  ;;  %1002 = vmatpush1.bf16.msra.mxu1 %v6048_v9  ;;  %11986 = vst [vmem:[#allocation17_spill] sm:$0xff] %v7519_v4  ;;  %v1081_v8 = vld [vmem:[%s11223_s3 + $0x228] sm:$0xff]  ;;  %v7534_v9 = vcombine.low %v1068_v61, %v1072_v62  ;;  %11988 = vst [vmem:[#allocation19_spill] sm:$0xff] %v7538_v13  ;;  %v7610_v61 = vcombine.low %v1093_v36, %v1097_v37 }
  0x83   :  { %2070 = vmatprep.subr.bf16.mxu0 %v7347_v10  ;;  %2111 = vmatprep.subr.bf16.mxu1 %v7349_v11  ;;  %v7543_v15 = vcombine.high %v1077_v7, %v1081_v8  ;;  %11999 = vst [vmem:[#allocation30_spill] sm:$0xff] %v7606_v55  ;;  %v7612_v62 = vcombine.high %v1100_v46, %v1104_v51  ;;  %12002 = vst [vmem:[#allocation33_spill] sm:$0xff] %v7615_v63  ;;  %v1121_v36 = vld [vmem:[%s11223_s3 + $0x368] sm:$0xff] }
  0x84   :  { %11987 = vst [vmem:[#allocation18_spill] sm:$0xff] %v7534_v9  ;;  %12000 = vst [vmem:[#allocation31_spill] sm:$0xff] %v7610_v61  ;;  %v7654_v37 = vcombine.low %v1108_v0, %v1112_v5 }
  0x85   :  { %963 = vmatmul.mubr.bf16.vlgmr.msra.gmra.mrb[4].mxu0 %v7155_v12  ;;  %1004 = vmatmul.mubr.bf16.vlgmr.msra.gmra.mrb[4].mxu1 %v7155_v12  ;;  %v1036_v12 = vld [vmem:[%s11223_s3 + $0xc0] sm:$0xff]  ;;  %11990 = vst [vmem:[#allocation21_spill] sm:$0xff] %v7543_v15  ;;  %12001 = vst [vmem:[#allocation32_spill] sm:$0xff] %v7612_v62 }
  0x86   :  { %2071 = vmatpush1.bf16.msra.mxu0 %v7363_v17  ;;  %2112 = vmatpush1.bf16.msra.mxu1 %v7366_v18  ;;  %v7420_v34 = vcombine.high %v1036_v12, %v1040_v28  ;;  %v7438_v39 = vcombine.low %v1036_v12, %v1040_v28  ;;  %v7562_v12 = vcombine.low %v1077_v7, %v1081_v8  ;;  %v1113_v7 = vld [vmem:[%s11223_s3 + $0x328] sm:$0xff]  ;;  %v1086_v18 = vld [vmem:[%s11223_s3 + $0x250] sm:$0xff] }
  0x87   :  { %2072 = vmatprep.subr.bf16.mxu0 %v7368_v53  ;;  %2113 = vmatprep.subr.bf16.mxu1 %v7371_v19  ;;  %v7564_v28 = vcombine.high %v1084_v16, %v1088_v20  ;;  %v7630_v8 = vcombine.low %v1100_v46, %v1104_v51  ;;  %v7634_v16 = vcombine.low %v1101_v52, %v1105_v54  ;;  %v1124_v54 = vld [vmem:[%s11223_s3 + $0x380] sm:$0xff] }
  0x88   :  { %2102 = vmatprep.mubr.bf16.mxu0 %v11230_v29  ;;  %2143 = vmatprep.mubr.bf16.mxu1 %v11230_v29  ;;  %11992 = vst [vmem:[#allocation23_spill] sm:$0xff] %v7562_v12  ;;  %v7636_v20 = vcombine.high %v1108_v0, %v1112_v5  ;;  %v7639_v21 = vcombine.high %v1109_v6, %v1113_v7  ;;  %12007 = vst [vmem:[#allocation38_spill] sm:$0xff] %v7654_v37  ;;  %v1128_v0 = vld [vmem:[%s11223_s3 + $0x3a0] sm:$0xff]  ;;  %v1125_v5 = vld [vmem:[%s11223_s3 + $0x388] sm:$0xff] }
  0x89   :  { %11993 = vst [vmem:[#allocation24_spill] sm:$0xff] %v7564_v28  ;;  %12003 = vst [vmem:[#allocation34_spill] sm:$0xff] %v7630_v8  ;;  %v7658_v46 = vcombine.low %v1109_v6, %v1113_v7  ;;  %v7660_v51 = vcombine.high %v1116_v22, %v1120_v31  ;;  %v7663_v52 = vcombine.high %v1117_v57, %v1121_v36  ;;  %v1129_v6 = vld [vmem:[%s11223_s3 + $0x3a8] sm:$0xff] }
  0x8a   :  { %2073 = vmatpush1.bf16.msra.mxu0 %v7388_v24  ;;  %2114 = vmatpush1.bf16.msra.mxu1 %v7392_v25  ;;  %12004 = vst [vmem:[#allocation35_spill] sm:$0xff] %v7634_v16  ;;  %12005 = vst [vmem:[#allocation36_spill] sm:$0xff] %v7636_v20  ;;  %v7678_v7 = vcombine.low %v1116_v22, %v1120_v31  ;;  %v7682_v29 = vcombine.low %v1117_v57, %v1121_v36  ;;  %v1136_v22 = vld [vmem:[%s11223_s3 + $0x3e0] sm:$0xff]  ;;  %v1133_v31 = vld [vmem:[%s11223_s3 + $0x3c8] sm:$0xff] }
  0x8b   :  { %2074 = vmatprep.subr.bf16.mxu0 %v7394_v26  ;;  %2115 = vmatprep.subr.bf16.mxu1 %v7397_v27  ;;  %12006 = vst [vmem:[#allocation37_spill] sm:$0xff] %v7639_v21  ;;  %12008 = vst [vmem:[#allocation39_spill] sm:$0xff] %v7658_v46  ;;  %v1137_v57 = vld [vmem:[%s11223_s3 + $0x3e8] sm:$0xff]  ;;  %v7702_v36 = vcombine.low %v1124_v54, %v1128_v0  ;;  %v1078_v25 = vld [vmem:[%s11223_s3 + $0x210] sm:$0xff] }
  0x8c   :  { %12009 = vst [vmem:[#allocation40_spill] sm:$0xff] %v7660_v51  ;;  %12010 = vst [vmem:[#allocation41_spill] sm:$0xff] %v7663_v52 }
  0x8d   :  { %12011 = vst [vmem:[#allocation42_spill] sm:$0xff] %v7678_v7  ;;  %12012 = vst [vmem:[#allocation43_spill] sm:$0xff] %v7682_v29 }
  0x8e   :  { %2075 = vmatpush1.bf16.msra.mxu0 %v7414_v32  ;;  %2116 = vmatpush1.bf16.msra.mxu1 %v7418_v33  ;;  %12015 = vst [vmem:[#allocation46_spill] sm:$0xff] %v7702_v36  ;;  %v1070_v33 = vld [vmem:[%s11223_s3 + $0x1d0] sm:$0xff] }
  0x8f   :  { %2076 = vmatprep.subr.bf16.mxu0 %v7420_v34  ;;  %2117 = vmatprep.subr.bf16.mxu1 %v7423_v35 }
  0x92   :  { %2077 = vmatpush1.bf16.msra.mxu0 %v7438_v39  ;;  %2118 = vmatpush1.bf16.msra.mxu1 %v7442_v40  ;;  %v1062_v40 = vld [vmem:[%s11223_s3 + $0x190] sm:$0xff] }
  0x93   :  { %2078 = vmatprep.subr.bf16.mxu0 %v7444_v41  ;;  %2119 = vmatprep.subr.bf16.mxu1 %v7447_v42 }
  0x96   :  { %2079 = vmatpush1.bf16.msra.mxu0 %v7462_v47  ;;  %2120 = vmatpush1.bf16.msra.mxu1 %v7466_v48  ;;  %v1054_v48 = vld [vmem:[%s11223_s3 + $0x150] sm:$0xff] }
  0x97   :  { %2080 = vmatprep.subr.bf16.mxu0 %v7468_v49  ;;  %2121 = vmatprep.subr.bf16.mxu1 %v7471_v50 }
  0x9a   :  { %2081 = vmatpush1.bf16.msra.mxu0 %v7486_v56  ;;  %2122 = vmatpush1.bf16.msra.mxu1 %v7490_v58  ;;  %v1046_v58 = vld [vmem:[%s11223_s3 + $0x110] sm:$0xff] }
  0x9b   :  { %2082 = vmatprep.subr.bf16.mxu0 %v7492_v59  ;;  %2123 = vmatprep.subr.bf16.mxu1 %v7495_v60 }
  0x9e   :  { %2083 = vmatpush1.bf16.msra.mxu0 %v7510_v1  ;;  %2124 = vmatpush1.bf16.msra.mxu1 %v7514_v2  ;;  %v1038_v2 = vld [vmem:[%s11223_s3 + $0xd0] sm:$0xff] }
  0x9f   :  { %2084 = vmatprep.subr.bf16.mxu0 %v7516_v3  ;;  %2125 = vmatprep.subr.bf16.mxu1 %v7519_v4 }
  0xa2   :  { %2085 = vmatpush1.bf16.msra.mxu0 %v7534_v9  ;;  %2126 = vmatpush1.bf16.msra.mxu1 %v7538_v13 }
  0xa3   :  { %2086 = vmatprep.subr.bf16.mxu0 %v7540_v14  ;;  %2127 = vmatprep.subr.bf16.mxu1 %v7543_v15  ;;  %v1030_v15 = vld [vmem:[%s11223_s3 + $0x90] sm:$0xff] }
  0xa6   :  { %2087 = vmatpush1.bf16.msra.mxu0 %v7558_v23  ;;  %2128 = vmatpush1.bf16.msra.mxu1 %v7562_v12 }
  0xa7   :  { %2088 = vmatprep.subr.bf16.mxu0 %v7564_v28  ;;  %2129 = vmatprep.subr.bf16.mxu1 %v7567_v30  ;;  %v1022_v30 = vld [vmem:[%s11223_s3 + $0x50] sm:$0xff] }
  0xaa   :  { %2089 = vmatpush1.bf16.msra.mxu0 %v7582_v38  ;;  %2130 = vmatpush1.bf16.msra.mxu1 %v7586_v43 }
  0xab   :  { %2090 = vmatprep.subr.bf16.mxu0 %v7588_v44  ;;  %2131 = vmatprep.subr.bf16.mxu1 %v7591_v45  ;;  %v1014_v45 = vld [vmem:[%s11223_s3 + $0x10] sm:$0xff] }
  0xae   :  { %2091 = vmatpush1.bf16.msra.mxu0 %v7606_v55  ;;  %2132 = vmatpush1.bf16.msra.mxu1 %v7610_v61  ;;  %v7711_v61 = vcombine.high %v1133_v31, %v1137_v57 }
  0xaf   :  { %2092 = vmatprep.subr.bf16.mxu0 %v7612_v62  ;;  %2133 = vmatprep.subr.bf16.mxu1 %v7615_v63  ;;  %v1132_v63 = vld [vmem:[%s11223_s3 + $0x3c0] sm:$0xff] }
  0xb0   :  { %12018 = vst [vmem:[#allocation49_spill] sm:$0xff] %v7711_v61 }
  0xb2   :  { %2093 = vmatpush1.bf16.msra.mxu0 %v7630_v8  ;;  %2134 = vmatpush1.bf16.msra.mxu1 %v7634_v16  ;;  %v7687_v16 = vcombine.high %v1125_v5, %v1129_v6 }
  0xb3   :  { %2094 = vmatprep.subr.bf16.mxu0 %v7636_v20  ;;  %2135 = vmatprep.subr.bf16.mxu1 %v7639_v21  ;;  %v7684_v21 = vcombine.high %v1124_v54, %v1128_v0  ;;  %v1018_v54 = vld [vmem:[%s11223_s3 + $0x30] sm:$0xff]  ;;  %v1015_v0 = vld [vmem:[%s11223_s3 + $0x18] sm:$0xff] }
  0xb4   :  { %12014 = vst [vmem:[#allocation45_spill] sm:$0xff] %v7687_v16 }
  0xb5   :  { %12013 = vst [vmem:[#allocation44_spill] sm:$0xff] %v7684_v21 }
  0xb6   :  { %2095 = vmatpush1.bf16.msra.mxu0 %v7654_v37  ;;  %2136 = vmatpush1.bf16.msra.mxu1 %v7658_v46  ;;  %v7708_v46 = vcombine.high %v1132_v63, %v1136_v22 }
  0xb7   :  { %2096 = vmatprep.subr.bf16.mxu0 %v7660_v51  ;;  %2137 = vmatprep.subr.bf16.mxu1 %v7663_v52  ;;  %v7706_v52 = vcombine.low %v1125_v5, %v1129_v6  ;;  %v1019_v5 = vld [vmem:[%s11223_s3 + $0x38] sm:$0xff]  ;;  %v7726_v6 = vcombine.low %v1132_v63, %v1136_v22  ;;  %v1026_v63 = vld [vmem:[%s11223_s3 + $0x70] sm:$0xff] }
  0xb8   :  { %12017 = vst [vmem:[#allocation48_spill] sm:$0xff] %v7708_v46  ;;  %v7735_v43 = vcombine.high %v1015_v0, %v1019_v5  ;;  %v1023_v22 = vld [vmem:[%s11223_s3 + $0x58] sm:$0xff] }
  0xb9   :  { %12016 = vst [vmem:[#allocation47_spill] sm:$0xff] %v7706_v52  ;;  %12019 = vst [vmem:[#allocation50_spill] sm:$0xff] %v7726_v6 }
  0xba   :  { %2097 = vmatpush1.bf16.msra.mxu0 %v7678_v7  ;;  %2138 = vmatpush1.bf16.msra.mxu1 %v7682_v29  ;;  %v7732_v29 = vcombine.high %v1014_v45, %v1018_v54  ;;  %12022 = vst [vmem:[#allocation53_spill] sm:$0xff] %v7735_v43 }
  0xbb   :  { %2098 = vmatprep.subr.bf16.mxu0 %v7684_v21  ;;  %2139 = vmatprep.subr.bf16.mxu1 %v7687_v16  ;;  %v7730_v16 = vcombine.low %v1133_v31, %v1137_v57  ;;  %v1027_v31 = vld [vmem:[%s11223_s3 + $0x78] sm:$0xff]  ;;  %v7750_v57 = vcombine.low %v1014_v45, %v1018_v54  ;;  %v1034_v45 = vld [vmem:[%s11223_s3 + $0xb0] sm:$0xff]  ;;  %v12027_v54 = vmov 0  }
  0xbc   :  { %12021 = vst [vmem:[#allocation52_spill] sm:$0xff] %v7732_v29  ;;  %v7759_v12 = vcombine.high %v1023_v22, %v1027_v31  ;;  %v7782_v13 = vcombine.high %v1030_v15, %v1034_v45 }
  0xbd   :  { %12020 = vst [vmem:[#allocation51_spill] sm:$0xff] %v7730_v16  ;;  %12023 = vst [vmem:[#allocation54_spill] sm:$0xff] %v7750_v57 }
  0xbe   :  { %2099 = vmatpush1.bf16.msra.mxu0 %v7702_v36  ;;  %2140 = vmatpush1.bf16.msra.mxu1 %v7706_v52  ;;  %v7756_v52 = vcombine.high %v1022_v30, %v1026_v63  ;;  %12026 = vst [vmem:[#allocation57_spill] sm:$0xff] %v7759_v12  ;;  %12030 = vst [vmem:[#allocation60_spill] sm:$0xff] %v7782_v13 }
  0xbf   :  { %2100 = vmatprep.subr.bf16.mxu0 %v7708_v46  ;;  %2141 = vmatprep.subr.bf16.mxu1 %v7711_v61  ;;  %v7754_v61 = vcombine.low %v1015_v0, %v1019_v5  ;;  %v1031_v0 = vld [vmem:[%s11223_s3 + $0x98] sm:$0xff] }
  0xc0   :  { %12025 = vst [vmem:[#allocation56_spill] sm:$0xff] %v7756_v52  ;;  %v1035_v5 = vld [vmem:[%s11223_s3 + $0xb8] sm:$0xff] }
  0xc1   :  { %12024 = vst [vmem:[#allocation55_spill] sm:$0xff] %v7754_v61  ;;  %v7785_v4 = vcombine.high %v1031_v0, %v1035_v5 }
  0xc2   :  { %2101 = vmatpush1.bf16.msra.mxu0 %v7726_v6  ;;  %2142 = vmatpush1.bf16.msra.mxu1 %v7730_v16  ;;  %v7780_v16 = vcombine.low %v1023_v22, %v1027_v31  ;;  %v1043_v22 = vld [vmem:[%s11223_s3 + $0xf8] sm:$0xff]  ;;  %v7802_v31 = vcombine.low %v1030_v15, %v1034_v45  ;;  %v1050_v15 = vld [vmem:[%s11223_s3 + $0x130] sm:$0xff] }
  0xc3   :  { %2152 = vmatprep.subr.bf16.mxu0 %v7732_v29  ;;  %2193 = vmatprep.subr.bf16.mxu1 %v7735_v43  ;;  %v7776_v43 = vcombine.low %v1022_v30, %v1026_v63  ;;  %12031 = vst [vmem:[#allocation61_spill] sm:$0xff] %v7785_v4  ;;  %v1042_v30 = vld [vmem:[%s11223_s3 + $0xf0] sm:$0xff]  ;;  %v1039_v63 = vld [vmem:[%s11223_s3 + $0xd8] sm:$0xff] }
  0xc4   :  { %12029 = vst [vmem:[#allocation59_spill] sm:$0xff] %v7780_v16  ;;  %12032 = vst [vmem:[#allocation62_spill] sm:$0xff] %v7802_v31  ;;  %v7811_v60 = vcombine.high %v1039_v63, %v1043_v22  ;;  %v1047_v45 = vld [vmem:[%s11223_s3 + $0x118] sm:$0xff] }
  0xc5   :  { %2103 = vmatmul.mubr.bf16.vlgmr.msra.gmra.mrb[8].mxu0 %v12027_v54  ;;  %2144 = vmatmul.mubr.bf16.vlgmr.msra.gmra.mrb[8].mxu1 %v12027_v54  ;;  %12028 = vst [vmem:[#allocation58_spill] sm:$0xff] %v7776_v43 }
  0xc6   :  { %2153 = vmatpush1.bf16.msra.mxu0 %v7750_v57  ;;  %2194 = vmatpush1.bf16.msra.mxu1 %v7754_v61  ;;  %v7808_v61 = vcombine.high %v1038_v2, %v1042_v30  ;;  %12035 = vst [vmem:[#allocation65_spill] sm:$0xff] %v7811_v60 }
  0xc7   :  { %2154 = vmatprep.subr.bf16.mxu0 %v7756_v52  ;;  %2195 = vmatprep.subr.bf16.mxu1 %v7759_v12  ;;  %v7806_v12 = vcombine.low %v1031_v0, %v1035_v5  ;;  %v1051_v0 = vld [vmem:[%s11223_s3 + $0x138] sm:$0xff]  ;;  %v7826_v5 = vcombine.low %v1038_v2, %v1042_v30  ;;  %v1058_v2 = vld [vmem:[%s11223_s3 + $0x170] sm:$0xff] }
  0xc8   :  { %2184 = vmatprep.mubr.bf16.mxu0 %v12027_v54  ;;  %2225 = vmatprep.mubr.bf16.mxu1 %v12027_v54  ;;  %12034 = vst [vmem:[#allocation64_spill] sm:$0xff] %v7808_v61  ;;  %v7835_v50 = vcombine.high %v1047_v45, %v1051_v0  ;;  %v1055_v30 = vld [vmem:[%s11223_s3 + $0x158] sm:$0xff] }
  0xc9   :  { %12033 = vst [vmem:[#allocation63_spill] sm:$0xff] %v7806_v12  ;;  %12036 = vst [vmem:[#allocation66_spill] sm:$0xff] %v7826_v5 }
  0xca   :  { %2155 = vmatpush1.bf16.msra.mxu0 %v7776_v43  ;;  %2196 = vmatpush1.bf16.msra.mxu1 %v7780_v16  ;;  %v7832_v16 = vcombine.high %v1046_v58, %v1050_v15  ;;  %12039 = vst [vmem:[#allocation69_spill] sm:$0xff] %v7835_v50 }
  0xcb   :  { %2156 = vmatprep.subr.bf16.mxu0 %v7782_v13  ;;  %2197 = vmatprep.subr.bf16.mxu1 %v7785_v4  ;;  %v7830_v4 = vcombine.low %v1039_v63, %v1043_v22  ;;  %v1059_v63 = vld [vmem:[%s11223_s3 + $0x178] sm:$0xff]  ;;  %v7850_v22 = vcombine.low %v1046_v58, %v1050_v15  ;;  %v1066_v58 = vld [vmem:[%s11223_s3 + $0x1b0] sm:$0xff] }
  0xcc   :  { %12038 = vst [vmem:[#allocation68_spill] sm:$0xff] %v7832_v16  ;;  %v7859_v42 = vcombine.high %v1055_v30, %v1059_v63  ;;  %v1063_v15 = vld [vmem:[%s11223_s3 + $0x198] sm:$0xff] }
  0xcd   :  { %12037 = vst [vmem:[#allocation67_spill] sm:$0xff] %v7830_v4  ;;  %12040 = vst [vmem:[#allocation70_spill] sm:$0xff] %v7850_v22 }
  0xce   :  { %2157 = vmatpush1.bf16.msra.mxu0 %v7802_v31  ;;  %2198 = vmatpush1.bf16.msra.mxu1 %v7806_v12  ;;  %v7856_v12 = vcombine.high %v1054_v48, %v1058_v2  ;;  %12043 = vst [vmem:[#allocation73_spill] sm:$0xff] %v7859_v42 }
  0xcf   :  { %2158 = vmatprep.subr.bf16.mxu0 %v7808_v61  ;;  %2199 = vmatprep.subr.bf16.mxu1 %v7811_v60  ;;  %v7854_v60 = vcombine.low %v1047_v45, %v1051_v0  ;;  %v1067_v45 = vld [vmem:[%s11223_s3 + $0x1b8] sm:$0xff]  ;;  %v7874_v0 = vcombine.low %v1054_v48, %v1058_v2  ;;  %v1074_v48 = vld [vmem:[%s11223_s3 + $0x1f0] sm:$0xff] }
  0xd0   :  { %12042 = vst [vmem:[#allocation72_spill] sm:$0xff] %v7856_v12  ;;  %v7883_v35 = vcombine.high %v1063_v15, %v1067_v45  ;;  %v1071_v2 = vld [vmem:[%s11223_s3 + $0x1d8] sm:$0xff] }
  0xd1   :  { %12041 = vst [vmem:[#allocation71_spill] sm:$0xff] %v7854_v60  ;;  %12044 = vst [vmem:[#allocation74_spill] sm:$0xff] %v7874_v0 }
  0xd2   :  { %2159 = vmatpush1.bf16.msra.mxu0 %v7826_v5  ;;  %2200 = vmatpush1.bf16.msra.mxu1 %v7830_v4  ;;  %v7880_v4 = vcombine.high %v1062_v40, %v1066_v58  ;;  %12047 = vst [vmem:[#allocation77_spill] sm:$0xff] %v7883_v35 }
  0xd3   :  { %2160 = vmatprep.subr.bf16.mxu0 %v7832_v16  ;;  %2201 = vmatprep.subr.bf16.mxu1 %v7835_v50  ;;  %v7878_v50 = vcombine.low %v1055_v30, %v1059_v63  ;;  %v1075_v30 = vld [vmem:[%s11223_s3 + $0x1f8] sm:$0xff]  ;;  %v7898_v63 = vcombine.low %v1062_v40, %v1066_v58  ;;  %v1082_v40 = vld [vmem:[%s11223_s3 + $0x230] sm:$0xff] }
  0xd4   :  { %12046 = vst [vmem:[#allocation76_spill] sm:$0xff] %v7880_v4  ;;  %v7907_v27 = vcombine.high %v1071_v2, %v1075_v30  ;;  %v1079_v58 = vld [vmem:[%s11223_s3 + $0x218] sm:$0xff] }
  0xd5   :  { %12045 = vst [vmem:[#allocation75_spill] sm:$0xff] %v7878_v50  ;;  %12048 = vst [vmem:[#allocation78_spill] sm:$0xff] %v7898_v63 }
  0xd6   :  { %2161 = vmatpush1.bf16.msra.mxu0 %v7850_v22  ;;  %2202 = vmatpush1.bf16.msra.mxu1 %v7854_v60  ;;  %v7904_v60 = vcombine.high %v1070_v33, %v1074_v48  ;;  %12051 = vst [vmem:[#allocation81_spill] sm:$0xff] %v7907_v27 }
  0xd7   :  { %2162 = vmatprep.subr.bf16.mxu0 %v7856_v12  ;;  %2203 = vmatprep.subr.bf16.mxu1 %v7859_v42  ;;  %v7902_v42 = vcombine.low %v1063_v15, %v1067_v45  ;;  %v1083_v15 = vld [vmem:[%s11223_s3 + $0x238] sm:$0xff]  ;;  %v7922_v45 = vcombine.low %v1070_v33, %v1074_v48  ;;  %v1090_v33 = vld [vmem:[%s11223_s3 + $0x270] sm:$0xff] }
  0xd8   :  { %12050 = vst [vmem:[#allocation80_spill] sm:$0xff] %v7904_v60  ;;  %v7931_v19 = vcombine.high %v1079_v58, %v1083_v15  ;;  %v1087_v48 = vld [vmem:[%s11223_s3 + $0x258] sm:$0xff] }
  0xd9   :  { %12049 = vst [vmem:[#allocation79_spill] sm:$0xff] %v7902_v42  ;;  %12052 = vst [vmem:[#allocation82_spill] sm:$0xff] %v7922_v45 }
  0xda   :  { %2163 = vmatpush1.bf16.msra.mxu0 %v7874_v0  ;;  %2204 = vmatpush1.bf16.msra.mxu1 %v7878_v50  ;;  %v7928_v50 = vcombine.high %v1078_v25, %v1082_v40  ;;  %12055 = vst [vmem:[#allocation85_spill] sm:$0xff] %v7931_v19 }
  0xdb   :  { %2164 = vmatprep.subr.bf16.mxu0 %v7880_v4  ;;  %2205 = vmatprep.subr.bf16.mxu1 %v7883_v35  ;;  %v7926_v35 = vcombine.low %v1071_v2, %v1075_v30  ;;  %v1091_v2 = vld [vmem:[%s11223_s3 + $0x278] sm:$0xff]  ;;  %v7946_v30 = vcombine.low %v1078_v25, %v1082_v40  ;;  %v1098_v25 = vld [vmem:[%s11223_s3 + $0x2b0] sm:$0xff] }
  0xdc   :  { %12054 = vst [vmem:[#allocation84_spill] sm:$0xff] %v7928_v50  ;;  %v7955_v11 = vcombine.high %v1087_v48, %v1091_v2  ;;  %v1095_v40 = vld [vmem:[%s11223_s3 + $0x298] sm:$0xff] }
  0xdd   :  { %12053 = vst [vmem:[#allocation83_spill] sm:$0xff] %v7926_v35  ;;  %12056 = vst [vmem:[#allocation86_spill] sm:$0xff] %v7946_v30 }
  0xde   :  { %2165 = vmatpush1.bf16.msra.mxu0 %v7898_v63  ;;  %2206 = vmatpush1.bf16.msra.mxu1 %v7902_v42  ;;  %v7952_v42 = vcombine.high %v1086_v18, %v1090_v33  ;;  %12059 = vst [vmem:[#allocation89_spill] sm:$0xff] %v7955_v11 }
  0xdf   :  { %2166 = vmatprep.subr.bf16.mxu0 %v7904_v60  ;;  %2207 = vmatprep.subr.bf16.mxu1 %v7907_v27  ;;  %v7950_v27 = vcombine.low %v1079_v58, %v1083_v15  ;;  %v1094_v60 = vld [vmem:[%s11223_s3 + $0x290] sm:$0xff]  ;;  %v1099_v58 = vld [vmem:[%s11223_s3 + $0x2b8] sm:$0xff]  ;;  %v7970_v15 = vcombine.low %v1086_v18, %v1090_v33 }
  0xe0   :  { %12058 = vst [vmem:[#allocation88_spill] sm:$0xff] %v7952_v42  ;;  %v1106_v18 = vld [vmem:[%s11223_s3 + $0x2f0] sm:$0xff]  ;;  %v1103_v33 = vld [vmem:[%s11223_s3 + $0x2d8] sm:$0xff] }
  0xe1   :  { %12057 = vst [vmem:[#allocation87_spill] sm:$0xff] %v7950_v27  ;;  %12060 = vst [vmem:[#allocation90_spill] sm:$0xff] %v7970_v15 }
  0xe2   :  { %2167 = vmatpush1.bf16.msra.mxu0 %v7922_v45  ;;  %2208 = vmatpush1.bf16.msra.mxu1 %v7926_v35  ;;  %v7976_v35 = vcombine.high %v1094_v60, %v1098_v25  ;;  %v1102_v45 = vld [vmem:[%s11223_s3 + $0x2d0] sm:$0xff] }
  0xe3   :  { %2168 = vmatprep.subr.bf16.mxu0 %v7928_v50  ;;  %2209 = vmatprep.subr.bf16.mxu1 %v7931_v19  ;;  %v7974_v19 = vcombine.low %v1087_v48, %v1091_v2  ;;  %v7979_v50 = vcombine.high %v1095_v40, %v1099_v58  ;;  %v1107_v48 = vld [vmem:[%s11223_s3 + $0x2f8] sm:$0xff]  ;;  %v7994_v2 = vcombine.low %v1094_v60, %v1098_v25  ;;  %v1114_v60 = vld [vmem:[%s11223_s3 + $0x330] sm:$0xff] }
  0xe4   :  { %12062 = vst [vmem:[#allocation92_spill] sm:$0xff] %v7976_v35  ;;  %v1111_v25 = vld [vmem:[%s11223_s3 + $0x318] sm:$0xff] }
  0xe5   :  { %12061 = vst [vmem:[#allocation91_spill] sm:$0xff] %v7974_v19  ;;  %12063 = vst [vmem:[#allocation93_spill] sm:$0xff] %v7979_v50 }
  0xe6   :  { %2169 = vmatpush1.bf16.msra.mxu0 %v7946_v30  ;;  %2210 = vmatpush1.bf16.msra.mxu1 %v7950_v27  ;;  %12064 = vst [vmem:[#allocation94_spill] sm:$0xff] %v7994_v2  ;;  %v8000_v27 = vcombine.high %v1102_v45, %v1106_v18  ;;  %v1110_v30 = vld [vmem:[%s11223_s3 + $0x310] sm:$0xff] }
  0xe7   :  { %2170 = vmatprep.subr.bf16.mxu0 %v7952_v42  ;;  %2211 = vmatprep.subr.bf16.mxu1 %v7955_v11  ;;  %v7998_v11 = vcombine.low %v1095_v40, %v1099_v58  ;;  %v8003_v42 = vcombine.high %v1103_v33, %v1107_v48  ;;  %v1115_v40 = vld [vmem:[%s11223_s3 + $0x338] sm:$0xff]  ;;  %v8018_v58 = vcombine.low %v1102_v45, %v1106_v18  ;;  %v1122_v45 = vld [vmem:[%s11223_s3 + $0x370] sm:$0xff] }
  0xe8   :  { %12066 = vst [vmem:[#allocation96_spill] sm:$0xff] %v8000_v27  ;;  %v1119_v18 = vld [vmem:[%s11223_s3 + $0x358] sm:$0xff] }
  0xe9   :  { %12065 = vst [vmem:[#allocation95_spill] sm:$0xff] %v7998_v11  ;;  %12067 = vst [vmem:[#allocation97_spill] sm:$0xff] %v8003_v42 }
  0xea   :  { %2171 = vmatpush1.bf16.msra.mxu0 %v7970_v15  ;;  %2212 = vmatpush1.bf16.msra.mxu1 %v7974_v19  ;;  %12068 = vst [vmem:[#allocation98_spill] sm:$0xff] %v8018_v58  ;;  %v8024_v19 = vcombine.high %v1110_v30, %v1114_v60  ;;  %v1118_v15 = vld [vmem:[%s11223_s3 + $0x350] sm:$0xff] }
  0xeb   :  { %2172 = vmatprep.subr.bf16.mxu0 %v7976_v35  ;;  %2213 = vmatprep.subr.bf16.mxu1 %v7979_v50  ;;  %v8022_v50 = vcombine.low %v1103_v33, %v1107_v48  ;;  %v8027_v35 = vcombine.high %v1111_v25, %v1115_v40  ;;  %v1123_v33 = vld [vmem:[%s11223_s3 + $0x378] sm:$0xff]  ;;  %v8042_v48 = vcombine.low %v1110_v30, %v1114_v60  ;;  %v1130_v30 = vld [vmem:[%s11223_s3 + $0x3b0] sm:$0xff] }
  0xec   :  { %12070 = vst [vmem:[#allocation100_spill] sm:$0xff] %v8024_v19  ;;  %v1127_v60 = vld [vmem:[%s11223_s3 + $0x398] sm:$0xff] }
  0xed   :  { %12069 = vst [vmem:[#allocation99_spill] sm:$0xff] %v8022_v50  ;;  %12071 = vst [vmem:[#allocation101_spill] sm:$0xff] %v8027_v35 }
  0xee   :  { %2173 = vmatpush1.bf16.msra.mxu0 %v7994_v2  ;;  %2214 = vmatpush1.bf16.msra.mxu1 %v7998_v11  ;;  %12072 = vst [vmem:[#allocation102_spill] sm:$0xff] %v8042_v48  ;;  %v8048_v11 = vcombine.high %v1118_v15, %v1122_v45  ;;  %v1126_v2 = vld [vmem:[%s11223_s3 + $0x390] sm:$0xff] }
  0xef   :  { %2174 = vmatprep.subr.bf16.mxu0 %v8000_v27  ;;  %2215 = vmatprep.subr.bf16.mxu1 %v8003_v42  ;;  %v8046_v42 = vcombine.low %v1111_v25, %v1115_v40  ;;  %v8051_v27 = vcombine.high %v1119_v18, %v1123_v33  ;;  %v1131_v25 = vld [vmem:[%s11223_s3 + $0x3b8] sm:$0xff]  ;;  %v8066_v40 = vcombine.low %v1118_v15, %v1122_v45  ;;  %v1138_v15 = vld [vmem:[%s11223_s3 + $0x3f0] sm:$0xff] }
  0xf0   :  { %12074 = vst [vmem:[#allocation104_spill] sm:$0xff] %v8048_v11  ;;  %v1135_v45 = vld [vmem:[%s11223_s3 + $0x3d8] sm:$0xff] }
  0xf1   :  { %12073 = vst [vmem:[#allocation103_spill] sm:$0xff] %v8046_v42  ;;  %12075 = vst [vmem:[#allocation105_spill] sm:$0xff] %v8051_v27 }
  0xf2   :  { %2175 = vmatpush1.bf16.msra.mxu0 %v8018_v58  ;;  %2216 = vmatpush1.bf16.msra.mxu1 %v8022_v50  ;;  %12076 = vst [vmem:[#allocation106_spill] sm:$0xff] %v8066_v40  ;;  %v8072_v50 = vcombine.high %v1126_v2, %v1130_v30  ;;  %v1134_v58 = vld [vmem:[%s11223_s3 + $0x3d0] sm:$0xff] }
  0xf3   :  { %2176 = vmatprep.subr.bf16.mxu0 %v8024_v19  ;;  %2217 = vmatprep.subr.bf16.mxu1 %v8027_v35  ;;  %v8070_v35 = vcombine.low %v1119_v18, %v1123_v33  ;;  %v8075_v19 = vcombine.high %v1127_v60, %v1131_v25  ;;  %v1139_v18 = vld [vmem:[%s11223_s3 + $0x3f8] sm:$0xff]  ;;  %v8090_v33 = vcombine.low %v1126_v2, %v1130_v30 }
  0xf4   :  { %12078 = vst [vmem:[#allocation108_spill] sm:$0xff] %v8072_v50  ;;  %v8106_v2 = vcombine.low %v1135_v45, %v1139_v18 }
  0xf5   :  { %12077 = vst [vmem:[#allocation107_spill] sm:$0xff] %v8070_v35  ;;  %12079 = vst [vmem:[#allocation109_spill] sm:$0xff] %v8075_v19 }
  0xf6   :  { %2177 = vmatpush1.bf16.msra.mxu0 %v8042_v48  ;;  %2218 = vmatpush1.bf16.msra.mxu1 %v8046_v42  ;;  %12080 = vst [vmem:[#allocation110_spill] sm:$0xff] %v8090_v33  ;;  %v8096_v42 = vcombine.high %v1134_v58, %v1138_v15  ;;  %v8102_v48 = vcombine.low %v1134_v58, %v1138_v15  ;;  %12085 = vst [vmem:[#allocation115_spill] sm:$0xff] %v8106_v2 }
  0xf7   :  { %2178 = vmatprep.subr.bf16.mxu0 %v8048_v11  ;;  %2219 = vmatprep.subr.bf16.mxu1 %v8051_v27  ;;  %v8094_v27 = vcombine.low %v1127_v60, %v1131_v25  ;;  %v8099_v11 = vcombine.high %v1135_v45, %v1139_v18 }
  0xf8   :  { %12082 = vst [vmem:[#allocation112_spill] sm:$0xff] %v8096_v42  ;;  %12084 = vst [vmem:[#allocation114_spill] sm:$0xff] %v8102_v48 }
  0xf9   :  { %12081 = vst [vmem:[#allocation111_spill] sm:$0xff] %v8094_v27  ;;  %12083 = vst [vmem:[#allocation113_spill] sm:$0xff] %v8099_v11 }
  0xfa   :  { %2179 = vmatpush1.bf16.msra.mxu0 %v8066_v40  ;;  %2220 = vmatpush1.bf16.msra.mxu1 %v8070_v35 }
  0xfb   :  { %2180 = vmatprep.subr.bf16.mxu0 %v8072_v50  ;;  %2221 = vmatprep.subr.bf16.mxu1 %v8075_v19 }
  0xfe   :  { %2181 = vmatpush1.bf16.msra.mxu0 %v8090_v33  ;;  %2222 = vmatpush1.bf16.msra.mxu1 %v8094_v27 }
  0xff   :  { %2182 = vmatprep.subr.bf16.mxu0 %v8096_v42  ;;  %2223 = vmatprep.subr.bf16.mxu1 %v8099_v11 }
 0x102   :  { %2183 = vmatpush1.bf16.msra.mxu0 %v8102_v48  ;;  %2224 = vmatpush1.bf16.msra.mxu1 %v8106_v2 }
 0x105   :  { %2185 = vmatmul.mubr.bf16.vlgmr.msra.gmra.mrb[12].mxu0 %v12027_v54  ;;  %2226 = vmatmul.mubr.bf16.vlgmr.msra.gmra.mrb[12].mxu1 %v12027_v54 }
 0x118   :  { %v882_v30 = vpop.f32.mrb[0].mxu0  ;;  %v923_v58 = vpop.f32.mrb[0].mxu1 }
 0x119   :  { %v884_v60 = vpop.f32.mrb[1].mxu0  ;;  %v925_v15 = vpop.f32.mrb[1].mxu1 }
 0x11a   :  { %v886_v25 = vpop.f32.mrb[2].mxu0  ;;  %v927_v19 = vpop.f32.mrb[2].mxu1 }
 0x11b   :  { %v887_v27 = vpop.f32.mrb[3].mxu0  ;;  %v928_v35 = vpop.f32.mrb[3].mxu1 }
 0x11c   :  { %v161_v27 = vlaneseq }
 0x11e   :  { %v8115_v19 = vshrl.u32 %v161_v27, 7 }
 0x120   :  { %12086 = vst [vmem:[#allocation116_spill] sm:$0xff] %v8115_v19  ;;  %v11410_v35 = vsub.s32 0, %v8115_v19  ;;  %v11411_v27 = vsub.s32 3, %v8115_v19 }
 0x158   :  { %v964_v45 = vpop.f32.mrb[4].mxu0  ;;  %v1005_v42 = vpop.f32.mrb[4].mxu1 }
 0x159   :  { %v966_v18 = vpop.f32.mrb[5].mxu0  ;;  %v8113_v33 = vpop.f32.mrb[5].mxu1 }
 0x15a   :  { %v968_v11 = vpop.f32.mrb[6].mxu0  ;;  %v1009_v2 = vpop.f32.mrb[6].mxu1 }
 0x15b   :  { %v969_v48 = vpop.f32.mrb[7].mxu0  ;;  %v1010_v50 = vpop.f32.mrb[7].mxu1  ;;  %v11413_v11 = vsub.s32 1, %v8115_v19 }
 0x15c   :  { %v159_v48 = vld [vmem:[%s11224_s2] sm:$0xff] }
 0x15d   :  { %v164_v50 = vrot.slane %v159_v48, %v11410_v35 }
 0x198   :  { %v2104_v40 = vpop.f32.mrb[8].mxu0  ;;  %v2145_v63 = vpop.f32.mrb[8].mxu1 }
 0x199   :  { %v2106_v54 = vpop.f32.mrb[9].mxu0  ;;  %v2147_v4 = vpop.f32.mrb[9].mxu1 }
 0x19a   :  { %v2108_v0 = vpop.f32.mrb[10].mxu0  ;;  %v2149_v25 = vpop.f32.mrb[10].mxu1 }
 0x19b   :  { %v2109_v12 = vpop.f32.mrb[11].mxu0  ;;  %v2150_v22 = vpop.f32.mrb[11].mxu1  ;;  %v168_v0 = vrot.slane %v159_v48, %v11413_v11 }
 0x19c   :  { %v11412_v12 = vsub.s32 2, %v8115_v19  ;;  %v8127_v22 = vadd.f32 %v882_v30, %v164_v50  ;;  %v176_v30 = vrot.slane %v159_v48, %v11411_v27  ;;  %v11429_v27 = vsub.s32 6, %v8115_v19 }
 0x19d   :  { %v8129_v2 = vadd.f32 %v884_v60, %v168_v0 }
 0x19e   :  { %12087 = vst [vmem:[#allocation117_spill] sm:$0xff] %v8127_v22  ;;  %v172_v25 = vrot.slane %v159_v48, %v11412_v12  ;;  %v8135_v16 = vadd.f32 %v2104_v40, %v8127_v22  ;;  %v8158_v12 = vadd.f32 %v925_v15, %v176_v30  ;;  %v12091_v22 = vsub.s32 4, %v8115_v19 }
 0x19f   :  { %12088 = vst [vmem:[#allocation118_spill] sm:$0xff] %v8129_v2  ;;  %v8138_v5 = vadd.f32 %v2106_v54, %v8129_v2  ;;  %v188_v30 = vrot.slane %v159_v48, %v11429_v27 }
 0x1a0   :  { %v8140_v35 = vadd.f32 %v923_v58, %v172_v25  ;;  %v2262_v60 = vmul.f32 %v8135_v16, %v8135_v16  ;;  %v2243_v40 = vsel %vm2242_vm0, %v8135_v16, 0.0  ;;  %v11428_v25 = vsub.s32 5, %v8115_v19  ;;  %12090 = vst [vmem:[#allocation120_spill] sm:$0xff] %v8158_v12 }
 0x1a1   :  { %v2263_v50 = vmul.f32 %v8138_v5, %v8138_v5  ;;  %v2244_v58 = vsel %vm2242_vm0, %v8138_v5, 0.0  ;;  %v180_v61 = vrot.slane %v159_v48, %v12091_v22  ;;  %v8168_v31 = vadd.f32 %v2147_v4, %v8158_v12 }
 0x1a2   :  { %12089 = vst [vmem:[#allocation119_spill] sm:$0xff] %v8140_v35  ;;  %v8152_v54 = vadd.f32 %v2145_v63, %v8140_v35  ;;  %v2270_v11 = vsel %vm2242_vm0, %v2262_v60, 0.0  ;;  %v2245_v0 = vadd.f32 %v2244_v58, %v2243_v40  ;;  %v11430_v63 = vsub.s32 7, %v8115_v19 }
 0x1a3   :  { %v2271_v2 = vsel %vm2242_vm0, %v2263_v50, 0.0  ;;  %v184_v15 = vrot.slane %v159_v48, %v11428_v25  ;;  %v8176_v22 = vadd.f32 %v964_v45, %v180_v61  ;;  %v2265_v4 = vmul.f32 %v8168_v31, %v8168_v31 }
 0x1a4   :  { %v2264_v35 = vmul.f32 %v8152_v54, %v8152_v54  ;;  %v2272_v60 = vadd.f32 %v2271_v2, %v2270_v11  ;;  %v2246_v50 = vsel %vm2242_vm0, %v8152_v54, 0.0  ;;  %v192_v58 = vrot.slane %v159_v48, %v11430_v63 }
 0x1a5   :  { %v2247_v40 = vadd.f32 %v2246_v50, %v2245_v0  ;;  %12092 = vst [vmem:[#allocation121_spill] sm:$0xff] %v8176_v22  ;;  %v8183_v12 = vadd.f32 %v966_v18, %v184_v15  ;;  %v8185_v25 = vadd.f32 %v1005_v42, %v188_v30  ;;  %v2248_v2 = vsel %vm2242_vm0, %v8168_v31, 0.0 }
 0x1a6   :  { %v2273_v13 = vsel %vm2242_vm0, %v2264_v35, 0.0  ;;  %v2275_v15 = vsel %vm2242_vm0, %v2265_v4, 0.0 }
 0x1a7   :  { %12093 = vst [vmem:[#allocation122_spill] sm:$0xff] %v8183_v12  ;;  %12094 = vst [vmem:[#allocation123_spill] sm:$0xff] %v8185_v25  ;;  %v2274_v27 = vadd.f32 %v2273_v13, %v2272_v60  ;;  %v2249_v48 = vadd.f32 %v2248_v2, %v2247_v40  ;;  %v8199_v13 = vadd.f32 %v8113_v33, %v192_v58 }
 0x1a9   :  { %12095 = vst [vmem:[#allocation124_spill] sm:$0xff] %v8199_v13  ;;  %v2276_v2 = vadd.f32 %v2275_v15, %v2274_v27 }
 0x1d8   :  { %v2186_v11 = vpop.f32.mrb[12].mxu0  ;;  %v2227_v45 = vpop.f32.mrb[12].mxu1 }
 0x1d9   :  { %v8190_v61 = vadd.f32 %v2186_v11, %v8176_v22  ;;  %v2188_v0 = vpop.f32.mrb[13].mxu0  ;;  %v8193_v35 = vadd.f32 %v2227_v45, %v8185_v25  ;;  %v2229_v18 = vpop.f32.mrb[13].mxu1  ;;  %v1169_v22 = vld [vmem:[%s11225_s4 + $0xe8] sm:$0xff] }
 0x1da   :  { %v8196_v50 = vadd.f32 %v2188_v0, %v8183_v12  ;;  %v2190_v42 = vpop.f32.mrb[14].mxu0  ;;  %v2231_v11 = vpop.f32.mrb[14].mxu1 }
 0x1db   :  { %v2250_v30 = vsel %vm2242_vm0, %v8190_v61, 0.0  ;;  %v2266_v60 = vmul.f32 %v8190_v61, %v8190_v61  ;;  %v2191_v40 = vpop.f32.mrb[15].mxu0  ;;  %v2232_v0 = vpop.f32.mrb[15].mxu1  ;;  %v2268_v4 = vmul.f32 %v8193_v35, %v8193_v35  ;;  %v8214_v42 = vadd.f32 %v2229_v18, %v8199_v13 }
 0x1dc   :  { %v2267_v45 = vmul.f32 %v8196_v50, %v8196_v50  ;;  %v2251_v63 = vadd.f32 %v2250_v30, %v2249_v48  ;;  %v2252_v33 = vsel %vm2242_vm0, %v8196_v50, 0.0  ;;  %v2254_v15 = vsel %vm2242_vm0, %v8193_v35, 0.0 }
 0x1dd   :  { %v2277_v58 = vsel %vm2242_vm0, %v2266_v60, 0.0  ;;  %v2256_v30 = vsel %vm2242_vm0, %v8214_v42, 0.0  ;;  %v2269_v60 = vmul.f32 %v8214_v42, %v8214_v42  ;;  %v2281_v0 = vsel %vm2242_vm0, %v2268_v4, 0.0 }
 0x1de   :  { %v2253_v25 = vadd.f32 %v2252_v33, %v2251_v63  ;;  %v2278_v40 = vadd.f32 %v2277_v58, %v2276_v2  ;;  %v2279_v27 = vsel %vm2242_vm0, %v2267_v45, 0.0  ;;  %v1144_v45 = vld [vmem:[%s11225_s4 + $0x20] sm:$0xff]  ;;  %v1141_v33 = vld [vmem:[%s11225_s4 + $0x8] sm:$0xff] }
 0x1df   :  { %v2283_v63 = vsel %vm2242_vm0, %v2269_v60, 0.0  ;;  %v1153_v60 = vld [vmem:[%s11225_s4 + $0x68] sm:$0xff] }
 0x1e0   :  { %v2255_v11 = vadd.f32 %v2254_v15, %v2253_v25  ;;  %v2280_v48 = vadd.f32 %v2279_v27, %v2278_v40  ;;  %v1140_v25 = vld [vmem:[%s11225_s4] sm:$0xff] }
 0x1e1   :  { %v8234_v58 = vcombine.high %v1140_v25, %v1144_v45  ;;  %v8239_v4 = vcombine.low %v1140_v25, %v1144_v45  ;;  %v1148_v15 = vld [vmem:[%s11225_s4 + $0x40] sm:$0xff]  ;;  %v1157_v45 = vld [vmem:[%s11225_s4 + $0x88] sm:$0xff] }
 0x1e2   :  { %v2257_v12 = vadd.f32 %v2256_v30, %v2255_v11  ;;  %v2282_v18 = vadd.f32 %v2281_v0, %v2280_v48  ;;  %v1152_v11 = vld [vmem:[%s11225_s4 + $0x60] sm:$0xff]  ;;  %v1149_v48 = vld [vmem:[%s11225_s4 + $0x48] sm:$0xff] }
 0x1e3   :  { %12096 = vst [vmem:[#allocation125_spill] sm:$0xff] %v8234_v58  ;;  %12097 = vst [vmem:[#allocation126_spill] sm:$0xff] %v8239_v4  ;;  %3681 = vmatprep.subr.bf16.mxu0 %v8234_v58  ;;  %v8258_v30 = vcombine.high %v1148_v15, %v1152_v11  ;;  %v8263_v0 = vcombine.low %v1148_v15, %v1152_v11  ;;  %v1160_v25 = vld [vmem:[%s11225_s4 + $0xa0] sm:$0xff]  ;;  %v1161_v15 = vld [vmem:[%s11225_s4 + $0xa8] sm:$0xff] }
 0x1e4   :  { %2258 = vadd.xlane.f32.xlu0 %v2257_v12  ;;  %v2284_v2 = vadd.f32 %v2283_v63, %v2282_v18  ;;  %v1145_v12 = vld [vmem:[%s11225_s4 + $0x28] sm:$0xff]  ;;  %3682 = vmatpush1.bf16.msra.mxu0 %v8239_v4  ;;  %v8265_v18 = vcombine.low %v1149_v48, %v1153_v60  ;;  %v8267_v63 = vcombine.high %v1149_v48, %v1153_v60  ;;  %v1164_v11 = vld [vmem:[%s11225_s4 + $0xc0] sm:$0xff] }
 0x1e5   :  { %v8241_v40 = vcombine.low %v1141_v33, %v1145_v12  ;;  %v8243_v27 = vcombine.high %v1141_v33, %v1145_v12  ;;  %12100 = vst [vmem:[#allocation129_spill] sm:$0xff] %v8258_v30  ;;  %12101 = vst [vmem:[#allocation130_spill] sm:$0xff] %v8263_v0  ;;  %3683 = vmatprep.subr.bf16.mxu0 %v8258_v30  ;;  %v1168_v48 = vld [vmem:[%s11225_s4 + $0xe0] sm:$0xff]  ;;  %v8295_v60 = vcombine.low %v1157_v45, %v1161_v15 }
 0x1e6   :  { %12102 = vst [vmem:[#allocation131_spill] sm:$0xff] %v8265_v18  ;;  %12103 = vst [vmem:[#allocation132_spill] sm:$0xff] %v8267_v63  ;;  %v8297_v13 = vcombine.high %v1157_v45, %v1161_v15  ;;  %v1176_v45 = vld [vmem:[%s11225_s4 + $0x120] sm:$0xff]  ;;  %v1173_v15 = vld [vmem:[%s11225_s4 + $0x108] sm:$0xff] }
 0x1e7   :  { %12098 = vst [vmem:[#allocation127_spill] sm:$0xff] %v8241_v40  ;;  %12099 = vst [vmem:[#allocation128_spill] sm:$0xff] %v8243_v27  ;;  %3763 = vmatprep.subr.bf16.mxu1 %v8243_v27  ;;  %v8324_v27 = vcombine.low %v1164_v11, %v1168_v48 }
 0x1e8   :  { %2285 = vadd.xlane.f32.xlu0 %v2284_v2  ;;  %3764 = vmatpush1.bf16.msra.mxu1 %v8241_v40  ;;  %v1156_v2 = vld [vmem:[%s11225_s4 + $0x80] sm:$0xff]  ;;  %12106 = vst [vmem:[#allocation135_spill] sm:$0xff] %v8295_v60  ;;  %12107 = vst [vmem:[#allocation136_spill] sm:$0xff] %v8297_v13  ;;  %v1177_v40 = vld [vmem:[%s11225_s4 + $0x128] sm:$0xff] }
 0x1e9   :  { %3765 = vmatprep.subr.bf16.mxu1 %v8267_v63  ;;  %3684 = vmatpush1.bf16.msra.mxu0 %v8263_v0  ;;  %v8281_v33 = vcombine.low %v1156_v2, %v1160_v25  ;;  %v8283_v12 = vcombine.high %v1156_v2, %v1160_v25  ;;  %v8299_v2 = vcombine.high %v1164_v11, %v1168_v48  ;;  %v1165_v25 = vld [vmem:[%s11225_s4 + $0xc8] sm:$0xff]  ;;  %v1180_v0 = vld [vmem:[%s11225_s4 + $0x140] sm:$0xff] }
 0x1ea   :  { %v8308_v63 = vcombine.high %v1165_v25, %v1169_v22  ;;  %12110 = vst [vmem:[#allocation139_spill] sm:$0xff] %v8324_v27  ;;  %v8328_v19 = vcombine.low %v1165_v25, %v1169_v22  ;;  %v1184_v11 = vld [vmem:[%s11225_s4 + $0x160] sm:$0xff]  ;;  %v1181_v48 = vld [vmem:[%s11225_s4 + $0x148] sm:$0xff] }
 0x1eb   :  { %12104 = vst [vmem:[#allocation133_spill] sm:$0xff] %v8281_v33  ;;  %12105 = vst [vmem:[#allocation134_spill] sm:$0xff] %v8283_v12  ;;  %3685 = vmatprep.subr.bf16.mxu0 %v8283_v12  ;;  %v1185_v22 = vld [vmem:[%s11225_s4 + $0x168] sm:$0xff] }
 0x1ec   :  { %3766 = vmatpush1.bf16.msra.mxu1 %v8265_v18  ;;  %12108 = vst [vmem:[#allocation137_spill] sm:$0xff] %v8299_v2  ;;  %12109 = vst [vmem:[#allocation138_spill] sm:$0xff] %v8308_v63  ;;  %v1172_v18 = vld [vmem:[%s11225_s4 + $0x100] sm:$0xff] }
 0x1ed   :  { %3767 = vmatprep.subr.bf16.mxu1 %v8297_v13  ;;  %3686 = vmatpush1.bf16.msra.mxu0 %v8281_v33  ;;  %12111 = vst [vmem:[#allocation140_spill] sm:$0xff] %v8328_v19  ;;  %v8330_v12 = vcombine.high %v1172_v18, %v1176_v45  ;;  %v8333_v13 = vcombine.high %v1173_v15, %v1177_v40  ;;  %v1188_v33 = vld [vmem:[%s11225_s4 + $0x180] sm:$0xff] }
 0x1ee   :  { %3687 = vmatprep.subr.bf16.mxu0 %v8299_v2  ;;  %v8348_v25 = vcombine.low %v1172_v18, %v1176_v45  ;;  %v8357_v2 = vcombine.high %v1181_v48, %v1185_v22  ;;  %v1192_v18 = vld [vmem:[%s11225_s4 + $0x1a0] sm:$0xff]  ;;  %v1189_v45 = vld [vmem:[%s11225_s4 + $0x188] sm:$0xff] }
 0x1ef   :  { %12112 = vst [vmem:[#allocation141_spill] sm:$0xff] %v8330_v12  ;;  %12113 = vst [vmem:[#allocation142_spill] sm:$0xff] %v8333_v13 }
 0x1f0   :  { %3768 = vmatpush1.bf16.msra.mxu1 %v8295_v60  ;;  %12114 = vst [vmem:[#allocation143_spill] sm:$0xff] %v8348_v25  ;;  %v8354_v60 = vcombine.high %v1180_v0, %v1184_v11  ;;  %12117 = vst [vmem:[#allocation146_spill] sm:$0xff] %v8357_v2 }
 0x1f1   :  { %3769 = vmatprep.subr.bf16.mxu1 %v8308_v63  ;;  %3688 = vmatpush1.bf16.msra.mxu0 %v8324_v27  ;;  %v8352_v63 = vcombine.low %v1173_v15, %v1177_v40  ;;  %v1193_v40 = vld [vmem:[%s11225_s4 + $0x1a8] sm:$0xff]  ;;  %v8372_v15 = vcombine.low %v1180_v0, %v1184_v11  ;;  %v1196_v27 = vld [vmem:[%s11225_s4 + $0x1c0] sm:$0xff] }
 0x1f2   :  { %3689 = vmatprep.subr.bf16.mxu0 %v8330_v12  ;;  %12116 = vst [vmem:[#allocation145_spill] sm:$0xff] %v8354_v60  ;;  %v8381_v12 = vcombine.high %v1189_v45, %v1193_v40  ;;  %v1200_v0 = vld [vmem:[%s11225_s4 + $0x1e0] sm:$0xff]  ;;  %v1197_v11 = vld [vmem:[%s11225_s4 + $0x1c8] sm:$0xff] }
 0x1f3   :  { %12115 = vst [vmem:[#allocation144_spill] sm:$0xff] %v8352_v63  ;;  %12118 = vst [vmem:[#allocation147_spill] sm:$0xff] %v8372_v15 }
 0x1f4   :  { %3770 = vmatpush1.bf16.msra.mxu1 %v8328_v19  ;;  %v8378_v19 = vcombine.high %v1188_v33, %v1192_v18  ;;  %12121 = vst [vmem:[#allocation150_spill] sm:$0xff] %v8381_v12 }
 0x1f5   :  { %3771 = vmatprep.subr.bf16.mxu1 %v8333_v13  ;;  %3690 = vmatpush1.bf16.msra.mxu0 %v8348_v25  ;;  %v8376_v13 = vcombine.low %v1181_v48, %v1185_v22  ;;  %v1201_v48 = vld [vmem:[%s11225_s4 + $0x1e8] sm:$0xff]  ;;  %v8396_v22 = vcombine.low %v1188_v33, %v1192_v18  ;;  %v1204_v25 = vld [vmem:[%s11225_s4 + $0x200] sm:$0xff] }
 0x1f6   :  { %3691 = vmatprep.subr.bf16.mxu0 %v8354_v60  ;;  %12120 = vst [vmem:[#allocation149_spill] sm:$0xff] %v8378_v19  ;;  %v8405_v60 = vcombine.high %v1197_v11, %v1201_v48  ;;  %v1208_v33 = vld [vmem:[%s11225_s4 + $0x220] sm:$0xff]  ;;  %v1205_v18 = vld [vmem:[%s11225_s4 + $0x208] sm:$0xff] }
 0x1f7   :  { %12119 = vst [vmem:[#allocation148_spill] sm:$0xff] %v8376_v13  ;;  %12122 = vst [vmem:[#allocation151_spill] sm:$0xff] %v8396_v22 }
 0x1f8   :  { %3772 = vmatpush1.bf16.msra.mxu1 %v8352_v63  ;;  %v8402_v63 = vcombine.high %v1196_v27, %v1200_v0  ;;  %12125 = vst [vmem:[#allocation154_spill] sm:$0xff] %v8405_v60 }
 0x1f9   :  { %3773 = vmatprep.subr.bf16.mxu1 %v8357_v2  ;;  %3692 = vmatpush1.bf16.msra.mxu0 %v8372_v15  ;;  %v8400_v2 = vcombine.low %v1189_v45, %v1193_v40  ;;  %v1209_v45 = vld [vmem:[%s11225_s4 + $0x228] sm:$0xff]  ;;  %v8420_v40 = vcombine.low %v1196_v27, %v1200_v0  ;;  %v1212_v15 = vld [vmem:[%s11225_s4 + $0x240] sm:$0xff] }
 0x1fa   :  { %3693 = vmatprep.subr.bf16.mxu0 %v8378_v19  ;;  %12124 = vst [vmem:[#allocation153_spill] sm:$0xff] %v8402_v63  ;;  %v8429_v19 = vcombine.high %v1205_v18, %v1209_v45  ;;  %v1216_v27 = vld [vmem:[%s11225_s4 + $0x260] sm:$0xff]  ;;  %v1213_v0 = vld [vmem:[%s11225_s4 + $0x248] sm:$0xff] }
 0x1fb   :  { %12123 = vst [vmem:[#allocation152_spill] sm:$0xff] %v8400_v2  ;;  %12126 = vst [vmem:[#allocation155_spill] sm:$0xff] %v8420_v40 }
 0x1fc   :  { %3774 = vmatpush1.bf16.msra.mxu1 %v8376_v13  ;;  %v8426_v13 = vcombine.high %v1204_v25, %v1208_v33  ;;  %12129 = vst [vmem:[#allocation158_spill] sm:$0xff] %v8429_v19 }
 0x1fd   :  { %3775 = vmatprep.subr.bf16.mxu1 %v8381_v12  ;;  %3694 = vmatpush1.bf16.msra.mxu0 %v8396_v22  ;;  %v8424_v12 = vcombine.low %v1197_v11, %v1201_v48  ;;  %v1217_v11 = vld [vmem:[%s11225_s4 + $0x268] sm:$0xff]  ;;  %v8444_v48 = vcombine.low %v1204_v25, %v1208_v33  ;;  %v1220_v22 = vld [vmem:[%s11225_s4 + $0x280] sm:$0xff] }
 0x1fe   :  { %3695 = vmatprep.subr.bf16.mxu0 %v8402_v63  ;;  %12128 = vst [vmem:[#allocation157_spill] sm:$0xff] %v8426_v13  ;;  %v8453_v63 = vcombine.high %v1213_v0, %v1217_v11  ;;  %v1224_v25 = vld [vmem:[%s11225_s4 + $0x2a0] sm:$0xff]  ;;  %v1221_v33 = vld [vmem:[%s11225_s4 + $0x288] sm:$0xff] }
 0x1ff   :  { %12127 = vst [vmem:[#allocation156_spill] sm:$0xff] %v8424_v12  ;;  %12130 = vst [vmem:[#allocation159_spill] sm:$0xff] %v8444_v48 }
 0x200   :  { %3776 = vmatpush1.bf16.msra.mxu1 %v8400_v2  ;;  %v8450_v2 = vcombine.high %v1212_v15, %v1216_v27  ;;  %12133 = vst [vmem:[#allocation162_spill] sm:$0xff] %v8453_v63 }
 0x201   :  { %3777 = vmatprep.subr.bf16.mxu1 %v8405_v60  ;;  %3696 = vmatpush1.bf16.msra.mxu0 %v8420_v40  ;;  %v8448_v60 = vcombine.low %v1205_v18, %v1209_v45  ;;  %v1225_v18 = vld [vmem:[%s11225_s4 + $0x2a8] sm:$0xff]  ;;  %v8468_v45 = vcombine.low %v1212_v15, %v1216_v27  ;;  %v1228_v40 = vld [vmem:[%s11225_s4 + $0x2c0] sm:$0xff] }
 0x202   :  { %3697 = vmatprep.subr.bf16.mxu0 %v8426_v13  ;;  %12132 = vst [vmem:[#allocation161_spill] sm:$0xff] %v8450_v2  ;;  %v8477_v13 = vcombine.high %v1221_v33, %v1225_v18  ;;  %v1232_v15 = vld [vmem:[%s11225_s4 + $0x2e0] sm:$0xff]  ;;  %v1229_v27 = vld [vmem:[%s11225_s4 + $0x2c8] sm:$0xff] }
 0x203   :  { %12131 = vst [vmem:[#allocation160_spill] sm:$0xff] %v8448_v60  ;;  %12134 = vst [vmem:[#allocation163_spill] sm:$0xff] %v8468_v45 }
 0x204   :  { %3778 = vmatpush1.bf16.msra.mxu1 %v8424_v12  ;;  %v8474_v12 = vcombine.high %v1220_v22, %v1224_v25  ;;  %12137 = vst [vmem:[#allocation166_spill] sm:$0xff] %v8477_v13 }
 0x205   :  { %3779 = vmatprep.subr.bf16.mxu1 %v8429_v19  ;;  %3698 = vmatpush1.bf16.msra.mxu0 %v8444_v48  ;;  %v8472_v19 = vcombine.low %v1213_v0, %v1217_v11  ;;  %v1233_v0 = vld [vmem:[%s11225_s4 + $0x2e8] sm:$0xff]  ;;  %v8492_v11 = vcombine.low %v1220_v22, %v1224_v25  ;;  %v1236_v48 = vld [vmem:[%s11225_s4 + $0x300] sm:$0xff] }
 0x206   :  { %3699 = vmatprep.subr.bf16.mxu0 %v8450_v2  ;;  %12136 = vst [vmem:[#allocation165_spill] sm:$0xff] %v8474_v12  ;;  %v8501_v2 = vcombine.high %v1229_v27, %v1233_v0  ;;  %v1240_v22 = vld [vmem:[%s11225_s4 + $0x320] sm:$0xff]  ;;  %v1237_v25 = vld [vmem:[%s11225_s4 + $0x308] sm:$0xff] }
 0x207   :  { %12135 = vst [vmem:[#allocation164_spill] sm:$0xff] %v8472_v19  ;;  %12138 = vst [vmem:[#allocation167_spill] sm:$0xff] %v8492_v11 }
 0x208   :  { %3780 = vmatpush1.bf16.msra.mxu1 %v8448_v60  ;;  %v8498_v60 = vcombine.high %v1228_v40, %v1232_v15  ;;  %12141 = vst [vmem:[#allocation170_spill] sm:$0xff] %v8501_v2 }
 0x209   :  { %3781 = vmatprep.subr.bf16.mxu1 %v8453_v63  ;;  %3700 = vmatpush1.bf16.msra.mxu0 %v8468_v45  ;;  %v8496_v63 = vcombine.low %v1221_v33, %v1225_v18  ;;  %v1241_v33 = vld [vmem:[%s11225_s4 + $0x328] sm:$0xff]  ;;  %v8516_v18 = vcombine.low %v1228_v40, %v1232_v15  ;;  %v1244_v45 = vld [vmem:[%s11225_s4 + $0x340] sm:$0xff] }
 0x20a   :  { %3701 = vmatprep.subr.bf16.mxu0 %v8474_v12  ;;  %12140 = vst [vmem:[#allocation169_spill] sm:$0xff] %v8498_v60  ;;  %v8525_v12 = vcombine.high %v1237_v25, %v1241_v33  ;;  %v1248_v40 = vld [vmem:[%s11225_s4 + $0x360] sm:$0xff]  ;;  %v1245_v15 = vld [vmem:[%s11225_s4 + $0x348] sm:$0xff] }
 0x20b   :  { %12139 = vst [vmem:[#allocation168_spill] sm:$0xff] %v8496_v63  ;;  %12142 = vst [vmem:[#allocation171_spill] sm:$0xff] %v8516_v18 }
 0x20c   :  { %3782 = vmatpush1.bf16.msra.mxu1 %v8472_v19  ;;  %v8522_v19 = vcombine.high %v1236_v48, %v1240_v22  ;;  %12145 = vst [vmem:[#allocation174_spill] sm:$0xff] %v8525_v12 }
 0x20d   :  { %3783 = vmatprep.subr.bf16.mxu1 %v8477_v13  ;;  %3702 = vmatpush1.bf16.msra.mxu0 %v8492_v11  ;;  %v8520_v13 = vcombine.low %v1229_v27, %v1233_v0  ;;  %v1249_v27 = vld [vmem:[%s11225_s4 + $0x368] sm:$0xff]  ;;  %v8540_v0 = vcombine.low %v1236_v48, %v1240_v22  ;;  %v1252_v11 = vld [vmem:[%s11225_s4 + $0x380] sm:$0xff] }
 0x20e   :  { %3703 = vmatprep.subr.bf16.mxu0 %v8498_v60  ;;  %12144 = vst [vmem:[#allocation173_spill] sm:$0xff] %v8522_v19  ;;  %v8549_v60 = vcombine.high %v1245_v15, %v1249_v27  ;;  %v1256_v48 = vld [vmem:[%s11225_s4 + $0x3a0] sm:$0xff]  ;;  %v1253_v22 = vld [vmem:[%s11225_s4 + $0x388] sm:$0xff] }
 0x20f   :  { %12143 = vst [vmem:[#allocation172_spill] sm:$0xff] %v8520_v13  ;;  %12146 = vst [vmem:[#allocation175_spill] sm:$0xff] %v8540_v0 }
 0x210   :  { %3784 = vmatpush1.bf16.msra.mxu1 %v8496_v63  ;;  %v8546_v63 = vcombine.high %v1244_v45, %v1248_v40  ;;  %12149 = vst [vmem:[#allocation178_spill] sm:$0xff] %v8549_v60 }
 0x211   :  { %3785 = vmatprep.subr.bf16.mxu1 %v8501_v2  ;;  %3704 = vmatpush1.bf16.msra.mxu0 %v8516_v18  ;;  %v8544_v2 = vcombine.low %v1237_v25, %v1241_v33  ;;  %v1257_v25 = vld [vmem:[%s11225_s4 + $0x3a8] sm:$0xff]  ;;  %v8564_v33 = vcombine.low %v1244_v45, %v1248_v40  ;;  %v1260_v18 = vld [vmem:[%s11225_s4 + $0x3c0] sm:$0xff] }
 0x212   :  { %3705 = vmatprep.subr.bf16.mxu0 %v8522_v19  ;;  %12148 = vst [vmem:[#allocation177_spill] sm:$0xff] %v8546_v63  ;;  %v8573_v19 = vcombine.high %v1253_v22, %v1257_v25  ;;  %v1264_v45 = vld [vmem:[%s11225_s4 + $0x3e0] sm:$0xff]  ;;  %v1261_v40 = vld [vmem:[%s11225_s4 + $0x3c8] sm:$0xff] }
 0x213   :  { %12147 = vst [vmem:[#allocation176_spill] sm:$0xff] %v8544_v2  ;;  %12150 = vst [vmem:[#allocation179_spill] sm:$0xff] %v8564_v33 }
 0x214   :  { %3786 = vmatpush1.bf16.msra.mxu1 %v8520_v13  ;;  %v8570_v13 = vcombine.high %v1252_v11, %v1256_v48  ;;  %12153 = vst [vmem:[#allocation182_spill] sm:$0xff] %v8573_v19 }
 0x215   :  { %3787 = vmatprep.subr.bf16.mxu1 %v8525_v12  ;;  %3706 = vmatpush1.bf16.msra.mxu0 %v8540_v0  ;;  %v8568_v12 = vcombine.low %v1245_v15, %v1249_v27  ;;  %v1265_v15 = vld [vmem:[%s11225_s4 + $0x3e8] sm:$0xff]  ;;  %v8588_v27 = vcombine.low %v1252_v11, %v1256_v48  ;;  %v8600_v0 = vcombine.low %v1260_v18, %v1264_v45  ;;  %v1268_v48 = vld [vmem:[%s11225_s4 + $0x400] sm:$0xff] }
 0x216   :  { %3707 = vmatprep.subr.bf16.mxu0 %v8546_v63  ;;  %12152 = vst [vmem:[#allocation181_spill] sm:$0xff] %v8570_v13  ;;  %v8597_v63 = vcombine.high %v1261_v40, %v1265_v15  ;;  %v8604_v11 = vcombine.low %v1261_v40, %v1265_v15 }
 0x217   :  { %12151 = vst [vmem:[#allocation180_spill] sm:$0xff] %v8568_v12  ;;  %12154 = vst [vmem:[#allocation183_spill] sm:$0xff] %v8588_v27 }
 0x218   :  { %3788 = vmatpush1.bf16.msra.mxu1 %v8544_v2  ;;  %v8594_v2 = vcombine.high %v1260_v18, %v1264_v45  ;;  %12157 = vst [vmem:[#allocation186_spill] sm:$0xff] %v8597_v63  ;;  %12158 = vst [vmem:[#allocation187_spill] sm:$0xff] %v8600_v0  ;;  %v1269_v18 = vld [vmem:[%s11225_s4 + $0x408] sm:$0xff] }
 0x219   :  { %3789 = vmatprep.subr.bf16.mxu1 %v8549_v60  ;;  %3708 = vmatpush1.bf16.msra.mxu0 %v8564_v33  ;;  %v8592_v60 = vcombine.low %v1253_v22, %v1257_v25  ;;  %12159 = vst [vmem:[#allocation188_spill] sm:$0xff] %v8604_v11  ;;  %v1272_v22 = vld [vmem:[%s11225_s4 + $0x420] sm:$0xff]  ;;  %v1273_v45 = vld [vmem:[%s11225_s4 + $0x428] sm:$0xff] }
 0x21a   :  { %3709 = vmatprep.subr.bf16.mxu0 %v8570_v13  ;;  %12156 = vst [vmem:[#allocation185_spill] sm:$0xff] %v8594_v2  ;;  %v8618_v25 = vcombine.high %v1268_v48, %v1272_v22  ;;  %v8623_v40 = vcombine.low %v1268_v48, %v1272_v22  ;;  %v8625_v15 = vcombine.low %v1269_v18, %v1273_v45 }
 0x21b   :  { %12155 = vst [vmem:[#allocation184_spill] sm:$0xff] %v8592_v60 }
 0x21c   :  { %3790 = vmatpush1.bf16.msra.mxu1 %v8568_v12  ;;  %12160 = vst [vmem:[#allocation189_spill] sm:$0xff] %v8618_v25 }
 0x21d   :  { %3791 = vmatprep.subr.bf16.mxu1 %v8573_v19  ;;  %3710 = vmatpush1.bf16.msra.mxu0 %v8588_v27 }
 0x21e   :  { %3711 = vmatprep.subr.bf16.mxu0 %v8594_v2 }
 0x220   :  { %3792 = vmatpush1.bf16.msra.mxu1 %v8592_v60 }
 0x221   :  { %3793 = vmatprep.subr.bf16.mxu1 %v8597_v63  ;;  %3712 = vmatpush1.bf16.msra.mxu0 %v8600_v0  ;;  %v8627_v63 = vcombine.high %v1269_v18, %v1273_v45 }
 0x222   :  { %3722 = vmatprep.subr.bf16.mxu0 %v8618_v25 }
 0x223   :  { %12161 = vst [vmem:[#allocation190_spill] sm:$0xff] %v8627_v63 }
 0x224   :  { %3794 = vmatpush1.bf16.msra.mxu1 %v8604_v11 }
 0x225   :  { %3804 = vmatprep.subr.bf16.mxu1 %v8627_v63 }
 0x271   :  { %v2259_v60 = vpop.xlane.xlu0 %2258 }
 0x272   :  { %v2261_v19 = vmul.f32 0.0009765625, %v2259_v60 }
 0x274   :  { %v2288_v11 = vmul.f32 %v2261_v19, %v2261_v19  ;;  %v2292_v48 = vsub.f32 %v8138_v5, %v2261_v19  ;;  %v2294_v22 = vsub.f32 %v8168_v31, %v2261_v19  ;;  %v2291_v18 = vsub.f32 %v8135_v16, %v2261_v19 }
 0x275   :  { %v2286_v12 = vpop.xlane.xlu0 %2285  ;;  %v2293_v45 = vsub.f32 %v8152_v54, %v2261_v19  ;;  %v2295_v5 = vsub.f32 %v8190_v61, %v2261_v19  ;;  %v2298_v16 = vsub.f32 %v8214_v42, %v2261_v19 }
 0x276   :  { %v2287_v0 = vmul.f32 0.0009765625, %v2286_v12 }
 0x278   :  { %v2289_v2 = vsub.f32 %v2287_v0, %v2288_v11 }
 0x27a   :  { %v2290_v27 = vmax.f32 %v2289_v2, 0.0 }
 0x27c   :  { %v2299_v13 = vadd.f32 1e-05, %v2290_v27 }
 0x27e   :  { %6647 = vrsqrt.f32 %v2299_v13  ;;  %v2296_v13 = vsub.f32 %v8196_v50, %v2261_v19 }
 0x288   :  { %v6648_v33 = vpop.eup %6647 }
 0x289   :  { %v2302_v25 = vmul.f32 %v6648_v33, %v2292_v48  ;;  %v2304_v63 = vmul.f32 %v6648_v33, %v2294_v22  ;;  %v2301_v30 = vmul.f32 %v6648_v33, %v2291_v18  ;;  %v2303_v60 = vmul.f32 %v6648_v33, %v2293_v45 }
 0x28a   :  { %v2306_v31 = vmul.f32 %v6648_v33, %v2296_v13  ;;  %v2305_v0 = vmul.f32 %v6648_v33, %v2295_v5  ;;  %v2308_v54 = vmul.f32 %v6648_v33, %v2298_v16 }
 0x28b   :  { %v6179_v4 = vmul.f32 -1.442695, %v2302_v25  ;;  %v6181_v58 = vmul.f32 -1.442695, %v2304_v63  ;;  %v6178_v12 = vmul.f32 -1.442695, %v2301_v30  ;;  %v2297_v25 = vsub.f32 %v8193_v35, %v2261_v19 }
 0x28c   :  { %v6180_v2 = vmul.f32 -1.442695, %v2303_v60  ;;  %v6183_v27 = vmul.f32 -1.442695, %v2306_v31  ;;  %v6182_v11 = vmul.f32 -1.442695, %v2305_v0 }
 0x28d   :  { %6649 = vpow2.f32 %v6179_v4  ;;  %v2307_v50 = vmul.f32 %v6648_v33, %v2297_v25 }
 0x28e   :  { %6651 = vpow2.f32 %v6181_v58 }
 0x28f   :  { %6653 = vpow2.f32 %v6178_v12 }
 0x290   :  { %6655 = vpow2.f32 %v6180_v2 }
 0x291   :  { %6657 = vtanh.f32 %v2308_v54 }
 0x292   :  { %6659 = vpow2.f32 %v6183_v27 }
 0x293   :  { %6661 = vpow2.f32 %v6182_v11 }
 0x297   :  { %v6650_v63 = vpop.eup %6649 }
 0x298   :  { %v6652_v4 = vpop.eup %6651  ;;  %v2316_v30 = vadd.f32 1.0, %v6650_v63 }
 0x299   :  { %v2328_v58 = vadd.f32 1.0, %v6652_v4  ;;  %v6654_v61 = vpop.eup %6653 }
 0x29a   :  { %6663 = vrcp.f32 %v2316_v30  ;;  %v6656_v48 = vpop.eup %6655  ;;  %v2315_v42 = vadd.f32 1.0, %v6654_v61 }
 0x29b   :  { %6665 = vrcp.f32 %v2328_v58  ;;  %v2327_v22 = vadd.f32 1.0, %v6656_v48  ;;  %v6658_v18 = vpop.eup %6657  ;;  %v1280_v48 = vld [vmem:[%s11225_s4 + $0x460] sm:$0xff] }
 0x29c   :  { %6667 = vtanh.f32 %v2307_v50  ;;  %v6660_v45 = vpop.eup %6659  ;;  %v1276_v50 = vld [vmem:[%s11225_s4 + $0x440] sm:$0xff] }
 0x29d   :  { %6669 = vrcp.f32 %v2315_v42  ;;  %v6662_v19 = vpop.eup %6661  ;;  %v2340_v12 = vadd.f32 1.0, %v6660_v45  ;;  %v1277_v42 = vld [vmem:[%s11225_s4 + $0x448] sm:$0xff] }
 0x29e   :  { %6671 = vrcp.f32 %v2327_v22  ;;  %v2339_v0 = vadd.f32 1.0, %v6662_v19  ;;  %v1281_v22 = vld [vmem:[%s11225_s4 + $0x468] sm:$0xff]  ;;  %v8663_v19 = vcombine.high %v1276_v50, %v1280_v48 }
 0x29f   :  { %6673 = vrcp.f32 %v2340_v12  ;;  %v1288_v12 = vld [vmem:[%s11225_s4 + $0x4a0] sm:$0xff] }
 0x2a4   :  { %v6664_v35 = vpop.eup %6663 }
 0x2a5   :  { %v6666_v60 = vpop.eup %6665  ;;  %v2350_v2 = vmul.f32 %v6664_v35, %v6658_v18  ;;  %v8665_v35 = vcombine.high %v1277_v42, %v1281_v22 }
 0x2a6   :  { %v6668_v13 = vpop.eup %6667  ;;  %v2348_v33 = vmul.f32 0.0, %v6666_v60  ;;  %v1284_v60 = vld [vmem:[%s11225_s4 + $0x480] sm:$0xff] }
 0x2a7   :  { %v6670_v5 = vpop.eup %6669 }
 0x2a8   :  { %v6672_v31 = vpop.eup %6671  ;;  %v8639_v16 = vadd.f32 %v2350_v2, %v2348_v33  ;;  %v2349_v54 = vmul.f32 %v6670_v5, %v6668_v13  ;;  %v1285_v2 = vld [vmem:[%s11225_s4 + $0x488] sm:$0xff]  ;;  %v8683_v33 = vcombine.low %v1276_v50, %v1280_v48  ;;  %v8685_v5 = vcombine.low %v1277_v42, %v1281_v22  ;;  %v1300_v42 = vld [vmem:[%s11225_s4 + $0x500] sm:$0xff] }
 0x2a9   :  { %v2347_v27 = vmul.f32 0.0, %v6672_v31  ;;  %v6674_v25 = vpop.eup %6673  ;;  %v1289_v13 = vld [vmem:[%s11225_s4 + $0x4a8] sm:$0xff]  ;;  %v8689_v31 = vcombine.high %v1284_v60, %v1288_v12  ;;  %v1304_v22 = vld [vmem:[%s11225_s4 + $0x520] sm:$0xff] }
 0x2aa   :  { %6675 = vtanh.f32 %v8639_v16  ;;  %v8711_v50 = vcombine.low %v1285_v2, %v1289_v13 }
 0x2ab   :  { %v8642_v11 = vadd.f32 %v2349_v54, %v2347_v27  ;;  %6677 = vrcp.f32 %v2339_v0  ;;  %12162 = vst [vmem:[#allocation191_spill] sm:$0xff] %v8689_v31  ;;  %v8691_v0 = vcombine.high %v1285_v2, %v1289_v13  ;;  %v1292_v54 = vld [vmem:[%s11225_s4 + $0x4c0] sm:$0xff]  ;;  %v8739_v13 = vcombine.high %v1300_v42, %v1304_v22 }
 0x2ac   :  { %v1296_v27 = vld [vmem:[%s11225_s4 + $0x4e0] sm:$0xff]  ;;  %12165 = vst [vmem:[#allocation194_spill] sm:$0xff] %v8711_v50 }
 0x2ad   :  { %6679 = vtanh.f32 %v8642_v11  ;;  %12163 = vst [vmem:[#allocation192_spill] sm:$0xff] %v8691_v0  ;;  %12170 = vst [vmem:[#allocation199_spill] sm:$0xff] %v8739_v13 }
 0x2b4   :  { %v6676_v63 = vpop.eup %6675 }
 0x2b5   :  { %v2356_v4 = vmul.f32 %v6676_v63, %v6674_v25  ;;  %v6678_v30 = vpop.eup %6677  ;;  %v1293_v25 = vld [vmem:[%s11225_s4 + $0x4c8] sm:$0xff] }
 0x2b6   :  { %v1297_v63 = vld [vmem:[%s11225_s4 + $0x4e8] sm:$0xff] }
 0x2b7   :  { %v6680_v58 = vpop.eup %6679  ;;  %v8648_v61 = vpack.c.bf16 %v2356_v4, %v2356_v4  ;;  %v11573_v4 = vmov 0.0|0.0   ;;  %v8717_v48 = vcombine.high %v1293_v25, %v1297_v63  ;;  %v8735_v2 = vcombine.low %v1293_v25, %v1297_v63 }
 0x2b8   :  { %v2355_v18 = vmul.f32 %v6680_v58, %v6678_v30  ;;  %v8709_v30 = vcombine.low %v1284_v60, %v1288_v12  ;;  %v8715_v58 = vcombine.high %v1292_v54, %v1296_v27  ;;  %v1305_v60 = vld [vmem:[%s11225_s4 + $0x528] sm:$0xff]  ;;  %v8733_v12 = vcombine.low %v1292_v54, %v1296_v27 }
 0x2b9   :  { %3713 = vmatprep.mubr.bf16.mxu0 %v8648_v61  ;;  %3795 = vmatprep.mubr.bf16.mxu1 %v8648_v61  ;;  %12167 = vst [vmem:[#allocation196_spill] sm:$0xff] %v8717_v48  ;;  %12169 = vst [vmem:[#allocation198_spill] sm:$0xff] %v8735_v2  ;;  %v1309_v54 = vld [vmem:[%s11225_s4 + $0x548] sm:$0xff]  ;;  %v8757_v25 = vcombine.low %v1300_v42, %v1304_v22 }
 0x2ba   :  { %v8661_v45 = vpack.c.bf16 %v2355_v18, %v2355_v18  ;;  %12164 = vst [vmem:[#allocation193_spill] sm:$0xff] %v8709_v30  ;;  %12166 = vst [vmem:[#allocation195_spill] sm:$0xff] %v8715_v58  ;;  %v1301_v18 = vld [vmem:[%s11225_s4 + $0x508] sm:$0xff] }
 0x2bb   :  { %12168 = vst [vmem:[#allocation197_spill] sm:$0xff] %v8733_v12  ;;  %v1313_v27 = vld [vmem:[%s11225_s4 + $0x568] sm:$0xff]  ;;  %12172 = vst [vmem:[#allocation201_spill] sm:$0xff] %v8757_v25  ;;  %v8759_v63 = vcombine.low %v1301_v18, %v1305_v60 }
 0x2bc   :  { %3714 = vmatmul.mubr.bf16.vlgmr.msra.gmra.mrb[16].mxu0 %v8661_v45  ;;  %3796 = vmatmul.mubr.bf16.vlgmr.msra.gmra.mrb[16].mxu1 %v8661_v45  ;;  %v1317_v42 = vld [vmem:[%s11225_s4 + $0x588] sm:$0xff] }
 0x2bd   :  { %3723 = vmatpush1.bf16.msra.mxu0 %v8623_v40  ;;  %3805 = vmatpush1.bf16.msra.mxu1 %v8625_v15  ;;  %12173 = vst [vmem:[#allocation202_spill] sm:$0xff] %v8759_v63  ;;  %v1321_v22 = vld [vmem:[%s11225_s4 + $0x5a8] sm:$0xff] }
 0x2be   :  { %3724 = vmatprep.subr.bf16.mxu0 %v8663_v19  ;;  %3806 = vmatprep.subr.bf16.mxu1 %v8665_v35 }
 0x2bf   :  { %3754 = vmatprep.mubr.bf16.mxu0 %v11573_v4  ;;  %3836 = vmatprep.mubr.bf16.mxu1 %v11573_v4  ;;  %v8741_v4 = vcombine.high %v1301_v18, %v1305_v60  ;;  %v8783_v60 = vcombine.low %v1309_v54, %v1313_v27 }
 0x2c1   :  { %3725 = vmatpush1.bf16.msra.mxu0 %v8683_v33  ;;  %3807 = vmatpush1.bf16.msra.mxu1 %v8685_v5  ;;  %12171 = vst [vmem:[#allocation200_spill] sm:$0xff] %v8741_v4  ;;  %12177 = vst [vmem:[#allocation206_spill] sm:$0xff] %v8783_v60 }
 0x2c2   :  { %3726 = vmatprep.subr.bf16.mxu0 %v8689_v31  ;;  %3808 = vmatprep.subr.bf16.mxu1 %v8691_v0  ;;  %v1308_v0 = vld [vmem:[%s11225_s4 + $0x540] sm:$0xff]  ;;  %v1174_v31 = vld [vmem:[%s11225_s4 + $0x110] sm:$0xff] }
 0x2c5   :  { %3727 = vmatpush1.bf16.msra.mxu0 %v8709_v30  ;;  %3809 = vmatpush1.bf16.msra.mxu1 %v8711_v50  ;;  %v1312_v50 = vld [vmem:[%s11225_s4 + $0x560] sm:$0xff] }
 0x2c6   :  { %3728 = vmatprep.subr.bf16.mxu0 %v8715_v58  ;;  %3810 = vmatprep.subr.bf16.mxu1 %v8717_v48  ;;  %v8763_v48 = vcombine.high %v1308_v0, %v1312_v50  ;;  %v8765_v58 = vcombine.high %v1309_v54, %v1313_v27  ;;  %v1316_v30 = vld [vmem:[%s11225_s4 + $0x580] sm:$0xff]  ;;  %v8781_v18 = vcombine.low %v1308_v0, %v1312_v50  ;;  %v1325_v0 = vld [vmem:[%s11225_s4 + $0x5c8] sm:$0xff] }
 0x2c7   :  { %v1329_v50 = vld [vmem:[%s11225_s4 + $0x5e8] sm:$0xff]  ;;  %v8807_v27 = vcombine.low %v1317_v42, %v1321_v22 }
 0x2c8   :  { %12174 = vst [vmem:[#allocation203_spill] sm:$0xff] %v8763_v48  ;;  %12175 = vst [vmem:[#allocation204_spill] sm:$0xff] %v8765_v58 }
 0x2c9   :  { %3729 = vmatpush1.bf16.msra.mxu0 %v8733_v12  ;;  %3811 = vmatpush1.bf16.msra.mxu1 %v8735_v2  ;;  %v1320_v2 = vld [vmem:[%s11225_s4 + $0x5a0] sm:$0xff]  ;;  %12176 = vst [vmem:[#allocation205_spill] sm:$0xff] %v8781_v18  ;;  %12181 = vst [vmem:[#allocation210_spill] sm:$0xff] %v8807_v27 }
 0x2ca   :  { %3730 = vmatprep.subr.bf16.mxu0 %v8739_v13  ;;  %3812 = vmatprep.subr.bf16.mxu1 %v8741_v4  ;;  %v8787_v4 = vcombine.high %v1316_v30, %v1320_v2  ;;  %v8789_v13 = vcombine.high %v1317_v42, %v1321_v22  ;;  %v1324_v12 = vld [vmem:[%s11225_s4 + $0x5c0] sm:$0xff]  ;;  %v8805_v54 = vcombine.low %v1316_v30, %v1320_v2  ;;  %v1333_v30 = vld [vmem:[%s11225_s4 + $0x608] sm:$0xff] }
 0x2cb   :  { %v1337_v2 = vld [vmem:[%s11225_s4 + $0x628] sm:$0xff]  ;;  %v8831_v22 = vcombine.low %v1325_v0, %v1329_v50 }
 0x2cc   :  { %12178 = vst [vmem:[#allocation207_spill] sm:$0xff] %v8787_v4  ;;  %12179 = vst [vmem:[#allocation208_spill] sm:$0xff] %v8789_v13 }
 0x2cd   :  { %3731 = vmatpush1.bf16.msra.mxu0 %v8757_v25  ;;  %3813 = vmatpush1.bf16.msra.mxu1 %v8759_v63  ;;  %v1328_v63 = vld [vmem:[%s11225_s4 + $0x5e0] sm:$0xff]  ;;  %12180 = vst [vmem:[#allocation209_spill] sm:$0xff] %v8805_v54  ;;  %12185 = vst [vmem:[#allocation214_spill] sm:$0xff] %v8831_v22 }
 0x2ce   :  { %3732 = vmatprep.subr.bf16.mxu0 %v8763_v48  ;;  %3814 = vmatprep.subr.bf16.mxu1 %v8765_v58  ;;  %v8811_v58 = vcombine.high %v1324_v12, %v1328_v63  ;;  %v8813_v48 = vcombine.high %v1325_v0, %v1329_v50  ;;  %v1332_v25 = vld [vmem:[%s11225_s4 + $0x600] sm:$0xff]  ;;  %v8829_v42 = vcombine.low %v1324_v12, %v1328_v63  ;;  %v1341_v12 = vld [vmem:[%s11225_s4 + $0x648] sm:$0xff] }
 0x2cf   :  { %v1345_v63 = vld [vmem:[%s11225_s4 + $0x668] sm:$0xff]  ;;  %v8855_v50 = vcombine.low %v1333_v30, %v1337_v2 }
 0x2d0   :  { %12182 = vst [vmem:[#allocation211_spill] sm:$0xff] %v8811_v58  ;;  %12183 = vst [vmem:[#allocation212_spill] sm:$0xff] %v8813_v48 }
 0x2d1   :  { %3733 = vmatpush1.bf16.msra.mxu0 %v8781_v18  ;;  %3815 = vmatpush1.bf16.msra.mxu1 %v8783_v60  ;;  %v1336_v60 = vld [vmem:[%s11225_s4 + $0x620] sm:$0xff]  ;;  %12184 = vst [vmem:[#allocation213_spill] sm:$0xff] %v8829_v42  ;;  %12189 = vst [vmem:[#allocation218_spill] sm:$0xff] %v8855_v50 }
 0x2d2   :  { %3734 = vmatprep.subr.bf16.mxu0 %v8787_v4  ;;  %3816 = vmatprep.subr.bf16.mxu1 %v8789_v13  ;;  %v8835_v13 = vcombine.high %v1332_v25, %v1336_v60  ;;  %v8837_v4 = vcombine.high %v1333_v30, %v1337_v2  ;;  %v1340_v18 = vld [vmem:[%s11225_s4 + $0x640] sm:$0xff]  ;;  %v8853_v0 = vcombine.low %v1332_v25, %v1336_v60  ;;  %v1349_v25 = vld [vmem:[%s11225_s4 + $0x688] sm:$0xff] }
 0x2d3   :  { %v1353_v60 = vld [vmem:[%s11225_s4 + $0x6a8] sm:$0xff]  ;;  %v8879_v2 = vcombine.low %v1341_v12, %v1345_v63 }
 0x2d4   :  { %12186 = vst [vmem:[#allocation215_spill] sm:$0xff] %v8835_v13  ;;  %12187 = vst [vmem:[#allocation216_spill] sm:$0xff] %v8837_v4 }
 0x2d5   :  { %3735 = vmatpush1.bf16.msra.mxu0 %v8805_v54  ;;  %3817 = vmatpush1.bf16.msra.mxu1 %v8807_v27  ;;  %v1344_v27 = vld [vmem:[%s11225_s4 + $0x660] sm:$0xff]  ;;  %12188 = vst [vmem:[#allocation217_spill] sm:$0xff] %v8853_v0  ;;  %12193 = vst [vmem:[#allocation222_spill] sm:$0xff] %v8879_v2 }
 0x2d6   :  { %3736 = vmatprep.subr.bf16.mxu0 %v8811_v58  ;;  %3818 = vmatprep.subr.bf16.mxu1 %v8813_v48  ;;  %v8859_v48 = vcombine.high %v1340_v18, %v1344_v27  ;;  %v8861_v58 = vcombine.high %v1341_v12, %v1345_v63  ;;  %v1348_v54 = vld [vmem:[%s11225_s4 + $0x680] sm:$0xff]  ;;  %v8877_v30 = vcombine.low %v1340_v18, %v1344_v27  ;;  %v1357_v18 = vld [vmem:[%s11225_s4 + $0x6c8] sm:$0xff] }
 0x2d7   :  { %v1361_v27 = vld [vmem:[%s11225_s4 + $0x6e8] sm:$0xff]  ;;  %v8903_v63 = vcombine.low %v1349_v25, %v1353_v60 }
 0x2d8   :  { %12190 = vst [vmem:[#allocation219_spill] sm:$0xff] %v8859_v48  ;;  %12191 = vst [vmem:[#allocation220_spill] sm:$0xff] %v8861_v58 }
 0x2d9   :  { %3737 = vmatpush1.bf16.msra.mxu0 %v8829_v42  ;;  %3819 = vmatpush1.bf16.msra.mxu1 %v8831_v22  ;;  %v1352_v22 = vld [vmem:[%s11225_s4 + $0x6a0] sm:$0xff]  ;;  %12192 = vst [vmem:[#allocation221_spill] sm:$0xff] %v8877_v30  ;;  %12197 = vst [vmem:[#allocation226_spill] sm:$0xff] %v8903_v63 }
 0x2da   :  { %3738 = vmatprep.subr.bf16.mxu0 %v8835_v13  ;;  %3820 = vmatprep.subr.bf16.mxu1 %v8837_v4  ;;  %v8883_v4 = vcombine.high %v1348_v54, %v1352_v22  ;;  %v8885_v13 = vcombine.high %v1349_v25, %v1353_v60  ;;  %v1356_v42 = vld [vmem:[%s11225_s4 + $0x6c0] sm:$0xff]  ;;  %v8901_v12 = vcombine.low %v1348_v54, %v1352_v22  ;;  %v1365_v54 = vld [vmem:[%s11225_s4 + $0x708] sm:$0xff] }
 0x2db   :  { %v1369_v22 = vld [vmem:[%s11225_s4 + $0x728] sm:$0xff]  ;;  %v8927_v60 = vcombine.low %v1357_v18, %v1361_v27 }
 0x2dc   :  { %12194 = vst [vmem:[#allocation223_spill] sm:$0xff] %v8883_v4  ;;  %12195 = vst [vmem:[#allocation224_spill] sm:$0xff] %v8885_v13 }
 0x2dd   :  { %3739 = vmatpush1.bf16.msra.mxu0 %v8853_v0  ;;  %3821 = vmatpush1.bf16.msra.mxu1 %v8855_v50  ;;  %v1360_v50 = vld [vmem:[%s11225_s4 + $0x6e0] sm:$0xff]  ;;  %12196 = vst [vmem:[#allocation225_spill] sm:$0xff] %v8901_v12  ;;  %12201 = vst [vmem:[#allocation230_spill] sm:$0xff] %v8927_v60 }
 0x2de   :  { %3740 = vmatprep.subr.bf16.mxu0 %v8859_v48  ;;  %3822 = vmatprep.subr.bf16.mxu1 %v8861_v58  ;;  %v8907_v58 = vcombine.high %v1356_v42, %v1360_v50  ;;  %v8909_v48 = vcombine.high %v1357_v18, %v1361_v27  ;;  %v1364_v0 = vld [vmem:[%s11225_s4 + $0x700] sm:$0xff]  ;;  %v8925_v25 = vcombine.low %v1356_v42, %v1360_v50  ;;  %v1373_v42 = vld [vmem:[%s11225_s4 + $0x748] sm:$0xff] }
 0x2df   :  { %v1377_v50 = vld [vmem:[%s11225_s4 + $0x768] sm:$0xff]  ;;  %v8951_v27 = vcombine.low %v1365_v54, %v1369_v22 }
 0x2e0   :  { %12198 = vst [vmem:[#allocation227_spill] sm:$0xff] %v8907_v58  ;;  %12199 = vst [vmem:[#allocation228_spill] sm:$0xff] %v8909_v48 }
 0x2e1   :  { %3741 = vmatpush1.bf16.msra.mxu0 %v8877_v30  ;;  %3823 = vmatpush1.bf16.msra.mxu1 %v8879_v2  ;;  %v1368_v2 = vld [vmem:[%s11225_s4 + $0x720] sm:$0xff]  ;;  %12200 = vst [vmem:[#allocation229_spill] sm:$0xff] %v8925_v25  ;;  %12205 = vst [vmem:[#allocation234_spill] sm:$0xff] %v8951_v27 }
 0x2e2   :  { %3742 = vmatprep.subr.bf16.mxu0 %v8883_v4  ;;  %3824 = vmatprep.subr.bf16.mxu1 %v8885_v13  ;;  %v8931_v13 = vcombine.high %v1364_v0, %v1368_v2  ;;  %v8933_v4 = vcombine.high %v1365_v54, %v1369_v22  ;;  %v1372_v30 = vld [vmem:[%s11225_s4 + $0x740] sm:$0xff]  ;;  %v8949_v18 = vcombine.low %v1364_v0, %v1368_v2  ;;  %v1381_v0 = vld [vmem:[%s11225_s4 + $0x788] sm:$0xff] }
 0x2e3   :  { %v1385_v2 = vld [vmem:[%s11225_s4 + $0x7a8] sm:$0xff]  ;;  %v8975_v22 = vcombine.low %v1373_v42, %v1377_v50 }
 0x2e4   :  { %12202 = vst [vmem:[#allocation231_spill] sm:$0xff] %v8931_v13  ;;  %12203 = vst [vmem:[#allocation232_spill] sm:$0xff] %v8933_v4 }
 0x2e5   :  { %3743 = vmatpush1.bf16.msra.mxu0 %v8901_v12  ;;  %3825 = vmatpush1.bf16.msra.mxu1 %v8903_v63  ;;  %v1376_v63 = vld [vmem:[%s11225_s4 + $0x760] sm:$0xff]  ;;  %12204 = vst [vmem:[#allocation233_spill] sm:$0xff] %v8949_v18  ;;  %12209 = vst [vmem:[#allocation238_spill] sm:$0xff] %v8975_v22 }
 0x2e6   :  { %3744 = vmatprep.subr.bf16.mxu0 %v8907_v58  ;;  %3826 = vmatprep.subr.bf16.mxu1 %v8909_v48  ;;  %v8955_v48 = vcombine.high %v1372_v30, %v1376_v63  ;;  %v8957_v58 = vcombine.high %v1373_v42, %v1377_v50  ;;  %v1380_v12 = vld [vmem:[%s11225_s4 + $0x780] sm:$0xff]  ;;  %v8973_v54 = vcombine.low %v1372_v30, %v1376_v63  ;;  %v1389_v30 = vld [vmem:[%s11225_s4 + $0x7c8] sm:$0xff] }
 0x2e7   :  { %v1393_v63 = vld [vmem:[%s11225_s4 + $0x7e8] sm:$0xff]  ;;  %v8999_v50 = vcombine.low %v1381_v0, %v1385_v2 }
 0x2e8   :  { %12206 = vst [vmem:[#allocation235_spill] sm:$0xff] %v8955_v48  ;;  %12207 = vst [vmem:[#allocation236_spill] sm:$0xff] %v8957_v58 }
 0x2e9   :  { %3745 = vmatpush1.bf16.msra.mxu0 %v8925_v25  ;;  %3827 = vmatpush1.bf16.msra.mxu1 %v8927_v60  ;;  %v1384_v60 = vld [vmem:[%s11225_s4 + $0x7a0] sm:$0xff]  ;;  %12208 = vst [vmem:[#allocation237_spill] sm:$0xff] %v8973_v54  ;;  %12213 = vst [vmem:[#allocation242_spill] sm:$0xff] %v8999_v50 }
 0x2ea   :  { %3746 = vmatprep.subr.bf16.mxu0 %v8931_v13  ;;  %3828 = vmatprep.subr.bf16.mxu1 %v8933_v4  ;;  %v8979_v4 = vcombine.high %v1380_v12, %v1384_v60  ;;  %v8981_v13 = vcombine.high %v1381_v0, %v1385_v2  ;;  %v1388_v25 = vld [vmem:[%s11225_s4 + $0x7c0] sm:$0xff]  ;;  %v8997_v42 = vcombine.low %v1380_v12, %v1384_v60  ;;  %v1143_v12 = vld [vmem:[%s11225_s4 + $0x18] sm:$0xff] }
 0x2eb   :  { %v1147_v60 = vld [vmem:[%s11225_s4 + $0x38] sm:$0xff]  ;;  %v9023_v2 = vcombine.low %v1389_v30, %v1393_v63 }
 0x2ec   :  { %12210 = vst [vmem:[#allocation239_spill] sm:$0xff] %v8979_v4  ;;  %12211 = vst [vmem:[#allocation240_spill] sm:$0xff] %v8981_v13 }
 0x2ed   :  { %3747 = vmatpush1.bf16.msra.mxu0 %v8949_v18  ;;  %3829 = vmatpush1.bf16.msra.mxu1 %v8951_v27  ;;  %v1392_v27 = vld [vmem:[%s11225_s4 + $0x7e0] sm:$0xff]  ;;  %12212 = vst [vmem:[#allocation241_spill] sm:$0xff] %v8997_v42  ;;  %v1142_v18 = vld [vmem:[%s11225_s4 + $0x10] sm:$0xff]  ;;  %12217 = vst [vmem:[#allocation246_spill] sm:$0xff] %v9023_v2 }
 0x2ee   :  { %3748 = vmatprep.subr.bf16.mxu0 %v8955_v48  ;;  %3830 = vmatprep.subr.bf16.mxu1 %v8957_v58  ;;  %v9003_v58 = vcombine.high %v1388_v25, %v1392_v27  ;;  %v9005_v48 = vcombine.high %v1389_v30, %v1393_v63  ;;  %v9021_v0 = vcombine.low %v1388_v25, %v1392_v27  ;;  %v1151_v25 = vld [vmem:[%s11225_s4 + $0x58] sm:$0xff] }
 0x2ef   :  { %v1155_v27 = vld [vmem:[%s11225_s4 + $0x78] sm:$0xff]  ;;  %v9048_v63 = vcombine.low %v1143_v12, %v1147_v60 }
 0x2f0   :  { %12214 = vst [vmem:[#allocation243_spill] sm:$0xff] %v9003_v58  ;;  %12215 = vst [vmem:[#allocation244_spill] sm:$0xff] %v9005_v48 }
 0x2f1   :  { %3749 = vmatpush1.bf16.msra.mxu0 %v8973_v54  ;;  %3831 = vmatpush1.bf16.msra.mxu1 %v8975_v22  ;;  %v1146_v22 = vld [vmem:[%s11225_s4 + $0x30] sm:$0xff]  ;;  %12216 = vst [vmem:[#allocation245_spill] sm:$0xff] %v9021_v0  ;;  %12221 = vst [vmem:[#allocation250_spill] sm:$0xff] %v9048_v63 }
 0x2f2   :  { %3750 = vmatprep.subr.bf16.mxu0 %v8979_v4  ;;  %3832 = vmatprep.subr.bf16.mxu1 %v8981_v13  ;;  %v9027_v13 = vcombine.high %v1142_v18, %v1146_v22  ;;  %v9029_v4 = vcombine.high %v1143_v12, %v1147_v60  ;;  %v1150_v54 = vld [vmem:[%s11225_s4 + $0x50] sm:$0xff]  ;;  %v9045_v30 = vcombine.low %v1142_v18, %v1146_v22  ;;  %v12224_v18 = vmov 0.0|0.0   ;;  %v1159_v22 = vld [vmem:[%s11225_s4 + $0x98] sm:$0xff] }
 0x2f3   :  { %v1163_v12 = vld [vmem:[%s11225_s4 + $0xb8] sm:$0xff] }
 0x2f4   :  { %12218 = vst [vmem:[#allocation247_spill] sm:$0xff] %v9027_v13  ;;  %12219 = vst [vmem:[#allocation248_spill] sm:$0xff] %v9029_v4 }
 0x2f5   :  { %3751 = vmatpush1.bf16.msra.mxu0 %v8997_v42  ;;  %3833 = vmatpush1.bf16.msra.mxu1 %v8999_v50  ;;  %v1154_v50 = vld [vmem:[%s11225_s4 + $0x70] sm:$0xff]  ;;  %12220 = vst [vmem:[#allocation249_spill] sm:$0xff] %v9045_v30 }
 0x2f6   :  { %3752 = vmatprep.subr.bf16.mxu0 %v9003_v58  ;;  %3834 = vmatprep.subr.bf16.mxu1 %v9005_v48  ;;  %v9051_v48 = vcombine.high %v1150_v54, %v1154_v50  ;;  %v9053_v58 = vcombine.high %v1151_v25, %v1155_v27  ;;  %v1158_v42 = vld [vmem:[%s11225_s4 + $0x90] sm:$0xff]  ;;  %v9071_v60 = vcombine.low %v1150_v54, %v1154_v50  ;;  %v1167_v50 = vld [vmem:[%s11225_s4 + $0xd8] sm:$0xff] }
 0x2f7   :  { %v1170_v54 = vld [vmem:[%s11225_s4 + $0xf0] sm:$0xff] }
 0x2f8   :  { %12222 = vst [vmem:[#allocation251_spill] sm:$0xff] %v9051_v48  ;;  %12223 = vst [vmem:[#allocation252_spill] sm:$0xff] %v9053_v58 }
 0x2f9   :  { %3753 = vmatpush1.bf16.msra.mxu0 %v9021_v0  ;;  %3835 = vmatpush1.bf16.msra.mxu1 %v9023_v2  ;;  %v1162_v2 = vld [vmem:[%s11225_s4 + $0xb0] sm:$0xff]  ;;  %12225 = vst [vmem:[#allocation253_spill] sm:$0xff] %v9071_v60  ;;  %v9081_v0 = vcombine.high %v1159_v22, %v1163_v12 }
 0x2fa   :  { %3845 = vmatprep.subr.bf16.mxu0 %v9027_v13  ;;  %3927 = vmatprep.subr.bf16.mxu1 %v9029_v4  ;;  %v9075_v4 = vcombine.low %v1151_v25, %v1155_v27  ;;  %v9077_v13 = vcombine.high %v1158_v42, %v1162_v2  ;;  %v1171_v25 = vld [vmem:[%s11225_s4 + $0xf8] sm:$0xff]  ;;  %v9096_v27 = vcombine.low %v1158_v42, %v1162_v2  ;;  %v1178_v42 = vld [vmem:[%s11225_s4 + $0x130] sm:$0xff] }
 0x2fb   :  { %12228 = vst [vmem:[#allocation256_spill] sm:$0xff] %v9081_v0  ;;  %v1175_v2 = vld [vmem:[%s11225_s4 + $0x118] sm:$0xff] }
 0x2fc   :  { %3755 = vmatmul.mubr.bf16.vlgmr.msra.gmra.mrb[16].mxu0 %v12224_v18  ;;  %3837 = vmatmul.mubr.bf16.vlgmr.msra.gmra.mrb[16].mxu1 %v12224_v18  ;;  %12226 = vst [vmem:[#allocation254_spill] sm:$0xff] %v9075_v4  ;;  %12227 = vst [vmem:[#allocation255_spill] sm:$0xff] %v9077_v13 }
 0x2fd   :  { %3846 = vmatpush1.bf16.msra.mxu0 %v9045_v30  ;;  %3877 = vmatprep.mubr.bf16.mxu0 %v8648_v61  ;;  %v1166_v30 = vld [vmem:[%s11225_s4 + $0xd0] sm:$0xff]  ;;  %12229 = vst [vmem:[#allocation257_spill] sm:$0xff] %v9096_v27 }
 0x2fe   :  { %3928 = vmatpush1.bf16.msra.mxu1 %v9048_v63  ;;  %3959 = vmatprep.mubr.bf16.mxu1 %v8648_v61  ;;  %v9105_v63 = vcombine.high %v1167_v50, %v1171_v25 }
 0x2ff   :  { %3847 = vmatprep.subr.bf16.mxu0 %v9051_v48  ;;  %3929 = vmatprep.subr.bf16.mxu1 %v9053_v58  ;;  %v9100_v58 = vcombine.low %v1159_v22, %v1163_v12  ;;  %v9102_v48 = vcombine.high %v1166_v30, %v1170_v54  ;;  %v1179_v22 = vld [vmem:[%s11225_s4 + $0x138] sm:$0xff]  ;;  %v9120_v12 = vcombine.low %v1166_v30, %v1170_v54  ;;  %v1186_v30 = vld [vmem:[%s11225_s4 + $0x170] sm:$0xff] }
 0x300   :  { %12232 = vst [vmem:[#allocation260_spill] sm:$0xff] %v9105_v63  ;;  %v1183_v54 = vld [vmem:[%s11225_s4 + $0x158] sm:$0xff] }
 0x301   :  { %3848 = vmatpush1.bf16.msra.mxu0 %v9071_v60  ;;  %12230 = vst [vmem:[#allocation258_spill] sm:$0xff] %v9100_v58  ;;  %12231 = vst [vmem:[#allocation259_spill] sm:$0xff] %v9102_v48  ;;  %v1182_v60 = vld [vmem:[%s11225_s4 + $0x150] sm:$0xff] }
 0x302   :  { %3930 = vmatpush1.bf16.msra.mxu1 %v9075_v4  ;;  %3849 = vmatprep.subr.bf16.mxu0 %v9077_v13  ;;  %12233 = vst [vmem:[#allocation261_spill] sm:$0xff] %v9120_v12  ;;  %v9126_v13 = vcombine.high %v1174_v31, %v1178_v42  ;;  %v9129_v4 = vcombine.high %v1175_v2, %v1179_v22 }
 0x303   :  { %3931 = vmatprep.subr.bf16.mxu1 %v9081_v0  ;;  %v9124_v0 = vcombine.low %v1167_v50, %v1171_v25  ;;  %v1187_v50 = vld [vmem:[%s11225_s4 + $0x178] sm:$0xff]  ;;  %v9144_v25 = vcombine.low %v1174_v31, %v1178_v42  ;;  %v1194_v31 = vld [vmem:[%s11225_s4 + $0x1b0] sm:$0xff] }
 0x304   :  { %12235 = vst [vmem:[#allocation263_spill] sm:$0xff] %v9126_v13  ;;  %12236 = vst [vmem:[#allocation264_spill] sm:$0xff] %v9129_v4  ;;  %v1191_v42 = vld [vmem:[%s11225_s4 + $0x198] sm:$0xff] }
 0x305   :  { %3850 = vmatpush1.bf16.msra.mxu0 %v9096_v27  ;;  %12234 = vst [vmem:[#allocation262_spill] sm:$0xff] %v9124_v0  ;;  %12237 = vst [vmem:[#allocation265_spill] sm:$0xff] %v9144_v25  ;;  %v1190_v27 = vld [vmem:[%s11225_s4 + $0x190] sm:$0xff] }
 0x306   :  { %3932 = vmatpush1.bf16.msra.mxu1 %v9100_v58  ;;  %3851 = vmatprep.subr.bf16.mxu0 %v9102_v48  ;;  %v9150_v48 = vcombine.high %v1182_v60, %v1186_v30  ;;  %v9153_v58 = vcombine.high %v1183_v54, %v1187_v50 }
 0x307   :  { %3933 = vmatprep.subr.bf16.mxu1 %v9105_v63  ;;  %v9148_v63 = vcombine.low %v1175_v2, %v1179_v22  ;;  %v1195_v2 = vld [vmem:[%s11225_s4 + $0x1b8] sm:$0xff]  ;;  %v9168_v22 = vcombine.low %v1182_v60, %v1186_v30  ;;  %v1202_v60 = vld [vmem:[%s11225_s4 + $0x1f0] sm:$0xff] }
 0x308   :  { %12239 = vst [vmem:[#allocation267_spill] sm:$0xff] %v9150_v48  ;;  %12240 = vst [vmem:[#allocation268_spill] sm:$0xff] %v9153_v58  ;;  %v1199_v30 = vld [vmem:[%s11225_s4 + $0x1d8] sm:$0xff] }
 0x309   :  { %3852 = vmatpush1.bf16.msra.mxu0 %v9120_v12  ;;  %12238 = vst [vmem:[#allocation266_spill] sm:$0xff] %v9148_v63  ;;  %12241 = vst [vmem:[#allocation269_spill] sm:$0xff] %v9168_v22  ;;  %v1198_v12 = vld [vmem:[%s11225_s4 + $0x1d0] sm:$0xff] }
 0x30a   :  { %3934 = vmatpush1.bf16.msra.mxu1 %v9124_v0  ;;  %3853 = vmatprep.subr.bf16.mxu0 %v9126_v13  ;;  %v9174_v13 = vcombine.high %v1190_v27, %v1194_v31  ;;  %v9177_v0 = vcombine.high %v1191_v42, %v1195_v2 }
 0x30b   :  { %3935 = vmatprep.subr.bf16.mxu1 %v9129_v4  ;;  %v9172_v4 = vcombine.low %v1183_v54, %v1187_v50  ;;  %v1203_v54 = vld [vmem:[%s11225_s4 + $0x1f8] sm:$0xff]  ;;  %v9192_v50 = vcombine.low %v1190_v27, %v1194_v31  ;;  %v1210_v27 = vld [vmem:[%s11225_s4 + $0x230] sm:$0xff] }
 0x30c   :  { %12243 = vst [vmem:[#allocation271_spill] sm:$0xff] %v9174_v13  ;;  %12244 = vst [vmem:[#allocation272_spill] sm:$0xff] %v9177_v0  ;;  %v1207_v31 = vld [vmem:[%s11225_s4 + $0x218] sm:$0xff] }
 0x30d   :  { %3854 = vmatpush1.bf16.msra.mxu0 %v9144_v25  ;;  %12242 = vst [vmem:[#allocation270_spill] sm:$0xff] %v9172_v4  ;;  %12245 = vst [vmem:[#allocation273_spill] sm:$0xff] %v9192_v50  ;;  %v1206_v25 = vld [vmem:[%s11225_s4 + $0x210] sm:$0xff] }
 0x30e   :  { %3936 = vmatpush1.bf16.msra.mxu1 %v9148_v63  ;;  %3855 = vmatprep.subr.bf16.mxu0 %v9150_v48  ;;  %v9198_v48 = vcombine.high %v1198_v12, %v1202_v60  ;;  %v9201_v63 = vcombine.high %v1199_v30, %v1203_v54 }
 0x30f   :  { %3937 = vmatprep.subr.bf16.mxu1 %v9153_v58  ;;  %v9196_v58 = vcombine.low %v1191_v42, %v1195_v2  ;;  %v1211_v42 = vld [vmem:[%s11225_s4 + $0x238] sm:$0xff]  ;;  %v9216_v2 = vcombine.low %v1198_v12, %v1202_v60  ;;  %v1218_v12 = vld [vmem:[%s11225_s4 + $0x270] sm:$0xff] }
 0x310   :  { %12247 = vst [vmem:[#allocation275_spill] sm:$0xff] %v9198_v48  ;;  %12248 = vst [vmem:[#allocation276_spill] sm:$0xff] %v9201_v63  ;;  %v1215_v60 = vld [vmem:[%s11225_s4 + $0x258] sm:$0xff] }
 0x311   :  { %3856 = vmatpush1.bf16.msra.mxu0 %v9168_v22  ;;  %12246 = vst [vmem:[#allocation274_spill] sm:$0xff] %v9196_v58  ;;  %12249 = vst [vmem:[#allocation277_spill] sm:$0xff] %v9216_v2  ;;  %v1214_v22 = vld [vmem:[%s11225_s4 + $0x250] sm:$0xff] }
 0x312   :  { %3938 = vmatpush1.bf16.msra.mxu1 %v9172_v4  ;;  %3857 = vmatprep.subr.bf16.mxu0 %v9174_v13  ;;  %v9222_v13 = vcombine.high %v1206_v25, %v1210_v27  ;;  %v9225_v4 = vcombine.high %v1207_v31, %v1211_v42 }
 0x313   :  { %3939 = vmatprep.subr.bf16.mxu1 %v9177_v0  ;;  %v9220_v0 = vcombine.low %v1199_v30, %v1203_v54  ;;  %v1219_v30 = vld [vmem:[%s11225_s4 + $0x278] sm:$0xff]  ;;  %v9240_v54 = vcombine.low %v1206_v25, %v1210_v27  ;;  %v1226_v25 = vld [vmem:[%s11225_s4 + $0x2b0] sm:$0xff] }
 0x314   :  { %12251 = vst [vmem:[#allocation279_spill] sm:$0xff] %v9222_v13  ;;  %12252 = vst [vmem:[#allocation280_spill] sm:$0xff] %v9225_v4  ;;  %v1223_v27 = vld [vmem:[%s11225_s4 + $0x298] sm:$0xff] }
 0x315   :  { %3858 = vmatpush1.bf16.msra.mxu0 %v9192_v50  ;;  %12250 = vst [vmem:[#allocation278_spill] sm:$0xff] %v9220_v0  ;;  %12253 = vst [vmem:[#allocation281_spill] sm:$0xff] %v9240_v54  ;;  %v1222_v50 = vld [vmem:[%s11225_s4 + $0x290] sm:$0xff] }
 0x316   :  { %3940 = vmatpush1.bf16.msra.mxu1 %v9196_v58  ;;  %3859 = vmatprep.subr.bf16.mxu0 %v9198_v48  ;;  %v9246_v48 = vcombine.high %v1214_v22, %v1218_v12  ;;  %v9249_v58 = vcombine.high %v1215_v60, %v1219_v30 }
 0x317   :  { %3941 = vmatprep.subr.bf16.mxu1 %v9201_v63  ;;  %v9244_v63 = vcombine.low %v1207_v31, %v1211_v42  ;;  %v1227_v31 = vld [vmem:[%s11225_s4 + $0x2b8] sm:$0xff]  ;;  %v9264_v42 = vcombine.low %v1214_v22, %v1218_v12  ;;  %v1234_v22 = vld [vmem:[%s11225_s4 + $0x2f0] sm:$0xff] }
 0x318   :  { %12255 = vst [vmem:[#allocation283_spill] sm:$0xff] %v9246_v48  ;;  %12256 = vst [vmem:[#allocation284_spill] sm:$0xff] %v9249_v58  ;;  %v1231_v12 = vld [vmem:[%s11225_s4 + $0x2d8] sm:$0xff] }
 0x319   :  { %3860 = vmatpush1.bf16.msra.mxu0 %v9216_v2  ;;  %12254 = vst [vmem:[#allocation282_spill] sm:$0xff] %v9244_v63  ;;  %12257 = vst [vmem:[#allocation285_spill] sm:$0xff] %v9264_v42  ;;  %v1230_v2 = vld [vmem:[%s11225_s4 + $0x2d0] sm:$0xff] }
 0x31a   :  { %3942 = vmatpush1.bf16.msra.mxu1 %v9220_v0  ;;  %3861 = vmatprep.subr.bf16.mxu0 %v9222_v13  ;;  %v9270_v13 = vcombine.high %v1222_v50, %v1226_v25  ;;  %v9273_v0 = vcombine.high %v1223_v27, %v1227_v31 }
 0x31b   :  { %3943 = vmatprep.subr.bf16.mxu1 %v9225_v4  ;;  %v9268_v4 = vcombine.low %v1215_v60, %v1219_v30  ;;  %v1235_v60 = vld [vmem:[%s11225_s4 + $0x2f8] sm:$0xff]  ;;  %v9288_v30 = vcombine.low %v1222_v50, %v1226_v25  ;;  %v1242_v50 = vld [vmem:[%s11225_s4 + $0x330] sm:$0xff] }
 0x31c   :  { %12259 = vst [vmem:[#allocation287_spill] sm:$0xff] %v9270_v13  ;;  %12260 = vst [vmem:[#allocation288_spill] sm:$0xff] %v9273_v0  ;;  %v1239_v25 = vld [vmem:[%s11225_s4 + $0x318] sm:$0xff] }
 0x31d   :  { %3862 = vmatpush1.bf16.msra.mxu0 %v9240_v54  ;;  %12258 = vst [vmem:[#allocation286_spill] sm:$0xff] %v9268_v4  ;;  %12261 = vst [vmem:[#allocation289_spill] sm:$0xff] %v9288_v30  ;;  %v1238_v54 = vld [vmem:[%s11225_s4 + $0x310] sm:$0xff] }
 0x31e   :  { %3944 = vmatpush1.bf16.msra.mxu1 %v9244_v63  ;;  %3863 = vmatprep.subr.bf16.mxu0 %v9246_v48  ;;  %v9294_v48 = vcombine.high %v1230_v2, %v1234_v22  ;;  %v9297_v63 = vcombine.high %v1231_v12, %v1235_v60 }
 0x31f   :  { %3945 = vmatprep.subr.bf16.mxu1 %v9249_v58  ;;  %v9292_v58 = vcombine.low %v1223_v27, %v1227_v31  ;;  %v1243_v27 = vld [vmem:[%s11225_s4 + $0x338] sm:$0xff]  ;;  %v9312_v31 = vcombine.low %v1230_v2, %v1234_v22  ;;  %v1250_v2 = vld [vmem:[%s11225_s4 + $0x370] sm:$0xff] }
 0x320   :  { %12263 = vst [vmem:[#allocation291_spill] sm:$0xff] %v9294_v48  ;;  %12264 = vst [vmem:[#allocation292_spill] sm:$0xff] %v9297_v63  ;;  %v1247_v22 = vld [vmem:[%s11225_s4 + $0x358] sm:$0xff] }
 0x321   :  { %3864 = vmatpush1.bf16.msra.mxu0 %v9264_v42  ;;  %12262 = vst [vmem:[#allocation290_spill] sm:$0xff] %v9292_v58  ;;  %12265 = vst [vmem:[#allocation293_spill] sm:$0xff] %v9312_v31  ;;  %v1246_v42 = vld [vmem:[%s11225_s4 + $0x350] sm:$0xff] }
 0x322   :  { %3946 = vmatpush1.bf16.msra.mxu1 %v9268_v4  ;;  %3865 = vmatprep.subr.bf16.mxu0 %v9270_v13  ;;  %v9318_v13 = vcombine.high %v1238_v54, %v1242_v50  ;;  %v9321_v4 = vcombine.high %v1239_v25, %v1243_v27 }
 0x323   :  { %3947 = vmatprep.subr.bf16.mxu1 %v9273_v0  ;;  %v9316_v0 = vcombine.low %v1231_v12, %v1235_v60  ;;  %v1251_v12 = vld [vmem:[%s11225_s4 + $0x378] sm:$0xff]  ;;  %v9336_v60 = vcombine.low %v1238_v54, %v1242_v50  ;;  %v1258_v54 = vld [vmem:[%s11225_s4 + $0x3b0] sm:$0xff] }
 0x324   :  { %12267 = vst [vmem:[#allocation295_spill] sm:$0xff] %v9318_v13  ;;  %12268 = vst [vmem:[#allocation296_spill] sm:$0xff] %v9321_v4  ;;  %v1255_v50 = vld [vmem:[%s11225_s4 + $0x398] sm:$0xff] }
 0x325   :  { %3866 = vmatpush1.bf16.msra.mxu0 %v9288_v30  ;;  %12266 = vst [vmem:[#allocation294_spill] sm:$0xff] %v9316_v0  ;;  %12269 = vst [vmem:[#allocation297_spill] sm:$0xff] %v9336_v60  ;;  %v1254_v30 = vld [vmem:[%s11225_s4 + $0x390] sm:$0xff] }
 0x326   :  { %3948 = vmatpush1.bf16.msra.mxu1 %v9292_v58  ;;  %3867 = vmatprep.subr.bf16.mxu0 %v9294_v48  ;;  %v9342_v48 = vcombine.high %v1246_v42, %v1250_v2  ;;  %v9345_v58 = vcombine.high %v1247_v22, %v1251_v12 }
 0x327   :  { %3949 = vmatprep.subr.bf16.mxu1 %v9297_v63  ;;  %v9340_v63 = vcombine.low %v1239_v25, %v1243_v27  ;;  %v1259_v25 = vld [vmem:[%s11225_s4 + $0x3b8] sm:$0xff]  ;;  %v9360_v27 = vcombine.low %v1246_v42, %v1250_v2  ;;  %v1266_v42 = vld [vmem:[%s11225_s4 + $0x3f0] sm:$0xff] }
 0x328   :  { %12271 = vst [vmem:[#allocation299_spill] sm:$0xff] %v9342_v48  ;;  %12272 = vst [vmem:[#allocation300_spill] sm:$0xff] %v9345_v58  ;;  %v1263_v2 = vld [vmem:[%s11225_s4 + $0x3d8] sm:$0xff] }
 0x329   :  { %3868 = vmatpush1.bf16.msra.mxu0 %v9312_v31  ;;  %12270 = vst [vmem:[#allocation298_spill] sm:$0xff] %v9340_v63  ;;  %12273 = vst [vmem:[#allocation301_spill] sm:$0xff] %v9360_v27  ;;  %v1262_v31 = vld [vmem:[%s11225_s4 + $0x3d0] sm:$0xff] }
 0x32a   :  { %3950 = vmatpush1.bf16.msra.mxu1 %v9316_v0  ;;  %3869 = vmatprep.subr.bf16.mxu0 %v9318_v13  ;;  %v9366_v13 = vcombine.high %v1254_v30, %v1258_v54  ;;  %v9369_v0 = vcombine.high %v1255_v50, %v1259_v25 }
 0x32b   :  { %3951 = vmatprep.subr.bf16.mxu1 %v9321_v4  ;;  %v9364_v4 = vcombine.low %v1247_v22, %v1251_v12  ;;  %v1267_v22 = vld [vmem:[%s11225_s4 + $0x3f8] sm:$0xff]  ;;  %v9384_v12 = vcombine.low %v1254_v30, %v1258_v54  ;;  %v1274_v30 = vld [vmem:[%s11225_s4 + $0x430] sm:$0xff] }
 0x32c   :  { %12275 = vst [vmem:[#allocation303_spill] sm:$0xff] %v9366_v13  ;;  %12276 = vst [vmem:[#allocation304_spill] sm:$0xff] %v9369_v0  ;;  %v1271_v54 = vld [vmem:[%s11225_s4 + $0x418] sm:$0xff] }
 0x32d   :  { %3870 = vmatpush1.bf16.msra.mxu0 %v9336_v60  ;;  %12274 = vst [vmem:[#allocation302_spill] sm:$0xff] %v9364_v4  ;;  %12277 = vst [vmem:[#allocation305_spill] sm:$0xff] %v9384_v12  ;;  %v1270_v60 = vld [vmem:[%s11225_s4 + $0x410] sm:$0xff] }
 0x32e   :  { %3952 = vmatpush1.bf16.msra.mxu1 %v9340_v63  ;;  %3871 = vmatprep.subr.bf16.mxu0 %v9342_v48  ;;  %v9390_v48 = vcombine.high %v1262_v31, %v1266_v42  ;;  %v9393_v63 = vcombine.high %v1263_v2, %v1267_v22 }
 0x32f   :  { %3953 = vmatprep.subr.bf16.mxu1 %v9345_v58  ;;  %v9388_v58 = vcombine.low %v1255_v50, %v1259_v25  ;;  %v1275_v50 = vld [vmem:[%s11225_s4 + $0x438] sm:$0xff]  ;;  %v9408_v25 = vcombine.low %v1262_v31, %v1266_v42  ;;  %v1282_v31 = vld [vmem:[%s11225_s4 + $0x470] sm:$0xff] }
 0x330   :  { %12279 = vst [vmem:[#allocation307_spill] sm:$0xff] %v9390_v48  ;;  %12280 = vst [vmem:[#allocation308_spill] sm:$0xff] %v9393_v63  ;;  %v1279_v42 = vld [vmem:[%s11225_s4 + $0x458] sm:$0xff] }
 0x331   :  { %3872 = vmatpush1.bf16.msra.mxu0 %v9360_v27  ;;  %12278 = vst [vmem:[#allocation306_spill] sm:$0xff] %v9388_v58  ;;  %12281 = vst [vmem:[#allocation309_spill] sm:$0xff] %v9408_v25  ;;  %v1278_v27 = vld [vmem:[%s11225_s4 + $0x450] sm:$0xff] }
 0x332   :  { %3954 = vmatpush1.bf16.msra.mxu1 %v9364_v4  ;;  %3873 = vmatprep.subr.bf16.mxu0 %v9366_v13  ;;  %v9414_v13 = vcombine.high %v1270_v60, %v1274_v30  ;;  %v9417_v4 = vcombine.high %v1271_v54, %v1275_v50 }
 0x333   :  { %3955 = vmatprep.subr.bf16.mxu1 %v9369_v0  ;;  %v9412_v0 = vcombine.low %v1263_v2, %v1267_v22  ;;  %v1283_v2 = vld [vmem:[%s11225_s4 + $0x478] sm:$0xff]  ;;  %v9432_v22 = vcombine.low %v1270_v60, %v1274_v30  ;;  %v1290_v60 = vld [vmem:[%s11225_s4 + $0x4b0] sm:$0xff] }
 0x334   :  { %12283 = vst [vmem:[#allocation311_spill] sm:$0xff] %v9414_v13  ;;  %12284 = vst [vmem:[#allocation312_spill] sm:$0xff] %v9417_v4  ;;  %v1287_v30 = vld [vmem:[%s11225_s4 + $0x498] sm:$0xff] }
 0x335   :  { %3874 = vmatpush1.bf16.msra.mxu0 %v9384_v12  ;;  %12282 = vst [vmem:[#allocation310_spill] sm:$0xff] %v9412_v0  ;;  %12285 = vst [vmem:[#allocation313_spill] sm:$0xff] %v9432_v22  ;;  %v1286_v12 = vld [vmem:[%s11225_s4 + $0x490] sm:$0xff] }
 0x336   :  { %3956 = vmatpush1.bf16.msra.mxu1 %v9388_v58  ;;  %3875 = vmatprep.subr.bf16.mxu0 %v9390_v48  ;;  %v9438_v48 = vcombine.high %v1278_v27, %v1282_v31  ;;  %v9441_v58 = vcombine.high %v1279_v42, %v1283_v2 }
 0x337   :  { %3957 = vmatprep.subr.bf16.mxu1 %v9393_v63  ;;  %v9436_v63 = vcombine.low %v1271_v54, %v1275_v50  ;;  %v1291_v54 = vld [vmem:[%s11225_s4 + $0x4b8] sm:$0xff]  ;;  %v9458_v50 = vcombine.low %v1278_v27, %v1282_v31  ;;  %v1298_v27 = vld [vmem:[%s11225_s4 + $0x4f0] sm:$0xff] }
 0x338   :  { %12287 = vst [vmem:[#allocation315_spill] sm:$0xff] %v9438_v48  ;;  %12288 = vst [vmem:[#allocation316_spill] sm:$0xff] %v9441_v58  ;;  %v1295_v31 = vld [vmem:[%s11225_s4 + $0x4d8] sm:$0xff] }
 0x339   :  { %3876 = vmatpush1.bf16.msra.mxu0 %v9408_v25  ;;  %12286 = vst [vmem:[#allocation314_spill] sm:$0xff] %v9436_v63  ;;  %12289 = vst [vmem:[#allocation317_spill] sm:$0xff] %v9458_v50  ;;  %v1294_v25 = vld [vmem:[%s11225_s4 + $0x4d0] sm:$0xff] }
 0x33a   :  { %3958 = vmatpush1.bf16.msra.mxu1 %v9412_v0  ;;  %3886 = vmatprep.subr.bf16.mxu0 %v9414_v13  ;;  %v9464_v13 = vcombine.high %v1286_v12, %v1290_v60  ;;  %v9467_v0 = vcombine.high %v1287_v30, %v1291_v54 }
 0x33b   :  { %3968 = vmatprep.subr.bf16.mxu1 %v9417_v4  ;;  %v9462_v4 = vcombine.low %v1279_v42, %v1283_v2  ;;  %v1299_v42 = vld [vmem:[%s11225_s4 + $0x4f8] sm:$0xff]  ;;  %v9484_v2 = vcombine.low %v1286_v12, %v1290_v60  ;;  %v1306_v12 = vld [vmem:[%s11225_s4 + $0x530] sm:$0xff] }
 0x33c   :  { %3878 = vmatmul.mubr.bf16.vlgmr.msra.gmra.mrb[20].mxu0 %v8661_v45  ;;  %12291 = vst [vmem:[#allocation319_spill] sm:$0xff] %v9464_v13  ;;  %12292 = vst [vmem:[#allocation320_spill] sm:$0xff] %v9467_v0  ;;  %v1303_v60 = vld [vmem:[%s11225_s4 + $0x518] sm:$0xff] }
 0x33d   :  { %3960 = vmatmul.mubr.bf16.vlgmr.msra.gmra.mrb[20].mxu1 %v8661_v45  ;;  %3887 = vmatpush1.bf16.msra.mxu0 %v9432_v22  ;;  %12290 = vst [vmem:[#allocation318_spill] sm:$0xff] %v9462_v4  ;;  %12293 = vst [vmem:[#allocation321_spill] sm:$0xff] %v9484_v2  ;;  %v1302_v22 = vld [vmem:[%s11225_s4 + $0x510] sm:$0xff] }
 0x33e   :  { %3969 = vmatpush1.bf16.msra.mxu1 %v9436_v63  ;;  %3888 = vmatprep.subr.bf16.mxu0 %v9438_v48  ;;  %v9490_v48 = vcombine.high %v1294_v25, %v1298_v27  ;;  %v9493_v63 = vcombine.high %v1295_v31, %v1299_v42 }
 0x33f   :  { %3970 = vmatprep.subr.bf16.mxu1 %v9441_v58  ;;  %3918 = vmatprep.mubr.bf16.mxu0 %v12224_v18  ;;  %v9488_v58 = vcombine.low %v1287_v30, %v1291_v54  ;;  %v1307_v30 = vld [vmem:[%s11225_s4 + $0x538] sm:$0xff]  ;;  %v9508_v54 = vcombine.low %v1294_v25, %v1298_v27  ;;  %v1314_v25 = vld [vmem:[%s11225_s4 + $0x570] sm:$0xff] }
 0x340   :  { %4000 = vmatprep.mubr.bf16.mxu1 %v12224_v18  ;;  %12295 = vst [vmem:[#allocation323_spill] sm:$0xff] %v9490_v48  ;;  %12296 = vst [vmem:[#allocation324_spill] sm:$0xff] %v9493_v63  ;;  %v1311_v27 = vld [vmem:[%s11225_s4 + $0x558] sm:$0xff] }
 0x341   :  { %3889 = vmatpush1.bf16.msra.mxu0 %v9458_v50  ;;  %12294 = vst [vmem:[#allocation322_spill] sm:$0xff] %v9488_v58  ;;  %12297 = vst [vmem:[#allocation325_spill] sm:$0xff] %v9508_v54  ;;  %v1310_v50 = vld [vmem:[%s11225_s4 + $0x550] sm:$0xff] }
 0x342   :  { %3971 = vmatpush1.bf16.msra.mxu1 %v9462_v4  ;;  %3890 = vmatprep.subr.bf16.mxu0 %v9464_v13  ;;  %v9514_v13 = vcombine.high %v1302_v22, %v1306_v12  ;;  %v9517_v4 = vcombine.high %v1303_v60, %v1307_v30 }
 0x343   :  { %3972 = vmatprep.subr.bf16.mxu1 %v9467_v0  ;;  %v9512_v0 = vcombine.low %v1295_v31, %v1299_v42  ;;  %v1315_v31 = vld [vmem:[%s11225_s4 + $0x578] sm:$0xff]  ;;  %v9532_v42 = vcombine.low %v1302_v22, %v1306_v12  ;;  %v1322_v22 = vld [vmem:[%s11225_s4 + $0x5b0] sm:$0xff] }
 0x344   :  { %12299 = vst [vmem:[#allocation327_spill] sm:$0xff] %v9514_v13  ;;  %12300 = vst [vmem:[#allocation328_spill] sm:$0xff] %v9517_v4  ;;  %v1319_v12 = vld [vmem:[%s11225_s4 + $0x598] sm:$0xff] }
 0x345   :  { %3891 = vmatpush1.bf16.msra.mxu0 %v9484_v2  ;;  %12298 = vst [vmem:[#allocation326_spill] sm:$0xff] %v9512_v0  ;;  %12301 = vst [vmem:[#allocation329_spill] sm:$0xff] %v9532_v42  ;;  %v1318_v2 = vld [vmem:[%s11225_s4 + $0x590] sm:$0xff] }
 0x346   :  { %3973 = vmatpush1.bf16.msra.mxu1 %v9488_v58  ;;  %3892 = vmatprep.subr.bf16.mxu0 %v9490_v48  ;;  %v9538_v48 = vcombine.high %v1310_v50, %v1314_v25  ;;  %v9541_v58 = vcombine.high %v1311_v27, %v1315_v31 }
 0x347   :  { %3974 = vmatprep.subr.bf16.mxu1 %v9493_v63  ;;  %v9536_v63 = vcombine.low %v1303_v60, %v1307_v30  ;;  %v1323_v60 = vld [vmem:[%s11225_s4 + $0x5b8] sm:$0xff]  ;;  %v9556_v30 = vcombine.low %v1310_v50, %v1314_v25  ;;  %v1330_v50 = vld [vmem:[%s11225_s4 + $0x5f0] sm:$0xff] }
 0x348   :  { %12303 = vst [vmem:[#allocation331_spill] sm:$0xff] %v9538_v48  ;;  %12304 = vst [vmem:[#allocation332_spill] sm:$0xff] %v9541_v58  ;;  %v1327_v25 = vld [vmem:[%s11225_s4 + $0x5d8] sm:$0xff] }
 0x349   :  { %3893 = vmatpush1.bf16.msra.mxu0 %v9508_v54  ;;  %12302 = vst [vmem:[#allocation330_spill] sm:$0xff] %v9536_v63  ;;  %12305 = vst [vmem:[#allocation333_spill] sm:$0xff] %v9556_v30  ;;  %v1326_v54 = vld [vmem:[%s11225_s4 + $0x5d0] sm:$0xff] }
 0x34a   :  { %3975 = vmatpush1.bf16.msra.mxu1 %v9512_v0  ;;  %3894 = vmatprep.subr.bf16.mxu0 %v9514_v13  ;;  %v9562_v13 = vcombine.high %v1318_v2, %v1322_v22  ;;  %v9565_v0 = vcombine.high %v1319_v12, %v1323_v60 }
 0x34b   :  { %3976 = vmatprep.subr.bf16.mxu1 %v9517_v4  ;;  %v9560_v4 = vcombine.low %v1311_v27, %v1315_v31  ;;  %v1331_v27 = vld [vmem:[%s11225_s4 + $0x5f8] sm:$0xff]  ;;  %v9580_v31 = vcombine.low %v1318_v2, %v1322_v22  ;;  %v1338_v2 = vld [vmem:[%s11225_s4 + $0x630] sm:$0xff] }
 0x34c   :  { %12307 = vst [vmem:[#allocation335_spill] sm:$0xff] %v9562_v13  ;;  %12308 = vst [vmem:[#allocation336_spill] sm:$0xff] %v9565_v0  ;;  %v1335_v22 = vld [vmem:[%s11225_s4 + $0x618] sm:$0xff] }
 0x34d   :  { %3895 = vmatpush1.bf16.msra.mxu0 %v9532_v42  ;;  %12306 = vst [vmem:[#allocation334_spill] sm:$0xff] %v9560_v4  ;;  %12309 = vst [vmem:[#allocation337_spill] sm:$0xff] %v9580_v31  ;;  %v1334_v42 = vld [vmem:[%s11225_s4 + $0x610] sm:$0xff] }
 0x34e   :  { %3977 = vmatpush1.bf16.msra.mxu1 %v9536_v63  ;;  %3896 = vmatprep.subr.bf16.mxu0 %v9538_v48  ;;  %v9586_v48 = vcombine.high %v1326_v54, %v1330_v50  ;;  %v9589_v63 = vcombine.high %v1327_v25, %v1331_v27 }
 0x34f   :  { %3978 = vmatprep.subr.bf16.mxu1 %v9541_v58  ;;  %v9584_v58 = vcombine.low %v1319_v12, %v1323_v60  ;;  %v1339_v12 = vld [vmem:[%s11225_s4 + $0x638] sm:$0xff]  ;;  %v9604_v60 = vcombine.low %v1326_v54, %v1330_v50  ;;  %v1346_v54 = vld [vmem:[%s11225_s4 + $0x670] sm:$0xff] }
 0x350   :  { %12311 = vst [vmem:[#allocation339_spill] sm:$0xff] %v9586_v48  ;;  %12312 = vst [vmem:[#allocation340_spill] sm:$0xff] %v9589_v63  ;;  %v1343_v50 = vld [vmem:[%s11225_s4 + $0x658] sm:$0xff] }
 0x351   :  { %3897 = vmatpush1.bf16.msra.mxu0 %v9556_v30  ;;  %12310 = vst [vmem:[#allocation338_spill] sm:$0xff] %v9584_v58  ;;  %12313 = vst [vmem:[#allocation341_spill] sm:$0xff] %v9604_v60  ;;  %v1342_v30 = vld [vmem:[%s11225_s4 + $0x650] sm:$0xff] }
 0x352   :  { %3979 = vmatpush1.bf16.msra.mxu1 %v9560_v4  ;;  %3898 = vmatprep.subr.bf16.mxu0 %v9562_v13  ;;  %v9610_v13 = vcombine.high %v1334_v42, %v1338_v2  ;;  %v9613_v4 = vcombine.high %v1335_v22, %v1339_v12 }
 0x353   :  { %3980 = vmatprep.subr.bf16.mxu1 %v9565_v0  ;;  %v9608_v0 = vcombine.low %v1327_v25, %v1331_v27  ;;  %v1347_v25 = vld [vmem:[%s11225_s4 + $0x678] sm:$0xff]  ;;  %v9628_v27 = vcombine.low %v1334_v42, %v1338_v2  ;;  %v1354_v42 = vld [vmem:[%s11225_s4 + $0x6b0] sm:$0xff] }
 0x354   :  { %12315 = vst [vmem:[#allocation343_spill] sm:$0xff] %v9610_v13  ;;  %12316 = vst [vmem:[#allocation344_spill] sm:$0xff] %v9613_v4  ;;  %v1351_v2 = vld [vmem:[%s11225_s4 + $0x698] sm:$0xff] }
 0x355   :  { %3899 = vmatpush1.bf16.msra.mxu0 %v9580_v31  ;;  %12314 = vst [vmem:[#allocation342_spill] sm:$0xff] %v9608_v0  ;;  %12317 = vst [vmem:[#allocation345_spill] sm:$0xff] %v9628_v27  ;;  %v1350_v31 = vld [vmem:[%s11225_s4 + $0x690] sm:$0xff] }
 0x356   :  { %3981 = vmatpush1.bf16.msra.mxu1 %v9584_v58  ;;  %3900 = vmatprep.subr.bf16.mxu0 %v9586_v48  ;;  %v9634_v48 = vcombine.high %v1342_v30, %v1346_v54  ;;  %v9637_v58 = vcombine.high %v1343_v50, %v1347_v25 }
 0x357   :  { %3982 = vmatprep.subr.bf16.mxu1 %v9589_v63  ;;  %v9632_v63 = vcombine.low %v1335_v22, %v1339_v12  ;;  %v1355_v22 = vld [vmem:[%s11225_s4 + $0x6b8] sm:$0xff]  ;;  %v9652_v12 = vcombine.low %v1342_v30, %v1346_v54  ;;  %v1362_v30 = vld [vmem:[%s11225_s4 + $0x6f0] sm:$0xff] }
 0x358   :  { %12319 = vst [vmem:[#allocation347_spill] sm:$0xff] %v9634_v48  ;;  %12320 = vst [vmem:[#allocation348_spill] sm:$0xff] %v9637_v58  ;;  %v1359_v54 = vld [vmem:[%s11225_s4 + $0x6d8] sm:$0xff] }
 0x359   :  { %3901 = vmatpush1.bf16.msra.mxu0 %v9604_v60  ;;  %12318 = vst [vmem:[#allocation346_spill] sm:$0xff] %v9632_v63  ;;  %12321 = vst [vmem:[#allocation349_spill] sm:$0xff] %v9652_v12  ;;  %v1358_v60 = vld [vmem:[%s11225_s4 + $0x6d0] sm:$0xff] }
 0x35a   :  { %3983 = vmatpush1.bf16.msra.mxu1 %v9608_v0  ;;  %3902 = vmatprep.subr.bf16.mxu0 %v9610_v13  ;;  %v9658_v13 = vcombine.high %v1350_v31, %v1354_v42  ;;  %v9661_v0 = vcombine.high %v1351_v2, %v1355_v22 }
 0x35b   :  { %3984 = vmatprep.subr.bf16.mxu1 %v9613_v4  ;;  %v9656_v4 = vcombine.low %v1343_v50, %v1347_v25  ;;  %v1363_v50 = vld [vmem:[%s11225_s4 + $0x6f8] sm:$0xff]  ;;  %v9676_v25 = vcombine.low %v1350_v31, %v1354_v42  ;;  %v1370_v31 = vld [vmem:[%s11225_s4 + $0x730] sm:$0xff] }
 0x35c   :  { %12323 = vst [vmem:[#allocation351_spill] sm:$0xff] %v9658_v13  ;;  %12324 = vst [vmem:[#allocation352_spill] sm:$0xff] %v9661_v0  ;;  %v1367_v42 = vld [vmem:[%s11225_s4 + $0x718] sm:$0xff] }
 0x35d   :  { %3903 = vmatpush1.bf16.msra.mxu0 %v9628_v27  ;;  %12322 = vst [vmem:[#allocation350_spill] sm:$0xff] %v9656_v4  ;;  %12325 = vst [vmem:[#allocation353_spill] sm:$0xff] %v9676_v25  ;;  %v1366_v27 = vld [vmem:[%s11225_s4 + $0x710] sm:$0xff] }
 0x35e   :  { %3985 = vmatpush1.bf16.msra.mxu1 %v9632_v63  ;;  %3904 = vmatprep.subr.bf16.mxu0 %v9634_v48  ;;  %v9682_v48 = vcombine.high %v1358_v60, %v1362_v30  ;;  %v9685_v63 = vcombine.high %v1359_v54, %v1363_v50 }
 0x35f   :  { %3986 = vmatprep.subr.bf16.mxu1 %v9637_v58  ;;  %v9680_v58 = vcombine.low %v1351_v2, %v1355_v22  ;;  %v1371_v2 = vld [vmem:[%s11225_s4 + $0x738] sm:$0xff]  ;;  %v9700_v22 = vcombine.low %v1358_v60, %v1362_v30  ;;  %v1378_v60 = vld [vmem:[%s11225_s4 + $0x770] sm:$0xff] }
 0x360   :  { %12327 = vst [vmem:[#allocation355_spill] sm:$0xff] %v9682_v48  ;;  %12328 = vst [vmem:[#allocation356_spill] sm:$0xff] %v9685_v63  ;;  %v1375_v30 = vld [vmem:[%s11225_s4 + $0x758] sm:$0xff] }
 0x361   :  { %3905 = vmatpush1.bf16.msra.mxu0 %v9652_v12  ;;  %12326 = vst [vmem:[#allocation354_spill] sm:$0xff] %v9680_v58  ;;  %12329 = vst [vmem:[#allocation357_spill] sm:$0xff] %v9700_v22  ;;  %v1374_v12 = vld [vmem:[%s11225_s4 + $0x750] sm:$0xff] }
 0x362   :  { %3987 = vmatpush1.bf16.msra.mxu1 %v9656_v4  ;;  %3906 = vmatprep.subr.bf16.mxu0 %v9658_v13  ;;  %v9706_v13 = vcombine.high %v1366_v27, %v1370_v31  ;;  %v9709_v4 = vcombine.high %v1367_v42, %v1371_v2 }
 0x363   :  { %3988 = vmatprep.subr.bf16.mxu1 %v9661_v0  ;;  %v9704_v0 = vcombine.low %v1359_v54, %v1363_v50  ;;  %v1379_v54 = vld [vmem:[%s11225_s4 + $0x778] sm:$0xff]  ;;  %v9724_v50 = vcombine.low %v1366_v27, %v1370_v31  ;;  %v1386_v27 = vld [vmem:[%s11225_s4 + $0x7b0] sm:$0xff] }
 0x364   :  { %12331 = vst [vmem:[#allocation359_spill] sm:$0xff] %v9706_v13  ;;  %12332 = vst [vmem:[#allocation360_spill] sm:$0xff] %v9709_v4  ;;  %v1383_v31 = vld [vmem:[%s11225_s4 + $0x798] sm:$0xff] }
 0x365   :  { %3907 = vmatpush1.bf16.msra.mxu0 %v9676_v25  ;;  %12330 = vst [vmem:[#allocation358_spill] sm:$0xff] %v9704_v0  ;;  %12333 = vst [vmem:[#allocation361_spill] sm:$0xff] %v9724_v50  ;;  %v1382_v25 = vld [vmem:[%s11225_s4 + $0x790] sm:$0xff] }
 0x366   :  { %3989 = vmatpush1.bf16.msra.mxu1 %v9680_v58  ;;  %3908 = vmatprep.subr.bf16.mxu0 %v9682_v48  ;;  %v9730_v48 = vcombine.high %v1374_v12, %v1378_v60  ;;  %v9733_v58 = vcombine.high %v1375_v30, %v1379_v54 }
 0x367   :  { %3990 = vmatprep.subr.bf16.mxu1 %v9685_v63  ;;  %v9728_v63 = vcombine.low %v1367_v42, %v1371_v2  ;;  %v1387_v42 = vld [vmem:[%s11225_s4 + $0x7b8] sm:$0xff]  ;;  %v9748_v2 = vcombine.low %v1374_v12, %v1378_v60  ;;  %v1394_v12 = vld [vmem:[%s11225_s4 + $0x7f0] sm:$0xff] }
 0x368   :  { %12335 = vst [vmem:[#allocation363_spill] sm:$0xff] %v9730_v48  ;;  %12336 = vst [vmem:[#allocation364_spill] sm:$0xff] %v9733_v58  ;;  %v1391_v60 = vld [vmem:[%s11225_s4 + $0x7d8] sm:$0xff] }
 0x369   :  { %3909 = vmatpush1.bf16.msra.mxu0 %v9700_v22  ;;  %12334 = vst [vmem:[#allocation362_spill] sm:$0xff] %v9728_v63  ;;  %12337 = vst [vmem:[#allocation365_spill] sm:$0xff] %v9748_v2  ;;  %v1390_v22 = vld [vmem:[%s11225_s4 + $0x7d0] sm:$0xff] }
 0x36a   :  { %3991 = vmatpush1.bf16.msra.mxu1 %v9704_v0  ;;  %3910 = vmatprep.subr.bf16.mxu0 %v9706_v13  ;;  %v9754_v13 = vcombine.high %v1382_v25, %v1386_v27  ;;  %v9757_v0 = vcombine.high %v1383_v31, %v1387_v42 }
 0x36b   :  { %3992 = vmatprep.subr.bf16.mxu1 %v9709_v4  ;;  %v9752_v4 = vcombine.low %v1375_v30, %v1379_v54  ;;  %v1395_v30 = vld [vmem:[%s11225_s4 + $0x7f8] sm:$0xff]  ;;  %v9772_v54 = vcombine.low %v1382_v25, %v1386_v27  ;;  %v12349_v27 = vld [vmem:[#allocation64_spill] sm:$0xff] }
 0x36c   :  { %12339 = vst [vmem:[#allocation367_spill] sm:$0xff] %v9754_v13  ;;  %12340 = vst [vmem:[#allocation368_spill] sm:$0xff] %v9757_v0  ;;  %v9788_v25 = vcombine.low %v1391_v60, %v1395_v30 }
 0x36d   :  { %3911 = vmatpush1.bf16.msra.mxu0 %v9724_v50  ;;  %12338 = vst [vmem:[#allocation366_spill] sm:$0xff] %v9752_v4  ;;  %12341 = vst [vmem:[#allocation369_spill] sm:$0xff] %v9772_v54  ;;  %v9784_v50 = vcombine.low %v1390_v22, %v1394_v12 }
 0x36e   :  { %3993 = vmatpush1.bf16.msra.mxu1 %v9728_v63  ;;  %3912 = vmatprep.subr.bf16.mxu0 %v9730_v48  ;;  %v9778_v48 = vcombine.high %v1390_v22, %v1394_v12  ;;  %v9781_v63 = vcombine.high %v1391_v60, %v1395_v30  ;;  %12346 = vst [vmem:[#allocation374_spill] sm:$0xff] %v9788_v25  ;;  %v12348_v22 = vld [vmem:[#allocation62_spill] sm:$0xff] }
 0x36f   :  { %3994 = vmatprep.subr.bf16.mxu1 %v9733_v58  ;;  %v9776_v58 = vcombine.low %v1383_v31, %v1387_v42  ;;  %12345 = vst [vmem:[#allocation373_spill] sm:$0xff] %v9784_v50  ;;  %v12350_v31 = vld [vmem:[#allocation66_spill] sm:$0xff]  ;;  %v12351_v42 = vld [vmem:[#allocation68_spill] sm:$0xff] }
 0x370   :  { %12343 = vst [vmem:[#allocation371_spill] sm:$0xff] %v9778_v48  ;;  %12344 = vst [vmem:[#allocation372_spill] sm:$0xff] %v9781_v63  ;;  %v12352_v12 = vld [vmem:[#allocation70_spill] sm:$0xff] }
 0x371   :  { %3913 = vmatpush1.bf16.msra.mxu0 %v9748_v2  ;;  %12342 = vst [vmem:[#allocation370_spill] sm:$0xff] %v9776_v58 }
 0x372   :  { %3995 = vmatpush1.bf16.msra.mxu1 %v9752_v4  ;;  %3914 = vmatprep.subr.bf16.mxu0 %v9754_v13 }
 0x373   :  { %3996 = vmatprep.subr.bf16.mxu1 %v9757_v0 }
 0x375   :  { %3915 = vmatpush1.bf16.msra.mxu0 %v9772_v54 }
 0x376   :  { %3997 = vmatpush1.bf16.msra.mxu1 %v9776_v58  ;;  %3916 = vmatprep.subr.bf16.mxu0 %v9778_v48 }
 0x377   :  { %3998 = vmatprep.subr.bf16.mxu1 %v9781_v63 }
 0x379   :  { %3917 = vmatpush1.bf16.msra.mxu0 %v9784_v50 }
 0x37a   :  { %3999 = vmatpush1.bf16.msra.mxu1 %v9788_v25 }
 0x37b   :  { %4268 = vmatprep.subr.bf16.mxu1 %v7347_v10 }
 0x37c   :  { %3919 = vmatmul.mubr.bf16.vlgmr.msra.gmra.mrb[20].mxu0 %v12224_v18 }
 0x37d   :  { %4001 = vmatmul.mubr.bf16.vlgmr.msra.gmra.mrb[20].mxu1 %v12224_v18  ;;  %v12347_v18 = vld [vmem:[#allocation60_spill] sm:$0xff] }
 0x37e   :  { %4269 = vmatpush1.bf16.msra.mxu1 %v7363_v17  ;;  %4300 = vmatprep.mubr.bf16.mxu1 %v8648_v61 }
 0x37f   :  { %4270 = vmatprep.subr.bf16.mxu1 %v7368_v53 }
 0x382   :  { %4271 = vmatpush1.bf16.msra.mxu1 %v7388_v24 }
 0x383   :  { %4272 = vmatprep.subr.bf16.mxu1 %v7394_v26 }
 0x386   :  { %4273 = vmatpush1.bf16.msra.mxu1 %v7414_v32 }
 0x387   :  { %4274 = vmatprep.subr.bf16.mxu1 %v7420_v34 }
 0x38a   :  { %4275 = vmatpush1.bf16.msra.mxu1 %v7438_v39 }
 0x38b   :  { %4276 = vmatprep.subr.bf16.mxu1 %v7444_v41 }
 0x38e   :  { %4277 = vmatpush1.bf16.msra.mxu1 %v7462_v47 }
 0x38f   :  { %4278 = vmatprep.subr.bf16.mxu1 %v7468_v49 }
 0x392   :  { %4279 = vmatpush1.bf16.msra.mxu1 %v7486_v56 }
 0x393   :  { %4280 = vmatprep.subr.bf16.mxu1 %v7492_v59 }
 0x396   :  { %4281 = vmatpush1.bf16.msra.mxu1 %v7510_v1 }
 0x397   :  { %4282 = vmatprep.subr.bf16.mxu1 %v7516_v3 }
 0x39a   :  { %4283 = vmatpush1.bf16.msra.mxu1 %v7534_v9 }
 0x39b   :  { %4284 = vmatprep.subr.bf16.mxu1 %v7540_v14 }
 0x39e   :  { %4285 = vmatpush1.bf16.msra.mxu1 %v7558_v23 }
 0x39f   :  { %4286 = vmatprep.subr.bf16.mxu1 %v7564_v28 }
 0x3a2   :  { %4287 = vmatpush1.bf16.msra.mxu1 %v7582_v38 }
 0x3a3   :  { %4288 = vmatprep.subr.bf16.mxu1 %v7588_v44 }
 0x3a6   :  { %4289 = vmatpush1.bf16.msra.mxu1 %v7606_v55 }
 0x3a7   :  { %4290 = vmatprep.subr.bf16.mxu1 %v7612_v62 }
 0x3aa   :  { %4291 = vmatpush1.bf16.msra.mxu1 %v7630_v8 }
 0x3ab   :  { %4292 = vmatprep.subr.bf16.mxu1 %v7636_v20 }
 0x3ae   :  { %4293 = vmatpush1.bf16.msra.mxu1 %v7654_v37 }
 0x3af   :  { %4294 = vmatprep.subr.bf16.mxu1 %v7660_v51 }
 0x3b2   :  { %4295 = vmatpush1.bf16.msra.mxu1 %v7678_v7 }
 0x3b3   :  { %4296 = vmatprep.subr.bf16.mxu1 %v7684_v21  ;;  %v12361_v21 = vld [vmem:[#allocation88_spill] sm:$0xff] }
 0x3b6   :  { %4297 = vmatpush1.bf16.msra.mxu1 %v7702_v36  ;;  %v12359_v36 = vld [vmem:[#allocation84_spill] sm:$0xff] }
 0x3b7   :  { %4298 = vmatprep.subr.bf16.mxu1 %v7708_v46  ;;  %v12358_v46 = vld [vmem:[#allocation82_spill] sm:$0xff] }
 0x3ba   :  { %4299 = vmatpush1.bf16.msra.mxu1 %v7726_v6  ;;  %v12355_v6 = vld [vmem:[#allocation76_spill] sm:$0xff] }
 0x3bb   :  { %4350 = vmatprep.subr.bf16.mxu1 %v7732_v29  ;;  %v12354_v29 = vld [vmem:[#allocation74_spill] sm:$0xff] }
 0x3bd   :  { %4301 = vmatmul.mubr.bf16.vlgmr.msra.gmra.mrb[24].mxu1 %v8661_v45 }
 0x3be   :  { %4351 = vmatpush1.bf16.msra.mxu1 %v7750_v57  ;;  %4382 = vmatprep.mubr.bf16.mxu1 %v8648_v61  ;;  %v12353_v57 = vld [vmem:[#allocation72_spill] sm:$0xff] }
 0x3bf   :  { %4352 = vmatprep.subr.bf16.mxu1 %v7756_v52 }
 0x3c2   :  { %4353 = vmatpush1.bf16.msra.mxu1 %v7776_v43 }
 0x3c3   :  { %4354 = vmatprep.subr.bf16.mxu1 %v12347_v18 }
 0x3c6   :  { %4355 = vmatpush1.bf16.msra.mxu1 %v12348_v22 }
 0x3c7   :  { %4356 = vmatprep.subr.bf16.mxu1 %v12349_v27 }
 0x3ca   :  { %4357 = vmatpush1.bf16.msra.mxu1 %v12350_v31 }
 0x3cb   :  { %4358 = vmatprep.subr.bf16.mxu1 %v12351_v42  ;;  %v12356_v42 = vld [vmem:[#allocation78_spill] sm:$0xff] }
 0x3ce   :  { %4359 = vmatpush1.bf16.msra.mxu1 %v12352_v12  ;;  %v12357_v12 = vld [vmem:[#allocation80_spill] sm:$0xff] }
 0x3cf   :  { %v9840_v60 = vpop.f32.mrb[16].mxu0  ;;  %v9842_v30 = vpop.f32.mrb[16].mxu1  ;;  %4360 = vmatprep.subr.bf16.mxu1 %v12353_v57  ;;  %v12360_v57 = vld [vmem:[#allocation86_spill] sm:$0xff] }
 0x3d0   :  { %v9845_v52 = vpop.f32.mrb[17].mxu0  ;;  %v9847_v43 = vpop.f32.mrb[17].mxu1 }
 0x3d1   :  { %v3760_v18 = vpop.f32.mrb[18].mxu0  ;;  %v3842_v22 = vpop.f32.mrb[18].mxu1 }
 0x3d2   :  { %4361 = vmatpush1.bf16.msra.mxu1 %v12354_v29  ;;  %v3761_v27 = vpop.f32.mrb[19].mxu0  ;;  %v3843_v31 = vpop.f32.mrb[19].mxu1  ;;  %v12362_v18 = vld [vmem:[#allocation90_spill] sm:$0xff]  ;;  %v12363_v22 = vld [vmem:[#allocation92_spill] sm:$0xff] }
 0x3d3   :  { %4362 = vmatprep.subr.bf16.mxu1 %v12355_v6  ;;  %v12364_v27 = vld [vmem:[#allocation94_spill] sm:$0xff]  ;;  %v12365_v31 = vld [vmem:[#allocation96_spill] sm:$0xff] }
 0x3d4   :  { %v12366_v6 = vld [vmem:[#allocation98_spill] sm:$0xff] }
 0x3d6   :  { %4363 = vmatpush1.bf16.msra.mxu1 %v12356_v42  ;;  %v12367_v42 = vld [vmem:[#allocation100_spill] sm:$0xff] }
 0x3d7   :  { %4364 = vmatprep.subr.bf16.mxu1 %v12357_v12  ;;  %v12368_v12 = vld [vmem:[#allocation102_spill] sm:$0xff] }
 0x3da   :  { %4365 = vmatpush1.bf16.msra.mxu1 %v12358_v46  ;;  %v12369_v46 = vld [vmem:[#allocation104_spill] sm:$0xff] }
 0x3db   :  { %4366 = vmatprep.subr.bf16.mxu1 %v12359_v36  ;;  %v12370_v36 = vld [vmem:[#allocation106_spill] sm:$0xff] }
 0x3de   :  { %4367 = vmatpush1.bf16.msra.mxu1 %v12360_v57  ;;  %v12371_v57 = vld [vmem:[#allocation108_spill] sm:$0xff] }
 0x3df   :  { %4368 = vmatprep.subr.bf16.mxu1 %v12361_v21  ;;  %v12372_v21 = vld [vmem:[#allocation110_spill] sm:$0xff] }
 0x3e2   :  { %4369 = vmatpush1.bf16.msra.mxu1 %v12362_v18  ;;  %v12373_v18 = vld [vmem:[#allocation112_spill] sm:$0xff] }
 0x3e3   :  { %4370 = vmatprep.subr.bf16.mxu1 %v12363_v22  ;;  %v12374_v22 = vld [vmem:[#allocation114_spill] sm:$0xff] }
 0x3e6   :  { %4371 = vmatpush1.bf16.msra.mxu1 %v12364_v27  ;;  %v12375_v27 = vld [vmem:[#allocation125_spill] sm:$0xff] }
 0x3e7   :  { %4372 = vmatprep.subr.bf16.mxu1 %v12365_v31  ;;  %v12386_v31 = vld [vmem:[#allocation147_spill] sm:$0xff] }
 0x3ea   :  { %4373 = vmatpush1.bf16.msra.mxu1 %v12366_v6  ;;  %v12376_v6 = vld [vmem:[#allocation126_spill] sm:$0xff] }
 0x3eb   :  { %4374 = vmatprep.subr.bf16.mxu1 %v12367_v42  ;;  %v12377_v42 = vld [vmem:[#allocation129_spill] sm:$0xff] }
 0x3ee   :  { %4375 = vmatpush1.bf16.msra.mxu1 %v12368_v12  ;;  %v12378_v12 = vld [vmem:[#allocation130_spill] sm:$0xff] }
 0x3ef   :  { %4376 = vmatprep.subr.bf16.mxu1 %v12369_v46  ;;  %v12379_v46 = vld [vmem:[#allocation134_spill] sm:$0xff] }
 0x3f2   :  { %4377 = vmatpush1.bf16.msra.mxu1 %v12370_v36  ;;  %v12380_v36 = vld [vmem:[#allocation133_spill] sm:$0xff] }
 0x3f3   :  { %4378 = vmatprep.subr.bf16.mxu1 %v12371_v57  ;;  %v12381_v57 = vld [vmem:[#allocation137_spill] sm:$0xff] }
 0x3f6   :  { %4379 = vmatpush1.bf16.msra.mxu1 %v12372_v21  ;;  %v12382_v21 = vld [vmem:[#allocation139_spill] sm:$0xff] }
 0x3f7   :  { %4380 = vmatprep.subr.bf16.mxu1 %v12373_v18  ;;  %v12383_v18 = vld [vmem:[#allocation141_spill] sm:$0xff] }
 0x3fa   :  { %4381 = vmatpush1.bf16.msra.mxu1 %v12374_v22  ;;  %v12384_v22 = vld [vmem:[#allocation143_spill] sm:$0xff] }
 0x3fb   :  { %4606 = vmatprep.subr.bf16.mxu1 %v12375_v27  ;;  %v12385_v27 = vld [vmem:[#allocation145_spill] sm:$0xff] }
 0x3fd   :  { %4383 = vmatmul.mubr.bf16.vlgmr.msra.gmra.mrb[28].mxu1 %v8661_v45 }
 0x3fe   :  { %4607 = vmatpush1.bf16.msra.mxu1 %v12376_v6  ;;  %v12387_v6 = vld [vmem:[#allocation149_spill] sm:$0xff] }
 0x3ff   :  { %4608 = vmatprep.subr.bf16.mxu1 %v12377_v42  ;;  %v12388_v42 = vld [vmem:[#allocation151_spill] sm:$0xff] }
 0x402   :  { %4609 = vmatpush1.bf16.msra.mxu1 %v12378_v12  ;;  %v12389_v12 = vld [vmem:[#allocation153_spill] sm:$0xff] }
 0x403   :  { %4610 = vmatprep.subr.bf16.mxu1 %v12379_v46  ;;  %v12390_v46 = vld [vmem:[#allocation155_spill] sm:$0xff] }
 0x406   :  { %4611 = vmatpush1.bf16.msra.mxu1 %v12380_v36  ;;  %v12391_v36 = vld [vmem:[#allocation157_spill] sm:$0xff] }
 0x407   :  { %4612 = vmatprep.subr.bf16.mxu1 %v12381_v57  ;;  %v12392_v57 = vld [vmem:[#allocation159_spill] sm:$0xff] }
 0x40a   :  { %4613 = vmatpush1.bf16.msra.mxu1 %v12382_v21  ;;  %v12393_v21 = vld [vmem:[#allocation161_spill] sm:$0xff] }
 0x40b   :  { %4614 = vmatprep.subr.bf16.mxu1 %v12383_v18  ;;  %v12394_v18 = vld [vmem:[#allocation163_spill] sm:$0xff] }
 0x40e   :  { %4615 = vmatpush1.bf16.msra.mxu1 %v12384_v22  ;;  %v12395_v22 = vld [vmem:[#allocation165_spill] sm:$0xff] }
 0x40f   :  { %4616 = vmatprep.subr.bf16.mxu1 %v12385_v27  ;;  %v12396_v27 = vld [vmem:[#allocation167_spill] sm:$0xff] }
 0x412   :  { %4617 = vmatpush1.bf16.msra.mxu1 %v12386_v31  ;;  %v12397_v31 = vld [vmem:[#allocation169_spill] sm:$0xff] }
 0x413   :  { %4618 = vmatprep.subr.bf16.mxu1 %v12387_v6  ;;  %v12398_v6 = vld [vmem:[#allocation171_spill] sm:$0xff] }
 0x416   :  { %4619 = vmatpush1.bf16.msra.mxu1 %v12388_v42  ;;  %v12399_v42 = vld [vmem:[#allocation173_spill] sm:$0xff] }
 0x417   :  { %4620 = vmatprep.subr.bf16.mxu1 %v12389_v12  ;;  %v12400_v12 = vld [vmem:[#allocation175_spill] sm:$0xff] }
 0x41a   :  { %4621 = vmatpush1.bf16.msra.mxu1 %v12390_v46  ;;  %v12401_v46 = vld [vmem:[#allocation177_spill] sm:$0xff] }
 0x41b   :  { %4622 = vmatprep.subr.bf16.mxu1 %v12391_v36  ;;  %v12402_v36 = vld [vmem:[#allocation179_spill] sm:$0xff] }
 0x41e   :  { %4623 = vmatpush1.bf16.msra.mxu1 %v12392_v57  ;;  %v12403_v57 = vld [vmem:[#allocation181_spill] sm:$0xff] }
 0x41f   :  { %4624 = vmatprep.subr.bf16.mxu1 %v12393_v21  ;;  %v12404_v21 = vld [vmem:[#allocation183_spill] sm:$0xff] }
 0x422   :  { %4625 = vmatpush1.bf16.msra.mxu1 %v12394_v18  ;;  %v12405_v18 = vld [vmem:[#allocation185_spill] sm:$0xff] }
 0x423   :  { %4626 = vmatprep.subr.bf16.mxu1 %v12395_v22 }
 0x426   :  { %4627 = vmatpush1.bf16.msra.mxu1 %v12396_v27  ;;  %v12406_v27 = vld [vmem:[#allocation187_spill] sm:$0xff] }
 0x427   :  { %4628 = vmatprep.subr.bf16.mxu1 %v12397_v31  ;;  %v1396_v31 = vld [vmem:[%s11226_s5] sm:$0xff] }
 0x42a   :  { %4629 = vmatpush1.bf16.msra.mxu1 %v12398_v6  ;;  %v12407_v6 = vld [vmem:[#allocation189_spill] sm:$0xff] }
 0x42b   :  { %4630 = vmatprep.subr.bf16.mxu1 %v12399_v42  ;;  %v12408_v42 = vld [vmem:[#allocation116_spill] sm:$0xff] }
 0x42c   :  { %v12417_v20 = vsub.s32 4, %v12408_v42  ;;  %v12423_v62 = vsub.s32 7, %v12408_v42 }
 0x42e   :  { %4631 = vmatpush1.bf16.msra.mxu1 %v12400_v12  ;;  %v12409_v12 = vsub.s32 0, %v12408_v42  ;;  %v9975_v55 = vrot.slane %v1396_v31, %v12423_v62 }
 0x42f   :  { %4632 = vmatprep.subr.bf16.mxu1 %v12401_v46 }
 0x430   :  { %v9909_v22 = vrot.slane %v1396_v31, %v12409_v12  ;;  %12424 = vst [vmem:[#allocation381_spill] sm:$0xff] %v9975_v55 }
 0x432   :  { %4633 = vmatpush1.bf16.msra.mxu1 %v12402_v36  ;;  %12410 = vst [vmem:[#allocation116_spill] sm:$0xff] %v9909_v22  ;;  %v12411_v36 = vsub.s32 1, %v12408_v42 }
 0x433   :  { %4634 = vmatprep.subr.bf16.mxu1 %v12403_v57 }
 0x434   :  { %v9913_v46 = vrot.slane %v1396_v31, %v12411_v36 }
 0x436   :  { %4635 = vmatpush1.bf16.msra.mxu1 %v12404_v21  ;;  %12412 = vst [vmem:[#allocation375_spill] sm:$0xff] %v9913_v46  ;;  %v9917_v21 = vadd.f32 %v9840_v60, %v9909_v22 }
 0x437   :  { %4636 = vmatprep.subr.bf16.mxu1 %v12405_v18  ;;  %v9921_v18 = vadd.f32 %v9845_v52, %v9913_v46  ;;  %v12415_v46 = vsub.s32 3, %v12408_v42 }
 0x438   :  { %v4027_v12 = vmul.f32 %v9917_v21, %v9917_v21  ;;  %v4009_v36 = vsel %vm2242_vm0, %v9917_v21, 0.0 }
 0x439   :  { %v4010_v52 = vsel %vm2242_vm0, %v9921_v18, 0.0 }
 0x43a   :  { %4637 = vmatpush1.bf16.msra.mxu1 %v12406_v27  ;;  %v12413_v27 = vsub.s32 2, %v12408_v42  ;;  %v4035_v22 = vsel %vm2242_vm0, %v4027_v12, 0.0  ;;  %v4011_v7 = vadd.f32 %v4010_v52, %v4009_v36  ;;  %v12419_v12 = vsub.s32 6, %v12408_v42 }
 0x43b   :  { %4647 = vmatprep.subr.bf16.mxu1 %v12407_v6  ;;  %v4028_v6 = vmul.f32 %v9921_v18, %v9921_v18  ;;  %v12421_v36 = vsub.s32 5, %v12408_v42 }
 0x43c   :  { %v9925_v57 = vrot.slane %v1396_v31, %v12413_v27  ;;  %v9941_v27 = vrot.slane %v1396_v31, %v12415_v46  ;;  %v9955_v46 = vrot.slane %v1396_v31, %v12417_v20 }
 0x43d   :  { %v4036_v29 = vsel %vm2242_vm0, %v4028_v6, 0.0  ;;  %v9959_v6 = vrot.slane %v1396_v31, %v12419_v12  ;;  %v9963_v52 = vrot.slane %v1396_v31, %v12421_v36 }
 0x43e   :  { %12414 = vst [vmem:[#allocation376_spill] sm:$0xff] %v9925_v57  ;;  %v9935_v60 = vadd.f32 %v9842_v30, %v9925_v57  ;;  %12416 = vst [vmem:[#allocation377_spill] sm:$0xff] %v9941_v27  ;;  %v9949_v37 = vadd.f32 %v9847_v43, %v9941_v27  ;;  %v4037_v30 = vadd.f32 %v4036_v29, %v4035_v22 }
 0x43f   :  { %12418 = vst [vmem:[#allocation378_spill] sm:$0xff] %v9955_v46  ;;  %12420 = vst [vmem:[#allocation379_spill] sm:$0xff] %v9959_v6 }
 0x440   :  { %v4029_v51 = vmul.f32 %v9935_v60, %v9935_v60  ;;  %v4012_v57 = vsel %vm2242_vm0, %v9935_v60, 0.0  ;;  %12422 = vst [vmem:[#allocation380_spill] sm:$0xff] %v9963_v52  ;;  %v4030_v29 = vmul.f32 %v9949_v37, %v9949_v37  ;;  %v4014_v20 = vsel %vm2242_vm0, %v9949_v37, 0.0 }
 0x441   :  { %v4013_v8 = vadd.f32 %v4012_v57, %v4011_v7 }
 0x442   :  { %v4038_v43 = vsel %vm2242_vm0, %v4029_v51, 0.0  ;;  %v4040_v38 = vsel %vm2242_vm0, %v4030_v29, 0.0 }
 0x443   :  { %v4039_v22 = vadd.f32 %v4038_v43, %v4037_v30  ;;  %v4015_v36 = vadd.f32 %v4014_v20, %v4013_v8 }
 0x445   :  { %v4041_v31 = vadd.f32 %v4040_v38, %v4039_v22 }
 0x44f   :  { %v3920_v27 = vpop.f32.mrb[20].mxu0 }
 0x450   :  { %v9971_v7 = vadd.f32 %v3920_v27, %v9955_v46  ;;  %v4002_v57 = vpop.f32.mrb[20].mxu1  ;;  %v3922_v12 = vpop.f32.mrb[21].mxu0 }
 0x451   :  { %v9978_v51 = vadd.f32 %v4002_v57, %v9959_v6  ;;  %v9981_v44 = vadd.f32 %v3922_v12, %v9963_v52  ;;  %v4004_v30 = vpop.f32.mrb[21].mxu1  ;;  %v3924_v43 = vpop.f32.mrb[22].mxu0 }
 0x452   :  { %v4016_v27 = vsel %vm2242_vm0, %v9971_v7, 0.0  ;;  %v4031_v46 = vmul.f32 %v9971_v7, %v9971_v7  ;;  %v4006_v42 = vpop.f32.mrb[22].mxu1  ;;  %v3925_v62 = vpop.f32.mrb[23].mxu0  ;;  %v9996_v52 = vadd.f32 %v4004_v30, %v9975_v55 }
 0x453   :  { %v4032_v8 = vmul.f32 %v9981_v44, %v9981_v44  ;;  %v4007_v20 = vpop.f32.mrb[23].mxu1  ;;  %v4017_v57 = vadd.f32 %v4016_v27, %v4015_v36  ;;  %v4018_v12 = vsel %vm2242_vm0, %v9981_v44, 0.0  ;;  %v4033_v29 = vmul.f32 %v9978_v51, %v9978_v51 }
 0x454   :  { %v4042_v43 = vsel %vm2242_vm0, %v4031_v46, 0.0  ;;  %v4020_v22 = vsel %vm2242_vm0, %v9978_v51, 0.0  ;;  %v4022_v27 = vsel %vm2242_vm0, %v9996_v52, 0.0  ;;  %v4034_v46 = vmul.f32 %v9996_v52, %v9996_v52 }
 0x455   :  { %v4019_v6 = vadd.f32 %v4018_v12, %v4017_v57  ;;  %v4043_v42 = vadd.f32 %v4042_v43, %v4041_v31  ;;  %v4044_v38 = vsel %vm2242_vm0, %v4032_v8, 0.0  ;;  %v4046_v20 = vsel %vm2242_vm0, %v4033_v29, 0.0  ;;  %v6632_v8 = vld [vmem:[%s11227_s6] sm:$0xff]   ;;  %v6633_v12 = vld [vmem:[%s11227_s6 + $0x48] sm:$0xff]   ;;  %v6635_v43 = vld [vmem:[%s11227_s6 + $0x50] sm:$0xff]  }
 0x456   :  { %v4048_v31 = vsel %vm2242_vm0, %v4034_v46, 0.0  ;;  %v6636_v29 = vld [vmem:[%s11227_s6 + $0x10] sm:$0xff]  }
 0x457   :  { %v4021_v62 = vadd.f32 %v4020_v22, %v4019_v6  ;;  %v4045_v36 = vadd.f32 %v4044_v38, %v4043_v42  ;;  %v6631_v6 = vld [vmem:[%s11227_s6 + $0x40] sm:$0xff]   ;;  %v6637_v42 = vld [vmem:[%s11227_s6 + $0x58] sm:$0xff]   ;;  %v6643_v46 = vld [vmem:[%s11227_s6 + $0x70] sm:$0xff]  }
 0x458   :  { %6489 = vmatprep.subr.bf16.mxu0 %v6631_v6  ;;  %v6638_v38 = vld [vmem:[%s11227_s6 + $0x18] sm:$0xff]   ;;  %v6639_v22 = vld [vmem:[%s11227_s6 + $0x60] sm:$0xff]  }
 0x459   :  { %v4023_v28 = vadd.f32 %v4022_v27, %v4021_v62  ;;  %v4047_v30 = vadd.f32 %v4046_v20, %v4045_v36  ;;  %6490 = vmatpush3.bf16.msra.mxu0 %v6632_v8  ;;  %v6640_v62 = vld [vmem:[%s11227_s6 + $0x20] sm:$0xff]   ;;  %v6641_v36 = vld [vmem:[%s11227_s6 + $0x68] sm:$0xff]   ;;  %v6644_v20 = vld [vmem:[%s11227_s6 + $0x30] sm:$0xff]  }
 0x45a   :  { %6491 = vmatprep.subr.bf16.mxu0 %v6633_v12  ;;  %v6642_v27 = vld [vmem:[%s11227_s6 + $0x28] sm:$0xff]   ;;  %v6646_v6 = vld [vmem:[%s11227_s6 + $0x38] sm:$0xff]  }
 0x45b   :  { %4024 = vadd.xlane.f32.xlu1 %v4023_v28  ;;  %v4049_v57 = vadd.f32 %v4048_v31, %v4047_v30  ;;  %v6634_v28 = vld [vmem:[%s11227_s6 + $0x8] sm:$0xff]   ;;  %v6645_v30 = vld [vmem:[%s11227_s6 + $0x78] sm:$0xff]  }
 0x45d   :  { %6492 = vmatpush3.bf16.msra.mxu0 %v6634_v28  ;;  %v12425_v28 = vld [vmem:[#allocation2_spill] sm:$0xff] }
 0x45e   :  { %6493 = vmatprep.subr.bf16.mxu0 %v6635_v43 }
 0x45f   :  { %4050 = vadd.xlane.f32.xlu1 %v4049_v57 }
 0x461   :  { %6494 = vmatpush3.bf16.msra.mxu0 %v6636_v29 }
 0x462   :  { %6495 = vmatprep.subr.bf16.mxu0 %v6637_v42 }
 0x465   :  { %6496 = vmatpush3.bf16.msra.mxu0 %v6638_v38 }
 0x466   :  { %6497 = vmatprep.subr.bf16.mxu0 %v6639_v22 }
 0x469   :  { %6498 = vmatpush3.bf16.msra.mxu0 %v6640_v62 }
 0x46a   :  { %6499 = vmatprep.subr.bf16.mxu0 %v6641_v36 }
 0x46d   :  { %6500 = vmatpush3.bf16.msra.mxu0 %v6642_v27 }
 0x46e   :  { %6501 = vmatprep.subr.bf16.mxu0 %v6643_v46 }
 0x471   :  { %6502 = vmatpush3.bf16.msra.mxu0 %v6644_v20 }
 0x472   :  { %6503 = vmatprep.subr.bf16.mxu0 %v6645_v30 }
 0x475   :  { %6504 = vmatpush3.bf16.msra.mxu0 %v6646_v6 }
 0x476   :  { %4309 = vmatprep.subr.bf16.mxu0 %v12425_v28 }
 0x490   :  { %v10052_v31 = vpop.f32.mrb[24].mxu1 }
 0x491   :  { %v10054_v57 = vpop.f32.mrb[25].mxu1 }
 0x492   :  { %v4306_v8 = vpop.f32.mrb[26].mxu1 }
 0x493   :  { %v4307_v12 = vpop.f32.mrb[27].mxu1 }
 0x4d0   :  { %v10060_v43 = vpop.f32.mrb[28].mxu1 }
 0x4d1   :  { %v10062_v29 = vpop.f32.mrb[29].mxu1 }
 0x4d2   :  { %v4388_v42 = vpop.f32.mrb[30].mxu1 }
 0x4d3   :  { %v4389_v38 = vpop.f32.mrb[31].mxu1 }
 0x4e8   :  { %v4025_v22 = vpop.xlane.xlu1 %4024 }
 0x4e9   :  { %v4026_v62 = vmul.f32 0.0009765625, %v4025_v22 }
 0x4eb   :  { %v4053_v27 = vmul.f32 %v4026_v62, %v4026_v62  ;;  %v4057_v30 = vsub.f32 %v9921_v18, %v4026_v62  ;;  %v4059_v6 = vsub.f32 %v9949_v37, %v4026_v62  ;;  %v4056_v12 = vsub.f32 %v9917_v21, %v4026_v62 }
 0x4ec   :  { %v4051_v36 = vpop.xlane.xlu1 %4050  ;;  %v4058_v14 = vsub.f32 %v9935_v60, %v4026_v62  ;;  %v4063_v21 = vsub.f32 %v9996_v52, %v4026_v62 }
 0x4ed   :  { %v4052_v46 = vmul.f32 0.0009765625, %v4051_v36 }
 0x4ef   :  { %v4054_v20 = vsub.f32 %v4052_v46, %v4053_v27 }
 0x4f1   :  { %v4055_v55 = vmax.f32 %v4054_v20, 0.0 }
 0x4f3   :  { %v4064_v23 = vadd.f32 1e-05, %v4055_v55  ;;  %v4060_v55 = vsub.f32 %v9971_v7, %v4026_v62 }
 0x4f5   :  { %6681 = vrsqrt.f32 %v4064_v23  ;;  %v4061_v23 = vsub.f32 %v9981_v44, %v4026_v62 }
 0x4ff   :  { %v6682_v8 = vpop.eup %6681 }
 0x500   :  { %v4067_v42 = vmul.f32 %v6682_v8, %v4057_v30  ;;  %v4069_v38 = vmul.f32 %v6682_v8, %v4059_v6  ;;  %v4066_v28 = vmul.f32 %v6682_v8, %v4056_v12  ;;  %v4068_v22 = vmul.f32 %v6682_v8, %v4058_v14 }
 0x501   :  { %v4071_v37 = vmul.f32 %v6682_v8, %v4061_v23  ;;  %v4070_v18 = vmul.f32 %v6682_v8, %v4060_v55  ;;  %v4073_v60 = vmul.f32 %v6682_v8, %v4063_v21  ;;  %v4062_v14 = vsub.f32 %v9978_v51, %v4026_v62 }
 0x502   :  { %v6441_v9 = vmul.f32 -1.442695, %v4067_v42  ;;  %v6443_v3 = vmul.f32 -1.442695, %v4069_v38  ;;  %v6440_v36 = vmul.f32 -1.442695, %v4066_v28 }
 0x503   :  { %v6442_v27 = vmul.f32 -1.442695, %v4068_v22  ;;  %v6445_v46 = vmul.f32 -1.442695, %v4071_v37  ;;  %v6444_v20 = vmul.f32 -1.442695, %v4070_v18  ;;  %v4072_v44 = vmul.f32 %v6682_v8, %v4062_v14 }
 0x504   :  { %6683 = vpow2.f32 %v6441_v9 }
 0x505   :  { %6685 = vpow2.f32 %v6443_v3 }
 0x506   :  { %6687 = vpow2.f32 %v6440_v36 }
 0x507   :  { %6689 = vpow2.f32 %v6442_v27 }
 0x508   :  { %6691 = vtanh.f32 %v4073_v60 }
 0x509   :  { %6693 = vpow2.f32 %v6445_v46 }
 0x50a   :  { %6695 = vpow2.f32 %v6444_v20 }
 0x50e   :  { %v6684_v30 = vpop.eup %6683 }
 0x50f   :  { %v6686_v9 = vpop.eup %6685  ;;  %v4081_v28 = vadd.f32 1.0, %v6684_v30 }
 0x510   :  { %v4093_v3 = vadd.f32 1.0, %v6686_v9  ;;  %v6688_v7 = vpop.eup %6687 }
 0x511   :  { %6697 = vrcp.f32 %v4081_v28  ;;  %v6690_v6 = vpop.eup %6689  ;;  %v4080_v52 = vadd.f32 1.0, %v6688_v7 }
 0x512   :  { %6699 = vrcp.f32 %v4093_v3  ;;  %v4092_v12 = vadd.f32 1.0, %v6690_v6  ;;  %v6692_v42 = vpop.eup %6691 }
 0x513   :  { %6701 = vtanh.f32 %v4072_v44  ;;  %v6694_v38 = vpop.eup %6693 }
 0x514   :  { %6703 = vrcp.f32 %v4080_v52  ;;  %v6696_v51 = vpop.eup %6695  ;;  %v4105_v36 = vadd.f32 1.0, %v6694_v38  ;;  %v12426_v52 = vld [vmem:[#allocation3_spill] sm:$0xff]  ;;  %v12429_v38 = vld [vmem:[#allocation6_spill] sm:$0xff] }
 0x515   :  { %6705 = vrcp.f32 %v4092_v12  ;;  %v4104_v18 = vadd.f32 1.0, %v6696_v51  ;;  %v12427_v12 = vld [vmem:[#allocation4_spill] sm:$0xff]  ;;  %v12430_v51 = vld [vmem:[#allocation7_spill] sm:$0xff] }
 0x516   :  { %6707 = vrcp.f32 %v4105_v36  ;;  %v12433_v36 = vld [vmem:[#allocation10_spill] sm:$0xff] }
 0x51b   :  { %v6698_v62 = vpop.eup %6697 }
 0x51c   :  { %v6700_v22 = vpop.eup %6699  ;;  %v4115_v27 = vmul.f32 %v6698_v62, %v6692_v42  ;;  %v12428_v42 = vld [vmem:[#allocation5_spill] sm:$0xff]  ;;  %v12431_v62 = vld [vmem:[#allocation8_spill] sm:$0xff] }
 0x51d   :  { %v6702_v23 = vpop.eup %6701  ;;  %v4113_v8 = vmul.f32 0.0, %v6700_v22  ;;  %v12432_v22 = vld [vmem:[#allocation9_spill] sm:$0xff] }
 0x51e   :  { %v6704_v55 = vpop.eup %6703 }
 0x51f   :  { %v6706_v37 = vpop.eup %6705  ;;  %v10072_v21 = vadd.f32 %v4115_v27, %v4113_v8  ;;  %v4114_v60 = vmul.f32 %v6704_v55, %v6702_v23  ;;  %v12434_v27 = vld [vmem:[#allocation11_spill] sm:$0xff]  ;;  %v12435_v23 = vld [vmem:[#allocation12_spill] sm:$0xff]  ;;  %v12436_v8 = vld [vmem:[#allocation13_spill] sm:$0xff] }
 0x520   :  { %v4112_v46 = vmul.f32 0.0, %v6706_v37  ;;  %v6708_v14 = vpop.eup %6707  ;;  %v12437_v55 = vld [vmem:[#allocation14_spill] sm:$0xff]  ;;  %v12438_v37 = vld [vmem:[#allocation15_spill] sm:$0xff] }
 0x521   :  { %6709 = vtanh.f32 %v10072_v21 }
 0x522   :  { %v10075_v20 = vadd.f32 %v4114_v60, %v4112_v46  ;;  %6711 = vrcp.f32 %v4104_v18  ;;  %v12439_v18 = vld [vmem:[#allocation17_spill] sm:$0xff]  ;;  %v12440_v60 = vld [vmem:[#allocation19_spill] sm:$0xff] }
 0x523   :  { %v12441_v46 = vld [vmem:[#allocation21_spill] sm:$0xff] }
 0x524   :  { %6713 = vtanh.f32 %v10075_v20 }
 0x52b   :  { %v6710_v30 = vpop.eup %6709 }
 0x52c   :  { %v10078_v9 = vmul.f32 %v6710_v30, %v6708_v14  ;;  %v6712_v28 = vpop.eup %6711  ;;  %v12442_v14 = vld [vmem:[#allocation23_spill] sm:$0xff]  ;;  %v12443_v30 = vld [vmem:[#allocation25_spill] sm:$0xff] }
 0x52e   :  { %v6714_v44 = vpop.eup %6713  ;;  %v4123_v3 = vpack.c.bf16 %v10078_v9, %v10078_v9 }
 0x52f   :  { %v10082_v7 = vmul.f32 %v6714_v44, %v6712_v28  ;;  %v12444_v28 = vld [vmem:[#allocation27_spill] sm:$0xff]  ;;  %v12445_v44 = vld [vmem:[#allocation29_spill] sm:$0xff] }
 0x530   :  { %4258 = vmatprep.mubr.bf16.mxu0 %v4123_v3  ;;  %v12446_v3 = vld [vmem:[#allocation31_spill] sm:$0xff] }
 0x531   :  { %v4122_v6 = vpack.c.bf16 %v10082_v7, %v10082_v7 }
 0x533   :  { %4259 = vmatmul.mubr.bf16.vlgmr.msra.gmra.mrb[24].mxu0 %v4122_v6  ;;  %v12447_v6 = vld [vmem:[#allocation33_spill] sm:$0xff] }
 0x534   :  { %4310 = vmatpush1.bf16.msra.mxu0 %v12426_v52  ;;  %4341 = vmatprep.mubr.bf16.mxu0 %v8648_v61 }
 0x535   :  { %4311 = vmatprep.subr.bf16.mxu0 %v12427_v12 }
 0x538   :  { %4312 = vmatpush1.bf16.msra.mxu0 %v12428_v42 }
 0x539   :  { %4313 = vmatprep.subr.bf16.mxu0 %v12429_v38 }
 0x53c   :  { %4314 = vmatpush1.bf16.msra.mxu0 %v12430_v51 }
 0x53d   :  { %4315 = vmatprep.subr.bf16.mxu0 %v12431_v62  ;;  %v12526_v62 = vld [vmem:[#allocation121_spill] sm:$0xff] }
 0x540   :  { %4316 = vmatpush1.bf16.msra.mxu0 %v12432_v22 }
 0x541   :  { %4317 = vmatprep.subr.bf16.mxu0 %v12433_v36 }
 0x544   :  { %4318 = vmatpush1.bf16.msra.mxu0 %v12434_v27  ;;  %v12522_v27 = vld [vmem:[#allocation117_spill] sm:$0xff] }
 0x545   :  { %4319 = vmatprep.subr.bf16.mxu0 %v12435_v23 }
 0x548   :  { %4320 = vmatpush1.bf16.msra.mxu0 %v12436_v8  ;;  %v4441_v8 = vrot.slane %v10054_v57, 6 }
 0x549   :  { %4321 = vmatprep.subr.bf16.mxu0 %v12437_v55  ;;  %v12448_v55 = vld [vmem:[#allocation35_spill] sm:$0xff] }
 0x54c   :  { %4322 = vmatpush1.bf16.msra.mxu0 %v12438_v37  ;;  %v12449_v37 = vld [vmem:[#allocation37_spill] sm:$0xff] }
 0x54d   :  { %4323 = vmatprep.subr.bf16.mxu0 %v12439_v18  ;;  %v12450_v18 = vld [vmem:[#allocation39_spill] sm:$0xff] }
 0x550   :  { %4324 = vmatpush1.bf16.msra.mxu0 %v12440_v60  ;;  %v12451_v60 = vld [vmem:[#allocation41_spill] sm:$0xff] }
 0x551   :  { %4325 = vmatprep.subr.bf16.mxu0 %v12441_v46  ;;  %v12452_v46 = vld [vmem:[#allocation43_spill] sm:$0xff] }
 0x554   :  { %4326 = vmatpush1.bf16.msra.mxu0 %v12442_v14  ;;  %v12453_v14 = vld [vmem:[#allocation45_spill] sm:$0xff] }
 0x555   :  { %4327 = vmatprep.subr.bf16.mxu0 %v12443_v30  ;;  %v12454_v30 = vld [vmem:[#allocation47_spill] sm:$0xff] }
 0x558   :  { %4328 = vmatpush1.bf16.msra.mxu0 %v12444_v28  ;;  %v12455_v28 = vld [vmem:[#allocation49_spill] sm:$0xff] }
 0x559   :  { %4329 = vmatprep.subr.bf16.mxu0 %v12445_v44  ;;  %v12456_v44 = vld [vmem:[#allocation51_spill] sm:$0xff] }
 0x55c   :  { %4330 = vmatpush1.bf16.msra.mxu0 %v12446_v3  ;;  %v12457_v3 = vld [vmem:[#allocation53_spill] sm:$0xff] }
 0x55d   :  { %4331 = vmatprep.subr.bf16.mxu0 %v12447_v6 }
 0x560   :  { %4332 = vmatpush1.bf16.msra.mxu0 %v12448_v55  ;;  %v12458_v55 = vld [vmem:[#allocation55_spill] sm:$0xff] }
 0x561   :  { %4333 = vmatprep.subr.bf16.mxu0 %v12449_v37  ;;  %v12467_v37 = vld [vmem:[#allocation73_spill] sm:$0xff] }
 0x564   :  { %4334 = vmatpush1.bf16.msra.mxu0 %v12450_v18  ;;  %v12459_v18 = vld [vmem:[#allocation57_spill] sm:$0xff] }
 0x565   :  { %4335 = vmatprep.subr.bf16.mxu0 %v12451_v60  ;;  %v12460_v60 = vld [vmem:[#allocation59_spill] sm:$0xff] }
 0x568   :  { %4336 = vmatpush1.bf16.msra.mxu0 %v12452_v46  ;;  %v12461_v46 = vld [vmem:[#allocation61_spill] sm:$0xff] }
 0x569   :  { %4337 = vmatprep.subr.bf16.mxu0 %v12453_v14  ;;  %v12462_v14 = vld [vmem:[#allocation63_spill] sm:$0xff] }
 0x56c   :  { %4338 = vmatpush1.bf16.msra.mxu0 %v12454_v30  ;;  %v12463_v30 = vld [vmem:[#allocation65_spill] sm:$0xff] }
 0x56d   :  { %4339 = vmatprep.subr.bf16.mxu0 %v12455_v28  ;;  %v12464_v28 = vld [vmem:[#allocation67_spill] sm:$0xff] }
 0x570   :  { %4340 = vmatpush1.bf16.msra.mxu0 %v12456_v44  ;;  %v12465_v44 = vld [vmem:[#allocation69_spill] sm:$0xff] }
 0x571   :  { %4391 = vmatprep.subr.bf16.mxu0 %v12457_v3  ;;  %v12466_v3 = vld [vmem:[#allocation71_spill] sm:$0xff] }
 0x573   :  { %4342 = vmatmul.mubr.bf16.vlgmr.msra.gmra.mrb[28].mxu0 %v8661_v45 }
 0x574   :  { %4392 = vmatpush1.bf16.msra.mxu0 %v12458_v55  ;;  %4423 = vmatprep.mubr.bf16.mxu0 %v8648_v61  ;;  %v12468_v55 = vld [vmem:[#allocation75_spill] sm:$0xff]  ;;  %v12469_v61 = vld [vmem:[#allocation77_spill] sm:$0xff] }
 0x575   :  { %4393 = vmatprep.subr.bf16.mxu0 %v12459_v18  ;;  %v12470_v18 = vld [vmem:[#allocation79_spill] sm:$0xff] }
 0x578   :  { %4394 = vmatpush1.bf16.msra.mxu0 %v12460_v60  ;;  %v12471_v60 = vld [vmem:[#allocation81_spill] sm:$0xff] }
 0x579   :  { %4395 = vmatprep.subr.bf16.mxu0 %v12461_v46  ;;  %v12472_v46 = vld [vmem:[#allocation83_spill] sm:$0xff] }
 0x57c   :  { %4396 = vmatpush1.bf16.msra.mxu0 %v12462_v14  ;;  %v12473_v14 = vld [vmem:[#allocation85_spill] sm:$0xff] }
 0x57d   :  { %4397 = vmatprep.subr.bf16.mxu0 %v12463_v30  ;;  %v12474_v30 = vld [vmem:[#allocation87_spill] sm:$0xff] }
 0x580   :  { %4398 = vmatpush1.bf16.msra.mxu0 %v12464_v28  ;;  %v12475_v28 = vld [vmem:[#allocation89_spill] sm:$0xff] }
 0x581   :  { %4399 = vmatprep.subr.bf16.mxu0 %v12465_v44  ;;  %v12476_v44 = vld [vmem:[#allocation91_spill] sm:$0xff] }
 0x584   :  { %4400 = vmatpush1.bf16.msra.mxu0 %v12466_v3  ;;  %v12477_v3 = vld [vmem:[#allocation93_spill] sm:$0xff] }
 0x585   :  { %4401 = vmatprep.subr.bf16.mxu0 %v12467_v37  ;;  %v12478_v37 = vld [vmem:[#allocation95_spill] sm:$0xff] }
 0x588   :  { %4402 = vmatpush1.bf16.msra.mxu0 %v12468_v55  ;;  %v12479_v55 = vld [vmem:[#allocation97_spill] sm:$0xff] }
 0x589   :  { %4403 = vmatprep.subr.bf16.mxu0 %v12469_v61  ;;  %v12480_v61 = vld [vmem:[#allocation99_spill] sm:$0xff] }
 0x58c   :  { %4404 = vmatpush1.bf16.msra.mxu0 %v12470_v18  ;;  %v12481_v18 = vld [vmem:[#allocation101_spill] sm:$0xff] }
 0x58d   :  { %4405 = vmatprep.subr.bf16.mxu0 %v12471_v60  ;;  %v12482_v60 = vld [vmem:[#allocation103_spill] sm:$0xff] }
 0x590   :  { %4406 = vmatpush1.bf16.msra.mxu0 %v12472_v46  ;;  %v12483_v46 = vld [vmem:[#allocation105_spill] sm:$0xff] }
 0x591   :  { %4407 = vmatprep.subr.bf16.mxu0 %v12473_v14  ;;  %v12484_v14 = vld [vmem:[#allocation107_spill] sm:$0xff] }
 0x594   :  { %4408 = vmatpush1.bf16.msra.mxu0 %v12474_v30  ;;  %v12485_v30 = vld [vmem:[#allocation109_spill] sm:$0xff] }
 0x595   :  { %4409 = vmatprep.subr.bf16.mxu0 %v12475_v28  ;;  %v12486_v28 = vld [vmem:[#allocation111_spill] sm:$0xff] }
 0x598   :  { %4410 = vmatpush1.bf16.msra.mxu0 %v12476_v44  ;;  %v12487_v44 = vld [vmem:[#allocation113_spill] sm:$0xff] }
 0x599   :  { %4411 = vmatprep.subr.bf16.mxu0 %v12477_v3  ;;  %v12488_v3 = vld [vmem:[#allocation115_spill] sm:$0xff] }
 0x59c   :  { %4412 = vmatpush1.bf16.msra.mxu0 %v12478_v37  ;;  %v12489_v37 = vld [vmem:[#allocation128_spill] sm:$0xff] }
 0x59d   :  { %4413 = vmatprep.subr.bf16.mxu0 %v12479_v55 }
 0x5a0   :  { %4414 = vmatpush1.bf16.msra.mxu0 %v12480_v61  ;;  %v12490_v61 = vld [vmem:[#allocation127_spill] sm:$0xff] }
 0x5a1   :  { %4415 = vmatprep.subr.bf16.mxu0 %v12481_v18  ;;  %v12491_v18 = vld [vmem:[#allocation132_spill] sm:$0xff] }
 0x5a4   :  { %4416 = vmatpush1.bf16.msra.mxu0 %v12482_v60  ;;  %v12492_v60 = vld [vmem:[#allocation131_spill] sm:$0xff] }
 0x5a5   :  { %4417 = vmatprep.subr.bf16.mxu0 %v12483_v46  ;;  %v12493_v46 = vld [vmem:[#allocation136_spill] sm:$0xff] }
 0x5a8   :  { %4418 = vmatpush1.bf16.msra.mxu0 %v12484_v14  ;;  %v12494_v14 = vld [vmem:[#allocation135_spill] sm:$0xff] }
 0x5a9   :  { %4419 = vmatprep.subr.bf16.mxu0 %v12485_v30  ;;  %v12495_v30 = vld [vmem:[#allocation138_spill] sm:$0xff] }
 0x5ac   :  { %4420 = vmatpush1.bf16.msra.mxu0 %v12486_v28  ;;  %v12496_v28 = vld [vmem:[#allocation140_spill] sm:$0xff] }
 0x5ad   :  { %4421 = vmatprep.subr.bf16.mxu0 %v12487_v44  ;;  %v12497_v44 = vld [vmem:[#allocation142_spill] sm:$0xff] }
 0x5b0   :  { %4422 = vmatpush1.bf16.msra.mxu0 %v12488_v3  ;;  %v12498_v3 = vld [vmem:[#allocation144_spill] sm:$0xff] }
 0x5b1   :  { %4688 = vmatprep.subr.bf16.mxu0 %v12489_v37  ;;  %v12499_v37 = vld [vmem:[#allocation146_spill] sm:$0xff] }
 0x5b3   :  { %4424 = vmatmul.mubr.bf16.vlgmr.msra.gmra.mrb[32].mxu0 %v8661_v45  ;;  %v12500_v45 = vld [vmem:[#allocation148_spill] sm:$0xff] }
 0x5b4   :  { %4689 = vmatpush1.bf16.msra.mxu0 %v12490_v61  ;;  %v12501_v61 = vld [vmem:[#allocation150_spill] sm:$0xff] }
 0x5b5   :  { %4690 = vmatprep.subr.bf16.mxu0 %v12491_v18  ;;  %v12502_v18 = vld [vmem:[#allocation152_spill] sm:$0xff] }
 0x5b8   :  { %4691 = vmatpush1.bf16.msra.mxu0 %v12492_v60  ;;  %v12503_v60 = vld [vmem:[#allocation154_spill] sm:$0xff] }
 0x5b9   :  { %4692 = vmatprep.subr.bf16.mxu0 %v12493_v46  ;;  %v12504_v46 = vld [vmem:[#allocation156_spill] sm:$0xff] }
 0x5bc   :  { %4693 = vmatpush1.bf16.msra.mxu0 %v12494_v14  ;;  %v12505_v14 = vld [vmem:[#allocation158_spill] sm:$0xff] }
 0x5bd   :  { %4694 = vmatprep.subr.bf16.mxu0 %v12495_v30  ;;  %v12506_v30 = vld [vmem:[#allocation160_spill] sm:$0xff] }
 0x5c0   :  { %4695 = vmatpush1.bf16.msra.mxu0 %v12496_v28  ;;  %v12507_v28 = vld [vmem:[#allocation162_spill] sm:$0xff] }
 0x5c1   :  { %4696 = vmatprep.subr.bf16.mxu0 %v12497_v44  ;;  %v12508_v44 = vld [vmem:[#allocation164_spill] sm:$0xff] }
 0x5c4   :  { %4697 = vmatpush1.bf16.msra.mxu0 %v12498_v3  ;;  %v12509_v3 = vld [vmem:[#allocation166_spill] sm:$0xff] }
 0x5c5   :  { %4698 = vmatprep.subr.bf16.mxu0 %v12499_v37  ;;  %v12510_v37 = vld [vmem:[#allocation168_spill] sm:$0xff] }
 0x5c8   :  { %4699 = vmatpush1.bf16.msra.mxu0 %v12500_v45  ;;  %v12511_v45 = vld [vmem:[#allocation170_spill] sm:$0xff] }
 0x5c9   :  { %4700 = vmatprep.subr.bf16.mxu0 %v12501_v61  ;;  %v12512_v61 = vld [vmem:[#allocation172_spill] sm:$0xff] }
 0x5cc   :  { %4701 = vmatpush1.bf16.msra.mxu0 %v12502_v18  ;;  %v12513_v18 = vld [vmem:[#allocation174_spill] sm:$0xff] }
 0x5cd   :  { %4702 = vmatprep.subr.bf16.mxu0 %v12503_v60  ;;  %v12514_v60 = vld [vmem:[#allocation176_spill] sm:$0xff] }
 0x5d0   :  { %4703 = vmatpush1.bf16.msra.mxu0 %v12504_v46  ;;  %v12515_v46 = vld [vmem:[#allocation178_spill] sm:$0xff] }
 0x5d1   :  { %4704 = vmatprep.subr.bf16.mxu0 %v12505_v14  ;;  %v12516_v14 = vld [vmem:[#allocation180_spill] sm:$0xff] }
 0x5d4   :  { %4705 = vmatpush1.bf16.msra.mxu0 %v12506_v30  ;;  %v12517_v30 = vld [vmem:[#allocation182_spill] sm:$0xff] }
 0x5d5   :  { %4706 = vmatprep.subr.bf16.mxu0 %v12507_v28  ;;  %v12518_v28 = vld [vmem:[#allocation184_spill] sm:$0xff] }
 0x5d8   :  { %4707 = vmatpush1.bf16.msra.mxu0 %v12508_v44  ;;  %v12519_v44 = vld [vmem:[#allocation186_spill] sm:$0xff] }
 0x5d9   :  { %4708 = vmatprep.subr.bf16.mxu0 %v12509_v3  ;;  %v12520_v3 = vld [vmem:[#allocation188_spill] sm:$0xff] }
 0x5dc   :  { %4709 = vmatpush1.bf16.msra.mxu0 %v12510_v37  ;;  %v12521_v37 = vld [vmem:[#allocation190_spill] sm:$0xff] }
 0x5dd   :  { %4710 = vmatprep.subr.bf16.mxu0 %v12511_v45 }
 0x5e0   :  { %4711 = vmatpush1.bf16.msra.mxu0 %v12512_v61 }
 0x5e1   :  { %4712 = vmatprep.subr.bf16.mxu0 %v12513_v18  ;;  %v6446_v18 = vld [vmem:[%s11228_s7] ss:$0 sm:$0xff] }
 0x5e4   :  { %4713 = vmatpush1.bf16.msra.mxu0 %v12514_v60 }
 0x5e5   :  { %4714 = vmatprep.subr.bf16.mxu0 %v12515_v46 }
 0x5e8   :  { %4715 = vmatpush1.bf16.msra.mxu0 %v12516_v14 }
 0x5e9   :  { %4716 = vmatprep.subr.bf16.mxu0 %v12517_v30 }
 0x5ec   :  { %4717 = vmatpush1.bf16.msra.mxu0 %v12518_v28 }
 0x5ed   :  { %4718 = vmatprep.subr.bf16.mxu0 %v12519_v44 }
 0x5f0   :  { %4719 = vmatpush1.bf16.msra.mxu0 %v12520_v3 }
 0x5f1   :  { %4729 = vmatprep.subr.bf16.mxu0 %v12521_v37  ;;  %v4440_v37 = vrot.slane %v10052_v31, 6 }
 0x5f3   :  { %v10195_v36 = vadd.f32 %v4440_v37, %v12522_v27 }
 0x5f5   :  { %v4465_v57 = vsel %vm4464_vm1, %v10195_v36, 0.0 }
 0x606   :  { %v6505_v45 = vpop.f32.mrb[24].mxu0 }
 0x607   :  { %v6506_v60 = vpop.f32.mrb[25].mxu0 }
 0x608   :  { %v6507_v61 = vadd.f32 %v6506_v60, %v6505_v45  ;;  %v6508_v46 = vpop.f32.mrb[26].mxu0  ;;  %v12523_v60 = vld [vmem:[#allocation118_spill] sm:$0xff] }
 0x609   :  { %v6509_v55 = vpop.f32.mrb[27].mxu0 }
 0x60a   :  { %v4261_v14 = vadd.f32 %v6507_v61, %v6446_v18  ;;  %v10198_v55 = vadd.f32 %v4441_v8, %v12523_v60  ;;  %v12524_v18 = vld [vmem:[#allocation119_spill] sm:$0xff] }
 0x60c   :  { %v4266_v6 = vmax.f32 %v4261_v14, 0.0  ;;  %v4484_v31 = vmul.f32 %v10198_v55, %v10198_v55  ;;  %v4466_v37 = vsel %vm4464_vm1, %v10198_v55, 0.0 }
 0x60d   :  { %v4467_v45 = vadd.f32 %v4466_v37, %v4465_v57  ;;  %v12527_v37 = vld [vmem:[#allocation122_spill] sm:$0xff] }
 0x60e   :  { %4267 = vst [vmem:[%s11229_s8] sm:$0x3] %v4266_v6  ;;  %v4444_v6 = vrot.slane %v10060_v43, 6 }
 0x646   :  { %v4343_v44 = vpop.f32.mrb[28].mxu0 }
 0x647   :  { %v4345_v28 = vpop.f32.mrb[29].mxu0  ;;  %v4442_v23 = vrot.slane %v4343_v44, 6  ;;  %v4492_v44 = vsel %vm4464_vm1, %v4484_v31, 0.0 }
 0x648   :  { %v4347_v3 = vpop.f32.mrb[30].mxu0  ;;  %v4443_v14 = vrot.slane %v4345_v28, 6 }
 0x649   :  { %v4348_v30 = vpop.f32.mrb[31].mxu0  ;;  %v10201_v46 = vadd.f32 %v4442_v23, %v12524_v18  ;;  %v4483_v3 = vmul.f32 %v10195_v36, %v10195_v36 }
 0x64a   :  { %v12525_v30 = vld [vmem:[#allocation120_spill] sm:$0xff] }
 0x64b   :  { %v4485_v8 = vmul.f32 %v10201_v46, %v10201_v46  ;;  %v10214_v23 = vadd.f32 %v4443_v14, %v12525_v30  ;;  %v4491_v28 = vsel %vm4464_vm1, %v4483_v3, 0.0  ;;  %v4468_v61 = vsel %vm4464_vm1, %v10201_v46, 0.0 }
 0x64c   :  { %v4493_v27 = vadd.f32 %v4492_v44, %v4491_v28  ;;  %v4469_v22 = vadd.f32 %v4468_v61, %v4467_v45  ;;  %v10225_v14 = vadd.f32 %v4444_v6, %v12526_v62  ;;  %v4445_v3 = vrot.slane %v10062_v29, 6 }
 0x64d   :  { %v4494_v18 = vsel %vm4464_vm1, %v4485_v8, 0.0  ;;  %v4486_v60 = vmul.f32 %v10214_v23, %v10214_v23  ;;  %v4470_v31 = vsel %vm4464_vm1, %v10214_v23, 0.0 }
 0x64e   :  { %v4495_v43 = vadd.f32 %v4494_v18, %v4493_v27  ;;  %v4471_v51 = vadd.f32 %v4470_v31, %v4469_v22  ;;  %v4487_v57 = vmul.f32 %v10225_v14, %v10225_v14  ;;  %v4461_v8 = vadd.f32 %v4445_v3, %v12527_v37  ;;  %v12528_v22 = vld [vmem:[#allocation123_spill] sm:$0xff]  ;;  %v12529_v3 = vld [vmem:[#allocation124_spill] sm:$0xff] }
 0x64f   :  { %v4496_v30 = vsel %vm4464_vm1, %v4486_v60, 0.0  ;;  %v4472_v28 = vsel %vm4464_vm1, %v10225_v14, 0.0 }
 0x650   :  { %v4497_v38 = vadd.f32 %v4496_v30, %v4495_v43  ;;  %v4473_v6 = vadd.f32 %v4472_v28, %v4471_v51  ;;  %v4488_v61 = vmul.f32 %v4461_v8, %v4461_v8  ;;  %v4498_v62 = vsel %vm4464_vm1, %v4487_v57, 0.0 }
 0x651   :  { %v4474_v12 = vsel %vm4464_vm1, %v4461_v8, 0.0 }
 0x652   :  { %v4499_v60 = vadd.f32 %v4498_v62, %v4497_v38  ;;  %v4475_v43 = vadd.f32 %v4474_v12, %v4473_v6  ;;  %v4500_v51 = vsel %vm4464_vm1, %v4488_v61, 0.0 }
 0x686   :  { %v4425_v44 = vpop.f32.mrb[32].mxu0 }
 0x687   :  { %v4446_v29 = vrot.slane %v4425_v44, 6  ;;  %v4427_v45 = vpop.f32.mrb[33].mxu0 }
 0x688   :  { %v4447_v27 = vrot.slane %v4427_v45, 6  ;;  %v4429_v18 = vpop.f32.mrb[34].mxu0  ;;  %v4501_v45 = vadd.f32 %v4500_v51, %v4499_v60 }
 0x689   :  { %v4462_v31 = vadd.f32 %v4446_v29, %v12528_v22  ;;  %v4430_v42 = vpop.f32.mrb[35].mxu0 }
 0x68a   :  { %v4463_v30 = vadd.f32 %v4447_v27, %v12529_v3 }
 0x68b   :  { %v4476_v37 = vsel %vm4464_vm1, %v4462_v31, 0.0  ;;  %v4489_v52 = vmul.f32 %v4462_v31, %v4462_v31 }
 0x68c   :  { %v4477_v28 = vadd.f32 %v4476_v37, %v4475_v43  ;;  %v4478_v44 = vsel %vm4464_vm1, %v4463_v30, 0.0  ;;  %v4490_v57 = vmul.f32 %v4463_v30, %v4463_v30 }
 0x68d   :  { %v4502_v38 = vsel %vm4464_vm1, %v4489_v52, 0.0 }
 0x68e   :  { %v4479_v62 = vadd.f32 %v4478_v44, %v4477_v28  ;;  %v4503_v29 = vadd.f32 %v4502_v38, %v4501_v45  ;;  %v4504_v42 = vsel %vm4464_vm1, %v4490_v57, 0.0 }
 0x690   :  { %4480 = vadd.xlane.f32.xlu0 %v4479_v62  ;;  %v4505_v18 = vadd.f32 %v4504_v42, %v4503_v29 }
 0x692   :  { %4506 = vadd.xlane.f32.xlu1 %v4505_v18 }
 0x71d   :  { %v4481_v12 = vpop.xlane.xlu0 %4480 }
 0x71e   :  { %v4482_v6 = vmul.f32 0.0009765625, %v4481_v12 }
 0x71f   :  { %v4507_v27 = vpop.xlane.xlu1 %4506 }
 0x720   :  { %v4508_v3 = vmul.f32 0.0009765625, %v4507_v27  ;;  %v4509_v22 = vmul.f32 %v4482_v6, %v4482_v6  ;;  %v4513_v60 = vsub.f32 %v10198_v55, %v4482_v6  ;;  %v4515_v52 = vsub.f32 %v10214_v23, %v4482_v6 }
 0x721   :  { %v4512_v28 = vsub.f32 %v10195_v36, %v4482_v6  ;;  %v4514_v44 = vsub.f32 %v10201_v46, %v4482_v6  ;;  %v4516_v55 = vsub.f32 %v10225_v14, %v4482_v6  ;;  %v4519_v23 = vsub.f32 %v4463_v30, %v4482_v6 }
 0x722   :  { %v4510_v61 = vsub.f32 %v4508_v3, %v4509_v22  ;;  %v4517_v3 = vsub.f32 %v4461_v8, %v4482_v6 }
 0x724   :  { %v4511_v37 = vmax.f32 %v4510_v61, 0.0 }
 0x726   :  { %v4520_v43 = vadd.f32 1e-05, %v4511_v37  ;;  %v4518_v37 = vsub.f32 %v4462_v31, %v4482_v6 }
 0x728   :  { %6715 = vrsqrt.f32 %v4520_v43 }
 0x732   :  { %v6716_v51 = vpop.eup %6715 }
 0x733   :  { %v4523_v57 = vmul.f32 %v6716_v51, %v4513_v60  ;;  %v4525_v45 = vmul.f32 %v6716_v51, %v4515_v52  ;;  %v4522_v38 = vmul.f32 %v6716_v51, %v4512_v28  ;;  %v4524_v62 = vmul.f32 %v6716_v51, %v4514_v44 }
 0x734   :  { %v4527_v12 = vmul.f32 %v6716_v51, %v4517_v3  ;;  %v4526_v27 = vmul.f32 %v6716_v51, %v4516_v55  ;;  %v4529_v36 = vmul.f32 %v6716_v51, %v4519_v23  ;;  %v4528_v28 = vmul.f32 %v6716_v51, %v4518_v37 }
 0x735   :  { %v6464_v29 = vmul.f32 -1.442695, %v4523_v57  ;;  %v6466_v42 = vmul.f32 -1.442695, %v4525_v45  ;;  %v6463_v18 = vmul.f32 -1.442695, %v4522_v38 }
 0x736   :  { %v6465_v22 = vmul.f32 -1.442695, %v4524_v62  ;;  %v6468_v46 = vmul.f32 -1.442695, %v4527_v12  ;;  %v6467_v61 = vmul.f32 -1.442695, %v4526_v27 }
 0x737   :  { %6717 = vpow2.f32 %v6464_v29  ;;  %v4571_v62 = vrot.slane %v8639_v16, 6  ;;  %v4570_v55 = vrot.slane %v8642_v11, 6  ;;  %v4587_v11 = vrot.slane %v10078_v9, 6  ;;  %v12530_v9 = vld [vmem:[#allocation191_spill] sm:$0xff] }
 0x738   :  { %6719 = vpow2.f32 %v6466_v42 }
 0x739   :  { %6721 = vpow2.f32 %v6463_v18 }
 0x73a   :  { %6723 = vpow2.f32 %v6465_v22 }
 0x73b   :  { %6725 = vtanh.f32 %v4529_v36 }
 0x73c   :  { %6727 = vpow2.f32 %v6468_v46 }
 0x73d   :  { %6729 = vpow2.f32 %v6467_v61 }
 0x741   :  { %v6718_v43 = vpop.eup %6717 }
 0x742   :  { %v6720_v60 = vpop.eup %6719  ;;  %v4537_v52 = vadd.f32 1.0, %v6718_v43 }
 0x743   :  { %v4549_v44 = vadd.f32 1.0, %v6720_v60  ;;  %v6722_v8 = vpop.eup %6721 }
 0x744   :  { %6731 = vrcp.f32 %v4537_v52  ;;  %v6724_v14 = vpop.eup %6723  ;;  %v4536_v57 = vadd.f32 1.0, %v6722_v8 }
 0x745   :  { %6733 = vrcp.f32 %v4549_v44  ;;  %v4548_v30 = vadd.f32 1.0, %v6724_v14  ;;  %v6726_v45 = vpop.eup %6725 }
 0x746   :  { %6735 = vtanh.f32 %v4528_v28  ;;  %v6728_v38 = vpop.eup %6727 }
 0x747   :  { %6737 = vrcp.f32 %v4536_v57  ;;  %v6730_v31 = vpop.eup %6729  ;;  %v4561_v42 = vadd.f32 1.0, %v6728_v38  ;;  %v4593_v57 = vpack.c.bf16 %v4587_v11, %v4587_v11  ;;  %v12531_v38 = vld [vmem:[#allocation192_spill] sm:$0xff]  ;;  %v12550_v11 = vld [vmem:[#allocation211_spill] sm:$0xff] }
 0x748   :  { %6739 = vrcp.f32 %v4548_v30  ;;  %v4560_v27 = vadd.f32 1.0, %v6730_v31  ;;  %v12532_v31 = vld [vmem:[#allocation193_spill] sm:$0xff] }
 0x749   :  { %6741 = vrcp.f32 %v4561_v42  ;;  %v12536_v42 = vld [vmem:[#allocation197_spill] sm:$0xff] }
 0x74e   :  { %v6732_v6 = vpop.eup %6731 }
 0x74f   :  { %v6734_v29 = vpop.eup %6733  ;;  %v4577_v51 = vmul.f32 %v6732_v6, %v6726_v45  ;;  %v10267_v45 = vrot.slane %v4593_v57, 1  ;;  %v12533_v6 = vld [vmem:[#allocation194_spill] sm:$0xff]  ;;  %v12555_v57 = vld [vmem:[#allocation216_spill] sm:$0xff] }
 0x750   :  { %v6736_v18 = vpop.eup %6735  ;;  %v4575_v22 = vmul.f32 %v6734_v29, %v4571_v62  ;;  %v12534_v62 = vld [vmem:[#allocation195_spill] sm:$0xff]  ;;  %v12535_v29 = vld [vmem:[#allocation196_spill] sm:$0xff] }
 0x751   :  { %v6738_v3 = vpop.eup %6737 }
 0x752   :  { %v6740_v12 = vpop.eup %6739  ;;  %v10252_v23 = vadd.f32 %v4577_v51, %v4575_v22  ;;  %v4576_v36 = vmul.f32 %v6738_v3, %v6736_v18  ;;  %v12537_v51 = vld [vmem:[#allocation198_spill] sm:$0xff]  ;;  %v12538_v18 = vld [vmem:[#allocation199_spill] sm:$0xff]  ;;  %v12539_v22 = vld [vmem:[#allocation200_spill] sm:$0xff] }
 0x753   :  { %v4574_v46 = vmul.f32 %v6740_v12, %v4570_v55  ;;  %v6742_v16 = vpop.eup %6741  ;;  %v12540_v3 = vld [vmem:[#allocation201_spill] sm:$0xff]  ;;  %v12541_v55 = vld [vmem:[#allocation202_spill] sm:$0xff]  ;;  %v12542_v12 = vld [vmem:[#allocation203_spill] sm:$0xff] }
 0x754   :  { %6743 = vtanh.f32 %v10252_v23 }
 0x755   :  { %v10255_v61 = vadd.f32 %v4576_v36, %v4574_v46  ;;  %6745 = vrcp.f32 %v4560_v27  ;;  %v12543_v27 = vld [vmem:[#allocation204_spill] sm:$0xff]  ;;  %v12544_v36 = vld [vmem:[#allocation205_spill] sm:$0xff]  ;;  %v12545_v46 = vld [vmem:[#allocation206_spill] sm:$0xff] }
 0x757   :  { %6747 = vtanh.f32 %v10255_v61 }
 0x75e   :  { %v6744_v37 = vpop.eup %6743 }
 0x75f   :  { %v4583_v43 = vmul.f32 %v6744_v37, %v6742_v16  ;;  %v6746_v60 = vpop.eup %6745  ;;  %v12546_v16 = vld [vmem:[#allocation207_spill] sm:$0xff]  ;;  %v12547_v37 = vld [vmem:[#allocation208_spill] sm:$0xff] }
 0x761   :  { %v6748_v52 = vpop.eup %6747  ;;  %v4591_v28 = vpack.c.bf16 %v4583_v43, %v4583_v43  ;;  %v12548_v43 = vld [vmem:[#allocation209_spill] sm:$0xff] }
 0x762   :  { %v4582_v44 = vmul.f32 %v6748_v52, %v6746_v60  ;;  %v12549_v60 = vld [vmem:[#allocation210_spill] sm:$0xff]  ;;  %v12551_v52 = vld [vmem:[#allocation212_spill] sm:$0xff] }
 0x763   :  { %v10259_v8 = vrot.slane %v4591_v28, 1  ;;  %v12552_v28 = vld [vmem:[#allocation213_spill] sm:$0xff] }
 0x764   :  { %v4590_v14 = vpack.c.bf16 %v4582_v44, %v4582_v44  ;;  %v12553_v44 = vld [vmem:[#allocation214_spill] sm:$0xff] }
 0x765   :  { %4638 = vmatprep.mubr.bf16.mxu1 %v10259_v8  ;;  %4720 = vmatprep.mubr.bf16.mxu0 %v10259_v8 }
 0x766   :  { %v10263_v30 = vrot.slane %v4590_v14, 1  ;;  %v12554_v14 = vld [vmem:[#allocation215_spill] sm:$0xff] }
 0x768   :  { %4639 = vmatmul.mubr.bf16.vlgmr.msra.gmra.mrb[32].mxu1 %v10263_v30  ;;  %4721 = vmatmul.mubr.bf16.vlgmr.msra.gmra.mrb[36].mxu0 %v10263_v30 }
 0x769   :  { %4648 = vmatpush1.bf16.msra.mxu1 %v8623_v40  ;;  %4730 = vmatpush1.bf16.msra.mxu0 %v8625_v15 }
 0x76a   :  { %4679 = vmatprep.mubr.bf16.mxu1 %v10267_v45  ;;  %4761 = vmatprep.mubr.bf16.mxu0 %v10267_v45 }
 0x76b   :  { %4649 = vmatprep.subr.bf16.mxu1 %v8663_v19  ;;  %4731 = vmatprep.subr.bf16.mxu0 %v8665_v35 }
 0x76d   :  { %4650 = vmatpush1.bf16.msra.mxu1 %v8683_v33  ;;  %4732 = vmatpush1.bf16.msra.mxu0 %v8685_v5 }
 0x76e   :  { %4651 = vmatprep.subr.bf16.mxu1 %v12530_v9  ;;  %4733 = vmatprep.subr.bf16.mxu0 %v12531_v38 }
 0x771   :  { %4652 = vmatpush1.bf16.msra.mxu1 %v12532_v31  ;;  %4734 = vmatpush1.bf16.msra.mxu0 %v12533_v6 }
 0x772   :  { %4653 = vmatprep.subr.bf16.mxu1 %v12534_v62  ;;  %4735 = vmatprep.subr.bf16.mxu0 %v12535_v29 }
 0x775   :  { %4654 = vmatpush1.bf16.msra.mxu1 %v12536_v42  ;;  %4736 = vmatpush1.bf16.msra.mxu0 %v12537_v51 }
 0x776   :  { %4655 = vmatprep.subr.bf16.mxu1 %v12538_v18  ;;  %4737 = vmatprep.subr.bf16.mxu0 %v12539_v22 }
 0x779   :  { %4656 = vmatpush1.bf16.msra.mxu1 %v12540_v3  ;;  %4738 = vmatpush1.bf16.msra.mxu0 %v12541_v55 }
 0x77a   :  { %4657 = vmatprep.subr.bf16.mxu1 %v12542_v12  ;;  %4739 = vmatprep.subr.bf16.mxu0 %v12543_v27 }
 0x77d   :  { %4658 = vmatpush1.bf16.msra.mxu1 %v12544_v36  ;;  %4740 = vmatpush1.bf16.msra.mxu0 %v12545_v46  ;;  %v12556_v46 = vld [vmem:[#allocation217_spill] sm:$0xff] }
 0x77e   :  { %4659 = vmatprep.subr.bf16.mxu1 %v12546_v16  ;;  %4741 = vmatprep.subr.bf16.mxu0 %v12547_v37  ;;  %v12557_v16 = vld [vmem:[#allocation218_spill] sm:$0xff]  ;;  %v12558_v37 = vld [vmem:[#allocation219_spill] sm:$0xff] }
 0x781   :  { %4660 = vmatpush1.bf16.msra.mxu1 %v12548_v43  ;;  %4742 = vmatpush1.bf16.msra.mxu0 %v12549_v60  ;;  %v12559_v43 = vld [vmem:[#allocation220_spill] sm:$0xff]  ;;  %v12560_v60 = vld [vmem:[#allocation221_spill] sm:$0xff] }
 0x782   :  { %4661 = vmatprep.subr.bf16.mxu1 %v12550_v11  ;;  %4743 = vmatprep.subr.bf16.mxu0 %v12551_v52  ;;  %v12561_v11 = vld [vmem:[#allocation222_spill] sm:$0xff]  ;;  %v12562_v52 = vld [vmem:[#allocation223_spill] sm:$0xff] }
 0x785   :  { %4662 = vmatpush1.bf16.msra.mxu1 %v12552_v28  ;;  %4744 = vmatpush1.bf16.msra.mxu0 %v12553_v44  ;;  %v12563_v28 = vld [vmem:[#allocation224_spill] sm:$0xff]  ;;  %v12564_v44 = vld [vmem:[#allocation225_spill] sm:$0xff] }
 0x786   :  { %4663 = vmatprep.subr.bf16.mxu1 %v12554_v14  ;;  %4745 = vmatprep.subr.bf16.mxu0 %v12555_v57  ;;  %v12565_v14 = vld [vmem:[#allocation226_spill] sm:$0xff]  ;;  %v12566_v57 = vld [vmem:[#allocation227_spill] sm:$0xff] }
 0x789   :  { %4664 = vmatpush1.bf16.msra.mxu1 %v12556_v46  ;;  %4746 = vmatpush1.bf16.msra.mxu0 %v12557_v16  ;;  %v12567_v46 = vld [vmem:[#allocation228_spill] sm:$0xff]  ;;  %v12568_v16 = vld [vmem:[#allocation229_spill] sm:$0xff] }
 0x78a   :  { %4665 = vmatprep.subr.bf16.mxu1 %v12558_v37  ;;  %4747 = vmatprep.subr.bf16.mxu0 %v12559_v43  ;;  %v12569_v37 = vld [vmem:[#allocation230_spill] sm:$0xff]  ;;  %v12570_v43 = vld [vmem:[#allocation231_spill] sm:$0xff] }
 0x78d   :  { %4666 = vmatpush1.bf16.msra.mxu1 %v12560_v60  ;;  %4748 = vmatpush1.bf16.msra.mxu0 %v12561_v11  ;;  %v12571_v60 = vld [vmem:[#allocation232_spill] sm:$0xff]  ;;  %v12572_v11 = vld [vmem:[#allocation233_spill] sm:$0xff] }
 0x78e   :  { %4667 = vmatprep.subr.bf16.mxu1 %v12562_v52  ;;  %4749 = vmatprep.subr.bf16.mxu0 %v12563_v28  ;;  %v12573_v52 = vld [vmem:[#allocation234_spill] sm:$0xff]  ;;  %v12574_v28 = vld [vmem:[#allocation235_spill] sm:$0xff] }
 0x791   :  { %4668 = vmatpush1.bf16.msra.mxu1 %v12564_v44  ;;  %4750 = vmatpush1.bf16.msra.mxu0 %v12565_v14  ;;  %v12575_v44 = vld [vmem:[#allocation236_spill] sm:$0xff]  ;;  %v12576_v14 = vld [vmem:[#allocation237_spill] sm:$0xff] }
 0x792   :  { %4669 = vmatprep.subr.bf16.mxu1 %v12566_v57  ;;  %4751 = vmatprep.subr.bf16.mxu0 %v12567_v46  ;;  %v12577_v57 = vld [vmem:[#allocation238_spill] sm:$0xff]  ;;  %v12578_v46 = vld [vmem:[#allocation239_spill] sm:$0xff] }
 0x795   :  { %4670 = vmatpush1.bf16.msra.mxu1 %v12568_v16  ;;  %4752 = vmatpush1.bf16.msra.mxu0 %v12569_v37  ;;  %v12579_v16 = vld [vmem:[#allocation240_spill] sm:$0xff]  ;;  %v12580_v37 = vld [vmem:[#allocation241_spill] sm:$0xff] }
 0x796   :  { %4671 = vmatprep.subr.bf16.mxu1 %v12570_v43  ;;  %4753 = vmatprep.subr.bf16.mxu0 %v12571_v60  ;;  %v4586_v43 = vrot.slane %v10082_v7, 6  ;;  %v12581_v60 = vld [vmem:[#allocation242_spill] sm:$0xff]  ;;  %v12588_v7 = vld [vmem:[#allocation249_spill] sm:$0xff] }
 0x799   :  { %4672 = vmatpush1.bf16.msra.mxu1 %v12572_v11  ;;  %4754 = vmatpush1.bf16.msra.mxu0 %v12573_v52  ;;  %v12582_v11 = vld [vmem:[#allocation243_spill] sm:$0xff]  ;;  %v12583_v52 = vld [vmem:[#allocation244_spill] sm:$0xff] }
 0x79a   :  { %4673 = vmatprep.subr.bf16.mxu1 %v12574_v28  ;;  %4755 = vmatprep.subr.bf16.mxu0 %v12575_v44  ;;  %v4592_v28 = vpack.c.bf16 %v4586_v43, %v4586_v43  ;;  %v12584_v44 = vld [vmem:[#allocation245_spill] sm:$0xff]  ;;  %v12590_v43 = vld [vmem:[#allocation251_spill] sm:$0xff] }
 0x79d   :  { %4674 = vmatpush1.bf16.msra.mxu1 %v12576_v14  ;;  %4756 = vmatpush1.bf16.msra.mxu0 %v12577_v57  ;;  %v12585_v14 = vld [vmem:[#allocation246_spill] sm:$0xff]  ;;  %v10334_v57 = vrot.slane %v4592_v28, 1  ;;  %v12591_v28 = vld [vmem:[#allocation252_spill] sm:$0xff] }
 0x79e   :  { %4675 = vmatprep.subr.bf16.mxu1 %v12578_v46  ;;  %4757 = vmatprep.subr.bf16.mxu0 %v12579_v16  ;;  %v12586_v46 = vld [vmem:[#allocation247_spill] sm:$0xff]  ;;  %v12587_v16 = vld [vmem:[#allocation248_spill] sm:$0xff] }
 0x7a1   :  { %4676 = vmatpush1.bf16.msra.mxu1 %v12580_v37  ;;  %4758 = vmatpush1.bf16.msra.mxu0 %v12581_v60  ;;  %v12598_v60 = vld [vmem:[#allocation259_spill] sm:$0xff]  ;;  %v12600_v37 = vld [vmem:[#allocation261_spill] sm:$0xff] }
 0x7a2   :  { %4677 = vmatprep.subr.bf16.mxu1 %v12582_v11  ;;  %4759 = vmatprep.subr.bf16.mxu0 %v12583_v52  ;;  %v12589_v52 = vld [vmem:[#allocation250_spill] sm:$0xff]  ;;  %v12596_v11 = vld [vmem:[#allocation257_spill] sm:$0xff] }
 0x7a5   :  { %4678 = vmatpush1.bf16.msra.mxu1 %v12584_v44  ;;  %4760 = vmatpush1.bf16.msra.mxu0 %v12585_v14  ;;  %v12592_v14 = vld [vmem:[#allocation253_spill] sm:$0xff]  ;;  %v12595_v44 = vld [vmem:[#allocation256_spill] sm:$0xff] }
 0x7a6   :  { %4770 = vmatprep.subr.bf16.mxu1 %v12586_v46  ;;  %4852 = vmatprep.subr.bf16.mxu0 %v12587_v16  ;;  %v12593_v46 = vld [vmem:[#allocation254_spill] sm:$0xff]  ;;  %v12594_v16 = vld [vmem:[#allocation255_spill] sm:$0xff] }
 0x7a8   :  { %4680 = vmatmul.mubr.bf16.vlgmr.msra.gmra.mrb[32].mxu1 %v10334_v57  ;;  %4762 = vmatmul.mubr.bf16.vlgmr.msra.gmra.mrb[36].mxu0 %v10334_v57 }
 0x7a9   :  { %4771 = vmatpush1.bf16.msra.mxu1 %v12588_v7  ;;  %4802 = vmatprep.mubr.bf16.mxu1 %v10259_v8  ;;  %v12597_v7 = vld [vmem:[#allocation258_spill] sm:$0xff] }
 0x7aa   :  { %4853 = vmatpush1.bf16.msra.mxu0 %v12589_v52  ;;  %4884 = vmatprep.mubr.bf16.mxu0 %v10259_v8  ;;  %v12599_v52 = vld [vmem:[#allocation260_spill] sm:$0xff] }
 0x7ab   :  { %4772 = vmatprep.subr.bf16.mxu1 %v12590_v43  ;;  %4854 = vmatprep.subr.bf16.mxu0 %v12591_v28  ;;  %v12601_v43 = vld [vmem:[#allocation262_spill] sm:$0xff]  ;;  %v12602_v28 = vld [vmem:[#allocation263_spill] sm:$0xff] }
 0x7ad   :  { %4773 = vmatpush1.bf16.msra.mxu1 %v12592_v14  ;;  %v12603_v14 = vld [vmem:[#allocation264_spill] sm:$0xff] }
 0x7ae   :  { %4855 = vmatpush1.bf16.msra.mxu0 %v12593_v46  ;;  %4774 = vmatprep.subr.bf16.mxu1 %v12594_v16  ;;  %v12604_v46 = vld [vmem:[#allocation265_spill] sm:$0xff]  ;;  %v12605_v16 = vld [vmem:[#allocation266_spill] sm:$0xff] }
 0x7af   :  { %4856 = vmatprep.subr.bf16.mxu0 %v12595_v44  ;;  %v12606_v44 = vld [vmem:[#allocation267_spill] sm:$0xff] }
 0x7b1   :  { %4775 = vmatpush1.bf16.msra.mxu1 %v12596_v11  ;;  %v12607_v11 = vld [vmem:[#allocation268_spill] sm:$0xff] }
 0x7b2   :  { %4857 = vmatpush1.bf16.msra.mxu0 %v12597_v7  ;;  %4776 = vmatprep.subr.bf16.mxu1 %v12598_v60  ;;  %v12608_v7 = vld [vmem:[#allocation269_spill] sm:$0xff]  ;;  %v12609_v60 = vld [vmem:[#allocation270_spill] sm:$0xff] }
 0x7b3   :  { %4858 = vmatprep.subr.bf16.mxu0 %v12599_v52  ;;  %v12610_v52 = vld [vmem:[#allocation271_spill] sm:$0xff] }
 0x7b5   :  { %4777 = vmatpush1.bf16.msra.mxu1 %v12600_v37  ;;  %v12611_v37 = vld [vmem:[#allocation272_spill] sm:$0xff] }
 0x7b6   :  { %4859 = vmatpush1.bf16.msra.mxu0 %v12601_v43  ;;  %4778 = vmatprep.subr.bf16.mxu1 %v12602_v28  ;;  %v12612_v43 = vld [vmem:[#allocation273_spill] sm:$0xff]  ;;  %v12613_v28 = vld [vmem:[#allocation274_spill] sm:$0xff] }
 0x7b7   :  { %4860 = vmatprep.subr.bf16.mxu0 %v12603_v14  ;;  %v12614_v14 = vld [vmem:[#allocation275_spill] sm:$0xff] }
 0x7b9   :  { %4779 = vmatpush1.bf16.msra.mxu1 %v12604_v46  ;;  %v12615_v46 = vld [vmem:[#allocation276_spill] sm:$0xff] }
 0x7ba   :  { %4861 = vmatpush1.bf16.msra.mxu0 %v12605_v16  ;;  %4780 = vmatprep.subr.bf16.mxu1 %v12606_v44  ;;  %v12616_v16 = vld [vmem:[#allocation277_spill] sm:$0xff]  ;;  %v12617_v44 = vld [vmem:[#allocation278_spill] sm:$0xff] }
 0x7bb   :  { %4862 = vmatprep.subr.bf16.mxu0 %v12607_v11  ;;  %v12618_v11 = vld [vmem:[#allocation279_spill] sm:$0xff] }
 0x7bd   :  { %4781 = vmatpush1.bf16.msra.mxu1 %v12608_v7  ;;  %v12619_v7 = vld [vmem:[#allocation280_spill] sm:$0xff] }
 0x7be   :  { %4863 = vmatpush1.bf16.msra.mxu0 %v12609_v60  ;;  %4782 = vmatprep.subr.bf16.mxu1 %v12610_v52  ;;  %v12620_v60 = vld [vmem:[#allocation281_spill] sm:$0xff]  ;;  %v12621_v52 = vld [vmem:[#allocation282_spill] sm:$0xff] }
 0x7bf   :  { %4864 = vmatprep.subr.bf16.mxu0 %v12611_v37  ;;  %v12622_v37 = vld [vmem:[#allocation283_spill] sm:$0xff] }
 0x7c1   :  { %4783 = vmatpush1.bf16.msra.mxu1 %v12612_v43  ;;  %v12623_v43 = vld [vmem:[#allocation284_spill] sm:$0xff] }
 0x7c2   :  { %4865 = vmatpush1.bf16.msra.mxu0 %v12613_v28  ;;  %4784 = vmatprep.subr.bf16.mxu1 %v12614_v14  ;;  %v12624_v28 = vld [vmem:[#allocation285_spill] sm:$0xff]  ;;  %v12625_v14 = vld [vmem:[#allocation286_spill] sm:$0xff] }
 0x7c3   :  { %4866 = vmatprep.subr.bf16.mxu0 %v12615_v46  ;;  %v12626_v46 = vld [vmem:[#allocation287_spill] sm:$0xff] }
 0x7c5   :  { %4785 = vmatpush1.bf16.msra.mxu1 %v12616_v16  ;;  %v12627_v16 = vld [vmem:[#allocation288_spill] sm:$0xff] }
 0x7c6   :  { %4867 = vmatpush1.bf16.msra.mxu0 %v12617_v44  ;;  %4786 = vmatprep.subr.bf16.mxu1 %v12618_v11  ;;  %v12628_v44 = vld [vmem:[#allocation289_spill] sm:$0xff]  ;;  %v12629_v11 = vld [vmem:[#allocation290_spill] sm:$0xff] }
 0x7c7   :  { %4868 = vmatprep.subr.bf16.mxu0 %v12619_v7  ;;  %v12630_v7 = vld [vmem:[#allocation291_spill] sm:$0xff] }
 0x7c9   :  { %4787 = vmatpush1.bf16.msra.mxu1 %v12620_v60  ;;  %v12631_v60 = vld [vmem:[#allocation292_spill] sm:$0xff] }
 0x7ca   :  { %4869 = vmatpush1.bf16.msra.mxu0 %v12621_v52  ;;  %4788 = vmatprep.subr.bf16.mxu1 %v12622_v37  ;;  %v12632_v52 = vld [vmem:[#allocation293_spill] sm:$0xff]  ;;  %v12633_v37 = vld [vmem:[#allocation294_spill] sm:$0xff] }
 0x7cb   :  { %4870 = vmatprep.subr.bf16.mxu0 %v12623_v43  ;;  %v12634_v43 = vld [vmem:[#allocation295_spill] sm:$0xff] }
 0x7cd   :  { %4789 = vmatpush1.bf16.msra.mxu1 %v12624_v28  ;;  %v12635_v28 = vld [vmem:[#allocation296_spill] sm:$0xff] }
 0x7ce   :  { %4871 = vmatpush1.bf16.msra.mxu0 %v12625_v14  ;;  %4790 = vmatprep.subr.bf16.mxu1 %v12626_v46  ;;  %v12636_v14 = vld [vmem:[#allocation297_spill] sm:$0xff]  ;;  %v12637_v46 = vld [vmem:[#allocation298_spill] sm:$0xff] }
 0x7cf   :  { %4872 = vmatprep.subr.bf16.mxu0 %v12627_v16  ;;  %v12638_v16 = vld [vmem:[#allocation299_spill] sm:$0xff] }
 0x7d1   :  { %4791 = vmatpush1.bf16.msra.mxu1 %v12628_v44  ;;  %v12639_v44 = vld [vmem:[#allocation300_spill] sm:$0xff] }
 0x7d2   :  { %4873 = vmatpush1.bf16.msra.mxu0 %v12629_v11  ;;  %4792 = vmatprep.subr.bf16.mxu1 %v12630_v7  ;;  %v12640_v11 = vld [vmem:[#allocation301_spill] sm:$0xff]  ;;  %v12641_v7 = vld [vmem:[#allocation302_spill] sm:$0xff] }
 0x7d3   :  { %4874 = vmatprep.subr.bf16.mxu0 %v12631_v60  ;;  %v12642_v60 = vld [vmem:[#allocation303_spill] sm:$0xff] }
 0x7d5   :  { %4793 = vmatpush1.bf16.msra.mxu1 %v12632_v52  ;;  %v12643_v52 = vld [vmem:[#allocation304_spill] sm:$0xff] }
 0x7d6   :  { %4875 = vmatpush1.bf16.msra.mxu0 %v12633_v37  ;;  %4794 = vmatprep.subr.bf16.mxu1 %v12634_v43  ;;  %v12644_v37 = vld [vmem:[#allocation305_spill] sm:$0xff]  ;;  %v12645_v43 = vld [vmem:[#allocation306_spill] sm:$0xff] }
 0x7d7   :  { %4876 = vmatprep.subr.bf16.mxu0 %v12635_v28  ;;  %v12646_v28 = vld [vmem:[#allocation307_spill] sm:$0xff] }
 0x7d9   :  { %4795 = vmatpush1.bf16.msra.mxu1 %v12636_v14  ;;  %v12647_v14 = vld [vmem:[#allocation308_spill] sm:$0xff] }
 0x7da   :  { %4877 = vmatpush1.bf16.msra.mxu0 %v12637_v46  ;;  %4796 = vmatprep.subr.bf16.mxu1 %v12638_v16  ;;  %v12648_v46 = vld [vmem:[#allocation309_spill] sm:$0xff]  ;;  %v12649_v16 = vld [vmem:[#allocation310_spill] sm:$0xff] }
 0x7db   :  { %4878 = vmatprep.subr.bf16.mxu0 %v12639_v44  ;;  %v12650_v44 = vld [vmem:[#allocation311_spill] sm:$0xff] }
 0x7dd   :  { %4797 = vmatpush1.bf16.msra.mxu1 %v12640_v11  ;;  %v12651_v11 = vld [vmem:[#allocation312_spill] sm:$0xff] }
 0x7de   :  { %4879 = vmatpush1.bf16.msra.mxu0 %v12641_v7  ;;  %4798 = vmatprep.subr.bf16.mxu1 %v12642_v60  ;;  %v12662_v60 = vld [vmem:[#allocation323_spill] sm:$0xff] }
 0x7df   :  { %4880 = vmatprep.subr.bf16.mxu0 %v12643_v52  ;;  %v12652_v52 = vld [vmem:[#allocation313_spill] sm:$0xff] }
 0x7e1   :  { %4799 = vmatpush1.bf16.msra.mxu1 %v12644_v37  ;;  %v12660_v37 = vld [vmem:[#allocation321_spill] sm:$0xff] }
 0x7e2   :  { %4881 = vmatpush1.bf16.msra.mxu0 %v12645_v43  ;;  %4800 = vmatprep.subr.bf16.mxu1 %v12646_v28  ;;  %v12653_v43 = vld [vmem:[#allocation314_spill] sm:$0xff]  ;;  %v12659_v28 = vld [vmem:[#allocation320_spill] sm:$0xff] }
 0x7e3   :  { %4882 = vmatprep.subr.bf16.mxu0 %v12647_v14  ;;  %v12654_v14 = vld [vmem:[#allocation315_spill] sm:$0xff] }
 0x7e5   :  { %4801 = vmatpush1.bf16.msra.mxu1 %v12648_v46  ;;  %v12655_v46 = vld [vmem:[#allocation316_spill] sm:$0xff] }
 0x7e6   :  { %4883 = vmatpush1.bf16.msra.mxu0 %v12649_v16  ;;  %4811 = vmatprep.subr.bf16.mxu1 %v12650_v44  ;;  %v12656_v16 = vld [vmem:[#allocation317_spill] sm:$0xff]  ;;  %v12657_v44 = vld [vmem:[#allocation318_spill] sm:$0xff] }
 0x7e7   :  { %4893 = vmatprep.subr.bf16.mxu0 %v12651_v11  ;;  %v12658_v11 = vld [vmem:[#allocation319_spill] sm:$0xff] }
 0x7e8   :  { %4803 = vmatmul.mubr.bf16.vlgmr.msra.gmra.mrb[36].mxu1 %v10263_v30 }
 0x7e9   :  { %4885 = vmatmul.mubr.bf16.vlgmr.msra.gmra.mrb[40].mxu0 %v10263_v30  ;;  %4812 = vmatpush1.bf16.msra.mxu1 %v12652_v52  ;;  %v12661_v52 = vld [vmem:[#allocation322_spill] sm:$0xff] }
 0x7ea   :  { %4843 = vmatprep.mubr.bf16.mxu1 %v10267_v45  ;;  %4894 = vmatpush1.bf16.msra.mxu0 %v12653_v43  ;;  %v12663_v43 = vld [vmem:[#allocation324_spill] sm:$0xff] }
 0x7eb   :  { %4925 = vmatprep.mubr.bf16.mxu0 %v10267_v45  ;;  %4813 = vmatprep.subr.bf16.mxu1 %v12654_v14  ;;  %v12664_v45 = vld [vmem:[#allocation325_spill] sm:$0xff]  ;;  %v12665_v14 = vld [vmem:[#allocation326_spill] sm:$0xff] }
 0x7ec   :  { %4895 = vmatprep.subr.bf16.mxu0 %v12655_v46  ;;  %v12666_v46 = vld [vmem:[#allocation327_spill] sm:$0xff] }
 0x7ed   :  { %4814 = vmatpush1.bf16.msra.mxu1 %v12656_v16  ;;  %v12667_v16 = vld [vmem:[#allocation328_spill] sm:$0xff] }
 0x7ee   :  { %4896 = vmatpush1.bf16.msra.mxu0 %v12657_v44  ;;  %4815 = vmatprep.subr.bf16.mxu1 %v12658_v11  ;;  %v12668_v44 = vld [vmem:[#allocation329_spill] sm:$0xff]  ;;  %v12669_v11 = vld [vmem:[#allocation330_spill] sm:$0xff] }
 0x7ef   :  { %4897 = vmatprep.subr.bf16.mxu0 %v12659_v28  ;;  %v12670_v28 = vld [vmem:[#allocation331_spill] sm:$0xff] }
 0x7f1   :  { %4816 = vmatpush1.bf16.msra.mxu1 %v12660_v37  ;;  %v12671_v37 = vld [vmem:[#allocation332_spill] sm:$0xff] }
 0x7f2   :  { %4898 = vmatpush1.bf16.msra.mxu0 %v12661_v52  ;;  %4817 = vmatprep.subr.bf16.mxu1 %v12662_v60  ;;  %v12672_v52 = vld [vmem:[#allocation333_spill] sm:$0xff]  ;;  %v12673_v60 = vld [vmem:[#allocation334_spill] sm:$0xff] }
 0x7f3   :  { %4899 = vmatprep.subr.bf16.mxu0 %v12663_v43  ;;  %v12674_v43 = vld [vmem:[#allocation335_spill] sm:$0xff] }
 0x7f5   :  { %4818 = vmatpush1.bf16.msra.mxu1 %v12664_v45  ;;  %v12675_v45 = vld [vmem:[#allocation336_spill] sm:$0xff] }
 0x7f6   :  { %4900 = vmatpush1.bf16.msra.mxu0 %v12665_v14  ;;  %4819 = vmatprep.subr.bf16.mxu1 %v12666_v46  ;;  %v12676_v14 = vld [vmem:[#allocation337_spill] sm:$0xff]  ;;  %v12677_v46 = vld [vmem:[#allocation338_spill] sm:$0xff] }
 0x7f7   :  { %4901 = vmatprep.subr.bf16.mxu0 %v12667_v16  ;;  %v12678_v16 = vld [vmem:[#allocation339_spill] sm:$0xff] }
 0x7f9   :  { %4820 = vmatpush1.bf16.msra.mxu1 %v12668_v44  ;;  %v12679_v44 = vld [vmem:[#allocation340_spill] sm:$0xff] }
 0x7fa   :  { %4902 = vmatpush1.bf16.msra.mxu0 %v12669_v11  ;;  %4821 = vmatprep.subr.bf16.mxu1 %v12670_v28  ;;  %v12680_v11 = vld [vmem:[#allocation341_spill] sm:$0xff]  ;;  %v12681_v28 = vld [vmem:[#allocation342_spill] sm:$0xff] }
 0x7fb   :  { %4903 = vmatprep.subr.bf16.mxu0 %v12671_v37  ;;  %v12682_v37 = vld [vmem:[#allocation343_spill] sm:$0xff] }
 0x7fd   :  { %4822 = vmatpush1.bf16.msra.mxu1 %v12672_v52  ;;  %v12683_v52 = vld [vmem:[#allocation344_spill] sm:$0xff] }
 0x7fe   :  { %4904 = vmatpush1.bf16.msra.mxu0 %v12673_v60  ;;  %4823 = vmatprep.subr.bf16.mxu1 %v12674_v43  ;;  %v12684_v60 = vld [vmem:[#allocation345_spill] sm:$0xff]  ;;  %v12685_v43 = vld [vmem:[#allocation346_spill] sm:$0xff] }
 0x7ff   :  { %4905 = vmatprep.subr.bf16.mxu0 %v12675_v45  ;;  %v12686_v45 = vld [vmem:[#allocation347_spill] sm:$0xff] }
 0x801   :  { %4824 = vmatpush1.bf16.msra.mxu1 %v12676_v14  ;;  %v12687_v14 = vld [vmem:[#allocation348_spill] sm:$0xff] }
 0x802   :  { %4906 = vmatpush1.bf16.msra.mxu0 %v12677_v46  ;;  %4825 = vmatprep.subr.bf16.mxu1 %v12678_v16  ;;  %v12688_v46 = vld [vmem:[#allocation349_spill] sm:$0xff]  ;;  %v12689_v16 = vld [vmem:[#allocation350_spill] sm:$0xff] }
 0x803   :  { %4907 = vmatprep.subr.bf16.mxu0 %v12679_v44  ;;  %v12690_v44 = vld [vmem:[#allocation351_spill] sm:$0xff] }
 0x805   :  { %4826 = vmatpush1.bf16.msra.mxu1 %v12680_v11  ;;  %v12691_v11 = vld [vmem:[#allocation352_spill] sm:$0xff] }
 0x806   :  { %4908 = vmatpush1.bf16.msra.mxu0 %v12681_v28  ;;  %4827 = vmatprep.subr.bf16.mxu1 %v12682_v37  ;;  %v12692_v28 = vld [vmem:[#allocation353_spill] sm:$0xff]  ;;  %v12693_v37 = vld [vmem:[#allocation354_spill] sm:$0xff] }
 0x807   :  { %4909 = vmatprep.subr.bf16.mxu0 %v12683_v52  ;;  %v12694_v52 = vld [vmem:[#allocation355_spill] sm:$0xff] }
 0x809   :  { %4828 = vmatpush1.bf16.msra.mxu1 %v12684_v60  ;;  %v12695_v60 = vld [vmem:[#allocation356_spill] sm:$0xff] }
 0x80a   :  { %4910 = vmatpush1.bf16.msra.mxu0 %v12685_v43  ;;  %4829 = vmatprep.subr.bf16.mxu1 %v12686_v45  ;;  %v12696_v43 = vld [vmem:[#allocation357_spill] sm:$0xff]  ;;  %v12697_v45 = vld [vmem:[#allocation358_spill] sm:$0xff] }
 0x80b   :  { %4911 = vmatprep.subr.bf16.mxu0 %v12687_v14  ;;  %v12698_v14 = vld [vmem:[#allocation359_spill] sm:$0xff] }
 0x80d   :  { %4830 = vmatpush1.bf16.msra.mxu1 %v12688_v46  ;;  %v12699_v46 = vld [vmem:[#allocation360_spill] sm:$0xff] }
 0x80e   :  { %4912 = vmatpush1.bf16.msra.mxu0 %v12689_v16  ;;  %4831 = vmatprep.subr.bf16.mxu1 %v12690_v44  ;;  %v12700_v16 = vld [vmem:[#allocation361_spill] sm:$0xff]  ;;  %v12701_v44 = vld [vmem:[#allocation362_spill] sm:$0xff] }
 0x80f   :  { %4913 = vmatprep.subr.bf16.mxu0 %v12691_v11  ;;  %v12702_v11 = vld [vmem:[#allocation363_spill] sm:$0xff] }
 0x811   :  { %4832 = vmatpush1.bf16.msra.mxu1 %v12692_v28  ;;  %v12703_v28 = vld [vmem:[#allocation364_spill] sm:$0xff] }
 0x812   :  { %4914 = vmatpush1.bf16.msra.mxu0 %v12693_v37  ;;  %4833 = vmatprep.subr.bf16.mxu1 %v12694_v52 }
 0x813   :  { %4915 = vmatprep.subr.bf16.mxu0 %v12695_v60 }
 0x815   :  { %4834 = vmatpush1.bf16.msra.mxu1 %v12696_v43 }
 0x816   :  { %4916 = vmatpush1.bf16.msra.mxu0 %v12697_v45  ;;  %4835 = vmatprep.subr.bf16.mxu1 %v12698_v14 }
 0x817   :  { %4917 = vmatprep.subr.bf16.mxu0 %v12699_v46 }
 0x819   :  { %4836 = vmatpush1.bf16.msra.mxu1 %v12700_v16 }
 0x81a   :  { %4918 = vmatpush1.bf16.msra.mxu0 %v12701_v44  ;;  %4837 = vmatprep.subr.bf16.mxu1 %v12702_v11 }
 0x81b   :  { %4919 = vmatprep.subr.bf16.mxu0 %v12703_v28 }
 0x81d   :  { %4838 = vmatpush1.bf16.msra.mxu1 %v9748_v2 }
 0x81e   :  { %4920 = vmatpush1.bf16.msra.mxu0 %v9752_v4  ;;  %4839 = vmatprep.subr.bf16.mxu1 %v9754_v13  ;;  %v6851_v4 = vld [vmem:[%s11227_s6 + $0x40] sm:$0xff]  }
 0x81f   :  { %4921 = vmatprep.subr.bf16.mxu0 %v9757_v0 }
 0x821   :  { %4840 = vmatpush1.bf16.msra.mxu1 %v9772_v54 }
 0x822   :  { %4922 = vmatpush1.bf16.msra.mxu0 %v9776_v58  ;;  %4841 = vmatprep.subr.bf16.mxu1 %v9778_v48  ;;  %v6852_v48 = vld [vmem:[%s11227_s6] sm:$0xff]  }
 0x823   :  { %4923 = vmatprep.subr.bf16.mxu0 %v9781_v63 }
 0x825   :  { %4842 = vmatpush1.bf16.msra.mxu1 %v9784_v50 }
 0x826   :  { %4924 = vmatpush1.bf16.msra.mxu0 %v9788_v25  ;;  %6511 = vmatprep.subr.bf16.mxu1 %v6851_v4  ;;  %v6853_v4 = vld [vmem:[%s11227_s6 + $0x48] sm:$0xff]  }
 0x827   :  { %5092 = vmatprep.subr.bf16.mxu0 %v7347_v10  ;;  %v6854_v10 = vld [vmem:[%s11227_s6 + $0x8] sm:$0xff]  }
 0x828   :  { %4844 = vmatmul.mubr.bf16.vlgmr.msra.gmra.mrb[36].mxu1 %v10334_v57 }
 0x829   :  { %4926 = vmatmul.mubr.bf16.vlgmr.msra.gmra.mrb[40].mxu0 %v10334_v57  ;;  %6512 = vmatpush3.bf16.msra.mxu1 %v6852_v48  ;;  %v6857_v48 = vld [vmem:[%s11227_s6 + $0x58] sm:$0xff]  }
 0x82a   :  { %5093 = vmatpush1.bf16.msra.mxu0 %v7363_v17  ;;  %5124 = vmatprep.mubr.bf16.mxu0 %v10259_v8  ;;  %v6855_v17 = vld [vmem:[%s11227_s6 + $0x50] sm:$0xff]   ;;  %v6866_v57 = vld [vmem:[%s11227_s6 + $0x38] sm:$0xff]  }
 0x82b   :  { %5094 = vmatprep.subr.bf16.mxu0 %v7368_v53  ;;  %6513 = vmatprep.subr.bf16.mxu1 %v6853_v4  ;;  %v6856_v53 = vld [vmem:[%s11227_s6 + $0x10] sm:$0xff]   ;;  %v12706_v4 = vld [vmem:[#allocation2_spill] sm:$0xff] }
 0x82d   :  { %6514 = vmatpush3.bf16.msra.mxu1 %v6854_v10  ;;  %v12707_v10 = vld [vmem:[#allocation20_spill] sm:$0xff] }
 0x82e   :  { %5095 = vmatpush1.bf16.msra.mxu0 %v7388_v24  ;;  %6515 = vmatprep.subr.bf16.mxu1 %v6855_v17  ;;  %v6858_v24 = vld [vmem:[%s11227_s6 + $0x18] sm:$0xff]   ;;  %v12708_v17 = vld [vmem:[#allocation22_spill] sm:$0xff] }
 0x82f   :  { %5096 = vmatprep.subr.bf16.mxu0 %v7394_v26  ;;  %v6859_v26 = vld [vmem:[%s11227_s6 + $0x60] sm:$0xff]  }
 0x831   :  { %6516 = vmatpush3.bf16.msra.mxu1 %v6856_v53  ;;  %v12710_v53 = vld [vmem:[#allocation26_spill] sm:$0xff] }
 0x832   :  { %5097 = vmatpush1.bf16.msra.mxu0 %v7414_v32  ;;  %6517 = vmatprep.subr.bf16.mxu1 %v6857_v48  ;;  %v6860_v32 = vld [vmem:[%s11227_s6 + $0x20] sm:$0xff]   ;;  %v12711_v48 = vld [vmem:[#allocation28_spill] sm:$0xff] }
 0x833   :  { %5098 = vmatprep.subr.bf16.mxu0 %v7420_v34  ;;  %v6861_v34 = vld [vmem:[%s11227_s6 + $0x68] sm:$0xff]  }
 0x835   :  { %6518 = vmatpush3.bf16.msra.mxu1 %v6858_v24  ;;  %v12712_v24 = vld [vmem:[#allocation30_spill] sm:$0xff] }
 0x836   :  { %5099 = vmatpush1.bf16.msra.mxu0 %v7438_v39  ;;  %6519 = vmatprep.subr.bf16.mxu1 %v6859_v26  ;;  %v6862_v39 = vld [vmem:[%s11227_s6 + $0x28] sm:$0xff]   ;;  %v12713_v26 = vld [vmem:[#allocation32_spill] sm:$0xff] }
 0x837   :  { %5100 = vmatprep.subr.bf16.mxu0 %v7444_v41  ;;  %v6863_v41 = vld [vmem:[%s11227_s6 + $0x70] sm:$0xff]  }
 0x839   :  { %6520 = vmatpush3.bf16.msra.mxu1 %v6860_v32  ;;  %v12714_v32 = vld [vmem:[#allocation34_spill] sm:$0xff] }
 0x83a   :  { %5101 = vmatpush1.bf16.msra.mxu0 %v7462_v47  ;;  %6521 = vmatprep.subr.bf16.mxu1 %v6861_v34  ;;  %v6864_v47 = vld [vmem:[%s11227_s6 + $0x30] sm:$0xff]  }
 0x83b   :  { %5102 = vmatprep.subr.bf16.mxu0 %v7468_v49  ;;  %v6865_v49 = vld [vmem:[%s11227_s6 + $0x78] sm:$0xff]   ;;  %v12715_v34 = vld [vmem:[#allocation36_spill] sm:$0xff] }
 0x83d   :  { %6522 = vmatpush3.bf16.msra.mxu1 %v6862_v39  ;;  %v12716_v39 = vld [vmem:[#allocation38_spill] sm:$0xff] }
 0x83e   :  { %5103 = vmatpush1.bf16.msra.mxu0 %v7486_v56  ;;  %6523 = vmatprep.subr.bf16.mxu1 %v6863_v41  ;;  %v12704_v56 = vld [vmem:[#allocation16_spill] sm:$0xff] }
 0x83f   :  { %5104 = vmatprep.subr.bf16.mxu0 %v7492_v59  ;;  %v12705_v59 = vld [vmem:[#allocation18_spill] sm:$0xff]  ;;  %v12717_v41 = vld [vmem:[#allocation40_spill] sm:$0xff] }
 0x841   :  { %6524 = vmatpush3.bf16.msra.mxu1 %v6864_v47  ;;  %v12718_v47 = vld [vmem:[#allocation42_spill] sm:$0xff] }
 0x842   :  { %5105 = vmatpush1.bf16.msra.mxu0 %v7510_v1  ;;  %6525 = vmatprep.subr.bf16.mxu1 %v6865_v49  ;;  %v12709_v1 = vld [vmem:[#allocation24_spill] sm:$0xff] }
 0x843   :  { %5106 = vmatprep.subr.bf16.mxu0 %v12704_v56  ;;  %v12719_v49 = vld [vmem:[#allocation44_spill] sm:$0xff]  ;;  %v12720_v56 = vld [vmem:[#allocation46_spill] sm:$0xff] }
 0x845   :  { %6526 = vmatpush3.bf16.msra.mxu1 %v6866_v57  ;;  %v12721_v57 = vld [vmem:[#allocation48_spill] sm:$0xff] }
 0x846   :  { %5107 = vmatpush1.bf16.msra.mxu0 %v12705_v59  ;;  %5133 = vmatprep.subr.bf16.mxu1 %v12706_v4  ;;  %v12722_v59 = vld [vmem:[#allocation50_spill] sm:$0xff]  ;;  %v12723_v4 = vld [vmem:[#allocation52_spill] sm:$0xff] }
 0x847   :  { %5108 = vmatprep.subr.bf16.mxu0 %v12707_v10  ;;  %v12724_v10 = vld [vmem:[#allocation54_spill] sm:$0xff] }
 0x84a   :  { %5109 = vmatpush1.bf16.msra.mxu0 %v12708_v17  ;;  %v12725_v17 = vld [vmem:[#allocation56_spill] sm:$0xff] }
 0x84b   :  { %5110 = vmatprep.subr.bf16.mxu0 %v12709_v1  ;;  %v12726_v1 = vld [vmem:[#allocation58_spill] sm:$0xff] }
 0x84e   :  { %5111 = vmatpush1.bf16.msra.mxu0 %v12710_v53  ;;  %v12727_v53 = vld [vmem:[#allocation60_spill] sm:$0xff] }
 0x84f   :  { %5112 = vmatprep.subr.bf16.mxu0 %v12711_v48  ;;  %v12728_v48 = vld [vmem:[#allocation62_spill] sm:$0xff] }
 0x852   :  { %5113 = vmatpush1.bf16.msra.mxu0 %v12712_v24  ;;  %v12729_v24 = vld [vmem:[#allocation64_spill] sm:$0xff] }
 0x853   :  { %5114 = vmatprep.subr.bf16.mxu0 %v12713_v26  ;;  %v12730_v26 = vld [vmem:[#allocation66_spill] sm:$0xff] }
 0x856   :  { %5115 = vmatpush1.bf16.msra.mxu0 %v12714_v32  ;;  %v12731_v32 = vld [vmem:[#allocation68_spill] sm:$0xff] }
 0x857   :  { %5116 = vmatprep.subr.bf16.mxu0 %v12715_v34  ;;  %v12732_v34 = vld [vmem:[#allocation70_spill] sm:$0xff] }
 0x85a   :  { %5117 = vmatpush1.bf16.msra.mxu0 %v12716_v39 }
 0x85b   :  { %5118 = vmatprep.subr.bf16.mxu0 %v12717_v41 }
 0x85e   :  { %5119 = vmatpush1.bf16.msra.mxu0 %v12718_v47  ;;  %v12733_v47 = vld [vmem:[#allocation72_spill] sm:$0xff] }
 0x85f   :  { %5120 = vmatprep.subr.bf16.mxu0 %v12719_v49 }
 0x862   :  { %5121 = vmatpush1.bf16.msra.mxu0 %v12720_v56 }
 0x863   :  { %5122 = vmatprep.subr.bf16.mxu0 %v12721_v57 }
 0x866   :  { %5123 = vmatpush1.bf16.msra.mxu0 %v12722_v59 }
 0x867   :  { %5174 = vmatprep.subr.bf16.mxu0 %v12723_v4  ;;  %v12734_v4 = vld [vmem:[#allocation74_spill] sm:$0xff] }
 0x869   :  { %5125 = vmatmul.mubr.bf16.vlgmr.msra.gmra.mrb[44].mxu0 %v10263_v30 }
 0x86a   :  { %5175 = vmatpush1.bf16.msra.mxu0 %v12724_v10  ;;  %5206 = vmatprep.mubr.bf16.mxu0 %v10259_v8 }
 0x86b   :  { %5176 = vmatprep.subr.bf16.mxu0 %v12725_v17 }
 0x86e   :  { %5177 = vmatpush1.bf16.msra.mxu0 %v12726_v1  ;;  %v12735_v1 = vld [vmem:[#allocation76_spill] sm:$0xff] }
 0x86f   :  { %5178 = vmatprep.subr.bf16.mxu0 %v12727_v53  ;;  %v12736_v53 = vld [vmem:[#allocation78_spill] sm:$0xff] }
 0x872   :  { %5179 = vmatpush1.bf16.msra.mxu0 %v12728_v48  ;;  %v12737_v48 = vld [vmem:[#allocation80_spill] sm:$0xff] }
 0x873   :  { %5180 = vmatprep.subr.bf16.mxu0 %v12729_v24  ;;  %v12738_v24 = vld [vmem:[#allocation82_spill] sm:$0xff] }
 0x876   :  { %5181 = vmatpush1.bf16.msra.mxu0 %v12730_v26  ;;  %v12739_v26 = vld [vmem:[#allocation84_spill] sm:$0xff] }
 0x877   :  { %5182 = vmatprep.subr.bf16.mxu0 %v12731_v32  ;;  %v12740_v32 = vld [vmem:[#allocation86_spill] sm:$0xff] }
 0x87a   :  { %5183 = vmatpush1.bf16.msra.mxu0 %v12732_v34  ;;  %v12741_v34 = vld [vmem:[#allocation88_spill] sm:$0xff] }
 0x87b   :  { %v10568_v39 = vpop.f32.mrb[32].mxu1  ;;  %v10570_v41 = vpop.f32.mrb[36].mxu0  ;;  %5184 = vmatprep.subr.bf16.mxu0 %v12733_v47  ;;  %v12742_v47 = vld [vmem:[#allocation90_spill] sm:$0xff] }
 0x87c   :  { %v4683_v49 = vpop.f32.mrb[33].mxu1  ;;  %v10573_v56 = vpop.f32.mrb[37].mxu0 }
 0x87d   :  { %v4685_v57 = vpop.f32.mrb[34].mxu1  ;;  %v4767_v59 = vpop.f32.mrb[38].mxu0 }
 0x87e   :  { %5185 = vmatpush1.bf16.msra.mxu0 %v12734_v4  ;;  %v4686_v10 = vpop.f32.mrb[35].mxu1  ;;  %v4768_v17 = vpop.f32.mrb[39].mxu0  ;;  %v12743_v57 = vld [vmem:[#allocation92_spill] sm:$0xff]  ;;  %v12744_v59 = vld [vmem:[#allocation94_spill] sm:$0xff] }
 0x87f   :  { %5186 = vmatprep.subr.bf16.mxu0 %v12735_v1  ;;  %v12745_v4 = vld [vmem:[#allocation96_spill] sm:$0xff]  ;;  %v12746_v10 = vld [vmem:[#allocation98_spill] sm:$0xff] }
 0x880   :  { %v12747_v17 = vld [vmem:[#allocation100_spill] sm:$0xff]  ;;  %v12748_v1 = vld [vmem:[#allocation102_spill] sm:$0xff] }
 0x882   :  { %5187 = vmatpush1.bf16.msra.mxu0 %v12736_v53  ;;  %v12749_v53 = vld [vmem:[#allocation104_spill] sm:$0xff] }
 0x883   :  { %5188 = vmatprep.subr.bf16.mxu0 %v12737_v48  ;;  %v12750_v48 = vld [vmem:[#allocation106_spill] sm:$0xff] }
 0x886   :  { %5189 = vmatpush1.bf16.msra.mxu0 %v12738_v24  ;;  %v12751_v24 = vld [vmem:[#allocation108_spill] sm:$0xff] }
 0x887   :  { %5190 = vmatprep.subr.bf16.mxu0 %v12739_v26  ;;  %v12752_v26 = vld [vmem:[#allocation110_spill] sm:$0xff] }
 0x88a   :  { %5191 = vmatpush1.bf16.msra.mxu0 %v12740_v32  ;;  %v12753_v32 = vld [vmem:[#allocation112_spill] sm:$0xff] }
 0x88b   :  { %5192 = vmatprep.subr.bf16.mxu0 %v12741_v34  ;;  %v12754_v34 = vld [vmem:[#allocation114_spill] sm:$0xff] }
 0x88e   :  { %5193 = vmatpush1.bf16.msra.mxu0 %v12742_v47  ;;  %v12755_v47 = vld [vmem:[#allocation125_spill] sm:$0xff] }
 0x88f   :  { %5194 = vmatprep.subr.bf16.mxu0 %v12743_v57  ;;  %v12756_v57 = vld [vmem:[#allocation126_spill] sm:$0xff] }
 0x892   :  { %5195 = vmatpush1.bf16.msra.mxu0 %v12744_v59  ;;  %v12757_v59 = vld [vmem:[#allocation129_spill] sm:$0xff] }
 0x893   :  { %5196 = vmatprep.subr.bf16.mxu0 %v12745_v4  ;;  %v12758_v4 = vld [vmem:[#allocation130_spill] sm:$0xff] }
 0x896   :  { %5197 = vmatpush1.bf16.msra.mxu0 %v12746_v10  ;;  %v12759_v10 = vld [vmem:[#allocation134_spill] sm:$0xff] }
 0x897   :  { %5198 = vmatprep.subr.bf16.mxu0 %v12747_v17  ;;  %v12760_v17 = vld [vmem:[#allocation133_spill] sm:$0xff] }
 0x89a   :  { %5199 = vmatpush1.bf16.msra.mxu0 %v12748_v1  ;;  %v12761_v1 = vld [vmem:[#allocation137_spill] sm:$0xff] }
 0x89b   :  { %5200 = vmatprep.subr.bf16.mxu0 %v12749_v53  ;;  %v12762_v53 = vld [vmem:[#allocation139_spill] sm:$0xff] }
 0x89e   :  { %5201 = vmatpush1.bf16.msra.mxu0 %v12750_v48  ;;  %v12763_v48 = vld [vmem:[#allocation141_spill] sm:$0xff] }
 0x89f   :  { %5202 = vmatprep.subr.bf16.mxu0 %v12751_v24  ;;  %v12764_v24 = vld [vmem:[#allocation143_spill] sm:$0xff] }
 0x8a2   :  { %5203 = vmatpush1.bf16.msra.mxu0 %v12752_v26  ;;  %v12765_v26 = vld [vmem:[#allocation145_spill] sm:$0xff] }
 0x8a3   :  { %5204 = vmatprep.subr.bf16.mxu0 %v12753_v32  ;;  %v12766_v32 = vld [vmem:[#allocation147_spill] sm:$0xff] }
 0x8a6   :  { %5205 = vmatpush1.bf16.msra.mxu0 %v12754_v34  ;;  %v12767_v34 = vld [vmem:[#allocation149_spill] sm:$0xff] }
 0x8a7   :  { %5430 = vmatprep.subr.bf16.mxu0 %v12755_v47  ;;  %v12768_v47 = vld [vmem:[#allocation151_spill] sm:$0xff] }
 0x8a9   :  { %5207 = vmatmul.mubr.bf16.vlgmr.msra.gmra.mrb[48].mxu0 %v10263_v30 }
 0x8aa   :  { %5431 = vmatpush1.bf16.msra.mxu0 %v12756_v57  ;;  %v12769_v57 = vld [vmem:[#allocation153_spill] sm:$0xff] }
 0x8ab   :  { %5432 = vmatprep.subr.bf16.mxu0 %v12757_v59  ;;  %v12770_v59 = vld [vmem:[#allocation155_spill] sm:$0xff] }
 0x8ae   :  { %5433 = vmatpush1.bf16.msra.mxu0 %v12758_v4  ;;  %v12771_v4 = vld [vmem:[#allocation157_spill] sm:$0xff] }
 0x8af   :  { %5434 = vmatprep.subr.bf16.mxu0 %v12759_v10  ;;  %v12772_v10 = vld [vmem:[#allocation159_spill] sm:$0xff] }
 0x8b2   :  { %5435 = vmatpush1.bf16.msra.mxu0 %v12760_v17  ;;  %v12773_v17 = vld [vmem:[#allocation161_spill] sm:$0xff] }
 0x8b3   :  { %5436 = vmatprep.subr.bf16.mxu0 %v12761_v1  ;;  %v12774_v1 = vld [vmem:[#allocation163_spill] sm:$0xff] }
 0x8b6   :  { %5437 = vmatpush1.bf16.msra.mxu0 %v12762_v53  ;;  %v12775_v53 = vld [vmem:[#allocation165_spill] sm:$0xff] }
 0x8b7   :  { %5438 = vmatprep.subr.bf16.mxu0 %v12763_v48  ;;  %v12776_v48 = vld [vmem:[#allocation167_spill] sm:$0xff] }
 0x8ba   :  { %5439 = vmatpush1.bf16.msra.mxu0 %v12764_v24  ;;  %v12777_v24 = vld [vmem:[#allocation169_spill] sm:$0xff] }
 0x8bb   :  { %5440 = vmatprep.subr.bf16.mxu0 %v12765_v26  ;;  %v12778_v26 = vld [vmem:[#allocation171_spill] sm:$0xff] }
 0x8be   :  { %5441 = vmatpush1.bf16.msra.mxu0 %v12766_v32  ;;  %v12779_v32 = vld [vmem:[#allocation173_spill] sm:$0xff] }
 0x8bf   :  { %5442 = vmatprep.subr.bf16.mxu0 %v12767_v34  ;;  %v12780_v34 = vld [vmem:[#allocation175_spill] sm:$0xff] }
 0x8c2   :  { %5443 = vmatpush1.bf16.msra.mxu0 %v12768_v47  ;;  %v12781_v47 = vld [vmem:[#allocation177_spill] sm:$0xff] }
 0x8c3   :  { %5444 = vmatprep.subr.bf16.mxu0 %v12769_v57  ;;  %v12782_v57 = vld [vmem:[#allocation179_spill] sm:$0xff] }
 0x8c6   :  { %5445 = vmatpush1.bf16.msra.mxu0 %v12770_v59  ;;  %v12783_v59 = vld [vmem:[#allocation181_spill] sm:$0xff] }
 0x8c7   :  { %5446 = vmatprep.subr.bf16.mxu0 %v12771_v4  ;;  %v12784_v4 = vld [vmem:[#allocation183_spill] sm:$0xff] }
 0x8ca   :  { %5447 = vmatpush1.bf16.msra.mxu0 %v12772_v10  ;;  %v12785_v10 = vld [vmem:[#allocation185_spill] sm:$0xff] }
 0x8cb   :  { %5448 = vmatprep.subr.bf16.mxu0 %v12773_v17  ;;  %v12786_v17 = vld [vmem:[#allocation187_spill] sm:$0xff] }
 0x8ce   :  { %5449 = vmatpush1.bf16.msra.mxu0 %v12774_v1  ;;  %v12787_v1 = vld [vmem:[#allocation189_spill] sm:$0xff] }
 0x8cf   :  { %5450 = vmatprep.subr.bf16.mxu0 %v12775_v53  ;;  %v12788_v53 = vld [vmem:[#allocation116_spill] sm:$0xff] }
 0x8d2   :  { %5451 = vmatpush1.bf16.msra.mxu0 %v12776_v48  ;;  %v10632_v48 = vadd.f32 %v10568_v39, %v12788_v53 }
 0x8d3   :  { %5452 = vmatprep.subr.bf16.mxu0 %v12777_v24  ;;  %v12789_v24 = vld [vmem:[#allocation375_spill] sm:$0xff] }
 0x8d6   :  { %5453 = vmatpush1.bf16.msra.mxu0 %v12778_v26  ;;  %v10635_v26 = vadd.f32 %v4683_v49, %v12789_v24 }
 0x8d7   :  { %5454 = vmatprep.subr.bf16.mxu0 %v12779_v32  ;;  %v4952_v32 = vmul.f32 %v10632_v48, %v10632_v48 }
 0x8d8   :  { %v4935_v39 = vsel %vm2242_vm0, %v10635_v26, 0.0 }
 0x8da   :  { %5455 = vmatpush1.bf16.msra.mxu0 %v12780_v34  ;;  %v4953_v34 = vmul.f32 %v10635_v26, %v10635_v26 }
 0x8db   :  { %5456 = vmatprep.subr.bf16.mxu0 %v12781_v47  ;;  %v4934_v47 = vsel %vm2242_vm0, %v10632_v48, 0.0 }
 0x8dc   :  { %v4961_v49 = vsel %vm2242_vm0, %v4953_v34, 0.0 }
 0x8de   :  { %5457 = vmatpush1.bf16.msra.mxu0 %v12782_v57  ;;  %v12790_v57 = vld [vmem:[#allocation376_spill] sm:$0xff] }
 0x8df   :  { %5458 = vmatprep.subr.bf16.mxu0 %v12783_v59  ;;  %v10645_v59 = vadd.f32 %v10570_v41, %v12790_v57 }
 0x8e1   :  { %v4937_v41 = vsel %vm2242_vm0, %v10645_v59, 0.0 }
 0x8e2   :  { %5459 = vmatpush1.bf16.msra.mxu0 %v12784_v4  ;;  %v4960_v4 = vsel %vm2242_vm0, %v4952_v32, 0.0 }
 0x8e3   :  { %5460 = vmatprep.subr.bf16.mxu0 %v12785_v10  ;;  %v4936_v10 = vadd.f32 %v4935_v39, %v4934_v47  ;;  %v4962_v53 = vadd.f32 %v4961_v49, %v4960_v4  ;;  %v12792_v39 = vld [vmem:[#allocation378_spill] sm:$0xff]  ;;  %v12793_v49 = vld [vmem:[#allocation379_spill] sm:$0xff] }
 0x8e5   :  { %v4938_v57 = vadd.f32 %v4937_v41, %v4936_v10  ;;  %v12794_v10 = vld [vmem:[#allocation380_spill] sm:$0xff] }
 0x8e6   :  { %5461 = vmatpush1.bf16.msra.mxu0 %v12786_v17  ;;  %v4954_v17 = vmul.f32 %v10645_v59, %v10645_v59 }
 0x8e7   :  { %5471 = vmatprep.subr.bf16.mxu0 %v12787_v1  ;;  %v12791_v1 = vld [vmem:[#allocation377_spill] sm:$0xff] }
 0x8e8   :  { %v10655_v24 = vadd.f32 %v10573_v56, %v12791_v1  ;;  %v4963_v25 = vsel %vm2242_vm0, %v4954_v17, 0.0 }
 0x8e9   :  { %v4964_v50 = vadd.f32 %v4963_v25, %v4962_v53 }
 0x8ea   :  { %v4955_v32 = vmul.f32 %v10655_v24, %v10655_v24  ;;  %v4939_v47 = vsel %vm2242_vm0, %v10655_v24, 0.0 }
 0x8eb   :  { %v4940_v4 = vadd.f32 %v4939_v47, %v4938_v57 }
 0x8ec   :  { %v4965_v25 = vsel %vm2242_vm0, %v4955_v32, 0.0 }
 0x8fb   :  { %v4845_v34 = vpop.f32.mrb[36].mxu1 }
 0x8fc   :  { %v10665_v63 = vadd.f32 %v4845_v34, %v12792_v39  ;;  %v4927_v56 = vpop.f32.mrb[40].mxu0  ;;  %v4847_v1 = vpop.f32.mrb[37].mxu1  ;;  %v12795_v39 = vld [vmem:[#allocation381_spill] sm:$0xff] }
 0x8fd   :  { %v10668_v58 = vadd.f32 %v4927_v56, %v12793_v49  ;;  %v10671_v41 = vadd.f32 %v4847_v1, %v12794_v10  ;;  %v4929_v17 = vpop.f32.mrb[41].mxu0  ;;  %v4849_v54 = vpop.f32.mrb[38].mxu1  ;;  %v4966_v56 = vadd.f32 %v4965_v25, %v4964_v50 }
 0x8fe   :  { %v4941_v53 = vsel %vm2242_vm0, %v10665_v63, 0.0  ;;  %v4956_v34 = vmul.f32 %v10665_v63, %v10665_v63  ;;  %v10679_v0 = vadd.f32 %v4929_v17, %v12795_v39  ;;  %v4931_v57 = vpop.f32.mrb[42].mxu0  ;;  %v4850_v47 = vpop.f32.mrb[39].mxu1 }
 0x8ff   :  { %v4942_v49 = vadd.f32 %v4941_v53, %v4940_v4  ;;  %v4943_v1 = vsel %vm2242_vm0, %v10671_v41, 0.0  ;;  %v4957_v54 = vmul.f32 %v10671_v41, %v10671_v41  ;;  %v4932_v32 = vpop.f32.mrb[43].mxu0  ;;  %v4958_v13 = vmul.f32 %v10668_v58, %v10668_v58 }
 0x900   :  { %v4967_v10 = vsel %vm2242_vm0, %v4956_v34, 0.0  ;;  %v4945_v50 = vsel %vm2242_vm0, %v10668_v58, 0.0  ;;  %v4959_v4 = vmul.f32 %v10679_v0, %v10679_v0  ;;  %v4947_v57 = vsel %vm2242_vm0, %v10679_v0, 0.0 }
 0x901   :  { %v4944_v2 = vadd.f32 %v4943_v1, %v4942_v49  ;;  %v4968_v28 = vadd.f32 %v4967_v10, %v4966_v56  ;;  %v4969_v17 = vsel %vm2242_vm0, %v4957_v54, 0.0  ;;  %v4971_v34 = vsel %vm2242_vm0, %v4958_v13, 0.0 }
 0x902   :  { %v4973_v49 = vsel %vm2242_vm0, %v4959_v4, 0.0 }
 0x903   :  { %v4946_v25 = vadd.f32 %v4945_v50, %v4944_v2  ;;  %v4970_v53 = vadd.f32 %v4969_v17, %v4968_v28 }
 0x905   :  { %v4948_v47 = vadd.f32 %v4947_v57, %v4946_v25  ;;  %v4972_v32 = vadd.f32 %v4971_v34, %v4970_v53 }
 0x907   :  { %4949 = vadd.xlane.f32.xlu0 %v4948_v47  ;;  %v4974_v10 = vadd.f32 %v4973_v49, %v4972_v32 }
 0x909   :  { %4975 = vadd.xlane.f32.xlu1 %v4974_v10 }
 0x93c   :  { %v10697_v56 = vpop.f32.mrb[44].mxu0 }
 0x93d   :  { %v10699_v1 = vpop.f32.mrb[45].mxu0 }
 0x93e   :  { %v5130_v54 = vpop.f32.mrb[46].mxu0 }
 0x93f   :  { %v5131_v39 = vpop.f32.mrb[47].mxu0 }
 0x97c   :  { %v10701_v2 = vpop.f32.mrb[48].mxu0 }
 0x97d   :  { %v10703_v28 = vpop.f32.mrb[49].mxu0 }
 0x97e   :  { %v5212_v17 = vpop.f32.mrb[50].mxu0 }
 0x97f   :  { %v5213_v50 = vpop.f32.mrb[51].mxu0 }
 0x994   :  { %v4950_v13 = vpop.xlane.xlu0 %4949 }
 0x995   :  { %v4951_v25 = vmul.f32 0.0009765625, %v4950_v13 }
 0x996   :  { %v4976_v53 = vpop.xlane.xlu1 %4975 }
 0x997   :  { %v4977_v57 = vmul.f32 0.0009765625, %v4976_v53  ;;  %v4978_v4 = vmul.f32 %v4951_v25, %v4951_v25  ;;  %v4982_v49 = vsub.f32 %v10635_v26, %v4951_v25  ;;  %v4984_v10 = vsub.f32 %v10655_v24, %v4951_v25 }
 0x998   :  { %v4981_v54 = vsub.f32 %v10632_v48, %v4951_v25  ;;  %v4983_v11 = vsub.f32 %v10645_v59, %v4951_v25  ;;  %v4985_v26 = vsub.f32 %v10665_v63, %v4951_v25  ;;  %v4988_v48 = vsub.f32 %v10679_v0, %v4951_v25 }
 0x999   :  { %v4979_v34 = vsub.f32 %v4977_v57, %v4978_v4  ;;  %v4986_v4 = vsub.f32 %v10671_v41, %v4951_v25 }
 0x99b   :  { %v4980_v47 = vmax.f32 %v4979_v34, 0.0 }
 0x99d   :  { %v4989_v32 = vadd.f32 1e-05, %v4980_v47 }
 0x99f   :  { %6749 = vrsqrt.f32 %v4989_v32 }
 0x9a9   :  { %v6750_v39 = vpop.eup %6749 }
 0x9aa   :  { %v4992_v17 = vmul.f32 %v6750_v39, %v4982_v49  ;;  %v4994_v50 = vmul.f32 %v6750_v39, %v4984_v10  ;;  %v4991_v44 = vmul.f32 %v6750_v39, %v4981_v54  ;;  %v4993_v13 = vmul.f32 %v6750_v39, %v4983_v11 }
 0x9ab   :  { %v4996_v24 = vmul.f32 %v6750_v39, %v4986_v4  ;;  %v4995_v34 = vmul.f32 %v6750_v39, %v4985_v26  ;;  %v4998_v59 = vmul.f32 %v6750_v39, %v4988_v48  ;;  %v4987_v11 = vsub.f32 %v10668_v58, %v4951_v25 }
 0x9ac   :  { %v6470_v16 = vmul.f32 -1.442695, %v4992_v17  ;;  %v6472_v53 = vmul.f32 -1.442695, %v4994_v50  ;;  %v6469_v46 = vmul.f32 -1.442695, %v4991_v44 }
 0x9ad   :  { %v6471_v57 = vmul.f32 -1.442695, %v4993_v13  ;;  %v6474_v47 = vmul.f32 -1.442695, %v4996_v24  ;;  %v6473_v32 = vmul.f32 -1.442695, %v4995_v34  ;;  %v4997_v41 = vmul.f32 %v6750_v39, %v4987_v11 }
 0x9ae   :  { %6751 = vpow2.f32 %v6470_v16 }
 0x9af   :  { %6753 = vpow2.f32 %v6472_v53 }
 0x9b0   :  { %6755 = vpow2.f32 %v6469_v46 }
 0x9b1   :  { %6757 = vpow2.f32 %v6471_v57 }
 0x9b2   :  { %6759 = vtanh.f32 %v4998_v59 }
 0x9b3   :  { %6761 = vpow2.f32 %v6474_v47 }
 0x9b4   :  { %6763 = vpow2.f32 %v6473_v32 }
 0x9b8   :  { %v6752_v49 = vpop.eup %6751 }
 0x9b9   :  { %v6754_v16 = vpop.eup %6753  ;;  %v5006_v44 = vadd.f32 1.0, %v6752_v49 }
 0x9ba   :  { %v5018_v10 = vadd.f32 1.0, %v6754_v16  ;;  %v6756_v63 = vpop.eup %6755 }
 0x9bb   :  { %6765 = vrcp.f32 %v5006_v44  ;;  %v6758_v46 = vpop.eup %6757  ;;  %v5005_v0 = vadd.f32 1.0, %v6756_v63  ;;  %v12796_v63 = vld [vmem:[#allocation3_spill] sm:$0xff] }
 0x9bc   :  { %6767 = vrcp.f32 %v5018_v10  ;;  %v5017_v54 = vadd.f32 1.0, %v6758_v46  ;;  %v6760_v17 = vpop.eup %6759  ;;  %v12797_v46 = vld [vmem:[#allocation4_spill] sm:$0xff] }
 0x9bd   :  { %6769 = vtanh.f32 %v4997_v41  ;;  %v6762_v50 = vpop.eup %6761 }
 0x9be   :  { %6771 = vrcp.f32 %v5005_v0  ;;  %v6764_v58 = vpop.eup %6763  ;;  %v5030_v53 = vadd.f32 1.0, %v6762_v50  ;;  %v12798_v0 = vld [vmem:[#allocation5_spill] sm:$0xff]  ;;  %v12801_v50 = vld [vmem:[#allocation8_spill] sm:$0xff] }
 0x9bf   :  { %6773 = vrcp.f32 %v5017_v54  ;;  %v5029_v34 = vadd.f32 1.0, %v6764_v58  ;;  %v12799_v54 = vld [vmem:[#allocation6_spill] sm:$0xff]  ;;  %v12802_v58 = vld [vmem:[#allocation9_spill] sm:$0xff] }
 0x9c0   :  { %6775 = vrcp.f32 %v5030_v53  ;;  %v12805_v53 = vld [vmem:[#allocation12_spill] sm:$0xff] }
 0x9c5   :  { %v6766_v25 = vpop.eup %6765 }
 0x9c6   :  { %v6768_v13 = vpop.eup %6767  ;;  %v5040_v57 = vmul.f32 %v6766_v25, %v6760_v17  ;;  %v12800_v17 = vld [vmem:[#allocation7_spill] sm:$0xff]  ;;  %v12803_v25 = vld [vmem:[#allocation10_spill] sm:$0xff] }
 0x9c7   :  { %v6770_v4 = vpop.eup %6769  ;;  %v5038_v39 = vmul.f32 %v6768_v13, %v10072_v21  ;;  %v12804_v13 = vld [vmem:[#allocation11_spill] sm:$0xff] }
 0x9c8   :  { %v6772_v26 = vpop.eup %6771 }
 0x9c9   :  { %v6774_v24 = vpop.eup %6773  ;;  %v10714_v48 = vadd.f32 %v5040_v57, %v5038_v39  ;;  %v5039_v59 = vmul.f32 %v6772_v26, %v6770_v4  ;;  %v12806_v57 = vld [vmem:[#allocation13_spill] sm:$0xff]  ;;  %v12807_v4 = vld [vmem:[#allocation14_spill] sm:$0xff]  ;;  %v12808_v39 = vld [vmem:[#allocation15_spill] sm:$0xff] }
 0x9ca   :  { %v5037_v47 = vmul.f32 %v6774_v24, %v10075_v20  ;;  %v6776_v11 = vpop.eup %6775  ;;  %v12809_v26 = vld [vmem:[#allocation17_spill] sm:$0xff]  ;;  %v12810_v24 = vld [vmem:[#allocation19_spill] sm:$0xff] }
 0x9cb   :  { %6777 = vtanh.f32 %v10714_v48 }
 0x9cc   :  { %v10718_v32 = vadd.f32 %v5039_v59, %v5037_v47  ;;  %6779 = vrcp.f32 %v5029_v34  ;;  %v12811_v34 = vld [vmem:[#allocation21_spill] sm:$0xff]  ;;  %v12812_v59 = vld [vmem:[#allocation23_spill] sm:$0xff] }
 0x9cd   :  { %v12813_v47 = vld [vmem:[#allocation25_spill] sm:$0xff] }
 0x9ce   :  { %6781 = vtanh.f32 %v10718_v32 }
 0x9d5   :  { %v6778_v49 = vpop.eup %6777 }
 0x9d6   :  { %v10721_v16 = vmul.f32 %v6778_v49, %v6776_v11  ;;  %v6780_v21 = vpop.eup %6779  ;;  %v12814_v11 = vld [vmem:[#allocation27_spill] sm:$0xff]  ;;  %v12815_v49 = vld [vmem:[#allocation29_spill] sm:$0xff] }
 0x9d8   :  { %v6782_v44 = vpop.eup %6781  ;;  %v5048_v41 = vpack.c.bf16 %v10721_v16, %v10721_v16 }
 0x9d9   :  { %v10725_v10 = vmul.f32 %v6782_v44, %v6780_v21  ;;  %v12816_v21 = vld [vmem:[#allocation31_spill] sm:$0xff]  ;;  %v12817_v44 = vld [vmem:[#allocation33_spill] sm:$0xff] }
 0x9da   :  { %5081 = vmatprep.mubr.bf16.mxu1 %v5048_v41  ;;  %v12818_v41 = vld [vmem:[#allocation35_spill] sm:$0xff] }
 0x9db   :  { %v5047_v20 = vpack.c.bf16 %v10725_v10, %v10725_v10 }
 0x9dd   :  { %5082 = vmatmul.mubr.bf16.vlgmr.msra.gmra.mrb[40].mxu1 %v5047_v20  ;;  %v12819_v20 = vld [vmem:[#allocation37_spill] sm:$0xff] }
 0x9de   :  { %5134 = vmatpush1.bf16.msra.mxu1 %v12796_v63  ;;  %5165 = vmatprep.mubr.bf16.mxu1 %v10259_v8  ;;  %v12820_v63 = vld [vmem:[#allocation39_spill] sm:$0xff] }
 0x9df   :  { %5135 = vmatprep.subr.bf16.mxu1 %v12797_v46  ;;  %v12821_v46 = vld [vmem:[#allocation41_spill] sm:$0xff] }
 0x9e2   :  { %5136 = vmatpush1.bf16.msra.mxu1 %v12798_v0  ;;  %v12822_v0 = vld [vmem:[#allocation43_spill] sm:$0xff] }
 0x9e3   :  { %5137 = vmatprep.subr.bf16.mxu1 %v12799_v54  ;;  %v12823_v54 = vld [vmem:[#allocation45_spill] sm:$0xff] }
 0x9e6   :  { %5138 = vmatpush1.bf16.msra.mxu1 %v12800_v17  ;;  %v12824_v17 = vld [vmem:[#allocation47_spill] sm:$0xff] }
 0x9e7   :  { %5139 = vmatprep.subr.bf16.mxu1 %v12801_v50  ;;  %v12825_v50 = vld [vmem:[#allocation49_spill] sm:$0xff] }
 0x9ea   :  { %5140 = vmatpush1.bf16.msra.mxu1 %v12802_v58  ;;  %v12826_v58 = vld [vmem:[#allocation51_spill] sm:$0xff] }
 0x9eb   :  { %5141 = vmatprep.subr.bf16.mxu1 %v12803_v25  ;;  %v12827_v25 = vld [vmem:[#allocation53_spill] sm:$0xff] }
 0x9ee   :  { %5142 = vmatpush1.bf16.msra.mxu1 %v12804_v13  ;;  %v12828_v13 = vld [vmem:[#allocation55_spill] sm:$0xff] }
 0x9ef   :  { %5143 = vmatprep.subr.bf16.mxu1 %v12805_v53  ;;  %v12829_v53 = vld [vmem:[#allocation57_spill] sm:$0xff] }
 0x9f2   :  { %5144 = vmatpush1.bf16.msra.mxu1 %v12806_v57  ;;  %v12830_v57 = vld [vmem:[#allocation59_spill] sm:$0xff] }
 0x9f3   :  { %5145 = vmatprep.subr.bf16.mxu1 %v12807_v4  ;;  %v12831_v4 = vld [vmem:[#allocation61_spill] sm:$0xff] }
 0x9f6   :  { %5146 = vmatpush1.bf16.msra.mxu1 %v12808_v39  ;;  %v12832_v39 = vld [vmem:[#allocation63_spill] sm:$0xff] }
 0x9f7   :  { %5147 = vmatprep.subr.bf16.mxu1 %v12809_v26  ;;  %v12833_v26 = vld [vmem:[#allocation65_spill] sm:$0xff] }
 0x9fa   :  { %5148 = vmatpush1.bf16.msra.mxu1 %v12810_v24  ;;  %v12834_v24 = vld [vmem:[#allocation67_spill] sm:$0xff] }
 0x9fb   :  { %5149 = vmatprep.subr.bf16.mxu1 %v12811_v34  ;;  %v12835_v34 = vld [vmem:[#allocation69_spill] sm:$0xff] }
 0x9fe   :  { %5150 = vmatpush1.bf16.msra.mxu1 %v12812_v59  ;;  %v12836_v59 = vld [vmem:[#allocation71_spill] sm:$0xff] }
 0x9ff   :  { %5151 = vmatprep.subr.bf16.mxu1 %v12813_v47  ;;  %v12837_v47 = vld [vmem:[#allocation73_spill] sm:$0xff] }
 0xa02   :  { %5152 = vmatpush1.bf16.msra.mxu1 %v12814_v11  ;;  %v12838_v11 = vld [vmem:[#allocation75_spill] sm:$0xff] }
 0xa03   :  { %5153 = vmatprep.subr.bf16.mxu1 %v12815_v49  ;;  %v12840_v49 = vld [vmem:[#allocation79_spill] sm:$0xff] }
 0xa06   :  { %5154 = vmatpush1.bf16.msra.mxu1 %v12816_v21  ;;  %v12841_v21 = vld [vmem:[#allocation81_spill] sm:$0xff] }
 0xa07   :  { %5155 = vmatprep.subr.bf16.mxu1 %v12817_v44  ;;  %v12842_v44 = vld [vmem:[#allocation83_spill] sm:$0xff] }
 0xa0a   :  { %5156 = vmatpush1.bf16.msra.mxu1 %v12818_v41  ;;  %v12843_v41 = vld [vmem:[#allocation85_spill] sm:$0xff] }
 0xa0b   :  { %5157 = vmatprep.subr.bf16.mxu1 %v12819_v20  ;;  %v12844_v20 = vld [vmem:[#allocation87_spill] sm:$0xff] }
 0xa0e   :  { %5158 = vmatpush1.bf16.msra.mxu1 %v12820_v63  ;;  %v12845_v63 = vld [vmem:[#allocation89_spill] sm:$0xff] }
 0xa0f   :  { %5159 = vmatprep.subr.bf16.mxu1 %v12821_v46  ;;  %v12846_v46 = vld [vmem:[#allocation91_spill] sm:$0xff] }
 0xa12   :  { %5160 = vmatpush1.bf16.msra.mxu1 %v12822_v0  ;;  %v12847_v0 = vld [vmem:[#allocation93_spill] sm:$0xff] }
 0xa13   :  { %5161 = vmatprep.subr.bf16.mxu1 %v12823_v54  ;;  %v12848_v54 = vld [vmem:[#allocation95_spill] sm:$0xff] }
 0xa16   :  { %5162 = vmatpush1.bf16.msra.mxu1 %v12824_v17  ;;  %v12849_v17 = vld [vmem:[#allocation97_spill] sm:$0xff] }
 0xa17   :  { %5163 = vmatprep.subr.bf16.mxu1 %v12825_v50  ;;  %v12850_v50 = vld [vmem:[#allocation99_spill] sm:$0xff] }
 0xa1a   :  { %5164 = vmatpush1.bf16.msra.mxu1 %v12826_v58  ;;  %v12851_v58 = vld [vmem:[#allocation101_spill] sm:$0xff] }
 0xa1b   :  { %5215 = vmatprep.subr.bf16.mxu1 %v12827_v25  ;;  %v12852_v25 = vld [vmem:[#allocation103_spill] sm:$0xff] }
 0xa1d   :  { %5166 = vmatmul.mubr.bf16.vlgmr.msra.gmra.mrb[44].mxu1 %v10263_v30 }
 0xa1e   :  { %5216 = vmatpush1.bf16.msra.mxu1 %v12828_v13  ;;  %5247 = vmatprep.mubr.bf16.mxu1 %v10259_v8  ;;  %v12839_v8 = vld [vmem:[#allocation77_spill] sm:$0xff] }
 0xa1f   :  { %5217 = vmatprep.subr.bf16.mxu1 %v12829_v53  ;;  %v12853_v13 = vld [vmem:[#allocation105_spill] sm:$0xff]  ;;  %v12854_v53 = vld [vmem:[#allocation107_spill] sm:$0xff] }
 0xa22   :  { %5218 = vmatpush1.bf16.msra.mxu1 %v12830_v57  ;;  %v12855_v57 = vld [vmem:[#allocation109_spill] sm:$0xff] }
 0xa23   :  { %5219 = vmatprep.subr.bf16.mxu1 %v12831_v4  ;;  %v12856_v4 = vld [vmem:[#allocation111_spill] sm:$0xff] }
 0xa26   :  { %5220 = vmatpush1.bf16.msra.mxu1 %v12832_v39  ;;  %v12857_v39 = vld [vmem:[#allocation113_spill] sm:$0xff] }
 0xa27   :  { %5221 = vmatprep.subr.bf16.mxu1 %v12833_v26  ;;  %v12858_v26 = vld [vmem:[#allocation115_spill] sm:$0xff] }
 0xa2a   :  { %5222 = vmatpush1.bf16.msra.mxu1 %v12834_v24  ;;  %v12859_v24 = vld [vmem:[#allocation128_spill] sm:$0xff] }
 0xa2b   :  { %5223 = vmatprep.subr.bf16.mxu1 %v12835_v34  ;;  %v12860_v34 = vld [vmem:[#allocation127_spill] sm:$0xff] }
 0xa2e   :  { %5224 = vmatpush1.bf16.msra.mxu1 %v12836_v59  ;;  %v12861_v59 = vld [vmem:[#allocation132_spill] sm:$0xff] }
 0xa2f   :  { %5225 = vmatprep.subr.bf16.mxu1 %v12837_v47  ;;  %v12862_v47 = vld [vmem:[#allocation131_spill] sm:$0xff] }
 0xa32   :  { %5226 = vmatpush1.bf16.msra.mxu1 %v12838_v11  ;;  %v12863_v11 = vld [vmem:[#allocation136_spill] sm:$0xff] }
 0xa33   :  { %5227 = vmatprep.subr.bf16.mxu1 %v12839_v8  ;;  %v12864_v8 = vld [vmem:[#allocation135_spill] sm:$0xff] }
 0xa36   :  { %5228 = vmatpush1.bf16.msra.mxu1 %v12840_v49  ;;  %v12865_v49 = vld [vmem:[#allocation138_spill] sm:$0xff] }
 0xa37   :  { %5229 = vmatprep.subr.bf16.mxu1 %v12841_v21  ;;  %v12866_v21 = vld [vmem:[#allocation140_spill] sm:$0xff] }
 0xa3a   :  { %5230 = vmatpush1.bf16.msra.mxu1 %v12842_v44  ;;  %v12867_v44 = vld [vmem:[#allocation142_spill] sm:$0xff] }
 0xa3b   :  { %5231 = vmatprep.subr.bf16.mxu1 %v12843_v41  ;;  %v12868_v41 = vld [vmem:[#allocation144_spill] sm:$0xff] }
 0xa3e   :  { %5232 = vmatpush1.bf16.msra.mxu1 %v12844_v20  ;;  %v12869_v20 = vld [vmem:[#allocation146_spill] sm:$0xff] }
 0xa3f   :  { %5233 = vmatprep.subr.bf16.mxu1 %v12845_v63  ;;  %v12871_v63 = vld [vmem:[#allocation150_spill] sm:$0xff] }
 0xa42   :  { %5234 = vmatpush1.bf16.msra.mxu1 %v12846_v46  ;;  %v12872_v46 = vld [vmem:[#allocation152_spill] sm:$0xff] }
 0xa43   :  { %5235 = vmatprep.subr.bf16.mxu1 %v12847_v0  ;;  %v12873_v0 = vld [vmem:[#allocation154_spill] sm:$0xff] }
 0xa46   :  { %5236 = vmatpush1.bf16.msra.mxu1 %v12848_v54  ;;  %v12874_v54 = vld [vmem:[#allocation156_spill] sm:$0xff] }
 0xa47   :  { %5237 = vmatprep.subr.bf16.mxu1 %v12849_v17  ;;  %v12875_v17 = vld [vmem:[#allocation158_spill] sm:$0xff] }
 0xa4a   :  { %5238 = vmatpush1.bf16.msra.mxu1 %v12850_v50  ;;  %v12876_v50 = vld [vmem:[#allocation160_spill] sm:$0xff] }
 0xa4b   :  { %5239 = vmatprep.subr.bf16.mxu1 %v12851_v58  ;;  %v12877_v58 = vld [vmem:[#allocation162_spill] sm:$0xff] }
 0xa4e   :  { %5240 = vmatpush1.bf16.msra.mxu1 %v12852_v25  ;;  %v12878_v25 = vld [vmem:[#allocation164_spill] sm:$0xff] }
 0xa4f   :  { %5241 = vmatprep.subr.bf16.mxu1 %v12853_v13  ;;  %v12879_v13 = vld [vmem:[#allocation166_spill] sm:$0xff] }
 0xa52   :  { %5242 = vmatpush1.bf16.msra.mxu1 %v12854_v53  ;;  %v12880_v53 = vld [vmem:[#allocation168_spill] sm:$0xff] }
 0xa53   :  { %5243 = vmatprep.subr.bf16.mxu1 %v12855_v57  ;;  %v12881_v57 = vld [vmem:[#allocation170_spill] sm:$0xff] }
 0xa56   :  { %5244 = vmatpush1.bf16.msra.mxu1 %v12856_v4  ;;  %v12882_v4 = vld [vmem:[#allocation172_spill] sm:$0xff] }
 0xa57   :  { %5245 = vmatprep.subr.bf16.mxu1 %v12857_v39  ;;  %v12883_v39 = vld [vmem:[#allocation174_spill] sm:$0xff] }
 0xa5a   :  { %5246 = vmatpush1.bf16.msra.mxu1 %v12858_v26  ;;  %v12884_v26 = vld [vmem:[#allocation176_spill] sm:$0xff] }
 0xa5b   :  { %5512 = vmatprep.subr.bf16.mxu1 %v12859_v24  ;;  %v12885_v24 = vld [vmem:[#allocation178_spill] sm:$0xff] }
 0xa5d   :  { %5248 = vmatmul.mubr.bf16.vlgmr.msra.gmra.mrb[48].mxu1 %v10263_v30  ;;  %v12870_v30 = vld [vmem:[#allocation148_spill] sm:$0xff] }
 0xa5e   :  { %5513 = vmatpush1.bf16.msra.mxu1 %v12860_v34  ;;  %v12886_v34 = vld [vmem:[#allocation180_spill] sm:$0xff] }
 0xa5f   :  { %5514 = vmatprep.subr.bf16.mxu1 %v12861_v59  ;;  %v12887_v59 = vld [vmem:[#allocation182_spill] sm:$0xff] }
 0xa62   :  { %5515 = vmatpush1.bf16.msra.mxu1 %v12862_v47  ;;  %v12888_v47 = vld [vmem:[#allocation184_spill] sm:$0xff] }
 0xa63   :  { %5516 = vmatprep.subr.bf16.mxu1 %v12863_v11  ;;  %v12889_v11 = vld [vmem:[#allocation186_spill] sm:$0xff] }
 0xa66   :  { %5517 = vmatpush1.bf16.msra.mxu1 %v12864_v8  ;;  %v12890_v8 = vld [vmem:[#allocation188_spill] sm:$0xff] }
 0xa67   :  { %5518 = vmatprep.subr.bf16.mxu1 %v12865_v49  ;;  %v12891_v49 = vld [vmem:[#allocation190_spill] sm:$0xff] }
 0xa6a   :  { %5519 = vmatpush1.bf16.msra.mxu1 %v12866_v21 }
 0xa6b   :  { %5520 = vmatprep.subr.bf16.mxu1 %v12867_v44 }
 0xa6e   :  { %5521 = vmatpush1.bf16.msra.mxu1 %v12868_v41 }
 0xa6f   :  { %5522 = vmatprep.subr.bf16.mxu1 %v12869_v20 }
 0xa72   :  { %5523 = vmatpush1.bf16.msra.mxu1 %v12870_v30 }
 0xa73   :  { %5524 = vmatprep.subr.bf16.mxu1 %v12871_v63  ;;  %v6867_v63 = vld [vmem:[%s11228_s7] ss:$0 sm:$0xff] }
 0xa76   :  { %5525 = vmatpush1.bf16.msra.mxu1 %v12872_v46 }
 0xa77   :  { %5526 = vmatprep.subr.bf16.mxu1 %v12873_v0 }
 0xa7a   :  { %5527 = vmatpush1.bf16.msra.mxu1 %v12874_v54 }
 0xa7b   :  { %5528 = vmatprep.subr.bf16.mxu1 %v12875_v17 }
 0xa7e   :  { %5529 = vmatpush1.bf16.msra.mxu1 %v12876_v50 }
 0xa7f   :  { %5530 = vmatprep.subr.bf16.mxu1 %v12877_v58 }
 0xa82   :  { %5531 = vmatpush1.bf16.msra.mxu1 %v12878_v25  ;;  %v5264_v25 = vrot.slane %v10697_v56, 4 }
 0xa83   :  { %5532 = vmatprep.subr.bf16.mxu1 %v12879_v13  ;;  %v5265_v13 = vrot.slane %v10699_v1, 4 }
 0xa86   :  { %5533 = vmatpush1.bf16.msra.mxu1 %v12880_v53 }
 0xa87   :  { %5534 = vmatprep.subr.bf16.mxu1 %v12881_v57  ;;  %v12892_v57 = vld [vmem:[#allocation117_spill] sm:$0xff] }
 0xa8a   :  { %5535 = vmatpush1.bf16.msra.mxu1 %v12882_v4  ;;  %v10838_v4 = vadd.f32 %v5264_v25, %v12892_v57  ;;  %v5269_v25 = vrot.slane %v10703_v28, 4 }
 0xa8b   :  { %5536 = vmatprep.subr.bf16.mxu1 %v12883_v39  ;;  %v12893_v39 = vld [vmem:[#allocation118_spill] sm:$0xff] }
 0xa8c   :  { %v5289_v1 = vsel %vm5288_vm2, %v10838_v4, 0.0 }
 0xa8e   :  { %5537 = vmatpush1.bf16.msra.mxu1 %v12884_v26  ;;  %v10841_v26 = vadd.f32 %v5265_v13, %v12893_v39 }
 0xa8f   :  { %5538 = vmatprep.subr.bf16.mxu1 %v12885_v24  ;;  %v12894_v24 = vld [vmem:[#allocation119_spill] sm:$0xff] }
 0xa90   :  { %v5308_v56 = vmul.f32 %v10841_v26, %v10841_v26 }
 0xa92   :  { %5539 = vmatpush1.bf16.msra.mxu1 %v12886_v34 }
 0xa93   :  { %5540 = vmatprep.subr.bf16.mxu1 %v12887_v59 }
 0xa96   :  { %5541 = vmatpush1.bf16.msra.mxu1 %v12888_v47  ;;  %v5307_v47 = vmul.f32 %v10838_v4, %v10838_v4 }
 0xa97   :  { %5542 = vmatprep.subr.bf16.mxu1 %v12889_v11  ;;  %v5290_v11 = vsel %vm5288_vm2, %v10841_v26, 0.0 }
 0xa9a   :  { %5543 = vmatpush1.bf16.msra.mxu1 %v12890_v8 }
 0xa9b   :  { %5553 = vmatprep.subr.bf16.mxu1 %v12891_v49  ;;  %v12895_v49 = vld [vmem:[#allocation120_spill] sm:$0xff] }
 0xab0   :  { %v6527_v21 = vpop.f32.mrb[40].mxu1 }
 0xab1   :  { %v6528_v44 = vpop.f32.mrb[41].mxu1 }
 0xab2   :  { %v6529_v41 = vadd.f32 %v6528_v44, %v6527_v21  ;;  %v6530_v20 = vpop.f32.mrb[42].mxu1  ;;  %v5315_v44 = vsel %vm5288_vm2, %v5307_v47, 0.0 }
 0xab3   :  { %v6531_v30 = vpop.f32.mrb[43].mxu1  ;;  %v5268_v20 = vrot.slane %v10701_v2, 4 }
 0xab4   :  { %v5084_v46 = vadd.f32 %v6867_v63, %v6529_v41  ;;  %v5316_v41 = vsel %vm5288_vm2, %v5308_v56, 0.0  ;;  %v5291_v63 = vadd.f32 %v5290_v11, %v5289_v1 }
 0xab6   :  { %v5089_v0 = vmax.f32 %v5084_v46, 0.0 }
 0xab8   :  { %6475 = vst [vmem:[%s11229_s8 + $0x2] sm:$0x3] %v5089_v0 }
 0xaf0   :  { %v5167_v54 = vpop.f32.mrb[44].mxu1 }
 0xaf1   :  { %v5169_v17 = vpop.f32.mrb[45].mxu1  ;;  %v5266_v53 = vrot.slane %v5167_v54, 4  ;;  %v5317_v54 = vadd.f32 %v5316_v41, %v5315_v44 }
 0xaf2   :  { %v5171_v50 = vpop.f32.mrb[46].mxu1  ;;  %v5267_v59 = vrot.slane %v5169_v17, 4 }
 0xaf3   :  { %v5172_v58 = vpop.f32.mrb[47].mxu1  ;;  %v10844_v34 = vadd.f32 %v5266_v53, %v12894_v24  ;;  %v12896_v50 = vld [vmem:[#allocation121_spill] sm:$0xff]  ;;  %v12897_v24 = vld [vmem:[#allocation122_spill] sm:$0xff] }
 0xaf4   :  { %v10857_v21 = vadd.f32 %v5267_v59, %v12895_v49  ;;  %v10868_v58 = vadd.f32 %v5268_v20, %v12896_v50  ;;  %v5285_v59 = vadd.f32 %v5269_v25, %v12897_v24 }
 0xaf5   :  { %v5309_v8 = vmul.f32 %v10844_v34, %v10844_v34  ;;  %v5292_v30 = vsel %vm5288_vm2, %v10844_v34, 0.0 }
 0xaf6   :  { %v5310_v0 = vmul.f32 %v10857_v21, %v10857_v21  ;;  %v5293_v17 = vadd.f32 %v5292_v30, %v5291_v63  ;;  %v5294_v13 = vsel %vm5288_vm2, %v10857_v21, 0.0  ;;  %v5311_v39 = vmul.f32 %v10868_v58, %v10868_v58  ;;  %v12898_v63 = vld [vmem:[#allocation123_spill] sm:$0xff] }
 0xaf7   :  { %v5318_v46 = vsel %vm5288_vm2, %v5309_v8, 0.0  ;;  %v5296_v56 = vsel %vm5288_vm2, %v10868_v58, 0.0  ;;  %v5312_v8 = vmul.f32 %v5285_v59, %v5285_v59 }
 0xaf8   :  { %v5319_v2 = vadd.f32 %v5318_v46, %v5317_v54  ;;  %v5320_v53 = vsel %vm5288_vm2, %v5310_v0, 0.0  ;;  %v5295_v57 = vadd.f32 %v5294_v13, %v5293_v17  ;;  %v5322_v44 = vsel %vm5288_vm2, %v5311_v39, 0.0  ;;  %v12899_v17 = vld [vmem:[#allocation124_spill] sm:$0xff] }
 0xaf9   :  { %v5298_v54 = vsel %vm5288_vm2, %v5285_v59, 0.0 }
 0xafa   :  { %v5321_v47 = vadd.f32 %v5320_v53, %v5319_v2  ;;  %v5297_v11 = vadd.f32 %v5296_v56, %v5295_v57  ;;  %v5324_v53 = vsel %vm5288_vm2, %v5312_v8, 0.0 }
 0xafc   :  { %v5323_v30 = vadd.f32 %v5322_v44, %v5321_v47  ;;  %v5299_v25 = vadd.f32 %v5298_v54, %v5297_v11 }
 0xafe   :  { %v5325_v56 = vadd.f32 %v5324_v53, %v5323_v30 }
 0xb30   :  { %v5249_v1 = vpop.f32.mrb[48].mxu1 }
 0xb31   :  { %v5270_v28 = vrot.slane %v5249_v1, 4  ;;  %v5251_v49 = vpop.f32.mrb[49].mxu1 }
 0xb32   :  { %v5271_v41 = vrot.slane %v5251_v49, 4  ;;  %v5253_v20 = vpop.f32.mrb[50].mxu1 }
 0xb33   :  { %v5286_v46 = vadd.f32 %v5270_v28, %v12898_v63  ;;  %v5254_v0 = vpop.f32.mrb[51].mxu1 }
 0xb34   :  { %v5287_v50 = vadd.f32 %v5271_v41, %v12899_v17 }
 0xb35   :  { %v5300_v13 = vsel %vm5288_vm2, %v5286_v46, 0.0  ;;  %v5313_v2 = vmul.f32 %v5286_v46, %v5286_v46 }
 0xb36   :  { %v5301_v57 = vadd.f32 %v5300_v13, %v5299_v25  ;;  %v5302_v24 = vsel %vm5288_vm2, %v5287_v50, 0.0  ;;  %v5314_v39 = vmul.f32 %v5287_v50, %v5287_v50 }
 0xb37   :  { %v5326_v47 = vsel %vm5288_vm2, %v5313_v2, 0.0 }
 0xb38   :  { %v5303_v1 = vadd.f32 %v5302_v24, %v5301_v57  ;;  %v5327_v28 = vadd.f32 %v5326_v47, %v5325_v56  ;;  %v5328_v49 = vsel %vm5288_vm2, %v5314_v39, 0.0 }
 0xb3a   :  { %5304 = vadd.xlane.f32.xlu0 %v5303_v1  ;;  %v5329_v44 = vadd.f32 %v5328_v49, %v5327_v28 }
 0xb3c   :  { %5330 = vadd.xlane.f32.xlu1 %v5329_v44 }
 0xbc7   :  { %v5305_v11 = vpop.xlane.xlu0 %5304 }
 0xbc8   :  { %v5306_v41 = vmul.f32 0.0009765625, %v5305_v11 }
 0xbc9   :  { %v5331_v20 = vpop.xlane.xlu1 %5330 }
 0xbca   :  { %v5332_v63 = vmul.f32 0.0009765625, %v5331_v20  ;;  %v5333_v0 = vmul.f32 %v5306_v41, %v5306_v41  ;;  %v5337_v30 = vsub.f32 %v10841_v26, %v5306_v41  ;;  %v5339_v25 = vsub.f32 %v10857_v21, %v5306_v41 }
 0xbcb   :  { %v5336_v2 = vsub.f32 %v10838_v4, %v5306_v41  ;;  %v5338_v53 = vsub.f32 %v10844_v34, %v5306_v41  ;;  %v5341_v44 = vsub.f32 %v5285_v59, %v5306_v41  ;;  %v5340_v26 = vsub.f32 %v10868_v58, %v5306_v41 }
 0xbcc   :  { %v5334_v8 = vsub.f32 %v5332_v63, %v5333_v0  ;;  %v5343_v21 = vsub.f32 %v5287_v50, %v5306_v41  ;;  %v5342_v0 = vsub.f32 %v5286_v46, %v5306_v41 }
 0xbce   :  { %v5335_v54 = vmax.f32 %v5334_v8, 0.0 }
 0xbd0   :  { %v5344_v17 = vadd.f32 1e-05, %v5335_v54 }
 0xbd2   :  { %6783 = vrsqrt.f32 %v5344_v17 }
 0xbdc   :  { %v6784_v13 = vpop.eup %6783 }
 0xbdd   :  { %v5347_v57 = vmul.f32 %v6784_v13, %v5337_v30  ;;  %v5349_v24 = vmul.f32 %v6784_v13, %v5339_v25  ;;  %v5346_v39 = vmul.f32 %v6784_v13, %v5336_v2  ;;  %v5348_v56 = vmul.f32 %v6784_v13, %v5338_v53 }
 0xbde   :  { %v5351_v11 = vmul.f32 %v6784_v13, %v5341_v44  ;;  %v5350_v20 = vmul.f32 %v6784_v13, %v5340_v26  ;;  %v5353_v4 = vmul.f32 %v6784_v13, %v5343_v21  ;;  %v5352_v30 = vmul.f32 %v6784_v13, %v5342_v0 }
 0xbdf   :  { %v6477_v47 = vmul.f32 -1.442695, %v5347_v57  ;;  %v6479_v1 = vmul.f32 -1.442695, %v5349_v24  ;;  %v6476_v28 = vmul.f32 -1.442695, %v5346_v39 }
 0xbe0   :  { %v6478_v49 = vmul.f32 -1.442695, %v5348_v56  ;;  %v6481_v34 = vmul.f32 -1.442695, %v5351_v11  ;;  %v6480_v63 = vmul.f32 -1.442695, %v5350_v20 }
 0xbe1   :  { %6785 = vpow2.f32 %v6477_v47  ;;  %v5395_v24 = vrot.slane %v10252_v23, 6 }
 0xbe2   :  { %6787 = vpow2.f32 %v6479_v1 }
 0xbe3   :  { %6789 = vpow2.f32 %v6476_v28 }
 0xbe4   :  { %6791 = vpow2.f32 %v6478_v49  ;;  %v5394_v49 = vrot.slane %v10255_v61, 6 }
 0xbe5   :  { %6793 = vtanh.f32 %v5353_v4 }
 0xbe6   :  { %6795 = vpow2.f32 %v6481_v34 }
 0xbe7   :  { %6797 = vpow2.f32 %v6480_v63 }
 0xbeb   :  { %v6786_v8 = vpop.eup %6785 }
 0xbec   :  { %v6788_v54 = vpop.eup %6787  ;;  %v5361_v17 = vadd.f32 1.0, %v6786_v8  ;;  %v5411_v8 = vrot.slane %v10721_v16, 4  ;;  %v12921_v16 = vld [vmem:[#allocation227_spill] sm:$0xff] }
 0xbed   :  { %v5373_v25 = vadd.f32 1.0, %v6788_v54  ;;  %v6790_v59 = vpop.eup %6789 }
 0xbee   :  { %6799 = vrcp.f32 %v5361_v17  ;;  %v6792_v58 = vpop.eup %6791  ;;  %v5360_v2 = vadd.f32 1.0, %v6790_v59  ;;  %v5417_v59 = vpack.c.bf16 %v5411_v8, %v5411_v8  ;;  %v12942_v8 = vld [vmem:[#allocation248_spill] sm:$0xff] }
 0xbef   :  { %6801 = vrcp.f32 %v5373_v25  ;;  %v5372_v50 = vadd.f32 1.0, %v6792_v58  ;;  %v6794_v53 = vpop.eup %6793 }
 0xbf0   :  { %6803 = vtanh.f32 %v5352_v30  ;;  %v6796_v57 = vpop.eup %6795 }
 0xbf1   :  { %6805 = vrcp.f32 %v5360_v2  ;;  %v6798_v46 = vpop.eup %6797  ;;  %v5385_v56 = vadd.f32 1.0, %v6796_v57  ;;  %v10904_v2 = vrot.slane %v5417_v59, 2  ;;  %v12924_v57 = vld [vmem:[#allocation230_spill] sm:$0xff] }
 0xbf2   :  { %6807 = vrcp.f32 %v5372_v50  ;;  %v5384_v11 = vadd.f32 1.0, %v6798_v46  ;;  %v12922_v50 = vld [vmem:[#allocation228_spill] sm:$0xff]  ;;  %v12925_v46 = vld [vmem:[#allocation231_spill] sm:$0xff]  ;;  %v12948_v59 = vld [vmem:[#allocation254_spill] sm:$0xff] }
 0xbf3   :  { %6809 = vrcp.f32 %v5385_v56  ;;  %v12929_v56 = vld [vmem:[#allocation235_spill] sm:$0xff] }
 0xbf8   :  { %v6800_v41 = vpop.eup %6799 }
 0xbf9   :  { %v6802_v39 = vpop.eup %6801  ;;  %v5401_v13 = vmul.f32 %v6800_v41, %v6794_v53  ;;  %v12923_v53 = vld [vmem:[#allocation229_spill] sm:$0xff]  ;;  %v12926_v41 = vld [vmem:[#allocation232_spill] sm:$0xff] }
 0xbfa   :  { %v6804_v47 = vpop.eup %6803  ;;  %v5399_v1 = vmul.f32 %v6802_v39, %v5395_v24  ;;  %v12927_v24 = vld [vmem:[#allocation233_spill] sm:$0xff]  ;;  %v12928_v39 = vld [vmem:[#allocation234_spill] sm:$0xff] }
 0xbfb   :  { %v6806_v28 = vpop.eup %6805 }
 0xbfc   :  { %v6808_v44 = vpop.eup %6807  ;;  %v5403_v26 = vadd.f32 %v5401_v13, %v5399_v1  ;;  %v5400_v21 = vmul.f32 %v6806_v28, %v6804_v47  ;;  %v12930_v13 = vld [vmem:[#allocation236_spill] sm:$0xff]  ;;  %v12931_v47 = vld [vmem:[#allocation237_spill] sm:$0xff]  ;;  %v12932_v1 = vld [vmem:[#allocation238_spill] sm:$0xff] }
 0xbfd   :  { %v5398_v20 = vmul.f32 %v6808_v44, %v5394_v49  ;;  %v6810_v34 = vpop.eup %6809  ;;  %v12933_v28 = vld [vmem:[#allocation239_spill] sm:$0xff]  ;;  %v12934_v49 = vld [vmem:[#allocation240_spill] sm:$0xff]  ;;  %v5410_v44 = vrot.slane %v10725_v10, 4  ;;  %v12943_v10 = vld [vmem:[#allocation249_spill] sm:$0xff] }
 0xbfe   :  { %6811 = vtanh.f32 %v5403_v26  ;;  %v12935_v26 = vld [vmem:[#allocation241_spill] sm:$0xff] }
 0xbff   :  { %v5402_v4 = vadd.f32 %v5400_v21, %v5398_v20  ;;  %6813 = vrcp.f32 %v5384_v11  ;;  %v12936_v11 = vld [vmem:[#allocation242_spill] sm:$0xff]  ;;  %v12937_v21 = vld [vmem:[#allocation243_spill] sm:$0xff]  ;;  %v12938_v20 = vld [vmem:[#allocation244_spill] sm:$0xff] }
 0xc01   :  { %6815 = vtanh.f32 %v5402_v4  ;;  %v5416_v4 = vpack.c.bf16 %v5410_v44, %v5410_v44  ;;  %v12985_v44 = vld [vmem:[#allocation291_spill] sm:$0xff] }
 0xc08   :  { %v6812_v23 = vpop.eup %6811 }
 0xc09   :  { %v5407_v63 = vmul.f32 %v6812_v23, %v6810_v34  ;;  %v6814_v0 = vpop.eup %6813  ;;  %v12939_v34 = vld [vmem:[#allocation245_spill] sm:$0xff]  ;;  %v12940_v23 = vld [vmem:[#allocation246_spill] sm:$0xff] }
 0xc0b   :  { %v6816_v54 = vpop.eup %6815  ;;  %v5415_v17 = vpack.c.bf16 %v5407_v63, %v5407_v63  ;;  %v10971_v63 = vrot.slane %v5416_v4, 2  ;;  %v12990_v4 = vld [vmem:[#allocation296_spill] sm:$0xff] }
 0xc0c   :  { %v5406_v30 = vmul.f32 %v6816_v54, %v6814_v0  ;;  %v12941_v0 = vld [vmem:[#allocation247_spill] sm:$0xff]  ;;  %v12944_v54 = vld [vmem:[#allocation250_spill] sm:$0xff] }
 0xc0d   :  { %v10896_v61 = vrot.slane %v5415_v17, 2  ;;  %v12945_v17 = vld [vmem:[#allocation251_spill] sm:$0xff] }
 0xc0e   :  { %v5414_v25 = vpack.c.bf16 %v5406_v30, %v5406_v30  ;;  %v12946_v30 = vld [vmem:[#allocation252_spill] sm:$0xff] }
 0xc0f   :  { %5462 = vmatprep.mubr.bf16.mxu0 %v10896_v61  ;;  %5544 = vmatprep.mubr.bf16.mxu1 %v10896_v61 }
 0xc10   :  { %v10900_v58 = vrot.slane %v5414_v25, 2  ;;  %v12947_v25 = vld [vmem:[#allocation253_spill] sm:$0xff] }
 0xc12   :  { %5463 = vmatmul.mubr.bf16.vlgmr.msra.gmra.mrb[52].mxu0 %v10900_v58  ;;  %5545 = vmatmul.mubr.bf16.vlgmr.msra.gmra.mrb[52].mxu1 %v10900_v58 }
 0xc13   :  { %5472 = vmatpush1.bf16.msra.mxu0 %v8623_v40  ;;  %5554 = vmatpush1.bf16.msra.mxu1 %v8625_v15  ;;  %v12900_v40 = vld [vmem:[#allocation206_spill] sm:$0xff]  ;;  %v12901_v15 = vld [vmem:[#allocation207_spill] sm:$0xff] }
 0xc14   :  { %5503 = vmatprep.mubr.bf16.mxu0 %v10904_v2  ;;  %5585 = vmatprep.mubr.bf16.mxu1 %v10904_v2 }
 0xc15   :  { %5473 = vmatprep.subr.bf16.mxu0 %v8663_v19  ;;  %5555 = vmatprep.subr.bf16.mxu1 %v8665_v35  ;;  %v12902_v19 = vld [vmem:[#allocation208_spill] sm:$0xff]  ;;  %v12903_v35 = vld [vmem:[#allocation209_spill] sm:$0xff] }
 0xc17   :  { %5474 = vmatpush1.bf16.msra.mxu0 %v8683_v33  ;;  %5556 = vmatpush1.bf16.msra.mxu1 %v8685_v5  ;;  %v12904_v33 = vld [vmem:[#allocation210_spill] sm:$0xff]  ;;  %v12905_v5 = vld [vmem:[#allocation211_spill] sm:$0xff] }
 0xc18   :  { %5475 = vmatprep.subr.bf16.mxu0 %v12530_v9  ;;  %5557 = vmatprep.subr.bf16.mxu1 %v12531_v38  ;;  %v12906_v9 = vld [vmem:[#allocation212_spill] sm:$0xff]  ;;  %v12907_v38 = vld [vmem:[#allocation213_spill] sm:$0xff] }
 0xc1b   :  { %5476 = vmatpush1.bf16.msra.mxu0 %v12532_v31  ;;  %5558 = vmatpush1.bf16.msra.mxu1 %v12533_v6  ;;  %v12908_v31 = vld [vmem:[#allocation214_spill] sm:$0xff]  ;;  %v12909_v6 = vld [vmem:[#allocation215_spill] sm:$0xff] }
 0xc1c   :  { %5477 = vmatprep.subr.bf16.mxu0 %v12534_v62  ;;  %5559 = vmatprep.subr.bf16.mxu1 %v12535_v29  ;;  %v12910_v62 = vld [vmem:[#allocation216_spill] sm:$0xff]  ;;  %v12911_v29 = vld [vmem:[#allocation217_spill] sm:$0xff] }
 0xc1f   :  { %5478 = vmatpush1.bf16.msra.mxu0 %v12536_v42  ;;  %5560 = vmatpush1.bf16.msra.mxu1 %v12537_v51  ;;  %v12912_v42 = vld [vmem:[#allocation218_spill] sm:$0xff]  ;;  %v12913_v51 = vld [vmem:[#allocation219_spill] sm:$0xff] }
 0xc20   :  { %5479 = vmatprep.subr.bf16.mxu0 %v12538_v18  ;;  %5561 = vmatprep.subr.bf16.mxu1 %v12539_v22  ;;  %v12914_v18 = vld [vmem:[#allocation220_spill] sm:$0xff]  ;;  %v12915_v22 = vld [vmem:[#allocation221_spill] sm:$0xff] }
 0xc23   :  { %5480 = vmatpush1.bf16.msra.mxu0 %v12540_v3  ;;  %5562 = vmatpush1.bf16.msra.mxu1 %v12541_v55  ;;  %v12916_v3 = vld [vmem:[#allocation222_spill] sm:$0xff]  ;;  %v12917_v55 = vld [vmem:[#allocation223_spill] sm:$0xff] }
 0xc24   :  { %5481 = vmatprep.subr.bf16.mxu0 %v12542_v12  ;;  %5563 = vmatprep.subr.bf16.mxu1 %v12543_v27  ;;  %v12918_v12 = vld [vmem:[#allocation224_spill] sm:$0xff]  ;;  %v12919_v27 = vld [vmem:[#allocation225_spill] sm:$0xff] }
 0xc27   :  { %5482 = vmatpush1.bf16.msra.mxu0 %v12544_v36  ;;  %5564 = vmatpush1.bf16.msra.mxu1 %v12900_v40  ;;  %v12920_v36 = vld [vmem:[#allocation226_spill] sm:$0xff]  ;;  %v12949_v40 = vld [vmem:[#allocation255_spill] sm:$0xff] }
 0xc28   :  { %5483 = vmatprep.subr.bf16.mxu0 %v12901_v15  ;;  %5565 = vmatprep.subr.bf16.mxu1 %v12902_v19  ;;  %v12950_v15 = vld [vmem:[#allocation256_spill] sm:$0xff]  ;;  %v12951_v19 = vld [vmem:[#allocation257_spill] sm:$0xff] }
 0xc2b   :  { %5484 = vmatpush1.bf16.msra.mxu0 %v12903_v35  ;;  %5566 = vmatpush1.bf16.msra.mxu1 %v12904_v33  ;;  %v12952_v35 = vld [vmem:[#allocation258_spill] sm:$0xff]  ;;  %v12953_v33 = vld [vmem:[#allocation259_spill] sm:$0xff] }
 0xc2c   :  { %5485 = vmatprep.subr.bf16.mxu0 %v12905_v5  ;;  %5567 = vmatprep.subr.bf16.mxu1 %v12906_v9  ;;  %v12954_v5 = vld [vmem:[#allocation260_spill] sm:$0xff]  ;;  %v12956_v9 = vld [vmem:[#allocation262_spill] sm:$0xff] }
 0xc2f   :  { %5486 = vmatpush1.bf16.msra.mxu0 %v12907_v38  ;;  %5568 = vmatpush1.bf16.msra.mxu1 %v12908_v31  ;;  %v12957_v38 = vld [vmem:[#allocation263_spill] sm:$0xff]  ;;  %v12958_v31 = vld [vmem:[#allocation264_spill] sm:$0xff] }
 0xc30   :  { %5487 = vmatprep.subr.bf16.mxu0 %v12909_v6  ;;  %5569 = vmatprep.subr.bf16.mxu1 %v12910_v62  ;;  %v12959_v6 = vld [vmem:[#allocation265_spill] sm:$0xff]  ;;  %v12960_v62 = vld [vmem:[#allocation266_spill] sm:$0xff] }
 0xc33   :  { %5488 = vmatpush1.bf16.msra.mxu0 %v12911_v29  ;;  %5570 = vmatpush1.bf16.msra.mxu1 %v12912_v42  ;;  %v12961_v29 = vld [vmem:[#allocation267_spill] sm:$0xff]  ;;  %v12962_v42 = vld [vmem:[#allocation268_spill] sm:$0xff] }
 0xc34   :  { %5489 = vmatprep.subr.bf16.mxu0 %v12913_v51  ;;  %5571 = vmatprep.subr.bf16.mxu1 %v12914_v18  ;;  %v12963_v51 = vld [vmem:[#allocation269_spill] sm:$0xff]  ;;  %v12964_v18 = vld [vmem:[#allocation270_spill] sm:$0xff] }
 0xc37   :  { %5490 = vmatpush1.bf16.msra.mxu0 %v12915_v22  ;;  %5572 = vmatpush1.bf16.msra.mxu1 %v12916_v3  ;;  %v12965_v22 = vld [vmem:[#allocation271_spill] sm:$0xff]  ;;  %v12966_v3 = vld [vmem:[#allocation272_spill] sm:$0xff] }
 0xc38   :  { %5491 = vmatprep.subr.bf16.mxu0 %v12917_v55  ;;  %5573 = vmatprep.subr.bf16.mxu1 %v12918_v12  ;;  %v12967_v55 = vld [vmem:[#allocation273_spill] sm:$0xff]  ;;  %v12968_v12 = vld [vmem:[#allocation274_spill] sm:$0xff] }
 0xc3b   :  { %5492 = vmatpush1.bf16.msra.mxu0 %v12919_v27  ;;  %5574 = vmatpush1.bf16.msra.mxu1 %v12920_v36  ;;  %v12969_v27 = vld [vmem:[#allocation275_spill] sm:$0xff]  ;;  %v12970_v36 = vld [vmem:[#allocation276_spill] sm:$0xff] }
 0xc3c   :  { %5493 = vmatprep.subr.bf16.mxu0 %v12921_v16  ;;  %5575 = vmatprep.subr.bf16.mxu1 %v12922_v50  ;;  %v12971_v16 = vld [vmem:[#allocation277_spill] sm:$0xff]  ;;  %v12972_v50 = vld [vmem:[#allocation278_spill] sm:$0xff] }
 0xc3f   :  { %5494 = vmatpush1.bf16.msra.mxu0 %v12923_v53  ;;  %5576 = vmatpush1.bf16.msra.mxu1 %v12924_v57  ;;  %v12973_v53 = vld [vmem:[#allocation279_spill] sm:$0xff]  ;;  %v12974_v57 = vld [vmem:[#allocation280_spill] sm:$0xff] }
 0xc40   :  { %5495 = vmatprep.subr.bf16.mxu0 %v12925_v46  ;;  %5577 = vmatprep.subr.bf16.mxu1 %v12926_v41  ;;  %v12975_v46 = vld [vmem:[#allocation281_spill] sm:$0xff]  ;;  %v12976_v41 = vld [vmem:[#allocation282_spill] sm:$0xff] }
 0xc43   :  { %5496 = vmatpush1.bf16.msra.mxu0 %v12927_v24  ;;  %5578 = vmatpush1.bf16.msra.mxu1 %v12928_v39  ;;  %v12977_v24 = vld [vmem:[#allocation283_spill] sm:$0xff]  ;;  %v12978_v39 = vld [vmem:[#allocation284_spill] sm:$0xff] }
 0xc44   :  { %5497 = vmatprep.subr.bf16.mxu0 %v12929_v56  ;;  %5579 = vmatprep.subr.bf16.mxu1 %v12930_v13  ;;  %v12979_v56 = vld [vmem:[#allocation285_spill] sm:$0xff]  ;;  %v12980_v13 = vld [vmem:[#allocation286_spill] sm:$0xff] }
 0xc47   :  { %5498 = vmatpush1.bf16.msra.mxu0 %v12931_v47  ;;  %5580 = vmatpush1.bf16.msra.mxu1 %v12932_v1  ;;  %v12981_v47 = vld [vmem:[#allocation287_spill] sm:$0xff]  ;;  %v12982_v1 = vld [vmem:[#allocation288_spill] sm:$0xff] }
 0xc48   :  { %5499 = vmatprep.subr.bf16.mxu0 %v12933_v28  ;;  %5581 = vmatprep.subr.bf16.mxu1 %v12934_v49  ;;  %v12983_v28 = vld [vmem:[#allocation289_spill] sm:$0xff]  ;;  %v12984_v49 = vld [vmem:[#allocation290_spill] sm:$0xff] }
 0xc4b   :  { %5500 = vmatpush1.bf16.msra.mxu0 %v12935_v26  ;;  %5582 = vmatpush1.bf16.msra.mxu1 %v12936_v11  ;;  %v12986_v26 = vld [vmem:[#allocation292_spill] sm:$0xff]  ;;  %v12987_v11 = vld [vmem:[#allocation293_spill] sm:$0xff] }
 0xc4c   :  { %5501 = vmatprep.subr.bf16.mxu0 %v12937_v21  ;;  %5583 = vmatprep.subr.bf16.mxu1 %v12938_v20  ;;  %v12988_v21 = vld [vmem:[#allocation294_spill] sm:$0xff]  ;;  %v12989_v20 = vld [vmem:[#allocation295_spill] sm:$0xff] }
 0xc4f   :  { %5502 = vmatpush1.bf16.msra.mxu0 %v12939_v34  ;;  %5584 = vmatpush1.bf16.msra.mxu1 %v12940_v23  ;;  %v12991_v34 = vld [vmem:[#allocation297_spill] sm:$0xff]  ;;  %v12992_v23 = vld [vmem:[#allocation298_spill] sm:$0xff] }
 0xc50   :  { %5594 = vmatprep.subr.bf16.mxu0 %v12941_v0  ;;  %5676 = vmatprep.subr.bf16.mxu1 %v12942_v8  ;;  %v12993_v0 = vld [vmem:[#allocation299_spill] sm:$0xff]  ;;  %v12994_v8 = vld [vmem:[#allocation300_spill] sm:$0xff] }
 0xc52   :  { %5504 = vmatmul.mubr.bf16.vlgmr.msra.gmra.mrb[52].mxu0 %v10971_v63  ;;  %5586 = vmatmul.mubr.bf16.vlgmr.msra.gmra.mrb[52].mxu1 %v10971_v63 }
 0xc53   :  { %5595 = vmatpush1.bf16.msra.mxu0 %v12943_v10  ;;  %5626 = vmatprep.mubr.bf16.mxu0 %v10896_v61  ;;  %v12995_v10 = vld [vmem:[#allocation301_spill] sm:$0xff] }
 0xc54   :  { %5677 = vmatpush1.bf16.msra.mxu1 %v12944_v54  ;;  %5708 = vmatprep.mubr.bf16.mxu1 %v10896_v61  ;;  %v12955_v61 = vld [vmem:[#allocation261_spill] sm:$0xff]  ;;  %v12996_v54 = vld [vmem:[#allocation303_spill] sm:$0xff] }
 0xc55   :  { %5596 = vmatprep.subr.bf16.mxu0 %v12945_v17  ;;  %5678 = vmatprep.subr.bf16.mxu1 %v12946_v30  ;;  %v12997_v17 = vld [vmem:[#allocation304_spill] sm:$0xff]  ;;  %v12998_v30 = vld [vmem:[#allocation305_spill] sm:$0xff] }
 0xc57   :  { %5597 = vmatpush1.bf16.msra.mxu0 %v12947_v25  ;;  %v12999_v25 = vld [vmem:[#allocation306_spill] sm:$0xff] }
 0xc58   :  { %5679 = vmatpush1.bf16.msra.mxu1 %v12948_v59  ;;  %5598 = vmatprep.subr.bf16.mxu0 %v12949_v40  ;;  %v13000_v59 = vld [vmem:[#allocation307_spill] sm:$0xff]  ;;  %v13001_v40 = vld [vmem:[#allocation308_spill] sm:$0xff] }
 0xc59   :  { %5680 = vmatprep.subr.bf16.mxu1 %v12950_v15  ;;  %v13002_v15 = vld [vmem:[#allocation309_spill] sm:$0xff] }
 0xc5b   :  { %5599 = vmatpush1.bf16.msra.mxu0 %v12951_v19  ;;  %v13003_v19 = vld [vmem:[#allocation310_spill] sm:$0xff] }
 0xc5c   :  { %5681 = vmatpush1.bf16.msra.mxu1 %v12952_v35  ;;  %5600 = vmatprep.subr.bf16.mxu0 %v12953_v33  ;;  %v13004_v35 = vld [vmem:[#allocation311_spill] sm:$0xff]  ;;  %v13005_v33 = vld [vmem:[#allocation312_spill] sm:$0xff] }
 0xc5d   :  { %5682 = vmatprep.subr.bf16.mxu1 %v12954_v5  ;;  %v13007_v5 = vld [vmem:[#allocation314_spill] sm:$0xff] }
 0xc5f   :  { %5601 = vmatpush1.bf16.msra.mxu0 %v12955_v61  ;;  %v13008_v61 = vld [vmem:[#allocation315_spill] sm:$0xff] }
 0xc60   :  { %5683 = vmatpush1.bf16.msra.mxu1 %v12956_v9  ;;  %5602 = vmatprep.subr.bf16.mxu0 %v12957_v38  ;;  %v13009_v9 = vld [vmem:[#allocation316_spill] sm:$0xff]  ;;  %v13010_v38 = vld [vmem:[#allocation317_spill] sm:$0xff] }
 0xc61   :  { %5684 = vmatprep.subr.bf16.mxu1 %v12958_v31  ;;  %v13011_v31 = vld [vmem:[#allocation318_spill] sm:$0xff] }
 0xc63   :  { %5603 = vmatpush1.bf16.msra.mxu0 %v12959_v6  ;;  %v13012_v6 = vld [vmem:[#allocation319_spill] sm:$0xff] }
 0xc64   :  { %5685 = vmatpush1.bf16.msra.mxu1 %v12960_v62  ;;  %5604 = vmatprep.subr.bf16.mxu0 %v12961_v29  ;;  %v13013_v62 = vld [vmem:[#allocation320_spill] sm:$0xff]  ;;  %v13015_v29 = vld [vmem:[#allocation322_spill] sm:$0xff] }
 0xc65   :  { %5686 = vmatprep.subr.bf16.mxu1 %v12962_v42  ;;  %v13016_v42 = vld [vmem:[#allocation323_spill] sm:$0xff] }
 0xc67   :  { %5605 = vmatpush1.bf16.msra.mxu0 %v12963_v51  ;;  %v13017_v51 = vld [vmem:[#allocation324_spill] sm:$0xff] }
 0xc68   :  { %5687 = vmatpush1.bf16.msra.mxu1 %v12964_v18  ;;  %5606 = vmatprep.subr.bf16.mxu0 %v12965_v22  ;;  %v13019_v18 = vld [vmem:[#allocation326_spill] sm:$0xff]  ;;  %v13020_v22 = vld [vmem:[#allocation327_spill] sm:$0xff] }
 0xc69   :  { %5688 = vmatprep.subr.bf16.mxu1 %v12966_v3  ;;  %v13021_v3 = vld [vmem:[#allocation328_spill] sm:$0xff] }
 0xc6b   :  { %5607 = vmatpush1.bf16.msra.mxu0 %v12967_v55  ;;  %v13022_v55 = vld [vmem:[#allocation329_spill] sm:$0xff] }
 0xc6c   :  { %5689 = vmatpush1.bf16.msra.mxu1 %v12968_v12  ;;  %5608 = vmatprep.subr.bf16.mxu0 %v12969_v27  ;;  %v13023_v12 = vld [vmem:[#allocation330_spill] sm:$0xff]  ;;  %v13024_v27 = vld [vmem:[#allocation331_spill] sm:$0xff] }
 0xc6d   :  { %5690 = vmatprep.subr.bf16.mxu1 %v12970_v36  ;;  %v13025_v36 = vld [vmem:[#allocation332_spill] sm:$0xff] }
 0xc6f   :  { %5609 = vmatpush1.bf16.msra.mxu0 %v12971_v16  ;;  %v13026_v16 = vld [vmem:[#allocation333_spill] sm:$0xff] }
 0xc70   :  { %5691 = vmatpush1.bf16.msra.mxu1 %v12972_v50  ;;  %5610 = vmatprep.subr.bf16.mxu0 %v12973_v53  ;;  %v13027_v50 = vld [vmem:[#allocation334_spill] sm:$0xff]  ;;  %v13028_v53 = vld [vmem:[#allocation335_spill] sm:$0xff] }
 0xc71   :  { %5692 = vmatprep.subr.bf16.mxu1 %v12974_v57  ;;  %v13029_v57 = vld [vmem:[#allocation336_spill] sm:$0xff] }
 0xc73   :  { %5611 = vmatpush1.bf16.msra.mxu0 %v12975_v46  ;;  %v13030_v46 = vld [vmem:[#allocation337_spill] sm:$0xff] }
 0xc74   :  { %5693 = vmatpush1.bf16.msra.mxu1 %v12976_v41  ;;  %5612 = vmatprep.subr.bf16.mxu0 %v12977_v24  ;;  %v13031_v41 = vld [vmem:[#allocation338_spill] sm:$0xff]  ;;  %v13032_v24 = vld [vmem:[#allocation339_spill] sm:$0xff] }
 0xc75   :  { %5694 = vmatprep.subr.bf16.mxu1 %v12978_v39  ;;  %v13033_v39 = vld [vmem:[#allocation340_spill] sm:$0xff] }
 0xc77   :  { %5613 = vmatpush1.bf16.msra.mxu0 %v12979_v56  ;;  %v13034_v56 = vld [vmem:[#allocation341_spill] sm:$0xff] }
 0xc78   :  { %5695 = vmatpush1.bf16.msra.mxu1 %v12980_v13  ;;  %5614 = vmatprep.subr.bf16.mxu0 %v12981_v47  ;;  %v13035_v13 = vld [vmem:[#allocation342_spill] sm:$0xff]  ;;  %v13036_v47 = vld [vmem:[#allocation343_spill] sm:$0xff] }
 0xc79   :  { %5696 = vmatprep.subr.bf16.mxu1 %v12982_v1  ;;  %v13037_v1 = vld [vmem:[#allocation344_spill] sm:$0xff] }
 0xc7b   :  { %5615 = vmatpush1.bf16.msra.mxu0 %v12983_v28  ;;  %v13038_v28 = vld [vmem:[#allocation345_spill] sm:$0xff] }
 0xc7c   :  { %5697 = vmatpush1.bf16.msra.mxu1 %v12984_v49  ;;  %5616 = vmatprep.subr.bf16.mxu0 %v12985_v44  ;;  %v13039_v49 = vld [vmem:[#allocation346_spill] sm:$0xff]  ;;  %v13040_v44 = vld [vmem:[#allocation347_spill] sm:$0xff] }
 0xc7d   :  { %5698 = vmatprep.subr.bf16.mxu1 %v12986_v26  ;;  %v13041_v26 = vld [vmem:[#allocation348_spill] sm:$0xff] }
 0xc7f   :  { %5617 = vmatpush1.bf16.msra.mxu0 %v12987_v11  ;;  %v13042_v11 = vld [vmem:[#allocation349_spill] sm:$0xff] }
 0xc80   :  { %5699 = vmatpush1.bf16.msra.mxu1 %v12988_v21  ;;  %5618 = vmatprep.subr.bf16.mxu0 %v12989_v20  ;;  %v13043_v21 = vld [vmem:[#allocation350_spill] sm:$0xff]  ;;  %v13044_v20 = vld [vmem:[#allocation351_spill] sm:$0xff] }
 0xc81   :  { %5700 = vmatprep.subr.bf16.mxu1 %v12990_v4  ;;  %v13045_v4 = vld [vmem:[#allocation352_spill] sm:$0xff] }
 0xc83   :  { %5619 = vmatpush1.bf16.msra.mxu0 %v12991_v34  ;;  %v13046_v34 = vld [vmem:[#allocation353_spill] sm:$0xff] }
 0xc84   :  { %5701 = vmatpush1.bf16.msra.mxu1 %v12992_v23  ;;  %5620 = vmatprep.subr.bf16.mxu0 %v12993_v0  ;;  %v13047_v23 = vld [vmem:[#allocation360_spill] sm:$0xff]  ;;  %v13048_v0 = vld [vmem:[#allocation361_spill] sm:$0xff] }
 0xc85   :  { %5702 = vmatprep.subr.bf16.mxu1 %v12994_v8  ;;  %v13049_v8 = vld [vmem:[#allocation362_spill] sm:$0xff] }
 0xc87   :  { %5621 = vmatpush1.bf16.msra.mxu0 %v12995_v10  ;;  %v13050_v10 = vld [vmem:[#allocation363_spill] sm:$0xff] }
 0xc88   :  { %5703 = vmatpush1.bf16.msra.mxu1 %v12641_v7  ;;  %5622 = vmatprep.subr.bf16.mxu0 %v12996_v54  ;;  %v13006_v7 = vld [vmem:[#allocation313_spill] sm:$0xff]  ;;  %v13051_v54 = vld [vmem:[#allocation364_spill] sm:$0xff] }
 0xc89   :  { %5704 = vmatprep.subr.bf16.mxu1 %v12997_v17  ;;  %v13058_v17 = vld [vmem:[#allocation371_spill] sm:$0xff] }
 0xc8b   :  { %5623 = vmatpush1.bf16.msra.mxu0 %v12998_v30  ;;  %v13059_v30 = vld [vmem:[#allocation372_spill] sm:$0xff] }
 0xc8c   :  { %5705 = vmatpush1.bf16.msra.mxu1 %v12999_v25  ;;  %5624 = vmatprep.subr.bf16.mxu0 %v13000_v59  ;;  %v13060_v25 = vld [vmem:[#allocation373_spill] sm:$0xff]  ;;  %v13061_v59 = vld [vmem:[#allocation374_spill] sm:$0xff] }
 0xc8d   :  { %5706 = vmatprep.subr.bf16.mxu1 %v13001_v40  ;;  %v6868_v40 = vld [vmem:[%s11227_s6 + $0x40] sm:$0xff]  }
 0xc8f   :  { %5625 = vmatpush1.bf16.msra.mxu0 %v13002_v15  ;;  %v6869_v15 = vld [vmem:[%s11227_s6] sm:$0xff]  }
 0xc90   :  { %5707 = vmatpush1.bf16.msra.mxu1 %v13003_v19  ;;  %5635 = vmatprep.subr.bf16.mxu0 %v13004_v35  ;;  %v6870_v19 = vld [vmem:[%s11227_s6 + $0x48] sm:$0xff]  }
 0xc91   :  { %5717 = vmatprep.subr.bf16.mxu1 %v13005_v33  ;;  %v6871_v35 = vld [vmem:[%s11227_s6 + $0x8] sm:$0xff]   ;;  %v6872_v33 = vld [vmem:[%s11227_s6 + $0x50] sm:$0xff]  }
 0xc92   :  { %5627 = vmatmul.mubr.bf16.vlgmr.msra.gmra.mrb[56].mxu0 %v10900_v58 }
 0xc93   :  { %5709 = vmatmul.mubr.bf16.vlgmr.msra.gmra.mrb[56].mxu1 %v10900_v58  ;;  %5636 = vmatpush1.bf16.msra.mxu0 %v13006_v7  ;;  %v13014_v58 = vld [vmem:[#allocation321_spill] sm:$0xff] }
 0xc94   :  { %5667 = vmatprep.mubr.bf16.mxu0 %v10904_v2  ;;  %5718 = vmatpush1.bf16.msra.mxu1 %v13007_v5  ;;  %v6874_v7 = vld [vmem:[%s11227_s6 + $0x58] sm:$0xff]  }
 0xc95   :  { %5749 = vmatprep.mubr.bf16.mxu1 %v10904_v2  ;;  %5637 = vmatprep.subr.bf16.mxu0 %v13008_v61  ;;  %v13018_v2 = vld [vmem:[#allocation325_spill] sm:$0xff]  ;;  %v6876_v61 = vld [vmem:[%s11227_s6 + $0x60] sm:$0xff]  }
 0xc96   :  { %5719 = vmatprep.subr.bf16.mxu1 %v13009_v9  ;;  %v6875_v5 = vld [vmem:[%s11227_s6 + $0x18] sm:$0xff]   ;;  %v6877_v9 = vld [vmem:[%s11227_s6 + $0x20] sm:$0xff]  }
 0xc97   :  { %5638 = vmatpush1.bf16.msra.mxu0 %v13010_v38  ;;  %v6878_v38 = vld [vmem:[%s11227_s6 + $0x68] sm:$0xff]  }
 0xc98   :  { %5720 = vmatpush1.bf16.msra.mxu1 %v13011_v31  ;;  %5639 = vmatprep.subr.bf16.mxu0 %v13012_v6  ;;  %v6879_v31 = vld [vmem:[%s11227_s6 + $0x28] sm:$0xff]   ;;  %v6880_v6 = vld [vmem:[%s11227_s6 + $0x70] sm:$0xff]  }
 0xc99   :  { %5721 = vmatprep.subr.bf16.mxu1 %v13013_v62  ;;  %v6881_v62 = vld [vmem:[%s11227_s6 + $0x30] sm:$0xff]  }
 0xc9b   :  { %5640 = vmatpush1.bf16.msra.mxu0 %v13014_v58  ;;  %v6882_v58 = vld [vmem:[%s11227_s6 + $0x78] sm:$0xff]  }
 0xc9c   :  { %5722 = vmatpush1.bf16.msra.mxu1 %v13015_v29  ;;  %5641 = vmatprep.subr.bf16.mxu0 %v13016_v42  ;;  %v6883_v29 = vld [vmem:[%s11227_s6 + $0x38] sm:$0xff]  }
 0xc9d   :  { %5723 = vmatprep.subr.bf16.mxu1 %v13017_v51 }
 0xc9f   :  { %5642 = vmatpush1.bf16.msra.mxu0 %v13018_v2 }
 0xca0   :  { %5724 = vmatpush1.bf16.msra.mxu1 %v13019_v18  ;;  %5643 = vmatprep.subr.bf16.mxu0 %v13020_v22 }
 0xca1   :  { %5725 = vmatprep.subr.bf16.mxu1 %v13021_v3 }
 0xca3   :  { %5644 = vmatpush1.bf16.msra.mxu0 %v13022_v55 }
 0xca4   :  { %5726 = vmatpush1.bf16.msra.mxu1 %v13023_v12  ;;  %5645 = vmatprep.subr.bf16.mxu0 %v13024_v27  ;;  %v13062_v27 = vld [vmem:[#allocation116_spill] sm:$0xff] }
 0xca5   :  { %5727 = vmatprep.subr.bf16.mxu1 %v13025_v36 }
 0xca7   :  { %5646 = vmatpush1.bf16.msra.mxu0 %v13026_v16  ;;  %v13063_v16 = vld [vmem:[#allocation375_spill] sm:$0xff] }
 0xca8   :  { %5728 = vmatpush1.bf16.msra.mxu1 %v13027_v50  ;;  %5647 = vmatprep.subr.bf16.mxu0 %v13028_v53 }
 0xca9   :  { %5729 = vmatprep.subr.bf16.mxu1 %v13029_v57 }
 0xcab   :  { %5648 = vmatpush1.bf16.msra.mxu0 %v13030_v46 }
 0xcac   :  { %5730 = vmatpush1.bf16.msra.mxu1 %v13031_v41  ;;  %5649 = vmatprep.subr.bf16.mxu0 %v13032_v24  ;;  %v13064_v41 = vld [vmem:[#allocation376_spill] sm:$0xff] }
 0xcad   :  { %5731 = vmatprep.subr.bf16.mxu1 %v13033_v39 }
 0xcaf   :  { %5650 = vmatpush1.bf16.msra.mxu0 %v13034_v56 }
 0xcb0   :  { %5732 = vmatpush1.bf16.msra.mxu1 %v13035_v13  ;;  %5651 = vmatprep.subr.bf16.mxu0 %v13036_v47 }
 0xcb1   :  { %5733 = vmatprep.subr.bf16.mxu1 %v13037_v1 }
 0xcb3   :  { %5652 = vmatpush1.bf16.msra.mxu0 %v13038_v28  ;;  %v13065_v28 = vld [vmem:[#allocation377_spill] sm:$0xff] }
 0xcb4   :  { %5734 = vmatpush1.bf16.msra.mxu1 %v13039_v49  ;;  %5653 = vmatprep.subr.bf16.mxu0 %v13040_v44 }
 0xcb5   :  { %5735 = vmatprep.subr.bf16.mxu1 %v13041_v26 }
 0xcb7   :  { %5654 = vmatpush1.bf16.msra.mxu0 %v13042_v11 }
 0xcb8   :  { %5736 = vmatpush1.bf16.msra.mxu1 %v13043_v21  ;;  %5655 = vmatprep.subr.bf16.mxu0 %v13044_v20 }
 0xcb9   :  { %5737 = vmatprep.subr.bf16.mxu1 %v13045_v4 }
 0xcbb   :  { %5656 = vmatpush1.bf16.msra.mxu0 %v13046_v34 }
 0xcbc   :  { %5738 = vmatpush1.bf16.msra.mxu1 %v12693_v37  ;;  %5657 = vmatprep.subr.bf16.mxu0 %v12694_v52  ;;  %v13052_v37 = vld [vmem:[#allocation365_spill] sm:$0xff]  ;;  %v13053_v52 = vld [vmem:[#allocation366_spill] sm:$0xff] }
 0xcbd   :  { %5739 = vmatprep.subr.bf16.mxu1 %v12695_v60  ;;  %v13054_v60 = vld [vmem:[#allocation367_spill] sm:$0xff] }
 0xcbf   :  { %5658 = vmatpush1.bf16.msra.mxu0 %v12696_v43  ;;  %v13055_v43 = vld [vmem:[#allocation368_spill] sm:$0xff] }
 0xcc0   :  { %5740 = vmatpush1.bf16.msra.mxu1 %v12697_v45  ;;  %5659 = vmatprep.subr.bf16.mxu0 %v12698_v14  ;;  %v13056_v45 = vld [vmem:[#allocation369_spill] sm:$0xff]  ;;  %v13057_v14 = vld [vmem:[#allocation370_spill] sm:$0xff] }
 0xcc1   :  { %5741 = vmatprep.subr.bf16.mxu1 %v13047_v23 }
 0xcc3   :  { %5660 = vmatpush1.bf16.msra.mxu0 %v13048_v0  ;;  %v13066_v0 = vld [vmem:[#allocation378_spill] sm:$0xff] }
 0xcc4   :  { %5742 = vmatpush1.bf16.msra.mxu1 %v13049_v8  ;;  %5661 = vmatprep.subr.bf16.mxu0 %v13050_v10 }
 0xcc5   :  { %5743 = vmatprep.subr.bf16.mxu1 %v13051_v54 }
 0xcc7   :  { %5662 = vmatpush1.bf16.msra.mxu0 %v13052_v37 }
 0xcc8   :  { %5744 = vmatpush1.bf16.msra.mxu1 %v13053_v52  ;;  %5663 = vmatprep.subr.bf16.mxu0 %v13054_v60  ;;  %v13067_v52 = vld [vmem:[#allocation379_spill] sm:$0xff] }
 0xcc9   :  { %5745 = vmatprep.subr.bf16.mxu1 %v13055_v43  ;;  %v13068_v43 = vld [vmem:[#allocation380_spill] sm:$0xff] }
 0xccb   :  { %5664 = vmatpush1.bf16.msra.mxu0 %v13056_v45 }
 0xccc   :  { %5746 = vmatpush1.bf16.msra.mxu1 %v13057_v14  ;;  %5665 = vmatprep.subr.bf16.mxu0 %v13058_v17 }
 0xccd   :  { %5747 = vmatprep.subr.bf16.mxu1 %v13059_v30 }
 0xccf   :  { %5666 = vmatpush1.bf16.msra.mxu0 %v13060_v25 }
 0xcd0   :  { %5748 = vmatpush1.bf16.msra.mxu1 %v13061_v59  ;;  %6533 = vmatprep.subr.bf16.mxu0 %v6868_v40  ;;  %v13069_v40 = vld [vmem:[#allocation381_spill] sm:$0xff] }
 0xcd2   :  { %5668 = vmatmul.mubr.bf16.vlgmr.msra.gmra.mrb[56].mxu0 %v10971_v63 }
 0xcd3   :  { %5750 = vmatmul.mubr.bf16.vlgmr.msra.gmra.mrb[56].mxu1 %v10971_v63  ;;  %6534 = vmatpush3.bf16.msra.mxu0 %v6869_v15  ;;  %v6873_v63 = vld [vmem:[%s11227_s6 + $0x10] sm:$0xff]  }
 0xcd4   :  { %6535 = vmatprep.subr.bf16.mxu0 %v6870_v19 }
 0xcd7   :  { %6536 = vmatpush3.bf16.msra.mxu0 %v6871_v35 }
 0xcd8   :  { %6537 = vmatprep.subr.bf16.mxu0 %v6872_v33 }
 0xcdb   :  { %6538 = vmatpush3.bf16.msra.mxu0 %v6873_v63 }
 0xcdc   :  { %6539 = vmatprep.subr.bf16.mxu0 %v6874_v7 }
 0xcdf   :  { %6540 = vmatpush3.bf16.msra.mxu0 %v6875_v5 }
 0xce0   :  { %6541 = vmatprep.subr.bf16.mxu0 %v6876_v61 }
 0xce3   :  { %6542 = vmatpush3.bf16.msra.mxu0 %v6877_v9 }
 0xce4   :  { %6543 = vmatprep.subr.bf16.mxu0 %v6878_v38 }
 0xce7   :  { %6544 = vmatpush3.bf16.msra.mxu0 %v6879_v31 }
 0xce8   :  { %6545 = vmatprep.subr.bf16.mxu0 %v6880_v6 }
 0xceb   :  { %6546 = vmatpush3.bf16.msra.mxu0 %v6881_v62 }
 0xcec   :  { %6547 = vmatprep.subr.bf16.mxu0 %v6882_v58 }
 0xcef   :  { %6548 = vmatpush3.bf16.msra.mxu0 %v6883_v29 }
 0xd25   :  { %v5505_v42 = vpop.f32.mrb[52].mxu0  ;;  %v5587_v51 = vpop.f32.mrb[52].mxu1 }
 0xd26   :  { %v5507_v2 = vpop.f32.mrb[53].mxu0  ;;  %v5589_v18 = vpop.f32.mrb[53].mxu1  ;;  %v11160_v36 = vadd.f32 %v5505_v42, %v13062_v27  ;;  %v11172_v24 = vadd.f32 %v5587_v51, %v13064_v41 }
 0xd27   :  { %v5509_v22 = vpop.f32.mrb[54].mxu0  ;;  %v5591_v3 = vpop.f32.mrb[54].mxu1  ;;  %v11163_v50 = vadd.f32 %v5507_v2, %v13063_v16  ;;  %v6574_v49 = vadd.f32 %v5589_v18, %v13065_v28 }
 0xd28   :  { %v5510_v55 = vpop.f32.mrb[55].mxu0  ;;  %v5592_v12 = vpop.f32.mrb[55].mxu1  ;;  %v5776_v53 = vmul.f32 %v11160_v36, %v11160_v36  ;;  %v5758_v46 = vsel %vm2242_vm0, %v11160_v36, 0.0  ;;  %v5778_v1 = vmul.f32 %v11172_v24, %v11172_v24  ;;  %v5761_v26 = vsel %vm2242_vm0, %v11172_v24, 0.0 }
 0xd29   :  { %v5777_v57 = vmul.f32 %v11163_v50, %v11163_v50  ;;  %v5759_v39 = vsel %vm2242_vm0, %v11163_v50, 0.0  ;;  %v5779_v20 = vmul.f32 %v6574_v49, %v6574_v49  ;;  %v5763_v23 = vsel %vm2242_vm0, %v6574_v49, 0.0 }
 0xd2a   :  { %v5784_v56 = vsel %vm2242_vm0, %v5776_v53, 0.0  ;;  %v5760_v47 = vadd.f32 %v5759_v39, %v5758_v46  ;;  %v5787_v21 = vsel %vm2242_vm0, %v5778_v1, 0.0 }
 0xd2b   :  { %v5785_v13 = vsel %vm2242_vm0, %v5777_v57, 0.0  ;;  %v5789_v30 = vsel %vm2242_vm0, %v5779_v20, 0.0 }
 0xd2c   :  { %v5786_v44 = vadd.f32 %v5785_v13, %v5784_v56  ;;  %v5762_v11 = vadd.f32 %v5761_v26, %v5760_v47 }
 0xd2e   :  { %v5788_v4 = vadd.f32 %v5787_v21, %v5786_v44  ;;  %v5764_v37 = vadd.f32 %v5763_v23, %v5762_v11 }
 0xd30   :  { %v5790_v33 = vadd.f32 %v5789_v30, %v5788_v4 }
 0xda5   :  { %v5669_v34 = vpop.f32.mrb[56].mxu0 }
 0xda6   :  { %v11186_v8 = vadd.f32 %v5669_v34, %v13066_v0  ;;  %v5751_v10 = vpop.f32.mrb[56].mxu1  ;;  %v5671_v54 = vpop.f32.mrb[57].mxu0 }
 0xda7   :  { %v11189_v60 = vadd.f32 %v5751_v10, %v13067_v52  ;;  %v6576_v45 = vadd.f32 %v5671_v54, %v13068_v43  ;;  %v5753_v14 = vpop.f32.mrb[57].mxu1  ;;  %v5673_v17 = vpop.f32.mrb[58].mxu0 }
 0xda8   :  { %v5765_v25 = vsel %vm2242_vm0, %v11186_v8, 0.0  ;;  %v5780_v59 = vmul.f32 %v11186_v8, %v11186_v8  ;;  %v6578_v15 = vadd.f32 %v5753_v14, %v13069_v40  ;;  %v5755_v19 = vpop.f32.mrb[58].mxu1  ;;  %v5674_v35 = vpop.f32.mrb[59].mxu0 }
 0xda9   :  { %v5766_v63 = vadd.f32 %v5765_v25, %v5764_v37  ;;  %v5767_v7 = vsel %vm2242_vm0, %v6576_v45, 0.0  ;;  %v5781_v5 = vmul.f32 %v6576_v45, %v6576_v45  ;;  %v5756_v61 = vpop.f32.mrb[59].mxu1  ;;  %v5782_v38 = vmul.f32 %v11189_v60, %v11189_v60 }
 0xdaa   :  { %v5791_v9 = vsel %vm2242_vm0, %v5780_v59, 0.0  ;;  %v5769_v58 = vsel %vm2242_vm0, %v11189_v60, 0.0  ;;  %v5783_v29 = vmul.f32 %v6578_v15, %v6578_v15  ;;  %v5771_v2 = vsel %vm2242_vm0, %v6578_v15, 0.0 }
 0xdab   :  { %v5768_v31 = vadd.f32 %v5767_v7, %v5766_v63  ;;  %v5792_v6 = vadd.f32 %v5791_v9, %v5790_v33  ;;  %v5793_v62 = vsel %vm2242_vm0, %v5781_v5, 0.0  ;;  %v5795_v18 = vsel %vm2242_vm0, %v5782_v38, 0.0 }
 0xdac   :  { %v5797_v55 = vsel %vm2242_vm0, %v5783_v29, 0.0 }
 0xdad   :  { %v5770_v42 = vadd.f32 %v5769_v58, %v5768_v31  ;;  %v5794_v51 = vadd.f32 %v5793_v62, %v5792_v6 }
 0xdaf   :  { %v5772_v22 = vadd.f32 %v5771_v2, %v5770_v42  ;;  %v5796_v3 = vadd.f32 %v5795_v18, %v5794_v51 }
 0xdb1   :  { %5773 = vadd.xlane.f32.xlu0 %v5772_v22  ;;  %v5798_v12 = vadd.f32 %v5797_v55, %v5796_v3 }
 0xdb3   :  { %5799 = vadd.xlane.f32.xlu1 %v5798_v12 }
 0xe3e   :  { %v5774_v27 = vpop.xlane.xlu0 %5773 }
 0xe3f   :  { %v5775_v16 = vmul.f32 0.0009765625, %v5774_v27 }
 0xe40   :  { %v5800_v53 = vpop.xlane.xlu1 %5799 }
 0xe41   :  { %v5801_v57 = vmul.f32 0.0009765625, %v5800_v53  ;;  %v5802_v46 = vmul.f32 %v5775_v16, %v5775_v16  ;;  %v5806_v13 = vsub.f32 %v11163_v50, %v5775_v16  ;;  %v5808_v47 = vsub.f32 %v6574_v49, %v5775_v16 }
 0xe42   :  { %v5805_v28 = vsub.f32 %v11160_v36, %v5775_v16  ;;  %v5807_v44 = vsub.f32 %v11172_v24, %v5775_v16  ;;  %v5810_v10 = vsub.f32 %v6576_v45, %v5775_v16  ;;  %v5809_v54 = vsub.f32 %v11186_v8, %v5775_v16 }
 0xe43   :  { %v5803_v41 = vsub.f32 %v5801_v57, %v5802_v46  ;;  %v5812_v49 = vsub.f32 %v6578_v15, %v5775_v16  ;;  %v5811_v43 = vsub.f32 %v11189_v60, %v5775_v16 }
 0xe45   :  { %v5804_v39 = vmax.f32 %v5803_v41, 0.0 }
 0xe47   :  { %v5813_v56 = vadd.f32 1e-05, %v5804_v39 }
 0xe49   :  { %6817 = vrsqrt.f32 %v5813_v56 }
 0xe53   :  { %v6818_v1 = vpop.eup %6817 }
 0xe54   :  { %v5816_v26 = vmul.f32 %v6818_v1, %v5806_v13  ;;  %v5818_v11 = vmul.f32 %v6818_v1, %v5808_v47  ;;  %v5815_v21 = vmul.f32 %v6818_v1, %v5805_v28  ;;  %v5817_v20 = vmul.f32 %v6818_v1, %v5807_v44 }
 0xe55   :  { %v5820_v50 = vmul.f32 %v6818_v1, %v5810_v10  ;;  %v5819_v37 = vmul.f32 %v6818_v1, %v5809_v54  ;;  %v5822_v36 = vmul.f32 %v6818_v1, %v5812_v49  ;;  %v5821_v25 = vmul.f32 %v6818_v1, %v5811_v43 }
 0xe56   :  { %v6483_v4 = vmul.f32 -1.442695, %v5816_v26  ;;  %v6485_v34 = vmul.f32 -1.442695, %v5818_v11  ;;  %v6482_v23 = vmul.f32 -1.442695, %v5815_v21 }
 0xe57   :  { %v6484_v0 = vmul.f32 -1.442695, %v5817_v20  ;;  %v6487_v24 = vmul.f32 -1.442695, %v5820_v50  ;;  %v6486_v52 = vmul.f32 -1.442695, %v5819_v37 }
 0xe58   :  { %6819 = vpow2.f32 %v6483_v4 }
 0xe59   :  { %6821 = vpow2.f32 %v6485_v34 }
 0xe5a   :  { %6823 = vpow2.f32 %v6482_v23 }
 0xe5b   :  { %6825 = vpow2.f32 %v6484_v0 }
 0xe5c   :  { %6827 = vtanh.f32 %v5822_v36 }
 0xe5d   :  { %6829 = vpow2.f32 %v6487_v24 }
 0xe5e   :  { %6831 = vpow2.f32 %v6486_v52 }
 0xe62   :  { %v6820_v14 = vpop.eup %6819 }
 0xe63   :  { %v6822_v17 = vpop.eup %6821  ;;  %v5830_v30 = vadd.f32 1.0, %v6820_v14 }
 0xe64   :  { %v5842_v45 = vadd.f32 1.0, %v6822_v17  ;;  %v6824_v59 = vpop.eup %6823 }
 0xe65   :  { %6833 = vrcp.f32 %v5830_v30  ;;  %v6826_v8 = vpop.eup %6825  ;;  %v5829_v40 = vadd.f32 1.0, %v6824_v59 }
 0xe66   :  { %6835 = vrcp.f32 %v5842_v45  ;;  %v5841_v15 = vadd.f32 1.0, %v6826_v8  ;;  %v6828_v19 = vpop.eup %6827 }
 0xe67   :  { %6837 = vtanh.f32 %v5821_v25  ;;  %v6830_v35 = vpop.eup %6829 }
 0xe68   :  { %6839 = vrcp.f32 %v5829_v40  ;;  %v6832_v60 = vpop.eup %6831  ;;  %v5854_v7 = vadd.f32 1.0, %v6830_v35 }
 0xe69   :  { %6841 = vrcp.f32 %v5841_v15  ;;  %v5853_v62 = vadd.f32 1.0, %v6832_v60 }
 0xe6a   :  { %6843 = vrcp.f32 %v5854_v7 }
 0xe6f   :  { %v6834_v33 = vpop.eup %6833 }
 0xe70   :  { %v6836_v63 = vpop.eup %6835  ;;  %v5864_v5 = vmul.f32 %v6834_v33, %v6828_v19 }
 0xe71   :  { %v6838_v61 = vpop.eup %6837  ;;  %v5862_v9 = vmul.f32 %v6836_v63, %v10714_v48 }
 0xe72   :  { %v6840_v38 = vpop.eup %6839 }
 0xe73   :  { %v6842_v31 = vpop.eup %6841  ;;  %v5866_v6 = vadd.f32 %v5864_v5, %v5862_v9  ;;  %v5863_v58 = vmul.f32 %v6840_v38, %v6838_v61 }
 0xe74   :  { %v5861_v29 = vmul.f32 %v6842_v31, %v10718_v32  ;;  %v6844_v51 = vpop.eup %6843  ;;  %v6884_v32 = vld [vmem:[%s11228_s7] ss:$0 sm:$0xff] }
 0xe75   :  { %6845 = vtanh.f32 %v5866_v6 }
 0xe76   :  { %v5865_v42 = vadd.f32 %v5863_v58, %v5861_v29  ;;  %6847 = vrcp.f32 %v5853_v62 }
 0xe78   :  { %6849 = vtanh.f32 %v5865_v42 }
 0xe7f   :  { %v6846_v2 = vpop.eup %6845 }
 0xe80   :  { %v5870_v18 = vmul.f32 %v6846_v2, %v6844_v51  ;;  %v6848_v22 = vpop.eup %6847 }
 0xe82   :  { %v6850_v3 = vpop.eup %6849  ;;  %v5872_v55 = vpack.c.bf16 %v5870_v18, %v5870_v18 }
 0xe83   :  { %v5869_v12 = vmul.f32 %v6850_v3, %v6848_v22 }
 0xe84   :  { %5905 = vmatprep.mubr.bf16.mxu0 %v5872_v55 }
 0xe85   :  { %v5871_v48 = vpack.c.bf16 %v5869_v12, %v5869_v12 }
 0xe87   :  { %5906 = vmatmul.mubr.bf16.vlgmr.msra.gmra.mrb[60].mxu0 %v5871_v48 }
 0xf5a   :  { %v6549_v27 = vpop.f32.mrb[60].mxu0 }
 0xf5b   :  { %v6550_v16 = vpop.f32.mrb[61].mxu0 }
 0xf5c   :  { %v6551_v53 = vadd.f32 %v6550_v16, %v6549_v27  ;;  %v6552_v57 = vpop.f32.mrb[62].mxu0 }
 0xf5d   :  { %v6553_v46 = vpop.f32.mrb[63].mxu0 }
 0xf5e   :  { %v5908_v41 = vadd.f32 %v6884_v32, %v6551_v53 }
 0xf60   :  { %v5913_v39 = vmax.f32 %v5908_v41, 0.0 }
 0xf62   :  { %6488 = vst [vmem:[%s11229_s8 + $0x4] sm:$0x3] %v5913_v39 }

</bundles_post_ra>
